<compile_context>
chip_gen: v5e
topology: v5e:2x2
jax: 0.10.0
libtpu: 0.0.40
codegen_flags: <defaults>
</compile_context>

<pallas_src>
import functools
import math

import jax
import jax.numpy as jnp
from jax.experimental import pallas as pl
from jax.experimental.pallas import tpu as pltpu


def _round_up(x, m):
    return (x + m - 1) // m * m


def _cpad(c):
    return _round_up(c, 128)


# ----------------------------- Pallas kernels ------------------------------

def _epilogue(acc_f32, bias_ref, res_ref, relu, scale):
    out = acc_f32 + bias_ref[...]
    if scale != 1.0:
        out = out * scale
    if res_ref is not None:
        out = out + res_ref[...].astype(jnp.float32)
    if relu:
        out = jnp.maximum(out, 0.0)
    return out


def _fused_matmul_kernel(*refs, nk, relu, scale, has_residual):
    """out = maybe_relu(scale * (A @ B + bias) [+ residual]); f32 accumulation."""
    if nk == 1:
        # Single K step (always true for this network): accumulate straight into vregs,
        # no VMEM scratch accumulator needed.
        if has_residual:
            a_ref, b_ref, bias_ref, res_ref, o_ref = refs
        else:
            a_ref, b_ref, bias_ref, o_ref = refs
            res_ref = None
        acc = jnp.dot(a_ref[...], b_ref[...], preferred_element_type=jnp.float32)
        o_ref[...] = _epilogue(acc, bias_ref, res_ref, relu, scale).astype(o_ref.dtype)
        return

    # Multi-step K reduction path (kept for generality; untaken at these shapes).
    if has_residual:
        a_ref, b_ref, bias_ref, res_ref, o_ref, acc_ref = refs
    else:
        a_ref, b_ref, bias_ref, o_ref, acc_ref = refs
        res_ref = None
    k = pl.program_id(2)

    @pl.when(k == 0)
    def _():
        acc_ref[...] = jnp.zeros_like(acc_ref)

    acc_ref[...] += jnp.dot(a_ref[...], b_ref[...], preferred_element_type=jnp.float32)

    @pl.when(k == nk - 1)
    def _():
        o_ref[...] = _epilogue(acc_ref[...], bias_ref, res_ref, relu, scale).astype(o_ref.dtype)


def _window_max_kernel(x_ref, o_ref):
    # One pooling window per grid step: o[0, 0, c] = max_k x[0, k, c]
    o_ref[...] = jnp.max(x_ref[...], axis=1, keepdims=True)


# ------------------------------ kernel wrappers -----------------------------

def matmul_fused(a, b, bias, residual=None, *, relu=False, scale=1.0,
                 trim=True, out_dtype=jnp.bfloat16):
    """Tiled MXU matmul with fused bias / scale / residual-add / ReLU epilogue.

    bf16 A/B on the MXU, f32 accumulation + f32 epilogue, store in `out_dtype`.
    With trim=False the (M,N)-padded result is returned so callers can keep padded
    activations resident across layers (no per-layer slice/pad glue).
    """
    m, k = a.shape
    _, n = b.shape

    tm = min(256, _round_up(m, 16))          # multiple of 16: native bf16 (16,128) tiles
    tn = min(256, _round_up(n, 128))         # <=256 so wide layers give >=2 parallel N tiles
    tk_full = _round_up(k, 128)
    # Single K step while double-buffered bf16 A/B tiles stay well under the smallest (v5e,
    # 16 MiB) default scoped-VMEM budget; for this network K <= 512 so it is always one step.
    tk = tk_full if (tm * tk_full + tk_full * tn) * 2 * 2 <= 12 * 1024 * 1024 else 512
    mp, np_, kp = _round_up(m, tm), _round_up(n, tn), _round_up(k, tk)
    nk = kp // tk

    a = a.astype(jnp.bfloat16)
    b = b.astype(jnp.bfloat16)
    if (mp, kp) != (m, k):
        a = jnp.pad(a, ((0, mp - m), (0, kp - k)))
    if (kp, np_) != (k, n):
        b = jnp.pad(b, ((0, kp - k), (0, np_ - n)))
    if np_ != n:
        bias = jnp.pad(bias, (0, np_ - n))
    bias = bias.reshape(1, np_).astype(jnp.float32)

    operands = [a, b, bias]
    in_specs = [
        pl.BlockSpec((tm, tk), lambda i, j, kk: (i, kk)),
        pl.BlockSpec((tk, tn), lambda i, j, kk: (kk, j)),
        pl.BlockSpec((1, tn), lambda i, j, kk: (0, j)),
    ]
    has_residual = residual is not None
    if has_residual:
        residual = residual.astype(jnp.bfloat16)
        rm, rn = residual.shape
        if (rm, rn) != (mp, np_):
            residual = jnp.pad(residual, ((0, mp - rm), (0, np_ - rn)))
        operands.append(residual)
        in_specs.append(pl.BlockSpec((tm, tn), lambda i, j, kk: (i, j)))

    grid = (mp // tm, np_ // tn, nk)
    scratch = [] if nk == 1 else [pltpu.VMEM((tm, tn), jnp.float32)]

    out = pl.pallas_call(
        functools.partial(_fused_matmul_kernel, nk=nk, relu=relu,
                          scale=float(scale), has_residual=has_residual),
        out_shape=jax.ShapeDtypeStruct((mp, np_), out_dtype),
        grid=grid,
        in_specs=in_specs,
        out_specs=pl.BlockSpec((tm, tn), lambda i, j, kk: (i, j)),
        scratch_shapes=scratch,
        compiler_params=pltpu.CompilerParams(
            dimension_semantics=("parallel", "parallel", "arbitrary")),
    )(*operands)

    if trim and (mp, np_) != (m, n):
        out = out[:m, :n]
    return out


def conv2d(x, w2d, bias, *, kh, kw, stride, padding, relu=False):
    """NHWC conv as an im2col matmul with the fused epilogue (bf16 patches).

    TODO(synk): for large feature maps the im2col extraction should move inside the matmul
    kernel (fold the kh*kw taps into the K grid axis) to avoid the kh*kw HBM blowup; at the
    stem-only usage here it is tiny XLA glue under the single top-level jit.
    """
    n, h, w, cin = x.shape
    cout = w2d.shape[1]
    ho = (h + 2 * padding - kh) // stride + 1
    wo = (w + 2 * padding - kw) // stride + 1
    xb = x.astype(jnp.bfloat16)                            # materialize patches in bf16
    xp = jnp.pad(xb, ((0, 0), (padding, padding), (padding, padding), (0, 0))) if padding else xb
    cols = [xp[:, i:i + ho * stride:stride, j:j + wo * stride:stride, :]
            for i in range(kh) for j in range(kw)]
    patches = jnp.stack(cols, axis=3).reshape(n * ho * wo, kh * kw * cin)
    out = matmul_fused(patches, w2d, bias, relu=relu)
    return out.reshape(n, ho, wo, cout)


def maxpool2d(x, kernel_size):
    """nn.MaxPool2d(k) with stride=k (PyTorch default), gridded per pooling window."""
    n, h, w, c = x.shape
    # TODO(synk): the module calls nn.MaxPool2d(out_channels); whenever that kernel exceeds
    # the feature-map size PyTorch raises ("output size too small") and the network cannot
    # run at all, so the kernel/stride is clamped to the spatial extent (global max pool).
    k = min(kernel_size, h, w)
    ho = (h - k) // k + 1
    wo = (w - k) // k + 1
    xc = x[:, :ho * k, :wo * k, :]                         # floor semantics (drop remainder)
    windows = (xc.reshape(n, ho, k, wo, k, c)
                 .transpose(0, 1, 3, 2, 4, 5)
                 .reshape(n * ho * wo, k * k, c))
    rows = n * ho * wo
    out = pl.pallas_call(
        _window_max_kernel,
        out_shape=jax.ShapeDtypeStruct((rows, 1, c), x.dtype),
        grid=(rows,),
        in_specs=[pl.BlockSpec((1, k * k, c), lambda i: (i, 0, 0))],
        out_specs=pl.BlockSpec((1, 1, c), lambda i: (i, 0, 0)),
        compiler_params=pltpu.CompilerParams(dimension_semantics=("parallel",)),
    )(windows)
    return out.reshape(n, ho, wo, c)


# ---------------------------- ResidualNetwork ------------------------------

def residual_block_1x1(x2d, p):
    """One ResidualNetwork block on a 1x1 feature map, as 2D fused matmuls.

    On a 1x1 map: the 3x3 'same' convs reduce to their centre tap (stride has no effect),
    and MaxPool2d(out_channels) clamps to an identity, so
      residual(x) = relu(x @ w1 + b1) @ w2 + b2.
    """
    y = matmul_fused(x2d, p["w1"], p["b1"], relu=True, trim=False)
    if "ws" in p:
        # TODO(synk): the original `x += self.shortcut(x)` feeds the *residual output* into
        # the 1x1 conv shortcut, which mismatches its in_channels / spatial stride and cannot
        # execute; the conv shortcut is applied to the block input instead (standard ResNet).
        s = matmul_fused(x2d, p["ws"], p["bs"], trim=False)
        # `x += shortcut; relu(x)` fused into conv2's matmul epilogue
        return matmul_fused(y, p["w2"], p["b2"], residual=s, relu=True, trim=False)
    # identity shortcut applied to the residual output exactly as written: relu(y + y)
    return matmul_fused(y, p["w2"], p["b2"], relu=True, scale=2.0, trim=False)


# --------------------------------- params ----------------------------------

_LAYER_CFG = ((64, 1), (128, 2), (256, 2), (512, 2))   # (out_channels, stride)
_BLOCKS_PER_LAYER = 3                                   # _make_layer: 1 + num_blocks(=2)


def _full_conv_init(key, kh, kw, cin, cout):
    k_w, k_b = jax.random.split(key)
    fan_in = kh * kw * cin
    w = jax.random.normal(k_w, (kh, kw, cin, cout), jnp.float32) * (0.5 / math.sqrt(fan_in))
    b = jax.random.normal(k_b, (cout,), jnp.float32) * 0.01
    return w, b


def _stem_conv_params(key, kh, kw, cin, cout):
    w, b = _full_conv_init(key, kh, kw, cin, cout)
    cout_p = _cpad(cout)
    w = jnp.pad(w, ((0, 0), (0, 0), (0, 0), (0, cout_p - cout)))
    b = jnp.pad(b, (0, cout_p - cout))
    # im2col matmul layout (kh*kw*cin, cout_p), bf16; K padding is done inside matmul_fused.
    return w.reshape(kh * kw * cin, cout_p).astype(jnp.bfloat16), b


def _trunk_conv_params(key, kh, kw, cin, cout):
    w, b = _full_conv_init(key, kh, kw, cin, cout)
    # Every post-stem feature map is 1x1 (the clamped stem MaxPool is a global spatial max),
    # so with 'same' padding only the (kh//2, kw//2) tap ever multiplies non-zero data.
    # Slice it at init and store the matmul-ready, lane-padded bf16 weight: 9x less weight
    # HBM traffic per 3x3 conv. Padded channels are zero and stay zero through the network.
    wc = w[kh // 2, kw // 2]                               # (cin, cout)
    wc = jnp.pad(wc, ((0, _cpad(cin) - cin), (0, _cpad(cout) - cout))).astype(jnp.bfloat16)
    b = jnp.pad(b, (0, _cpad(cout) - cout))
    return wc, b


def init_resnet_params(key, num_classes=1000):
    keys = iter(jax.random.split(key, 64))
    params = {}
    # stem: Conv2d(3, 64, kernel_size=7, stride=2, padding=3)
    params["stem_w"], params["stem_b"] = _stem_conv_params(next(keys), 7, 7, 3, 64)

    layers = []
    # TODO(synk): the module keeps self.in_channels = 3 when building layer1 even though its
    # real input already has 64 channels from the stem (channel-mismatch crash in PyTorch);
    # layer1 is built with the actual 64 input channels.
    in_c = 64
    for out_c, stride in _LAYER_CFG:
        blocks = []
        for b_idx in range(_BLOCKS_PER_LAYER):
            s = stride if b_idx == 0 else 1
            blk = {}
            blk["w1"], blk["b1"] = _trunk_conv_params(next(keys), 3, 3, in_c, out_c)
            blk["w2"], blk["b2"] = _trunk_conv_params(next(keys), 3, 3, out_c, out_c)
            if s != 1 or in_c != out_c:
                blk["ws"], blk["bs"] = _trunk_conv_params(next(keys), 1, 1, in_c, out_c)
            blocks.append(blk)
            in_c = out_c
        layers.append(blocks)
    params["layers"] = layers

    k_fw, k_fb = jax.random.split(next(keys))
    params["fc_w"] = jax.random.normal(k_fw, (512, num_classes), jnp.float32) / math.sqrt(512)
    params["fc_b"] = jax.random.normal(k_fb, (num_classes,), jnp.float32) * 0.01
    return params


# --------------------------------- ResNet ----------------------------------

def resnet_forward(params, x_nchw):
    # PyTorch feeds NCHW; transpose once to NHWC (channels on the 128-lane axis).
    x = jnp.transpose(x_nchw, (0, 2, 3, 1))
    batch = x.shape[0]
    num_classes = params["fc_b"].shape[0]

    # stem: Conv2d(3, 64, k=7, s=2, p=3) -> MaxPool2d(64) (clamped -> global spatial max)
    x = conv2d(x, params["stem_w"], params["stem_b"], kh=7, kw=7, stride=2, padding=3)
    x = maxpool2d(x, 64)

    if x.shape[1] != 1 or x.shape[2] != 1:
        # TODO(synk): inputs large enough to leave >1x1 maps after the clamped stem pool
        # would need the general in-kernel im2col trunk; not implemented (never hit here).
        raise NotImplementedError("post-stem feature map expected to be 1x1")

    # Trunk runs in 2D: (M_pad, C_pad) bf16 activations, M padded to a 16-row slab exactly
    # once and kept padded through every block (padded rows never mix with real rows since
    # no op reduces over the batch axis before the final slice).
    mp = _round_up(batch, 16)
    x = x.reshape(batch, x.shape[-1])
    x = jnp.pad(x, ((0, mp - batch), (0, 0)))

    for blocks in params["layers"]:
        for blk in blocks:
            x = residual_block_1x1(x, blk)

    # AdaptiveAvgPool2d((1, 1)) and Flatten are identities on a 1x1 map.
    logits = matmul_fused(x, params["fc_w"], params["fc_b"],
                          trim=False, out_dtype=jnp.float32)
    # TODO(synk): ResNet.forward has no return statement (returns None); the logits are
    # returned here so the computation can be verified.
    return logits[:batch, :num_classes]


# ----------------------------------- main -----------------------------------

if __name__ == "__main__":
    key = jax.random.PRNGKey(0)
    pkey, xkey = jax.random.split(key)

    params = init_resnet_params(pkey, num_classes=1000)
    x = jax.random.normal(xkey, (2, 3, 32, 32), jnp.float32)   # NCHW, as in PyTorch

    forward = jax.jit(resnet_forward)        # single executable for the whole network
    logits = jax.block_until_ready(forward(params, x))

    assert logits.shape == (2, 1000), logits.shape
    assert bool(jnp.all(jnp.isfinite(logits)))
    print("KERNEL_OK")
</pallas_src>

<mosaic_0001>
module attributes {stable_mosaic.version = 11 : i64} {
  func.func @_fused_matmul_kernel(%arg0: i32, %arg1: i32, %arg2: i32, %arg3: memref<256x256xbf16, #tpu.memory_space<vmem>>, %arg4: memref<256x128xbf16, #tpu.memory_space<vmem>>, %arg5: memref<1x128xf32, #tpu.memory_space<vmem>>, %arg6: memref<256x128xbf16, #tpu.memory_space<vmem>>) attributes {dimension_semantics = [#tpu.dimension_semantics<parallel>, #tpu.dimension_semantics<parallel>, #tpu.dimension_semantics<arbitrary>], iteration_bounds = array<i64: 2, 1, 1>, scalar_prefetch = 0 : i64, scratch_operands = 0 : i64, tpu.core_type = #tpu.core_type<tc>, window_params = [{transform_indices = @transform_0, window_bounds = array<i64: 256, 256>}, {transform_indices = @transform_1, window_bounds = array<i64: 256, 128>}, {transform_indices = @transform_2, window_bounds = array<i64: 1, 128>}, {transform_indices = @transform_3, window_bounds = array<i64: 256, 128>}]} {
    %c0 = arith.constant 0 : index
    %c0_0 = arith.constant 0 : index
    %0 = vector.load %arg3[%c0, %c0_0] : memref<256x256xbf16, #tpu.memory_space<vmem>>, vector<256x256xbf16>
    %c0_1 = arith.constant 0 : index
    %c0_2 = arith.constant 0 : index
    %1 = vector.load %arg4[%c0_1, %c0_2] : memref<256x128xbf16, #tpu.memory_space<vmem>>, vector<256x128xbf16>
    %cst = arith.constant dense<0.000000e+00> : vector<256x128xf32>
    %2 = tpu.matmul %0, %1, %cst {dimension_numbers = #tpu.dot_dimension_numbers<[1], [0], [0], [1], [0, 0, 1, 1], [], []>} : vector<256x256xbf16>, vector<256x128xbf16>, vector<256x128xf32> -> vector<256x128xf32>
    %c0_3 = arith.constant 0 : index
    %c0_4 = arith.constant 0 : index
    %3 = vector.load %arg5[%c0_3, %c0_4] : memref<1x128xf32, #tpu.memory_space<vmem>>, vector<1x128xf32>
    %4 = vector.broadcast %3 : vector<1x128xf32> to vector<256x128xf32>
    %5 = arith.addf %2, %4 : vector<256x128xf32>
    %6 = arith.truncf %5 : vector<256x128xf32> to vector<256x128xbf16>
    %c0_5 = arith.constant 0 : index
    %c0_6 = arith.constant 0 : index
    %7 = vector.load %arg6[%c0_5, %c0_6] : memref<256x128xbf16, #tpu.memory_space<vmem>>, vector<256x128xbf16>
    tpu.vector_store %arg6[%c0_5, %c0_6], %6 {strides = array<i32>} : memref<256x128xbf16, #tpu.memory_space<vmem>>, vector<256x128xbf16>,
    return
  }
  func.func @transform_0(%arg0: i32, %arg1: i32, %arg2: i32) -> (i32, i32) {
    %c0_i32 = arith.constant 0 : i32
    return %arg0, %arg2 : i32, i32
  }
  func.func @transform_1(%arg0: i32, %arg1: i32, %arg2: i32) -> (i32, i32) {
    %c0_i32 = arith.constant 0 : i32
    return %arg2, %arg1 : i32, i32
  }
  func.func @transform_2(%arg0: i32, %arg1: i32, %arg2: i32) -> (i32, i32) {
    %c0_i32 = arith.constant 0 : i32
    %c0_i32_0 = arith.constant 0 : i32
    return %c0_i32, %arg1 : i32, i32
  }
  func.func @transform_3(%arg0: i32, %arg1: i32, %arg2: i32) -> (i32, i32) {
    %c0_i32 = arith.constant 0 : i32
    return %arg0, %arg1 : i32, i32
  }
}

module attributes {stable_mosaic.version = 11 : i64} {
  func.func @_window_max_kernel(%arg0: i32, %arg1: memref<1x256x128xbf16, #tpu.memory_space<vmem>>, %arg2: memref<1x1x128xbf16, #tpu.memory_space<vmem>>) attributes {dimension_semantics = [#tpu.dimension_semantics<parallel>], iteration_bounds = array<i64: 2>, scalar_prefetch = 0 : i64, scratch_operands = 0 : i64, tpu.core_type = #tpu.core_type<tc>, window_params = [{transform_indices = @transform_0, window_bounds = array<i64: 1, 256, 128>}, {transform_indices = @transform_1, window_bounds = array<i64: 1, 1, 128>}]} {
    %c0 = arith.constant 0 : index
    %c0_0 = arith.constant 0 : index
    %c0_1 = arith.constant 0 : index
    %0 = vector.load %arg1[%c0, %c0_0, %c0_1] : memref<1x256x128xbf16, #tpu.memory_space<vmem>>, vector<1x256x128xbf16>
    %cst = arith.constant dense<0xFF80> : vector<1x128xbf16>
    %1 = vector.multi_reduction <maximumf>, %0, %cst [1] : vector<1x256x128xbf16> to vector<1x128xbf16>
    %2 = vector.shape_cast %1 : vector<1x128xbf16> to vector<1x1x128xbf16>
    %c0_2 = arith.constant 0 : index
    %c0_3 = arith.constant 0 : index
    %c0_4 = arith.constant 0 : index
    %3 = vector.load %arg2[%c0_2, %c0_3, %c0_4] : memref<1x1x128xbf16, #tpu.memory_space<vmem>>, vector<1x1x128xbf16>
    tpu.vector_store %arg2[%c0_2, %c0_3, %c0_4], %2 {strides = array<i32>} : memref<1x1x128xbf16, #tpu.memory_space<vmem>>, vector<1x1x128xbf16>,
    return
  }
  func.func @transform_0(%arg0: i32) -> (i32, i32, i32) {
    %c0_i32 = arith.constant 0 : i32
    %c0_i32_0 = arith.constant 0 : i32
    %c0_i32_1 = arith.constant 0 : i32
    return %arg0, %c0_i32, %c0_i32_0 : i32, i32, i32
  }
  func.func @transform_1(%arg0: i32) -> (i32, i32, i32) {
    %c0_i32 = arith.constant 0 : i32
    %c0_i32_0 = arith.constant 0 : i32
    %c0_i32_1 = arith.constant 0 : i32
    return %arg0, %c0_i32, %c0_i32_0 : i32, i32, i32
  }
}

module attributes {stable_mosaic.version = 11 : i64} {
  func.func @_fused_matmul_kernel(%arg0: i32, %arg1: i32, %arg2: i32, %arg3: memref<16x128xbf16, #tpu.memory_space<vmem>>, %arg4: memref<128x128xbf16, #tpu.memory_space<vmem>>, %arg5: memref<1x128xf32, #tpu.memory_space<vmem>>, %arg6: memref<16x128xbf16, #tpu.memory_space<vmem>>) attributes {dimension_semantics = [#tpu.dimension_semantics<parallel>, #tpu.dimension_semantics<parallel>, #tpu.dimension_semantics<arbitrary>], iteration_bounds = array<i64: 1, 1, 1>, scalar_prefetch = 0 : i64, scratch_operands = 0 : i64, tpu.core_type = #tpu.core_type<tc>, window_params = [{transform_indices = @transform_0, window_bounds = array<i64: 16, 128>}, {transform_indices = @transform_1, window_bounds = array<i64: 128, 128>}, {transform_indices = @transform_2, window_bounds = array<i64: 1, 128>}, {transform_indices = @transform_3, window_bounds = array<i64: 16, 128>}]} {
    %c0 = arith.constant 0 : index
    %c0_0 = arith.constant 0 : index
    %0 = vector.load %arg3[%c0, %c0_0] : memref<16x128xbf16, #tpu.memory_space<vmem>>, vector<16x128xbf16>
    %c0_1 = arith.constant 0 : index
    %c0_2 = arith.constant 0 : index
    %1 = vector.load %arg4[%c0_1, %c0_2] : memref<128x128xbf16, #tpu.memory_space<vmem>>, vector<128x128xbf16>
    %cst = arith.constant dense<0.000000e+00> : vector<16x128xf32>
    %2 = tpu.matmul %0, %1, %cst {dimension_numbers = #tpu.dot_dimension_numbers<[1], [0], [0], [1], [0, 0, 1, 1], [], []>} : vector<16x128xbf16>, vector<128x128xbf16>, vector<16x128xf32> -> vector<16x128xf32>
    %c0_3 = arith.constant 0 : index
    %c0_4 = arith.constant 0 : index
    %3 = vector.load %arg5[%c0_3, %c0_4] : memref<1x128xf32, #tpu.memory_space<vmem>>, vector<1x128xf32>
    %4 = vector.broadcast %3 : vector<1x128xf32> to vector<16x128xf32>
    %5 = arith.addf %2, %4 : vector<16x128xf32>
    %cst_5 = arith.constant 0.000000e+00 : f32
    %6 = vector.broadcast %cst_5 : f32 to vector<16x128xf32>
    %7 = arith.maximumf %5, %6 : vector<16x128xf32>
    %8 = arith.truncf %7 : vector<16x128xf32> to vector<16x128xbf16>
    %c0_6 = arith.constant 0 : index
    %c0_7 = arith.constant 0 : index
    %9 = vector.load %arg6[%c0_6, %c0_7] : memref<16x128xbf16, #tpu.memory_space<vmem>>, vector<16x128xbf16>
    tpu.vector_store %arg6[%c0_6, %c0_7], %8 {strides = array<i32>} : memref<16x128xbf16, #tpu.memory_space<vmem>>, vector<16x128xbf16>,
    return
  }
  func.func @transform_0(%arg0: i32, %arg1: i32, %arg2: i32) -> (i32, i32) {
    %c0_i32 = arith.constant 0 : i32
    return %arg0, %arg2 : i32, i32
  }
  func.func @transform_1(%arg0: i32, %arg1: i32, %arg2: i32) -> (i32, i32) {
    %c0_i32 = arith.constant 0 : i32
    return %arg2, %arg1 : i32, i32
  }
  func.func @transform_2(%arg0: i32, %arg1: i32, %arg2: i32) -> (i32, i32) {
    %c0_i32 = arith.constant 0 : i32
    %c0_i32_0 = arith.constant 0 : i32
    return %c0_i32, %arg1 : i32, i32
  }
  func.func @transform_3(%arg0: i32, %arg1: i32, %arg2: i32) -> (i32, i32) {
    %c0_i32 = arith.constant 0 : i32
    return %arg0, %arg1 : i32, i32
  }
}

module attributes {stable_mosaic.version = 11 : i64} {
  func.func @_fused_matmul_kernel(%arg0: i32, %arg1: i32, %arg2: i32, %arg3: memref<16x128xbf16, #tpu.memory_space<vmem>>, %arg4: memref<128x128xbf16, #tpu.memory_space<vmem>>, %arg5: memref<1x128xf32, #tpu.memory_space<vmem>>, %arg6: memref<16x128xbf16, #tpu.memory_space<vmem>>) attributes {dimension_semantics = [#tpu.dimension_semantics<parallel>, #tpu.dimension_semantics<parallel>, #tpu.dimension_semantics<arbitrary>], iteration_bounds = array<i64: 1, 1, 1>, scalar_prefetch = 0 : i64, scratch_operands = 0 : i64, tpu.core_type = #tpu.core_type<tc>, window_params = [{transform_indices = @transform_0, window_bounds = array<i64: 16, 128>}, {transform_indices = @transform_1, window_bounds = array<i64: 128, 128>}, {transform_indices = @transform_2, window_bounds = array<i64: 1, 128>}, {transform_indices = @transform_3, window_bounds = array<i64: 16, 128>}]} {
    %c0 = arith.constant 0 : index
    %c0_0 = arith.constant 0 : index
    %0 = vector.load %arg3[%c0, %c0_0] : memref<16x128xbf16, #tpu.memory_space<vmem>>, vector<16x128xbf16>
    %c0_1 = arith.constant 0 : index
    %c0_2 = arith.constant 0 : index
    %1 = vector.load %arg4[%c0_1, %c0_2] : memref<128x128xbf16, #tpu.memory_space<vmem>>, vector<128x128xbf16>
    %cst = arith.constant dense<0.000000e+00> : vector<16x128xf32>
    %2 = tpu.matmul %0, %1, %cst {dimension_numbers = #tpu.dot_dimension_numbers<[1], [0], [0], [1], [0, 0, 1, 1], [], []>} : vector<16x128xbf16>, vector<128x128xbf16>, vector<16x128xf32> -> vector<16x128xf32>
    %c0_3 = arith.constant 0 : index
    %c0_4 = arith.constant 0 : index
    %3 = vector.load %arg5[%c0_3, %c0_4] : memref<1x128xf32, #tpu.memory_space<vmem>>, vector<1x128xf32>
    %4 = vector.broadcast %3 : vector<1x128xf32> to vector<16x128xf32>
    %5 = arith.addf %2, %4 : vector<16x128xf32>
    %6 = arith.truncf %5 : vector<16x128xf32> to vector<16x128xbf16>
    %c0_5 = arith.constant 0 : index
    %c0_6 = arith.constant 0 : index
    %7 = vector.load %arg6[%c0_5, %c0_6] : memref<16x128xbf16, #tpu.memory_space<vmem>>, vector<16x128xbf16>
    tpu.vector_store %arg6[%c0_5, %c0_6], %6 {strides = array<i32>} : memref<16x128xbf16, #tpu.memory_space<vmem>>, vector<16x128xbf16>,
    return
  }
  func.func @transform_0(%arg0: i32, %arg1: i32, %arg2: i32) -> (i32, i32) {
    %c0_i32 = arith.constant 0 : i32
    return %arg0, %arg2 : i32, i32
  }
  func.func @transform_1(%arg0: i32, %arg1: i32, %arg2: i32) -> (i32, i32) {
    %c0_i32 = arith.constant 0 : i32
    return %arg2, %arg1 : i32, i32
  }
  func.func @transform_2(%arg0: i32, %arg1: i32, %arg2: i32) -> (i32, i32) {
    %c0_i32 = arith.constant 0 : i32
    %c0_i32_0 = arith.constant 0 : i32
    return %c0_i32, %arg1 : i32, i32
  }
  func.func @transform_3(%arg0: i32, %arg1: i32, %arg2: i32) -> (i32, i32) {
    %c0_i32 = arith.constant 0 : i32
    return %arg0, %arg1 : i32, i32
  }
}

module attributes {stable_mosaic.version = 11 : i64} {
  func.func @_fused_matmul_kernel(%arg0: i32, %arg1: i32, %arg2: i32, %arg3: memref<16x128xbf16, #tpu.memory_space<vmem>>, %arg4: memref<128x128xbf16, #tpu.memory_space<vmem>>, %arg5: memref<1x128xf32, #tpu.memory_space<vmem>>, %arg6: memref<16x128xbf16, #tpu.memory_space<vmem>>) attributes {dimension_semantics = [#tpu.dimension_semantics<parallel>, #tpu.dimension_semantics<parallel>, #tpu.dimension_semantics<arbitrary>], iteration_bounds = array<i64: 1, 1, 1>, scalar_prefetch = 0 : i64, scratch_operands = 0 : i64, tpu.core_type = #tpu.core_type<tc>, window_params = [{transform_indices = @transform_0, window_bounds = array<i64: 16, 128>}, {transform_indices = @transform_1, window_bounds = array<i64: 128, 128>}, {transform_indices = @transform_2, window_bounds = array<i64: 1, 128>}, {transform_indices = @transform_3, window_bounds = array<i64: 16, 128>}]} {
    %c0 = arith.constant 0 : index
    %c0_0 = arith.constant 0 : index
    %0 = vector.load %arg3[%c0, %c0_0] : memref<16x128xbf16, #tpu.memory_space<vmem>>, vector<16x128xbf16>
    %c0_1 = arith.constant 0 : index
    %c0_2 = arith.constant 0 : index
    %1 = vector.load %arg4[%c0_1, %c0_2] : memref<128x128xbf16, #tpu.memory_space<vmem>>, vector<128x128xbf16>
    %cst = arith.constant dense<0.000000e+00> : vector<16x128xf32>
    %2 = tpu.matmul %0, %1, %cst {dimension_numbers = #tpu.dot_dimension_numbers<[1], [0], [0], [1], [0, 0, 1, 1], [], []>} : vector<16x128xbf16>, vector<128x128xbf16>, vector<16x128xf32> -> vector<16x128xf32>
    %c0_3 = arith.constant 0 : index
    %c0_4 = arith.constant 0 : index
    %3 = vector.load %arg5[%c0_3, %c0_4] : memref<1x128xf32, #tpu.memory_space<vmem>>, vector<1x128xf32>
    %4 = vector.broadcast %3 : vector<1x128xf32> to vector<16x128xf32>
    %5 = arith.addf %2, %4 : vector<16x128xf32>
    %cst_5 = arith.constant 2.000000e+00 : f32
    %6 = vector.broadcast %cst_5 : f32 to vector<16x128xf32>
    %7 = arith.mulf %5, %6 : vector<16x128xf32>
    %cst_6 = arith.constant 0.000000e+00 : f32
    %8 = vector.broadcast %cst_6 : f32 to vector<16x128xf32>
    %9 = arith.maximumf %7, %8 : vector<16x128xf32>
    %10 = arith.truncf %9 : vector<16x128xf32> to vector<16x128xbf16>
    %c0_7 = arith.constant 0 : index
    %c0_8 = arith.constant 0 : index
    %11 = vector.load %arg6[%c0_7, %c0_8] : memref<16x128xbf16, #tpu.memory_space<vmem>>, vector<16x128xbf16>
    tpu.vector_store %arg6[%c0_7, %c0_8], %10 {strides = array<i32>} : memref<16x128xbf16, #tpu.memory_space<vmem>>, vector<16x128xbf16>,
    return
  }
  func.func @transform_0(%arg0: i32, %arg1: i32, %arg2: i32) -> (i32, i32) {
    %c0_i32 = arith.constant 0 : i32
    return %arg0, %arg2 : i32, i32
  }
  func.func @transform_1(%arg0: i32, %arg1: i32, %arg2: i32) -> (i32, i32) {
    %c0_i32 = arith.constant 0 : i32
    return %arg2, %arg1 : i32, i32
  }
  func.func @transform_2(%arg0: i32, %arg1: i32, %arg2: i32) -> (i32, i32) {
    %c0_i32 = arith.constant 0 : i32
    %c0_i32_0 = arith.constant 0 : i32
    return %c0_i32, %arg1 : i32, i32
  }
  func.func @transform_3(%arg0: i32, %arg1: i32, %arg2: i32) -> (i32, i32) {
    %c0_i32 = arith.constant 0 : i32
    return %arg0, %arg1 : i32, i32
  }
}

module attributes {stable_mosaic.version = 11 : i64} {
  func.func @_fused_matmul_kernel(%arg0: i32, %arg1: i32, %arg2: i32, %arg3: memref<16x128xbf16, #tpu.memory_space<vmem>>, %arg4: memref<128x128xbf16, #tpu.memory_space<vmem>>, %arg5: memref<1x128xf32, #tpu.memory_space<vmem>>, %arg6: memref<16x128xbf16, #tpu.memory_space<vmem>>, %arg7: memref<16x128xbf16, #tpu.memory_space<vmem>>) attributes {dimension_semantics = [#tpu.dimension_semantics<parallel>, #tpu.dimension_semantics<parallel>, #tpu.dimension_semantics<arbitrary>], iteration_bounds = array<i64: 1, 1, 1>, scalar_prefetch = 0 : i64, scratch_operands = 0 : i64, tpu.core_type = #tpu.core_type<tc>, window_params = [{transform_indices = @transform_0, window_bounds = array<i64: 16, 128>}, {transform_indices = @transform_1, window_bounds = array<i64: 128, 128>}, {transform_indices = @transform_2, window_bounds = array<i64: 1, 128>}, {transform_indices = @transform_3, window_bounds = array<i64: 16, 128>}, {transform_indices = @transform_4, window_bounds = array<i64: 16, 128>}]} {
    %c0 = arith.constant 0 : index
    %c0_0 = arith.constant 0 : index
    %0 = vector.load %arg3[%c0, %c0_0] : memref<16x128xbf16, #tpu.memory_space<vmem>>, vector<16x128xbf16>
    %c0_1 = arith.constant 0 : index
    %c0_2 = arith.constant 0 : index
    %1 = vector.load %arg4[%c0_1, %c0_2] : memref<128x128xbf16, #tpu.memory_space<vmem>>, vector<128x128xbf16>
    %cst = arith.constant dense<0.000000e+00> : vector<16x128xf32>
    %2 = tpu.matmul %0, %1, %cst {dimension_numbers = #tpu.dot_dimension_numbers<[1], [0], [0], [1], [0, 0, 1, 1], [], []>} : vector<16x128xbf16>, vector<128x128xbf16>, vector<16x128xf32> -> vector<16x128xf32>
    %c0_3 = arith.constant 0 : index
    %c0_4 = arith.constant 0 : index
    %3 = vector.load %arg5[%c0_3, %c0_4] : memref<1x128xf32, #tpu.memory_space<vmem>>, vector<1x128xf32>
    %4 = vector.broadcast %3 : vector<1x128xf32> to vector<16x128xf32>
    %5 = arith.addf %2, %4 : vector<16x128xf32>
    %c0_5 = arith.constant 0 : index
    %c0_6 = arith.constant 0 : index
    %6 = vector.load %arg6[%c0_5, %c0_6] : memref<16x128xbf16, #tpu.memory_space<vmem>>, vector<16x128xbf16>
    %7 = arith.extf %6 : vector<16x128xbf16> to vector<16x128xf32>
    %8 = arith.addf %5, %7 : vector<16x128xf32>
    %cst_7 = arith.constant 0.000000e+00 : f32
    %9 = vector.broadcast %cst_7 : f32 to vector<16x128xf32>
    %10 = arith.maximumf %8, %9 : vector<16x128xf32>
    %11 = arith.truncf %10 : vector<16x128xf32> to vector<16x128xbf16>
    %c0_8 = arith.constant 0 : index
    %c0_9 = arith.constant 0 : index
    %12 = vector.load %arg7[%c0_8, %c0_9] : memref<16x128xbf16, #tpu.memory_space<vmem>>, vector<16x128xbf16>
    tpu.vector_store %arg7[%c0_8, %c0_9], %11 {strides = array<i32>} : memref<16x128xbf16, #tpu.memory_space<vmem>>, vector<16x128xbf16>,
    return
  }
  func.func @transform_0(%arg0: i32, %arg1: i32, %arg2: i32) -> (i32, i32) {
    %c0_i32 = arith.constant 0 : i32
    return %arg0, %arg2 : i32, i32
  }
  func.func @transform_1(%arg0: i32, %arg1: i32, %arg2: i32) -> (i32, i32) {
    %c0_i32 = arith.constant 0 : i32
    return %arg2, %arg1 : i32, i32
  }
  func.func @transform_2(%arg0: i32, %arg1: i32, %arg2: i32) -> (i32, i32) {
    %c0_i32 = arith.constant 0 : i32
    %c0_i32_0 = arith.constant 0 : i32
    return %c0_i32, %arg1 : i32, i32
  }
  func.func @transform_3(%arg0: i32, %arg1: i32, %arg2: i32) -> (i32, i32) {
    %c0_i32 = arith.constant 0 : i32
    return %arg0, %arg1 : i32, i32
  }
  func.func @transform_4(%arg0: i32, %arg1: i32, %arg2: i32) -> (i32, i32) {
    %c0_i32 = arith.constant 0 : i32
    return %arg0, %arg1 : i32, i32
  }
}

module attributes {stable_mosaic.version = 11 : i64} {
  func.func @_fused_matmul_kernel(%arg0: i32, %arg1: i32, %arg2: i32, %arg3: memref<16x128xbf16, #tpu.memory_space<vmem>>, %arg4: memref<128x256xbf16, #tpu.memory_space<vmem>>, %arg5: memref<1x256xf32, #tpu.memory_space<vmem>>, %arg6: memref<16x256xbf16, #tpu.memory_space<vmem>>) attributes {dimension_semantics = [#tpu.dimension_semantics<parallel>, #tpu.dimension_semantics<parallel>, #tpu.dimension_semantics<arbitrary>], iteration_bounds = array<i64: 1, 1, 1>, scalar_prefetch = 0 : i64, scratch_operands = 0 : i64, tpu.core_type = #tpu.core_type<tc>, window_params = [{transform_indices = @transform_0, window_bounds = array<i64: 16, 128>}, {transform_indices = @transform_1, window_bounds = array<i64: 128, 256>}, {transform_indices = @transform_2, window_bounds = array<i64: 1, 256>}, {transform_indices = @transform_3, window_bounds = array<i64: 16, 256>}]} {
    %c0 = arith.constant 0 : index
    %c0_0 = arith.constant 0 : index
    %0 = vector.load %arg3[%c0, %c0_0] : memref<16x128xbf16, #tpu.memory_space<vmem>>, vector<16x128xbf16>
    %c0_1 = arith.constant 0 : index
    %c0_2 = arith.constant 0 : index
    %1 = vector.load %arg4[%c0_1, %c0_2] : memref<128x256xbf16, #tpu.memory_space<vmem>>, vector<128x256xbf16>
    %cst = arith.constant dense<0.000000e+00> : vector<16x256xf32>
    %2 = tpu.matmul %0, %1, %cst {dimension_numbers = #tpu.dot_dimension_numbers<[1], [0], [0], [1], [0, 0, 1, 1], [], []>} : vector<16x128xbf16>, vector<128x256xbf16>, vector<16x256xf32> -> vector<16x256xf32>
    %c0_3 = arith.constant 0 : index
    %c0_4 = arith.constant 0 : index
    %3 = vector.load %arg5[%c0_3, %c0_4] : memref<1x256xf32, #tpu.memory_space<vmem>>, vector<1x256xf32>
    %4 = vector.broadcast %3 : vector<1x256xf32> to vector<16x256xf32>
    %5 = arith.addf %2, %4 : vector<16x256xf32>
    %cst_5 = arith.constant 0.000000e+00 : f32
    %6 = vector.broadcast %cst_5 : f32 to vector<16x256xf32>
    %7 = arith.maximumf %5, %6 : vector<16x256xf32>
    %8 = arith.truncf %7 : vector<16x256xf32> to vector<16x256xbf16>
    %c0_6 = arith.constant 0 : index
    %c0_7 = arith.constant 0 : index
    %9 = vector.load %arg6[%c0_6, %c0_7] : memref<16x256xbf16, #tpu.memory_space<vmem>>, vector<16x256xbf16>
    tpu.vector_store %arg6[%c0_6, %c0_7], %8 {strides = array<i32>} : memref<16x256xbf16, #tpu.memory_space<vmem>>, vector<16x256xbf16>,
    return
  }
  func.func @transform_0(%arg0: i32, %arg1: i32, %arg2: i32) -> (i32, i32) {
    %c0_i32 = arith.constant 0 : i32
    return %arg0, %arg2 : i32, i32
  }
  func.func @transform_1(%arg0: i32, %arg1: i32, %arg2: i32) -> (i32, i32) {
    %c0_i32 = arith.constant 0 : i32
    return %arg2, %arg1 : i32, i32
  }
  func.func @transform_2(%arg0: i32, %arg1: i32, %arg2: i32) -> (i32, i32) {
    %c0_i32 = arith.constant 0 : i32
    %c0_i32_0 = arith.constant 0 : i32
    return %c0_i32, %arg1 : i32, i32
  }
  func.func @transform_3(%arg0: i32, %arg1: i32, %arg2: i32) -> (i32, i32) {
    %c0_i32 = arith.constant 0 : i32
    return %arg0, %arg1 : i32, i32
  }
}

module attributes {stable_mosaic.version = 11 : i64} {
  func.func @_fused_matmul_kernel(%arg0: i32, %arg1: i32, %arg2: i32, %arg3: memref<16x128xbf16, #tpu.memory_space<vmem>>, %arg4: memref<128x256xbf16, #tpu.memory_space<vmem>>, %arg5: memref<1x256xf32, #tpu.memory_space<vmem>>, %arg6: memref<16x256xbf16, #tpu.memory_space<vmem>>) attributes {dimension_semantics = [#tpu.dimension_semantics<parallel>, #tpu.dimension_semantics<parallel>, #tpu.dimension_semantics<arbitrary>], iteration_bounds = array<i64: 1, 1, 1>, scalar_prefetch = 0 : i64, scratch_operands = 0 : i64, tpu.core_type = #tpu.core_type<tc>, window_params = [{transform_indices = @transform_0, window_bounds = array<i64: 16, 128>}, {transform_indices = @transform_1, window_bounds = array<i64: 128, 256>}, {transform_indices = @transform_2, window_bounds = array<i64: 1, 256>}, {transform_indices = @transform_3, window_bounds = array<i64: 16, 256>}]} {
    %c0 = arith.constant 0 : index
    %c0_0 = arith.constant 0 : index
    %0 = vector.load %arg3[%c0, %c0_0] : memref<16x128xbf16, #tpu.memory_space<vmem>>, vector<16x128xbf16>
    %c0_1 = arith.constant 0 : index
    %c0_2 = arith.constant 0 : index
    %1 = vector.load %arg4[%c0_1, %c0_2] : memref<128x256xbf16, #tpu.memory_space<vmem>>, vector<128x256xbf16>
    %cst = arith.constant dense<0.000000e+00> : vector<16x256xf32>
    %2 = tpu.matmul %0, %1, %cst {dimension_numbers = #tpu.dot_dimension_numbers<[1], [0], [0], [1], [0, 0, 1, 1], [], []>} : vector<16x128xbf16>, vector<128x256xbf16>, vector<16x256xf32> -> vector<16x256xf32>
    %c0_3 = arith.constant 0 : index
    %c0_4 = arith.constant 0 : index
    %3 = vector.load %arg5[%c0_3, %c0_4] : memref<1x256xf32, #tpu.memory_space<vmem>>, vector<1x256xf32>
    %4 = vector.broadcast %3 : vector<1x256xf32> to vector<16x256xf32>
    %5 = arith.addf %2, %4 : vector<16x256xf32>
    %6 = arith.truncf %5 : vector<16x256xf32> to vector<16x256xbf16>
    %c0_5 = arith.constant 0 : index
    %c0_6 = arith.constant 0 : index
    %7 = vector.load %arg6[%c0_5, %c0_6] : memref<16x256xbf16, #tpu.memory_space<vmem>>, vector<16x256xbf16>
    tpu.vector_store %arg6[%c0_5, %c0_6], %6 {strides = array<i32>} : memref<16x256xbf16, #tpu.memory_space<vmem>>, vector<16x256xbf16>,
    return
  }
  func.func @transform_0(%arg0: i32, %arg1: i32, %arg2: i32) -> (i32, i32) {
    %c0_i32 = arith.constant 0 : i32
    return %arg0, %arg2 : i32, i32
  }
  func.func @transform_1(%arg0: i32, %arg1: i32, %arg2: i32) -> (i32, i32) {
    %c0_i32 = arith.constant 0 : i32
    return %arg2, %arg1 : i32, i32
  }
  func.func @transform_2(%arg0: i32, %arg1: i32, %arg2: i32) -> (i32, i32) {
    %c0_i32 = arith.constant 0 : i32
    %c0_i32_0 = arith.constant 0 : i32
    return %c0_i32, %arg1 : i32, i32
  }
  func.func @transform_3(%arg0: i32, %arg1: i32, %arg2: i32) -> (i32, i32) {
    %c0_i32 = arith.constant 0 : i32
    return %arg0, %arg1 : i32, i32
  }
}

module attributes {stable_mosaic.version = 11 : i64} {
  func.func @_fused_matmul_kernel(%arg0: i32, %arg1: i32, %arg2: i32, %arg3: memref<16x256xbf16, #tpu.memory_space<vmem>>, %arg4: memref<256x256xbf16, #tpu.memory_space<vmem>>, %arg5: memref<1x256xf32, #tpu.memory_space<vmem>>, %arg6: memref<16x256xbf16, #tpu.memory_space<vmem>>, %arg7: memref<16x256xbf16, #tpu.memory_space<vmem>>) attributes {dimension_semantics = [#tpu.dimension_semantics<parallel>, #tpu.dimension_semantics<parallel>, #tpu.dimension_semantics<arbitrary>], iteration_bounds = array<i64: 1, 1, 1>, scalar_prefetch = 0 : i64, scratch_operands = 0 : i64, tpu.core_type = #tpu.core_type<tc>, window_params = [{transform_indices = @transform_0, window_bounds = array<i64: 16, 256>}, {transform_indices = @transform_1, window_bounds = array<i64: 256, 256>}, {transform_indices = @transform_2, window_bounds = array<i64: 1, 256>}, {transform_indices = @transform_3, window_bounds = array<i64: 16, 256>}, {transform_indices = @transform_4, window_bounds = array<i64: 16, 256>}]} {
    %c0 = arith.constant 0 : index
    %c0_0 = arith.constant 0 : index
    %0 = vector.load %arg3[%c0, %c0_0] : memref<16x256xbf16, #tpu.memory_space<vmem>>, vector<16x256xbf16>
    %c0_1 = arith.constant 0 : index
    %c0_2 = arith.constant 0 : index
    %1 = vector.load %arg4[%c0_1, %c0_2] : memref<256x256xbf16, #tpu.memory_space<vmem>>, vector<256x256xbf16>
    %cst = arith.constant dense<0.000000e+00> : vector<16x256xf32>
    %2 = tpu.matmul %0, %1, %cst {dimension_numbers = #tpu.dot_dimension_numbers<[1], [0], [0], [1], [0, 0, 1, 1], [], []>} : vector<16x256xbf16>, vector<256x256xbf16>, vector<16x256xf32> -> vector<16x256xf32>
    %c0_3 = arith.constant 0 : index
    %c0_4 = arith.constant 0 : index
    %3 = vector.load %arg5[%c0_3, %c0_4] : memref<1x256xf32, #tpu.memory_space<vmem>>, vector<1x256xf32>
    %4 = vector.broadcast %3 : vector<1x256xf32> to vector<16x256xf32>
    %5 = arith.addf %2, %4 : vector<16x256xf32>
    %c0_5 = arith.constant 0 : index
    %c0_6 = arith.constant 0 : index
    %6 = vector.load %arg6[%c0_5, %c0_6] : memref<16x256xbf16, #tpu.memory_space<vmem>>, vector<16x256xbf16>
    %7 = arith.extf %6 : vector<16x256xbf16> to vector<16x256xf32>
    %8 = arith.addf %5, %7 : vector<16x256xf32>
    %cst_7 = arith.constant 0.000000e+00 : f32
    %9 = vector.broadcast %cst_7 : f32 to vector<16x256xf32>
    %10 = arith.maximumf %8, %9 : vector<16x256xf32>
    %11 = arith.truncf %10 : vector<16x256xf32> to vector<16x256xbf16>
    %c0_8 = arith.constant 0 : index
    %c0_9 = arith.constant 0 : index
    %12 = vector.load %arg7[%c0_8, %c0_9] : memref<16x256xbf16, #tpu.memory_space<vmem>>, vector<16x256xbf16>
    tpu.vector_store %arg7[%c0_8, %c0_9], %11 {strides = array<i32>} : memref<16x256xbf16, #tpu.memory_space<vmem>>, vector<16x256xbf16>,
    return
  }
  func.func @transform_0(%arg0: i32, %arg1: i32, %arg2: i32) -> (i32, i32) {
    %c0_i32 = arith.constant 0 : i32
    return %arg0, %arg2 : i32, i32
  }
  func.func @transform_1(%arg0: i32, %arg1: i32, %arg2: i32) -> (i32, i32) {
    %c0_i32 = arith.constant 0 : i32
    return %arg2, %arg1 : i32, i32
  }
  func.func @transform_2(%arg0: i32, %arg1: i32, %arg2: i32) -> (i32, i32) {
    %c0_i32 = arith.constant 0 : i32
    %c0_i32_0 = arith.constant 0 : i32
    return %c0_i32, %arg1 : i32, i32
  }
  func.func @transform_3(%arg0: i32, %arg1: i32, %arg2: i32) -> (i32, i32) {
    %c0_i32 = arith.constant 0 : i32
    return %arg0, %arg1 : i32, i32
  }
  func.func @transform_4(%arg0: i32, %arg1: i32, %arg2: i32) -> (i32, i32) {
    %c0_i32 = arith.constant 0 : i32
    return %arg0, %arg1 : i32, i32
  }
}

module attributes {stable_mosaic.version = 11 : i64} {
  func.func @_fused_matmul_kernel(%arg0: i32, %arg1: i32, %arg2: i32, %arg3: memref<16x256xbf16, #tpu.memory_space<vmem>>, %arg4: memref<256x256xbf16, #tpu.memory_space<vmem>>, %arg5: memref<1x256xf32, #tpu.memory_space<vmem>>, %arg6: memref<16x256xbf16, #tpu.memory_space<vmem>>) attributes {dimension_semantics = [#tpu.dimension_semantics<parallel>, #tpu.dimension_semantics<parallel>, #tpu.dimension_semantics<arbitrary>], iteration_bounds = array<i64: 1, 1, 1>, scalar_prefetch = 0 : i64, scratch_operands = 0 : i64, tpu.core_type = #tpu.core_type<tc>, window_params = [{transform_indices = @transform_0, window_bounds = array<i64: 16, 256>}, {transform_indices = @transform_1, window_bounds = array<i64: 256, 256>}, {transform_indices = @transform_2, window_bounds = array<i64: 1, 256>}, {transform_indices = @transform_3, window_bounds = array<i64: 16, 256>}]} {
    %c0 = arith.constant 0 : index
    %c0_0 = arith.constant 0 : index
    %0 = vector.load %arg3[%c0, %c0_0] : memref<16x256xbf16, #tpu.memory_space<vmem>>, vector<16x256xbf16>
    %c0_1 = arith.constant 0 : index
    %c0_2 = arith.constant 0 : index
    %1 = vector.load %arg4[%c0_1, %c0_2] : memref<256x256xbf16, #tpu.memory_space<vmem>>, vector<256x256xbf16>
    %cst = arith.constant dense<0.000000e+00> : vector<16x256xf32>
    %2 = tpu.matmul %0, %1, %cst {dimension_numbers = #tpu.dot_dimension_numbers<[1], [0], [0], [1], [0, 0, 1, 1], [], []>} : vector<16x256xbf16>, vector<256x256xbf16>, vector<16x256xf32> -> vector<16x256xf32>
    %c0_3 = arith.constant 0 : index
    %c0_4 = arith.constant 0 : index
    %3 = vector.load %arg5[%c0_3, %c0_4] : memref<1x256xf32, #tpu.memory_space<vmem>>, vector<1x256xf32>
    %4 = vector.broadcast %3 : vector<1x256xf32> to vector<16x256xf32>
    %5 = arith.addf %2, %4 : vector<16x256xf32>
    %cst_5 = arith.constant 0.000000e+00 : f32
    %6 = vector.broadcast %cst_5 : f32 to vector<16x256xf32>
    %7 = arith.maximumf %5, %6 : vector<16x256xf32>
    %8 = arith.truncf %7 : vector<16x256xf32> to vector<16x256xbf16>
    %c0_6 = arith.constant 0 : index
    %c0_7 = arith.constant 0 : index
    %9 = vector.load %arg6[%c0_6, %c0_7] : memref<16x256xbf16, #tpu.memory_space<vmem>>, vector<16x256xbf16>
    tpu.vector_store %arg6[%c0_6, %c0_7], %8 {strides = array<i32>} : memref<16x256xbf16, #tpu.memory_space<vmem>>, vector<16x256xbf16>,
    return
  }
  func.func @transform_0(%arg0: i32, %arg1: i32, %arg2: i32) -> (i32, i32) {
    %c0_i32 = arith.constant 0 : i32
    return %arg0, %arg2 : i32, i32
  }
  func.func @transform_1(%arg0: i32, %arg1: i32, %arg2: i32) -> (i32, i32) {
    %c0_i32 = arith.constant 0 : i32
    return %arg2, %arg1 : i32, i32
  }
  func.func @transform_2(%arg0: i32, %arg1: i32, %arg2: i32) -> (i32, i32) {
    %c0_i32 = arith.constant 0 : i32
    %c0_i32_0 = arith.constant 0 : i32
    return %c0_i32, %arg1 : i32, i32
  }
  func.func @transform_3(%arg0: i32, %arg1: i32, %arg2: i32) -> (i32, i32) {
    %c0_i32 = arith.constant 0 : i32
    return %arg0, %arg1 : i32, i32
  }
}

module attributes {stable_mosaic.version = 11 : i64} {
  func.func @_fused_matmul_kernel(%arg0: i32, %arg1: i32, %arg2: i32, %arg3: memref<16x256xbf16, #tpu.memory_space<vmem>>, %arg4: memref<256x256xbf16, #tpu.memory_space<vmem>>, %arg5: memref<1x256xf32, #tpu.memory_space<vmem>>, %arg6: memref<16x256xbf16, #tpu.memory_space<vmem>>) attributes {dimension_semantics = [#tpu.dimension_semantics<parallel>, #tpu.dimension_semantics<parallel>, #tpu.dimension_semantics<arbitrary>], iteration_bounds = array<i64: 1, 1, 1>, scalar_prefetch = 0 : i64, scratch_operands = 0 : i64, tpu.core_type = #tpu.core_type<tc>, window_params = [{transform_indices = @transform_0, window_bounds = array<i64: 16, 256>}, {transform_indices = @transform_1, window_bounds = array<i64: 256, 256>}, {transform_indices = @transform_2, window_bounds = array<i64: 1, 256>}, {transform_indices = @transform_3, window_bounds = array<i64: 16, 256>}]} {
    %c0 = arith.constant 0 : index
    %c0_0 = arith.constant 0 : index
    %0 = vector.load %arg3[%c0, %c0_0] : memref<16x256xbf16, #tpu.memory_space<vmem>>, vector<16x256xbf16>
    %c0_1 = arith.constant 0 : index
    %c0_2 = arith.constant 0 : index
    %1 = vector.load %arg4[%c0_1, %c0_2] : memref<256x256xbf16, #tpu.memory_space<vmem>>, vector<256x256xbf16>
    %cst = arith.constant dense<0.000000e+00> : vector<16x256xf32>
    %2 = tpu.matmul %0, %1, %cst {dimension_numbers = #tpu.dot_dimension_numbers<[1], [0], [0], [1], [0, 0, 1, 1], [], []>} : vector<16x256xbf16>, vector<256x256xbf16>, vector<16x256xf32> -> vector<16x256xf32>
    %c0_3 = arith.constant 0 : index
    %c0_4 = arith.constant 0 : index
    %3 = vector.load %arg5[%c0_3, %c0_4] : memref<1x256xf32, #tpu.memory_space<vmem>>, vector<1x256xf32>
    %4 = vector.broadcast %3 : vector<1x256xf32> to vector<16x256xf32>
    %5 = arith.addf %2, %4 : vector<16x256xf32>
    %cst_5 = arith.constant 2.000000e+00 : f32
    %6 = vector.broadcast %cst_5 : f32 to vector<16x256xf32>
    %7 = arith.mulf %5, %6 : vector<16x256xf32>
    %cst_6 = arith.constant 0.000000e+00 : f32
    %8 = vector.broadcast %cst_6 : f32 to vector<16x256xf32>
    %9 = arith.maximumf %7, %8 : vector<16x256xf32>
    %10 = arith.truncf %9 : vector<16x256xf32> to vector<16x256xbf16>
    %c0_7 = arith.constant 0 : index
    %c0_8 = arith.constant 0 : index
    %11 = vector.load %arg6[%c0_7, %c0_8] : memref<16x256xbf16, #tpu.memory_space<vmem>>, vector<16x256xbf16>
    tpu.vector_store %arg6[%c0_7, %c0_8], %10 {strides = array<i32>} : memref<16x256xbf16, #tpu.memory_space<vmem>>, vector<16x256xbf16>,
    return
  }
  func.func @transform_0(%arg0: i32, %arg1: i32, %arg2: i32) -> (i32, i32) {
    %c0_i32 = arith.constant 0 : i32
    return %arg0, %arg2 : i32, i32
  }
  func.func @transform_1(%arg0: i32, %arg1: i32, %arg2: i32) -> (i32, i32) {
    %c0_i32 = arith.constant 0 : i32
    return %arg2, %arg1 : i32, i32
  }
  func.func @transform_2(%arg0: i32, %arg1: i32, %arg2: i32) -> (i32, i32) {
    %c0_i32 = arith.constant 0 : i32
    %c0_i32_0 = arith.constant 0 : i32
    return %c0_i32, %arg1 : i32, i32
  }
  func.func @transform_3(%arg0: i32, %arg1: i32, %arg2: i32) -> (i32, i32) {
    %c0_i32 = arith.constant 0 : i32
    return %arg0, %arg1 : i32, i32
  }
}

module attributes {stable_mosaic.version = 11 : i64} {
  func.func @_fused_matmul_kernel(%arg0: i32, %arg1: i32, %arg2: i32, %arg3: memref<16x256xbf16, #tpu.memory_space<vmem>>, %arg4: memref<256x256xbf16, #tpu.memory_space<vmem>>, %arg5: memref<1x256xf32, #tpu.memory_space<vmem>>, %arg6: memref<16x256xbf16, #tpu.memory_space<vmem>>) attributes {dimension_semantics = [#tpu.dimension_semantics<parallel>, #tpu.dimension_semantics<parallel>, #tpu.dimension_semantics<arbitrary>], iteration_bounds = array<i64: 1, 2, 1>, scalar_prefetch = 0 : i64, scratch_operands = 0 : i64, tpu.core_type = #tpu.core_type<tc>, window_params = [{transform_indices = @transform_0, window_bounds = array<i64: 16, 256>}, {transform_indices = @transform_1, window_bounds = array<i64: 256, 256>}, {transform_indices = @transform_2, window_bounds = array<i64: 1, 256>}, {transform_indices = @transform_3, window_bounds = array<i64: 16, 256>}]} {
    %c0 = arith.constant 0 : index
    %c0_0 = arith.constant 0 : index
    %0 = vector.load %arg3[%c0, %c0_0] : memref<16x256xbf16, #tpu.memory_space<vmem>>, vector<16x256xbf16>
    %c0_1 = arith.constant 0 : index
    %c0_2 = arith.constant 0 : index
    %1 = vector.load %arg4[%c0_1, %c0_2] : memref<256x256xbf16, #tpu.memory_space<vmem>>, vector<256x256xbf16>
    %cst = arith.constant dense<0.000000e+00> : vector<16x256xf32>
    %2 = tpu.matmul %0, %1, %cst {dimension_numbers = #tpu.dot_dimension_numbers<[1], [0], [0], [1], [0, 0, 1, 1], [], []>} : vector<16x256xbf16>, vector<256x256xbf16>, vector<16x256xf32> -> vector<16x256xf32>
    %c0_3 = arith.constant 0 : index
    %c0_4 = arith.constant 0 : index
    %3 = vector.load %arg5[%c0_3, %c0_4] : memref<1x256xf32, #tpu.memory_space<vmem>>, vector<1x256xf32>
    %4 = vector.broadcast %3 : vector<1x256xf32> to vector<16x256xf32>
    %5 = arith.addf %2, %4 : vector<16x256xf32>
    %cst_5 = arith.constant 0.000000e+00 : f32
    %6 = vector.broadcast %cst_5 : f32 to vector<16x256xf32>
    %7 = arith.maximumf %5, %6 : vector<16x256xf32>
    %8 = arith.truncf %7 : vector<16x256xf32> to vector<16x256xbf16>
    %c0_6 = arith.constant 0 : index
    %c0_7 = arith.constant 0 : index
    %9 = vector.load %arg6[%c0_6, %c0_7] : memref<16x256xbf16, #tpu.memory_space<vmem>>, vector<16x256xbf16>
    tpu.vector_store %arg6[%c0_6, %c0_7], %8 {strides = array<i32>} : memref<16x256xbf16, #tpu.memory_space<vmem>>, vector<16x256xbf16>,
    return
  }
  func.func @transform_0(%arg0: i32, %arg1: i32, %arg2: i32) -> (i32, i32) {
    %c0_i32 = arith.constant 0 : i32
    return %arg0, %arg2 : i32, i32
  }
  func.func @transform_1(%arg0: i32, %arg1: i32, %arg2: i32) -> (i32, i32) {
    %c0_i32 = arith.constant 0 : i32
    return %arg2, %arg1 : i32, i32
  }
  func.func @transform_2(%arg0: i32, %arg1: i32, %arg2: i32) -> (i32, i32) {
    %c0_i32 = arith.constant 0 : i32
    %c0_i32_0 = arith.constant 0 : i32
    return %c0_i32, %arg1 : i32, i32
  }
  func.func @transform_3(%arg0: i32, %arg1: i32, %arg2: i32) -> (i32, i32) {
    %c0_i32 = arith.constant 0 : i32
    return %arg0, %arg1 : i32, i32
  }
}

module attributes {stable_mosaic.version = 11 : i64} {
  func.func @_fused_matmul_kernel(%arg0: i32, %arg1: i32, %arg2: i32, %arg3: memref<16x256xbf16, #tpu.memory_space<vmem>>, %arg4: memref<256x256xbf16, #tpu.memory_space<vmem>>, %arg5: memref<1x256xf32, #tpu.memory_space<vmem>>, %arg6: memref<16x256xbf16, #tpu.memory_space<vmem>>) attributes {dimension_semantics = [#tpu.dimension_semantics<parallel>, #tpu.dimension_semantics<parallel>, #tpu.dimension_semantics<arbitrary>], iteration_bounds = array<i64: 1, 2, 1>, scalar_prefetch = 0 : i64, scratch_operands = 0 : i64, tpu.core_type = #tpu.core_type<tc>, window_params = [{transform_indices = @transform_0, window_bounds = array<i64: 16, 256>}, {transform_indices = @transform_1, window_bounds = array<i64: 256, 256>}, {transform_indices = @transform_2, window_bounds = array<i64: 1, 256>}, {transform_indices = @transform_3, window_bounds = array<i64: 16, 256>}]} {
    %c0 = arith.constant 0 : index
    %c0_0 = arith.constant 0 : index
    %0 = vector.load %arg3[%c0, %c0_0] : memref<16x256xbf16, #tpu.memory_space<vmem>>, vector<16x256xbf16>
    %c0_1 = arith.constant 0 : index
    %c0_2 = arith.constant 0 : index
    %1 = vector.load %arg4[%c0_1, %c0_2] : memref<256x256xbf16, #tpu.memory_space<vmem>>, vector<256x256xbf16>
    %cst = arith.constant dense<0.000000e+00> : vector<16x256xf32>
    %2 = tpu.matmul %0, %1, %cst {dimension_numbers = #tpu.dot_dimension_numbers<[1], [0], [0], [1], [0, 0, 1, 1], [], []>} : vector<16x256xbf16>, vector<256x256xbf16>, vector<16x256xf32> -> vector<16x256xf32>
    %c0_3 = arith.constant 0 : index
    %c0_4 = arith.constant 0 : index
    %3 = vector.load %arg5[%c0_3, %c0_4] : memref<1x256xf32, #tpu.memory_space<vmem>>, vector<1x256xf32>
    %4 = vector.broadcast %3 : vector<1x256xf32> to vector<16x256xf32>
    %5 = arith.addf %2, %4 : vector<16x256xf32>
    %6 = arith.truncf %5 : vector<16x256xf32> to vector<16x256xbf16>
    %c0_5 = arith.constant 0 : index
    %c0_6 = arith.constant 0 : index
    %7 = vector.load %arg6[%c0_5, %c0_6] : memref<16x256xbf16, #tpu.memory_space<vmem>>, vector<16x256xbf16>
    tpu.vector_store %arg6[%c0_5, %c0_6], %6 {strides = array<i32>} : memref<16x256xbf16, #tpu.memory_space<vmem>>, vector<16x256xbf16>,
    return
  }
  func.func @transform_0(%arg0: i32, %arg1: i32, %arg2: i32) -> (i32, i32) {
    %c0_i32 = arith.constant 0 : i32
    return %arg0, %arg2 : i32, i32
  }
  func.func @transform_1(%arg0: i32, %arg1: i32, %arg2: i32) -> (i32, i32) {
    %c0_i32 = arith.constant 0 : i32
    return %arg2, %arg1 : i32, i32
  }
  func.func @transform_2(%arg0: i32, %arg1: i32, %arg2: i32) -> (i32, i32) {
    %c0_i32 = arith.constant 0 : i32
    %c0_i32_0 = arith.constant 0 : i32
    return %c0_i32, %arg1 : i32, i32
  }
  func.func @transform_3(%arg0: i32, %arg1: i32, %arg2: i32) -> (i32, i32) {
    %c0_i32 = arith.constant 0 : i32
    return %arg0, %arg1 : i32, i32
  }
}

module attributes {stable_mosaic.version = 11 : i64} {
  func.func @_fused_matmul_kernel(%arg0: i32, %arg1: i32, %arg2: i32, %arg3: memref<16x512xbf16, #tpu.memory_space<vmem>>, %arg4: memref<512x256xbf16, #tpu.memory_space<vmem>>, %arg5: memref<1x256xf32, #tpu.memory_space<vmem>>, %arg6: memref<16x256xbf16, #tpu.memory_space<vmem>>, %arg7: memref<16x256xbf16, #tpu.memory_space<vmem>>) attributes {dimension_semantics = [#tpu.dimension_semantics<parallel>, #tpu.dimension_semantics<parallel>, #tpu.dimension_semantics<arbitrary>], iteration_bounds = array<i64: 1, 2, 1>, scalar_prefetch = 0 : i64, scratch_operands = 0 : i64, tpu.core_type = #tpu.core_type<tc>, window_params = [{transform_indices = @transform_0, window_bounds = array<i64: 16, 512>}, {transform_indices = @transform_1, window_bounds = array<i64: 512, 256>}, {transform_indices = @transform_2, window_bounds = array<i64: 1, 256>}, {transform_indices = @transform_3, window_bounds = array<i64: 16, 256>}, {transform_indices = @transform_4, window_bounds = array<i64: 16, 256>}]} {
    %c0 = arith.constant 0 : index
    %c0_0 = arith.constant 0 : index
    %0 = vector.load %arg3[%c0, %c0_0] : memref<16x512xbf16, #tpu.memory_space<vmem>>, vector<16x512xbf16>
    %c0_1 = arith.constant 0 : index
    %c0_2 = arith.constant 0 : index
    %1 = vector.load %arg4[%c0_1, %c0_2] : memref<512x256xbf16, #tpu.memory_space<vmem>>, vector<512x256xbf16>
    %cst = arith.constant dense<0.000000e+00> : vector<16x256xf32>
    %2 = tpu.matmul %0, %1, %cst {dimension_numbers = #tpu.dot_dimension_numbers<[1], [0], [0], [1], [0, 0, 1, 1], [], []>} : vector<16x512xbf16>, vector<512x256xbf16>, vector<16x256xf32> -> vector<16x256xf32>
    %c0_3 = arith.constant 0 : index
    %c0_4 = arith.constant 0 : index
    %3 = vector.load %arg5[%c0_3, %c0_4] : memref<1x256xf32, #tpu.memory_space<vmem>>, vector<1x256xf32>
    %4 = vector.broadcast %3 : vector<1x256xf32> to vector<16x256xf32>
    %5 = arith.addf %2, %4 : vector<16x256xf32>
    %c0_5 = arith.constant 0 : index
    %c0_6 = arith.constant 0 : index
    %6 = vector.load %arg6[%c0_5, %c0_6] : memref<16x256xbf16, #tpu.memory_space<vmem>>, vector<16x256xbf16>
    %7 = arith.extf %6 : vector<16x256xbf16> to vector<16x256xf32>
    %8 = arith.addf %5, %7 : vector<16x256xf32>
    %cst_7 = arith.constant 0.000000e+00 : f32
    %9 = vector.broadcast %cst_7 : f32 to vector<16x256xf32>
    %10 = arith.maximumf %8, %9 : vector<16x256xf32>
    %11 = arith.truncf %10 : vector<16x256xf32> to vector<16x256xbf16>
    %c0_8 = arith.constant 0 : index
    %c0_9 = arith.constant 0 : index
    %12 = vector.load %arg7[%c0_8, %c0_9] : memref<16x256xbf16, #tpu.memory_space<vmem>>, vector<16x256xbf16>
    tpu.vector_store %arg7[%c0_8, %c0_9], %11 {strides = array<i32>} : memref<16x256xbf16, #tpu.memory_space<vmem>>, vector<16x256xbf16>,
    return
  }
  func.func @transform_0(%arg0: i32, %arg1: i32, %arg2: i32) -> (i32, i32) {
    %c0_i32 = arith.constant 0 : i32
    return %arg0, %arg2 : i32, i32
  }
  func.func @transform_1(%arg0: i32, %arg1: i32, %arg2: i32) -> (i32, i32) {
    %c0_i32 = arith.constant 0 : i32
    return %arg2, %arg1 : i32, i32
  }
  func.func @transform_2(%arg0: i32, %arg1: i32, %arg2: i32) -> (i32, i32) {
    %c0_i32 = arith.constant 0 : i32
    %c0_i32_0 = arith.constant 0 : i32
    return %c0_i32, %arg1 : i32, i32
  }
  func.func @transform_3(%arg0: i32, %arg1: i32, %arg2: i32) -> (i32, i32) {
    %c0_i32 = arith.constant 0 : i32
    return %arg0, %arg1 : i32, i32
  }
  func.func @transform_4(%arg0: i32, %arg1: i32, %arg2: i32) -> (i32, i32) {
    %c0_i32 = arith.constant 0 : i32
    return %arg0, %arg1 : i32, i32
  }
}

module attributes {stable_mosaic.version = 11 : i64} {
  func.func @_fused_matmul_kernel(%arg0: i32, %arg1: i32, %arg2: i32, %arg3: memref<16x512xbf16, #tpu.memory_space<vmem>>, %arg4: memref<512x256xbf16, #tpu.memory_space<vmem>>, %arg5: memref<1x256xf32, #tpu.memory_space<vmem>>, %arg6: memref<16x256xbf16, #tpu.memory_space<vmem>>) attributes {dimension_semantics = [#tpu.dimension_semantics<parallel>, #tpu.dimension_semantics<parallel>, #tpu.dimension_semantics<arbitrary>], iteration_bounds = array<i64: 1, 2, 1>, scalar_prefetch = 0 : i64, scratch_operands = 0 : i64, tpu.core_type = #tpu.core_type<tc>, window_params = [{transform_indices = @transform_0, window_bounds = array<i64: 16, 512>}, {transform_indices = @transform_1, window_bounds = array<i64: 512, 256>}, {transform_indices = @transform_2, window_bounds = array<i64: 1, 256>}, {transform_indices = @transform_3, window_bounds = array<i64: 16, 256>}]} {
    %c0 = arith.constant 0 : index
    %c0_0 = arith.constant 0 : index
    %0 = vector.load %arg3[%c0, %c0_0] : memref<16x512xbf16, #tpu.memory_space<vmem>>, vector<16x512xbf16>
    %c0_1 = arith.constant 0 : index
    %c0_2 = arith.constant 0 : index
    %1 = vector.load %arg4[%c0_1, %c0_2] : memref<512x256xbf16, #tpu.memory_space<vmem>>, vector<512x256xbf16>
    %cst = arith.constant dense<0.000000e+00> : vector<16x256xf32>
    %2 = tpu.matmul %0, %1, %cst {dimension_numbers = #tpu.dot_dimension_numbers<[1], [0], [0], [1], [0, 0, 1, 1], [], []>} : vector<16x512xbf16>, vector<512x256xbf16>, vector<16x256xf32> -> vector<16x256xf32>
    %c0_3 = arith.constant 0 : index
    %c0_4 = arith.constant 0 : index
    %3 = vector.load %arg5[%c0_3, %c0_4] : memref<1x256xf32, #tpu.memory_space<vmem>>, vector<1x256xf32>
    %4 = vector.broadcast %3 : vector<1x256xf32> to vector<16x256xf32>
    %5 = arith.addf %2, %4 : vector<16x256xf32>
    %cst_5 = arith.constant 0.000000e+00 : f32
    %6 = vector.broadcast %cst_5 : f32 to vector<16x256xf32>
    %7 = arith.maximumf %5, %6 : vector<16x256xf32>
    %8 = arith.truncf %7 : vector<16x256xf32> to vector<16x256xbf16>
    %c0_6 = arith.constant 0 : index
    %c0_7 = arith.constant 0 : index
    %9 = vector.load %arg6[%c0_6, %c0_7] : memref<16x256xbf16, #tpu.memory_space<vmem>>, vector<16x256xbf16>
    tpu.vector_store %arg6[%c0_6, %c0_7], %8 {strides = array<i32>} : memref<16x256xbf16, #tpu.memory_space<vmem>>, vector<16x256xbf16>,
    return
  }
  func.func @transform_0(%arg0: i32, %arg1: i32, %arg2: i32) -> (i32, i32) {
    %c0_i32 = arith.constant 0 : i32
    return %arg0, %arg2 : i32, i32
  }
  func.func @transform_1(%arg0: i32, %arg1: i32, %arg2: i32) -> (i32, i32) {
    %c0_i32 = arith.constant 0 : i32
    return %arg2, %arg1 : i32, i32
  }
  func.func @transform_2(%arg0: i32, %arg1: i32, %arg2: i32) -> (i32, i32) {
    %c0_i32 = arith.constant 0 : i32
    %c0_i32_0 = arith.constant 0 : i32
    return %c0_i32, %arg1 : i32, i32
  }
  func.func @transform_3(%arg0: i32, %arg1: i32, %arg2: i32) -> (i32, i32) {
    %c0_i32 = arith.constant 0 : i32
    return %arg0, %arg1 : i32, i32
  }
}

module attributes {stable_mosaic.version = 11 : i64} {
  func.func @_fused_matmul_kernel(%arg0: i32, %arg1: i32, %arg2: i32, %arg3: memref<16x512xbf16, #tpu.memory_space<vmem>>, %arg4: memref<512x256xbf16, #tpu.memory_space<vmem>>, %arg5: memref<1x256xf32, #tpu.memory_space<vmem>>, %arg6: memref<16x256xbf16, #tpu.memory_space<vmem>>) attributes {dimension_semantics = [#tpu.dimension_semantics<parallel>, #tpu.dimension_semantics<parallel>, #tpu.dimension_semantics<arbitrary>], iteration_bounds = array<i64: 1, 2, 1>, scalar_prefetch = 0 : i64, scratch_operands = 0 : i64, tpu.core_type = #tpu.core_type<tc>, window_params = [{transform_indices = @transform_0, window_bounds = array<i64: 16, 512>}, {transform_indices = @transform_1, window_bounds = array<i64: 512, 256>}, {transform_indices = @transform_2, window_bounds = array<i64: 1, 256>}, {transform_indices = @transform_3, window_bounds = array<i64: 16, 256>}]} {
    %c0 = arith.constant 0 : index
    %c0_0 = arith.constant 0 : index
    %0 = vector.load %arg3[%c0, %c0_0] : memref<16x512xbf16, #tpu.memory_space<vmem>>, vector<16x512xbf16>
    %c0_1 = arith.constant 0 : index
    %c0_2 = arith.constant 0 : index
    %1 = vector.load %arg4[%c0_1, %c0_2] : memref<512x256xbf16, #tpu.memory_space<vmem>>, vector<512x256xbf16>
    %cst = arith.constant dense<0.000000e+00> : vector<16x256xf32>
    %2 = tpu.matmul %0, %1, %cst {dimension_numbers = #tpu.dot_dimension_numbers<[1], [0], [0], [1], [0, 0, 1, 1], [], []>} : vector<16x512xbf16>, vector<512x256xbf16>, vector<16x256xf32> -> vector<16x256xf32>
    %c0_3 = arith.constant 0 : index
    %c0_4 = arith.constant 0 : index
    %3 = vector.load %arg5[%c0_3, %c0_4] : memref<1x256xf32, #tpu.memory_space<vmem>>, vector<1x256xf32>
    %4 = vector.broadcast %3 : vector<1x256xf32> to vector<16x256xf32>
    %5 = arith.addf %2, %4 : vector<16x256xf32>
    %cst_5 = arith.constant 2.000000e+00 : f32
    %6 = vector.broadcast %cst_5 : f32 to vector<16x256xf32>
    %7 = arith.mulf %5, %6 : vector<16x256xf32>
    %cst_6 = arith.constant 0.000000e+00 : f32
    %8 = vector.broadcast %cst_6 : f32 to vector<16x256xf32>
    %9 = arith.maximumf %7, %8 : vector<16x256xf32>
    %10 = arith.truncf %9 : vector<16x256xf32> to vector<16x256xbf16>
    %c0_7 = arith.constant 0 : index
    %c0_8 = arith.constant 0 : index
    %11 = vector.load %arg6[%c0_7, %c0_8] : memref<16x256xbf16, #tpu.memory_space<vmem>>, vector<16x256xbf16>
    tpu.vector_store %arg6[%c0_7, %c0_8], %10 {strides = array<i32>} : memref<16x256xbf16, #tpu.memory_space<vmem>>, vector<16x256xbf16>,
    return
  }
  func.func @transform_0(%arg0: i32, %arg1: i32, %arg2: i32) -> (i32, i32) {
    %c0_i32 = arith.constant 0 : i32
    return %arg0, %arg2 : i32, i32
  }
  func.func @transform_1(%arg0: i32, %arg1: i32, %arg2: i32) -> (i32, i32) {
    %c0_i32 = arith.constant 0 : i32
    return %arg2, %arg1 : i32, i32
  }
  func.func @transform_2(%arg0: i32, %arg1: i32, %arg2: i32) -> (i32, i32) {
    %c0_i32 = arith.constant 0 : i32
    %c0_i32_0 = arith.constant 0 : i32
    return %c0_i32, %arg1 : i32, i32
  }
  func.func @transform_3(%arg0: i32, %arg1: i32, %arg2: i32) -> (i32, i32) {
    %c0_i32 = arith.constant 0 : i32
    return %arg0, %arg1 : i32, i32
  }
}

module attributes {stable_mosaic.version = 11 : i64} {
  func.func @_fused_matmul_kernel(%arg0: i32, %arg1: i32, %arg2: i32, %arg3: memref<16x512xbf16, #tpu.memory_space<vmem>>, %arg4: memref<512x256xbf16, #tpu.memory_space<vmem>>, %arg5: memref<1x256xf32, #tpu.memory_space<vmem>>, %arg6: memref<16x256xf32, #tpu.memory_space<vmem>>) attributes {dimension_semantics = [#tpu.dimension_semantics<parallel>, #tpu.dimension_semantics<parallel>, #tpu.dimension_semantics<arbitrary>], iteration_bounds = array<i64: 1, 4, 1>, scalar_prefetch = 0 : i64, scratch_operands = 0 : i64, tpu.core_type = #tpu.core_type<tc>, window_params = [{transform_indices = @transform_0, window_bounds = array<i64: 16, 512>}, {transform_indices = @transform_1, window_bounds = array<i64: 512, 256>}, {transform_indices = @transform_2, window_bounds = array<i64: 1, 256>}, {transform_indices = @transform_3, window_bounds = array<i64: 16, 256>}]} {
    %c0 = arith.constant 0 : index
    %c0_0 = arith.constant 0 : index
    %0 = vector.load %arg3[%c0, %c0_0] : memref<16x512xbf16, #tpu.memory_space<vmem>>, vector<16x512xbf16>
    %c0_1 = arith.constant 0 : index
    %c0_2 = arith.constant 0 : index
    %1 = vector.load %arg4[%c0_1, %c0_2] : memref<512x256xbf16, #tpu.memory_space<vmem>>, vector<512x256xbf16>
    %cst = arith.constant dense<0.000000e+00> : vector<16x256xf32>
    %2 = tpu.matmul %0, %1, %cst {dimension_numbers = #tpu.dot_dimension_numbers<[1], [0], [0], [1], [0, 0, 1, 1], [], []>} : vector<16x512xbf16>, vector<512x256xbf16>, vector<16x256xf32> -> vector<16x256xf32>
    %c0_3 = arith.constant 0 : index
    %c0_4 = arith.constant 0 : index
    %3 = vector.load %arg5[%c0_3, %c0_4] : memref<1x256xf32, #tpu.memory_space<vmem>>, vector<1x256xf32>
    %4 = vector.broadcast %3 : vector<1x256xf32> to vector<16x256xf32>
    %5 = arith.addf %2, %4 : vector<16x256xf32>
    %c0_5 = arith.constant 0 : index
    %c0_6 = arith.constant 0 : index
    %6 = vector.load %arg6[%c0_5, %c0_6] : memref<16x256xf32, #tpu.memory_space<vmem>>, vector<16x256xf32>
    tpu.vector_store %arg6[%c0_5, %c0_6], %5 {strides = array<i32>} : memref<16x256xf32, #tpu.memory_space<vmem>>, vector<16x256xf32>,
    return
  }
  func.func @transform_0(%arg0: i32, %arg1: i32, %arg2: i32) -> (i32, i32) {
    %c0_i32 = arith.constant 0 : i32
    return %arg0, %arg2 : i32, i32
  }
  func.func @transform_1(%arg0: i32, %arg1: i32, %arg2: i32) -> (i32, i32) {
    %c0_i32 = arith.constant 0 : i32
    return %arg2, %arg1 : i32, i32
  }
  func.func @transform_2(%arg0: i32, %arg1: i32, %arg2: i32) -> (i32, i32) {
    %c0_i32 = arith.constant 0 : i32
    %c0_i32_0 = arith.constant 0 : i32
    return %c0_i32, %arg1 : i32, i32
  }
  func.func @transform_3(%arg0: i32, %arg1: i32, %arg2: i32) -> (i32, i32) {
    %c0_i32 = arith.constant 0 : i32
    return %arg0, %arg1 : i32, i32
  }
}

</mosaic_0001>

<bundles_post_ra>
// kernel: resnet_forward.31
= control target key start
LH: loop header
LB: loop body
LE: loop exit
PB: predicated region body
PF: predicated region fallthrough
CT: control target
= control target key end

     0   :  { %s383_s6 = smov 0   ;;  %s422_s0 = inlined_call_operand.vmem [shape: bf16[2,256,128], index: 0, kind: input, shape index: {}]   ;;  %s423_s1 = inlined_call_operand.vmem [shape: bf16[2,1,128], index: 1, kind: output, shape index: {}]  }
   0x1 LB: > { %s268_s7 = sadd.s32 4294967295, %s371_s6   ;;  %p272_p0 = scmp.ge.s32.totalorder %s371_s6, 1  ;;  %s371_s6 = sphi %s383_s6, %s11_s6  }
   0x2   : > { %p87_p1 = scmp.lt.s32.totalorder %s371_s6, 3 }
   0x4   : > { %p88_p2 = pnand %p272_p0, %p87_p1 }
   0x5   : > { %p105_p3 = scmp.lt.s32.totalorder (!%p88_p2), %s268_s7, 1 }
   0x6   : > { %91 = sbr.rel (%p88_p2) target bundleno = 53 (0x35), region = 24 }
   0xb   : > { %s425_s7 = smov (!%p105_p3, %s268_s7), 1  ;;  %vm215_vm0 = vcmask 1040384   ;;  %vm216_vm1 = vsmask.f32 256 }
   0xc   : > { %s277_s8 = sshll.u32 %s425_s7, 7  ;;  %s112_s14 = scalar_lea.vmem %s423_s1, %s425_s7  ;;  %vm217_vm2 = vmand %vm215_vm0, %vm216_vm1 }
   0xd   : > { %s397_s11 = scalar_lea.vmem %s422_s0, %s277_s8 }
   0xe   : > { %v279_v0 = vld [vmem:[%s397_s11] sm:$0xff]   ;;  %v342_v1 = vld [vmem:[%s397_s11 + $0x8] sm:$0xff]   ;;  %v343_v2 = vld [vmem:[%s397_s11 + $0x10] sm:$0xff]  }
   0xf   : > { %v344_v3 = vld [vmem:[%s397_s11 + $0x18] sm:$0xff]   ;;  %v280_v4 = vunpack.c.l.bf16 %v279_v0  ;;  %v281_v5 = vunpack.c.h.bf16 %v279_v0  ;;  %v284_v6 = vunpack.c.l.bf16 %v342_v1  ;;  %v285_v7 = vunpack.c.h.bf16 %v342_v1  ;;  %v345_v8 = vld [vmem:[%s397_s11 + $0x20] sm:$0xff]   ;;  %v346_v9 = vld [vmem:[%s397_s11 + $0x28] sm:$0xff]  }
  0x10   : > { %v288_v10 = vunpack.c.l.bf16 %v343_v2  ;;  %v289_v11 = vunpack.c.h.bf16 %v343_v2  ;;  %v292_v12 = vunpack.c.l.bf16 %v344_v3  ;;  %v293_v13 = vunpack.c.h.bf16 %v344_v3  ;;  %v347_v14 = vld [vmem:[%s397_s11 + $0x30] sm:$0xff]   ;;  %v348_v15 = vld [vmem:[%s397_s11 + $0x38] sm:$0xff]   ;;  %v349_v20 = vld [vmem:[%s397_s11 + $0x40] sm:$0xff]  }
  0x11   : > { %v296_v16 = vunpack.c.l.bf16 %v345_v8  ;;  %v297_v17 = vunpack.c.h.bf16 %v345_v8  ;;  %v300_v18 = vunpack.c.l.bf16 %v346_v9  ;;  %v301_v19 = vunpack.c.h.bf16 %v346_v9  ;;  %v350_v21 = vld [vmem:[%s397_s11 + $0x48] sm:$0xff]   ;;  %v351_v26 = vld [vmem:[%s397_s11 + $0x50] sm:$0xff]   ;;  %v352_v27 = vld [vmem:[%s397_s11 + $0x58] sm:$0xff]  }
  0x12   : > { %v304_v22 = vunpack.c.l.bf16 %v347_v14  ;;  %v305_v23 = vunpack.c.h.bf16 %v347_v14  ;;  %v308_v24 = vunpack.c.l.bf16 %v348_v15  ;;  %v309_v25 = vunpack.c.h.bf16 %v348_v15  ;;  %v353_v36 = vld [vmem:[%s397_s11 + $0x60] sm:$0xff]   ;;  %v354_v37 = vld [vmem:[%s397_s11 + $0x68] sm:$0xff]   ;;  %v355_v46 = vld [vmem:[%s397_s11 + $0x70] sm:$0xff]  }
  0x13   : > { %v177_v28 = vmax.f32 %v280_v4, %v288_v10  ;;  %v178_v29 = vmax.f32 %v281_v5, %v289_v11  ;;  %v179_v30 = vmax.f32 %v284_v6, %v292_v12  ;;  %v180_v31 = vmax.f32 %v285_v7, %v293_v13  ;;  %v356_v47 = vld [vmem:[%s397_s11 + $0x78] sm:$0xff]  }
  0x14   : > { %v312_v32 = vunpack.c.l.bf16 %v349_v20  ;;  %v313_v33 = vunpack.c.h.bf16 %v349_v20  ;;  %v316_v34 = vunpack.c.l.bf16 %v350_v21  ;;  %v317_v35 = vunpack.c.h.bf16 %v350_v21  ;;  %v218_v21 = vld [vmem:[%s112_s14] sm:$0x1] }
  0x15   : > { %v181_v38 = vmax.f32 %v177_v28, %v296_v16  ;;  %v182_v39 = vmax.f32 %v178_v29, %v297_v17  ;;  %v183_v40 = vmax.f32 %v179_v30, %v300_v18  ;;  %v184_v41 = vmax.f32 %v180_v31, %v301_v19 }
  0x16   : > { %v320_v42 = vunpack.c.l.bf16 %v351_v26  ;;  %v321_v43 = vunpack.c.h.bf16 %v351_v26  ;;  %v324_v44 = vunpack.c.l.bf16 %v352_v27  ;;  %v325_v45 = vunpack.c.h.bf16 %v352_v27 }
  0x17   : > { %v185_v48 = vmax.f32 %v181_v38, %v304_v22  ;;  %v186_v49 = vmax.f32 %v182_v39, %v305_v23  ;;  %v187_v50 = vmax.f32 %v183_v40, %v308_v24  ;;  %v188_v51 = vmax.f32 %v184_v41, %v309_v25 }
  0x18   : > { %v328_v52 = vunpack.c.l.bf16 %v353_v36  ;;  %v329_v53 = vunpack.c.h.bf16 %v353_v36  ;;  %v332_v54 = vunpack.c.l.bf16 %v354_v37  ;;  %v333_v55 = vunpack.c.h.bf16 %v354_v37 }
  0x19   : > { %v189_v56 = vmax.f32 %v185_v48, %v312_v32  ;;  %v190_v57 = vmax.f32 %v186_v49, %v313_v33  ;;  %v191_v58 = vmax.f32 %v187_v50, %v316_v34  ;;  %v192_v59 = vmax.f32 %v188_v51, %v317_v35 }
  0x1a   : > { %v336_v60 = vunpack.c.l.bf16 %v355_v46  ;;  %v337_v61 = vunpack.c.h.bf16 %v355_v46  ;;  %v340_v62 = vunpack.c.l.bf16 %v356_v47  ;;  %v341_v63 = vunpack.c.h.bf16 %v356_v47 }
  0x1b   : > { %v193_v0 = vmax.f32 %v189_v56, %v320_v42  ;;  %v194_v1 = vmax.f32 %v190_v57, %v321_v43  ;;  %v195_v2 = vmax.f32 %v191_v58, %v324_v44  ;;  %v196_v3 = vmax.f32 %v192_v59, %v325_v45 }
  0x1d   : > { %v197_v4 = vmax.f32 %v193_v0, %v328_v52  ;;  %v198_v5 = vmax.f32 %v194_v1, %v329_v53  ;;  %v199_v6 = vmax.f32 %v195_v2, %v332_v54  ;;  %v200_v7 = vmax.f32 %v196_v3, %v333_v55 }
  0x1f   : > { %v201_v8 = vmax.f32 %v197_v4, %v336_v60  ;;  %v202_v9 = vmax.f32 %v198_v5, %v337_v61  ;;  %v203_v10 = vmax.f32 %v199_v6, %v340_v62  ;;  %v204_v11 = vmax.f32 %v200_v7, %v341_v63 }
  0x21   : > { %v205_v12 = vmax.f32 %v201_v8, %v202_v9  ;;  %v206_v13 = vmax.f32 %v203_v10, %v204_v11 }
  0x23   : > { %v207_v14 = vmax.f32 %v205_v12, %v206_v13 }
  0x25   : > { %v208_v15 = vrot.slane %v207_v14, 4 }
  0x27   : > { %v209_v16 = vmax.f32 %v207_v14, %v208_v15 }
  0x29   : > { %v210_v17 = vrot.slane %v209_v16, 2 }
  0x2b   : > { %v211_v18 = vmax.f32 %v209_v16, %v210_v17 }
  0x2d   : > { %v212_v19 = vrot.slane %v211_v18, 1 }
  0x2f   : > { %v213_v20 = vmax.f32 %v211_v18, %v212_v19 }
  0x31   : > { %v214_v22 = vpack.c.bf16 %v213_v20, %v213_v20 }
  0x33   : > { %v219_v23 = vsel %vm217_vm2, %v214_v22, %v218_v21 }
  0x34   : > { %220 = vst [vmem:[%s112_s14] sm:$0x1] %v219_v23 }
  0x35 PF: > { %s11_s6 = sadd.s32 1, %s371_s6  }
  0x36   : > { %p8_p4 = scmp.ge.s32.totalorder %s11_s6, 4  }
  0x38   :  { %10 = sbr.rel (!%p8_p4) target bundleno = 1 (0x1), region = 54 }

// kernel: resnet_forward.30
= control target key start
LH: loop header
LB: loop body
LE: loop exit
PB: predicated region body
PF: predicated region fallthrough
CT: control target
= control target key end

     0   :  { %8 = vsyncpa [#allocation3], 0  ;;  %s1437_s12 = smov 0   ;;  %s1439_s13 = smov 0   ;;  %s1647_s0 = inlined_call_operand.vmem [shape: bf16[512,256], index: 0, kind: input, shape index: {}]   ;;  %s1648_s1 = inlined_call_operand.vmem [shape: bf16[256,128], index: 1, kind: input, shape index: {}]   ;;  %s1649_s2 = inlined_call_operand.hbm [shape: f32[1,128], index: 2, kind: input, shape index: {}]   ;;  %s1650_s3 = inlined_call_operand.vmem [shape: bf16[512,128], index: 3, kind: output, shape index: {}]  }
   0x1   :  { %s1441_s14 = smov 0  }
   0x2 LB: > { %s955_s15 = sadd.s32 4294967295, %s1414_s14   ;;  %s33_s16 = sadd.s32 1, %s1410_s13  ;;  %s1414_s14 = sphi %s1441_s14, %s14_s14   ;;  %s1410_s13 = sphi %s1439_s13, %s1652_s13   ;;  %s1406_s12 = sphi %s1437_s12, %s1651_s12  }
   0x3   : > { %p35_p0 = scmp.ge.s32.totalorder %s33_s16, 2  ;;  %p957_p1 = scmp.ge.s32.totalorder %s1414_s14, 1 }
   0x4   : > { %p148_p2 = scmp.lt.s32.totalorder %s1414_s14, 3  ;;  %p1330_p4 = scmp.eq.s32.totalorder %s955_s15, 0 }
   0x5   : > { %s1654_s16 = smov (%p35_p0, %s33_s16), 0  ;;  %s173_s19 = sshll.u32 %s1649_s2, 4  ;;  %s174_s19 = int_to_ptr.hbm [resolvable:$true] %s173_s19 }
   0x6   : > { %p149_p3 = pnand %p957_p1, %p148_p2  ;;  %s1416_s20 = smov [#allocation2]  }
   0x7   : > { %s175_s21 = sshll.u32 %s1416_s20, 4  ;;  %s176_s21 = int_to_ptr.vmem [resolvable:$true] %s175_s21 }
   0x8   : > { %p1326_p5 = pneg %p149_p3  ;;  %203 = sbr.rel (%p149_p3) target bundleno = 305 (0x131), region = 32 }
   0xa   : > { %p1327_p6 = pnand %p1330_p4, %p1326_p5 }
   0xc   : > { %1329 = dma.hbm_to_vmem [thread:$0]  (!%p1327_p6), %s174_s19, 16, %s176_s21, [#allocation3]  }
   0xd   : > { %1401 = dma.done.wait (%p1330_p4), [#allocation3], 16  }
   0xe   : > { %1403 = vsyncadd (%p1330_p4), [#allocation3], 4294967280  ;;  %v1202_v0 = vld [vmem:[%s1648_s1 + $0x38] sm:$0xff]  ;;  %v1201_v2 = vld [vmem:[%s1648_s1 + $0x30] sm:$0xff]  ;;  %s963_s7 = sshll.u32 %s1406_s12, 5 }
   0xf   : > { %v1210_v1 = vld [vmem:[%s1648_s1 + $0x78] sm:$0xff]  ;;  %598 = vmatpush.bf16.msra.mxu0 %v1202_v0  ;;  %1306 = vmatpush.bf16.msra.mxu2 %v1202_v0  ;;  %v1209_v3 = vld [vmem:[%s1648_s1 + $0x70] sm:$0xff]  ;;  %v1200_v4 = vld [vmem:[%s1648_s1 + $0x28] sm:$0xff]  ;;  %p246_p7 = scmp.lt.s32.totalorder %s963_s7, 63 }
  0x10   : > { %687 = vmatpush.bf16.msra.mxu1 %v1210_v1  ;;  %1314 = vmatpush.bf16.msra.mxu3 %v1210_v1  ;;  %v1208_v5 = vld [vmem:[%s1648_s1 + $0x68] sm:$0xff]  ;;  %v1199_v6 = vld [vmem:[%s1648_s1 + $0x20] sm:$0xff]  ;;  %v1198_v8 = vld [vmem:[%s1648_s1 + $0x18] sm:$0xff] }
  0x11   : > { %v1207_v7 = vld [vmem:[%s1648_s1 + $0x60] sm:$0xff]  ;;  %v1206_v9 = vld [vmem:[%s1648_s1 + $0x58] sm:$0xff]  ;;  %s1656_s7 = smov (!%p246_p7, %s963_s7), 63  ;;  %v1197_v10 = vld [vmem:[%s1648_s1 + $0x10] sm:$0xff] }
  0x12   : > { %v1205_v11 = vld [vmem:[%s1648_s1 + $0x50] sm:$0xff]  ;;  %s1162_s23 = sshll.u32 %s1656_s7, 3  ;;  %v1196_v12 = vld [vmem:[%s1648_s1 + $0x8] sm:$0xff]  ;;  %v1195_v14 = vld [vmem:[%s1648_s1] sm:$0xff]  ;;  %s967_s9 = sshll.u32 %s1656_s7, 2 }
  0x13   : > { %599 = vmatpush.bf16.msra.mxu0 %v1201_v2  ;;  %1307 = vmatpush.bf16.msra.mxu2 %v1201_v2  ;;  %s1507_s28 = scalar_lea.vmem %s1647_s0, %s1162_s23  ;;  %v1204_v13 = vld [vmem:[%s1648_s1 + $0x48] sm:$0xff]  ;;  %v1203_v15 = vld [vmem:[%s1648_s1 + $0x40] sm:$0xff]  ;;  %s1590_s15 = scalar_lea.vmem %s1650_s3, %s967_s9 }
  0x14   : > { %688 = vmatpush.bf16.msra.mxu1 %v1209_v3  ;;  %1315 = vmatpush.bf16.msra.mxu3 %v1209_v3  ;;  %v970_v16 = vld [vmem:[%s1507_s28] sm:$0xf]  ;;  %v1164_v17 = vld [vmem:[%s1507_s28 + $0x4] sm:$0xf0]  ;;  %v1163_v20 = vld [vmem:[%s1507_s28 + $0x4] sm:$0xf] }
  0x15   : > { %v1034_v18 = vld [vmem:[%s1507_s28 + $0x80] sm:$0xf]  ;;  %v1180_v19 = vld [vmem:[%s1507_s28 + $0x84] sm:$0xf0]  ;;  %v972_v21 = vld [vmem:[%s1507_s28 + $0x8] sm:$0xf0]  ;;  %v971_v24 = vor.u32 %v1164_v17, %v970_v16 }
  0x16   : > { %v1179_v22 = vld [vmem:[%s1507_s28 + $0x84] sm:$0xf]  ;;  %v1036_v23 = vld [vmem:[%s1507_s28 + $0x88] sm:$0xf0]  ;;  %v1035_v25 = vor.u32 %v1180_v19, %v1034_v18  ;;  %v975_v26 = vor.u32 %v1163_v20, %v972_v21  ;;  %v978_v28 = vld [vmem:[%s1507_s28 + $0x10] sm:$0xf] }
  0x17   : > { %600 = vmatpush.bf16.msra.mxu0 %v1200_v4  ;;  %1308 = vmatpush.bf16.msra.mxu2 %v1200_v4  ;;  %v1039_v27 = vor.u32 %v1179_v22, %v1036_v23  ;;  %v1166_v29 = vld [vmem:[%s1507_s28 + $0x14] sm:$0xf0]  ;;  %v1042_v30 = vld [vmem:[%s1507_s28 + $0x90] sm:$0xf]  ;;  %v1165_v32 = vld [vmem:[%s1507_s28 + $0x14] sm:$0xf] }
  0x18   : > { %689 = vmatpush.bf16.msra.mxu1 %v1208_v5  ;;  %1316 = vmatpush.bf16.msra.mxu3 %v1208_v5  ;;  %v1182_v31 = vld [vmem:[%s1507_s28 + $0x94] sm:$0xf0]  ;;  %v980_v33 = vld [vmem:[%s1507_s28 + $0x18] sm:$0xf0]  ;;  %v1181_v34 = vld [vmem:[%s1507_s28 + $0x94] sm:$0xf]  ;;  %v979_v36 = vor.u32 %v1166_v29, %v978_v28 }
  0x19   : > { %v1044_v35 = vld [vmem:[%s1507_s28 + $0x98] sm:$0xf0]  ;;  %v1043_v37 = vor.u32 %v1182_v31, %v1042_v30  ;;  %v983_v38 = vor.u32 %v1165_v32, %v980_v33  ;;  %v986_v40 = vld [vmem:[%s1507_s28 + $0x20] sm:$0xf]  ;;  %v1168_v41 = vld [vmem:[%s1507_s28 + $0x24] sm:$0xf0] }
  0x1a   : > { %v1047_v39 = vor.u32 %v1181_v34, %v1044_v35  ;;  %v1050_v42 = vld [vmem:[%s1507_s28 + $0xa0] sm:$0xf]  ;;  %v1184_v43 = vld [vmem:[%s1507_s28 + $0xa4] sm:$0xf0]  ;;  %v1167_v44 = vld [vmem:[%s1507_s28 + $0x24] sm:$0xf]  ;;  %v987_v48 = vor.u32 %v1168_v41, %v986_v40 }
  0x1b   : > { %601 = vmatpush.bf16.msra.mxu0 %v1199_v6  ;;  %1309 = vmatpush.bf16.msra.mxu2 %v1199_v6  ;;  %v988_v45 = vld [vmem:[%s1507_s28 + $0x28] sm:$0xf0]  ;;  %v1183_v46 = vld [vmem:[%s1507_s28 + $0xa4] sm:$0xf]  ;;  %v1051_v49 = vor.u32 %v1184_v43, %v1050_v42  ;;  %v994_v52 = vld [vmem:[%s1507_s28 + $0x30] sm:$0xf] }
  0x1c   : > { %690 = vmatpush.bf16.msra.mxu1 %v1207_v7  ;;  %1317 = vmatpush.bf16.msra.mxu3 %v1207_v7  ;;  %v1052_v47 = vld [vmem:[%s1507_s28 + $0xa8] sm:$0xf0]  ;;  %v991_v50 = vor.u32 %v1167_v44, %v988_v45  ;;  %v1170_v53 = vld [vmem:[%s1507_s28 + $0x34] sm:$0xf0]  ;;  %v1058_v54 = vld [vmem:[%s1507_s28 + $0xb0] sm:$0xf] }
  0x1d   : > { %v1055_v51 = vor.u32 %v1183_v46, %v1052_v47  ;;  %v1186_v55 = vld [vmem:[%s1507_s28 + $0xb4] sm:$0xf0]  ;;  %v1169_v56 = vld [vmem:[%s1507_s28 + $0x34] sm:$0xf]  ;;  %v996_v57 = vld [vmem:[%s1507_s28 + $0x38] sm:$0xf0]  ;;  %v995_v60 = vor.u32 %v1170_v53, %v994_v52 }
  0x1e   : > { %v1185_v58 = vld [vmem:[%s1507_s28 + $0xb4] sm:$0xf]  ;;  %v1060_v59 = vld [vmem:[%s1507_s28 + $0xb8] sm:$0xf0]  ;;  %v1059_v61 = vor.u32 %v1186_v55, %v1058_v54  ;;  %v999_v62 = vor.u32 %v1169_v56, %v996_v57  ;;  %v1002_v0 = vld [vmem:[%s1507_s28 + $0x40] sm:$0xf] }
  0x1f   : > { %602 = vmatpush.bf16.msra.mxu0 %v1198_v8  ;;  %1310 = vmatpush.bf16.msra.mxu2 %v1198_v8  ;;  %v1063_v63 = vor.u32 %v1185_v58, %v1060_v59  ;;  %v1172_v1 = vld [vmem:[%s1507_s28 + $0x44] sm:$0xf0]  ;;  %v1066_v2 = vld [vmem:[%s1507_s28 + $0xc0] sm:$0xf]  ;;  %v1171_v4 = vld [vmem:[%s1507_s28 + $0x44] sm:$0xf] }
  0x20   : > { %691 = vmatpush.bf16.msra.mxu1 %v1206_v9  ;;  %1318 = vmatpush.bf16.msra.mxu3 %v1206_v9  ;;  %v1188_v3 = vld [vmem:[%s1507_s28 + $0xc4] sm:$0xf0]  ;;  %v1004_v5 = vld [vmem:[%s1507_s28 + $0x48] sm:$0xf0]  ;;  %v1187_v6 = vld [vmem:[%s1507_s28 + $0xc4] sm:$0xf]  ;;  %v1003_v8 = vor.u32 %v1172_v1, %v1002_v0 }
  0x21   : > { %v1068_v7 = vld [vmem:[%s1507_s28 + $0xc8] sm:$0xf0]  ;;  %v1067_v9 = vor.u32 %v1188_v3, %v1066_v2  ;;  %v1173_v16 = vld [vmem:[%s1507_s28 + $0x54] sm:$0xf]  ;;  %v1012_v17 = vld [vmem:[%s1507_s28 + $0x58] sm:$0xf0] }
  0x22   : > { %v1189_v18 = vld [vmem:[%s1507_s28 + $0xd4] sm:$0xf]  ;;  %v1076_v19 = vld [vmem:[%s1507_s28 + $0xd8] sm:$0xf0]  ;;  %v1015_v22 = vor.u32 %v1173_v16, %v1012_v17  ;;  %v1175_v28 = vld [vmem:[%s1507_s28 + $0x64] sm:$0xf] }
  0x23   : > { %603 = vmatpush.bf16.msra.mxu0 %v1197_v10  ;;  %1311 = vmatpush.bf16.msra.mxu2 %v1197_v10  ;;  %v1007_v10 = vor.u32 %v1171_v4, %v1004_v5  ;;  %v1079_v23 = vor.u32 %v1189_v18, %v1076_v19  ;;  %v1020_v29 = vld [vmem:[%s1507_s28 + $0x68] sm:$0xf0]  ;;  %v1191_v30 = vld [vmem:[%s1507_s28 + $0xe4] sm:$0xf]  ;;  %v1177_v40 = vld [vmem:[%s1507_s28 + $0x74] sm:$0xf] }
  0x24   : > { %692 = vmatpush.bf16.msra.mxu1 %v1205_v11  ;;  %1319 = vmatpush.bf16.msra.mxu3 %v1205_v11  ;;  %v1071_v11 = vor.u32 %v1187_v6, %v1068_v7  ;;  %v1084_v31 = vld [vmem:[%s1507_s28 + $0xe8] sm:$0xf0]  ;;  %v1023_v34 = vor.u32 %v1175_v28, %v1020_v29  ;;  %v1028_v41 = vld [vmem:[%s1507_s28 + $0x78] sm:$0xf0]  ;;  %v1193_v42 = vld [vmem:[%s1507_s28 + $0xf4] sm:$0xf] }
  0x25   : > { %v1087_v35 = vor.u32 %v1191_v30, %v1084_v31  ;;  %v1092_v43 = vld [vmem:[%s1507_s28 + $0xf8] sm:$0xf0]  ;;  %v1031_v46 = vor.u32 %v1177_v40, %v1028_v41 }
  0x26   : > { %v1095_v47 = vor.u32 %v1193_v42, %v1092_v43 }
  0x27   : > { %604 = vmatpush.bf16.msra.mxu0 %v1196_v12  ;;  %1312 = vmatpush.bf16.msra.mxu2 %v1196_v12  ;;  %v1010_v12 = vld [vmem:[%s1507_s28 + $0x50] sm:$0xf] }
  0x28   : > { %693 = vmatpush.bf16.msra.mxu1 %v1204_v13  ;;  %1320 = vmatpush.bf16.msra.mxu3 %v1204_v13  ;;  %v1174_v13 = vld [vmem:[%s1507_s28 + $0x54] sm:$0xf0] }
  0x29   : > { %v1011_v20 = vor.u32 %v1174_v13, %v1010_v12 }
  0x2b   : > { %605 = vmatpush.bf16.msra.mxu0 %v1195_v14  ;;  %1313 = vmatpush.bf16.msra.mxu2 %v1195_v14  ;;  %v1074_v14 = vld [vmem:[%s1507_s28 + $0xd0] sm:$0xf] }
  0x2c   : > { %694 = vmatpush.bf16.msra.mxu1 %v1203_v15  ;;  %1321 = vmatpush.bf16.msra.mxu3 %v1203_v15  ;;  %v1190_v15 = vld [vmem:[%s1507_s28 + $0xd4] sm:$0xf0] }
  0x2d   : > { %v1075_v21 = vor.u32 %v1190_v15, %v1074_v14 }
  0x2e   : > { %606 = vmatmul.bf16.vlgmr.msra.gmra.mxu0 %v971_v24  ;;  %646 = vmatmul.bf16.vlgmr.msra.gmra.mxu2 %v1035_v25  ;;  %v1018_v24 = vld [vmem:[%s1507_s28 + $0x60] sm:$0xf]  ;;  %v1176_v25 = vld [vmem:[%s1507_s28 + $0x64] sm:$0xf0] }
  0x2f   : > { %695 = vmatmul.bf16.vlgmr.msra.gmra.mxu1 %v975_v26  ;;  %735 = vmatmul.bf16.vlgmr.msra.gmra.mxu3 %v1039_v27  ;;  %v1082_v26 = vld [vmem:[%s1507_s28 + $0xe0] sm:$0xf]  ;;  %v1192_v27 = vld [vmem:[%s1507_s28 + $0xe4] sm:$0xf0]  ;;  %v1019_v32 = vor.u32 %v1176_v25, %v1018_v24 }
  0x30   : > { %v1083_v33 = vor.u32 %v1192_v27, %v1082_v26 }
  0x3e   : > { %611 = vmatmul.bf16.gmra.mxu0 %v979_v36  ;;  %651 = vmatmul.bf16.gmra.mxu2 %v1043_v37  ;;  %v1026_v36 = vld [vmem:[%s1507_s28 + $0x70] sm:$0xf]  ;;  %v1178_v37 = vld [vmem:[%s1507_s28 + $0x74] sm:$0xf0] }
  0x3f   : > { %700 = vmatmul.bf16.gmra.mxu1 %v983_v38  ;;  %740 = vmatmul.bf16.gmra.mxu3 %v1047_v39  ;;  %v1090_v38 = vld [vmem:[%s1507_s28 + $0xf0] sm:$0xf]  ;;  %v1194_v39 = vld [vmem:[%s1507_s28 + $0xf4] sm:$0xf0]  ;;  %v1027_v44 = vor.u32 %v1178_v37, %v1026_v36 }
  0x40   : > { %v1091_v45 = vor.u32 %v1194_v39, %v1090_v38 }
  0x4e   : > { %616 = vmatmul.bf16.gmra.mxu0 %v987_v48  ;;  %656 = vmatmul.bf16.gmra.mxu2 %v1051_v49 }
  0x4f   : > { %705 = vmatmul.bf16.gmra.mxu1 %v991_v50  ;;  %745 = vmatmul.bf16.gmra.mxu3 %v1055_v51  ;;  %v1582_v50 = vld [vmem:[#allocation2] ss:$0 sm:$0xff] }
  0x5e   : > { %621 = vmatmul.bf16.gmra.mxu0 %v995_v60  ;;  %661 = vmatmul.bf16.gmra.mxu2 %v1059_v61 }
  0x5f   : > { %710 = vmatmul.bf16.gmra.mxu1 %v999_v62  ;;  %750 = vmatmul.bf16.gmra.mxu3 %v1063_v63 }
  0x6e   : > { %626 = vmatmul.bf16.gmra.mxu0 %v1003_v8  ;;  %666 = vmatmul.bf16.gmra.mxu2 %v1067_v9 }
  0x6f   : > { %715 = vmatmul.bf16.gmra.mxu1 %v1007_v10  ;;  %755 = vmatmul.bf16.gmra.mxu3 %v1071_v11 }
  0x7e   : > { %631 = vmatmul.bf16.gmra.mxu0 %v1011_v20  ;;  %671 = vmatmul.bf16.gmra.mxu2 %v1075_v21 }
  0x7f   : > { %720 = vmatmul.bf16.gmra.mxu1 %v1015_v22  ;;  %760 = vmatmul.bf16.gmra.mxu3 %v1079_v23 }
  0x8e   : > { %636 = vmatmul.bf16.gmra.mxu0 %v1019_v32  ;;  %676 = vmatmul.bf16.gmra.mxu2 %v1083_v33 }
  0x8f   : > { %725 = vmatmul.bf16.gmra.mxu1 %v1023_v34  ;;  %765 = vmatmul.bf16.gmra.mxu3 %v1087_v35 }
  0x9e   : > { %641 = vmatmul.bf16.gmra.mxu0 %v1027_v44  ;;  %681 = vmatmul.bf16.gmra.mxu2 %v1091_v45 }
  0x9f   : > { %730 = vmatmul.bf16.gmra.mxu1 %v1031_v46  ;;  %770 = vmatmul.bf16.gmra.mxu3 %v1095_v47 }
  0xab   : > { %v607_v48 = vpop.f32.mrf.mxu0 }
  0xac   : > { %v696_v49 = vpop.f32.mrf.mxu1  ;;  %v608_v52 = vadd.f32 %v1582_v50, %v607_v48 }
  0xae   : > { %v697_v57 = vadd.f32 %v696_v49, %v608_v52 }
  0xb1   : > { %v647_v51 = vpop.f32.mrf.mxu2 }
  0xb2   : > { %v736_v53 = vpop.f32.mrf.mxu3  ;;  %v648_v59 = vadd.f32 %v1582_v50, %v647_v51 }
  0xb3   : > { %v609_v54 = vpop.f32.mrf.mxu0 }
  0xb4   : > { %v610_v55 = vadd.f32 %v1582_v50, %v609_v54  ;;  %v698_v56 = vpop.f32.mrf.mxu1  ;;  %v737_v1 = vadd.f32 %v736_v53, %v648_v59 }
  0xb6   : > { %v699_v58 = vadd.f32 %v698_v56, %v610_v55 }
  0xb8   : > { %v1214_v60 = vpack.c.bf16 %v699_v58, %v697_v57 }
  0xb9   : > { %v649_v61 = vpop.f32.mrf.mxu2 }
  0xba   : > { %1215 = vst [vmem:[%s1590_s15] sm:$0xff] %v1214_v60   ;;  %v650_v62 = vadd.f32 %v1582_v50, %v649_v61  ;;  %v738_v63 = vpop.f32.mrf.mxu3 }
  0xbb   : > { %v612_v0 = vpop.f32.mrf.mxu0 }
  0xbc   : > { %v739_v2 = vadd.f32 %v738_v63, %v650_v62  ;;  %v701_v3 = vpop.f32.mrf.mxu1  ;;  %v613_v6 = vadd.f32 %v1582_v50, %v612_v0 }
  0xbe   : > { %v1254_v4 = vpack.c.bf16 %v739_v2, %v737_v1  ;;  %v702_v11 = vadd.f32 %v701_v3, %v613_v6 }
  0xc0   : > { %1298 = vst [vmem:[%s1590_s15 + $0x40] sm:$0xff] %v1254_v4  }
  0xc1   : > { %v652_v5 = vpop.f32.mrf.mxu2 }
  0xc2   : > { %v741_v7 = vpop.f32.mrf.mxu3  ;;  %v653_v13 = vadd.f32 %v1582_v50, %v652_v5 }
  0xc3   : > { %v614_v8 = vpop.f32.mrf.mxu0 }
  0xc4   : > { %v615_v9 = vadd.f32 %v1582_v50, %v614_v8  ;;  %v703_v10 = vpop.f32.mrf.mxu1  ;;  %v742_v19 = vadd.f32 %v741_v7, %v653_v13 }
  0xc6   : > { %v704_v12 = vadd.f32 %v703_v10, %v615_v9 }
  0xc8   : > { %v1219_v14 = vpack.c.bf16 %v704_v12, %v702_v11 }
  0xc9   : > { %v654_v15 = vpop.f32.mrf.mxu2 }
  0xca   : > { %1291 = vst [vmem:[%s1590_s15 + $0x8] sm:$0xff] %v1219_v14   ;;  %v655_v16 = vadd.f32 %v1582_v50, %v654_v15  ;;  %v743_v17 = vpop.f32.mrf.mxu3 }
  0xcb   : > { %v617_v18 = vpop.f32.mrf.mxu0 }
  0xcc   : > { %v744_v20 = vadd.f32 %v743_v17, %v655_v16  ;;  %v706_v21 = vpop.f32.mrf.mxu1  ;;  %v618_v24 = vadd.f32 %v1582_v50, %v617_v18 }
  0xce   : > { %v1259_v22 = vpack.c.bf16 %v744_v20, %v742_v19  ;;  %v707_v29 = vadd.f32 %v706_v21, %v618_v24 }
  0xd0   : > { %1299 = vst [vmem:[%s1590_s15 + $0x48] sm:$0xff] %v1259_v22  }
  0xd1   : > { %v657_v23 = vpop.f32.mrf.mxu2 }
  0xd2   : > { %v746_v25 = vpop.f32.mrf.mxu3  ;;  %v658_v31 = vadd.f32 %v1582_v50, %v657_v23 }
  0xd3   : > { %v619_v26 = vpop.f32.mrf.mxu0 }
  0xd4   : > { %v620_v27 = vadd.f32 %v1582_v50, %v619_v26  ;;  %v708_v28 = vpop.f32.mrf.mxu1  ;;  %v747_v37 = vadd.f32 %v746_v25, %v658_v31 }
  0xd6   : > { %v709_v30 = vadd.f32 %v708_v28, %v620_v27 }
  0xd8   : > { %v1224_v32 = vpack.c.bf16 %v709_v30, %v707_v29 }
  0xd9   : > { %v659_v33 = vpop.f32.mrf.mxu2 }
  0xda   : > { %1292 = vst [vmem:[%s1590_s15 + $0x10] sm:$0xff] %v1224_v32   ;;  %v660_v34 = vadd.f32 %v1582_v50, %v659_v33  ;;  %v748_v35 = vpop.f32.mrf.mxu3 }
  0xdb   : > { %v622_v36 = vpop.f32.mrf.mxu0 }
  0xdc   : > { %v749_v38 = vadd.f32 %v748_v35, %v660_v34  ;;  %v711_v39 = vpop.f32.mrf.mxu1  ;;  %v623_v42 = vadd.f32 %v1582_v50, %v622_v36 }
  0xde   : > { %v1264_v40 = vpack.c.bf16 %v749_v38, %v747_v37  ;;  %v712_v47 = vadd.f32 %v711_v39, %v623_v42 }
  0xe0   : > { %1300 = vst [vmem:[%s1590_s15 + $0x50] sm:$0xff] %v1264_v40  }
  0xe1   : > { %v662_v41 = vpop.f32.mrf.mxu2 }
  0xe2   : > { %v751_v43 = vpop.f32.mrf.mxu3  ;;  %v663_v49 = vadd.f32 %v1582_v50, %v662_v41 }
  0xe3   : > { %v624_v44 = vpop.f32.mrf.mxu0 }
  0xe4   : > { %v625_v45 = vadd.f32 %v1582_v50, %v624_v44  ;;  %v713_v46 = vpop.f32.mrf.mxu1  ;;  %v752_v56 = vadd.f32 %v751_v43, %v663_v49 }
  0xe6   : > { %v714_v48 = vadd.f32 %v713_v46, %v625_v45 }
  0xe8   : > { %v1229_v51 = vpack.c.bf16 %v714_v48, %v712_v47 }
  0xe9   : > { %v664_v52 = vpop.f32.mrf.mxu2 }
  0xea   : > { %1293 = vst [vmem:[%s1590_s15 + $0x18] sm:$0xff] %v1229_v51   ;;  %v665_v53 = vadd.f32 %v1582_v50, %v664_v52  ;;  %v753_v54 = vpop.f32.mrf.mxu3 }
  0xeb   : > { %v627_v55 = vpop.f32.mrf.mxu0 }
  0xec   : > { %v754_v57 = vadd.f32 %v753_v54, %v665_v53  ;;  %v716_v58 = vpop.f32.mrf.mxu1  ;;  %v628_v61 = vadd.f32 %v1582_v50, %v627_v55 }
  0xee   : > { %v1269_v59 = vpack.c.bf16 %v754_v57, %v752_v56  ;;  %v717_v2 = vadd.f32 %v716_v58, %v628_v61 }
  0xf0   : > { %1301 = vst [vmem:[%s1590_s15 + $0x58] sm:$0xff] %v1269_v59  }
  0xf1   : > { %v667_v60 = vpop.f32.mrf.mxu2 }
  0xf2   : > { %v756_v62 = vpop.f32.mrf.mxu3  ;;  %v668_v4 = vadd.f32 %v1582_v50, %v667_v60 }
  0xf3   : > { %v629_v63 = vpop.f32.mrf.mxu0 }
  0xf4   : > { %v630_v0 = vadd.f32 %v1582_v50, %v629_v63  ;;  %v718_v1 = vpop.f32.mrf.mxu1  ;;  %v757_v10 = vadd.f32 %v756_v62, %v668_v4 }
  0xf6   : > { %v719_v3 = vadd.f32 %v718_v1, %v630_v0 }
  0xf8   : > { %v1234_v5 = vpack.c.bf16 %v719_v3, %v717_v2 }
  0xf9   : > { %v669_v6 = vpop.f32.mrf.mxu2 }
  0xfa   : > { %1294 = vst [vmem:[%s1590_s15 + $0x20] sm:$0xff] %v1234_v5   ;;  %v670_v7 = vadd.f32 %v1582_v50, %v669_v6  ;;  %v758_v8 = vpop.f32.mrf.mxu3 }
  0xfb   : > { %v632_v9 = vpop.f32.mrf.mxu0 }
  0xfc   : > { %v759_v11 = vadd.f32 %v758_v8, %v670_v7  ;;  %v721_v12 = vpop.f32.mrf.mxu1  ;;  %v633_v15 = vadd.f32 %v1582_v50, %v632_v9 }
  0xfe   : > { %v1274_v13 = vpack.c.bf16 %v759_v11, %v757_v10  ;;  %v722_v20 = vadd.f32 %v721_v12, %v633_v15 }
 0x100   : > { %1302 = vst [vmem:[%s1590_s15 + $0x60] sm:$0xff] %v1274_v13  }
 0x101   : > { %v672_v14 = vpop.f32.mrf.mxu2 }
 0x102   : > { %v761_v16 = vpop.f32.mrf.mxu3  ;;  %v673_v22 = vadd.f32 %v1582_v50, %v672_v14 }
 0x103   : > { %v634_v17 = vpop.f32.mrf.mxu0 }
 0x104   : > { %v635_v18 = vadd.f32 %v1582_v50, %v634_v17  ;;  %v723_v19 = vpop.f32.mrf.mxu1  ;;  %v762_v28 = vadd.f32 %v761_v16, %v673_v22 }
 0x106   : > { %v724_v21 = vadd.f32 %v723_v19, %v635_v18 }
 0x108   : > { %v1239_v23 = vpack.c.bf16 %v724_v21, %v722_v20 }
 0x109   : > { %v674_v24 = vpop.f32.mrf.mxu2 }
 0x10a   : > { %1295 = vst [vmem:[%s1590_s15 + $0x28] sm:$0xff] %v1239_v23   ;;  %v675_v25 = vadd.f32 %v1582_v50, %v674_v24  ;;  %v763_v26 = vpop.f32.mrf.mxu3 }
 0x10b   : > { %v637_v27 = vpop.f32.mrf.mxu0 }
 0x10c   : > { %v764_v29 = vadd.f32 %v763_v26, %v675_v25  ;;  %v726_v30 = vpop.f32.mrf.mxu1  ;;  %v638_v33 = vadd.f32 %v1582_v50, %v637_v27 }
 0x10e   : > { %v1279_v31 = vpack.c.bf16 %v764_v29, %v762_v28  ;;  %v727_v38 = vadd.f32 %v726_v30, %v638_v33 }
 0x110   : > { %1303 = vst [vmem:[%s1590_s15 + $0x68] sm:$0xff] %v1279_v31  }
 0x111   : > { %v677_v32 = vpop.f32.mrf.mxu2 }
 0x112   : > { %v766_v34 = vpop.f32.mrf.mxu3  ;;  %v678_v40 = vadd.f32 %v1582_v50, %v677_v32 }
 0x113   : > { %v639_v35 = vpop.f32.mrf.mxu0 }
 0x114   : > { %v640_v36 = vadd.f32 %v1582_v50, %v639_v35  ;;  %v728_v37 = vpop.f32.mrf.mxu1  ;;  %v767_v46 = vadd.f32 %v766_v34, %v678_v40 }
 0x116   : > { %v729_v39 = vadd.f32 %v728_v37, %v640_v36 }
 0x118   : > { %v1244_v41 = vpack.c.bf16 %v729_v39, %v727_v38 }
 0x119   : > { %v679_v42 = vpop.f32.mrf.mxu2 }
 0x11a   : > { %1296 = vst [vmem:[%s1590_s15 + $0x30] sm:$0xff] %v1244_v41   ;;  %v680_v43 = vadd.f32 %v1582_v50, %v679_v42  ;;  %v768_v44 = vpop.f32.mrf.mxu3 }
 0x11b   : > { %v642_v45 = vpop.f32.mrf.mxu0 }
 0x11c   : > { %v769_v47 = vadd.f32 %v768_v44, %v680_v43  ;;  %v731_v48 = vpop.f32.mrf.mxu1  ;;  %v643_v52 = vadd.f32 %v1582_v50, %v642_v45 }
 0x11e   : > { %v1284_v49 = vpack.c.bf16 %v769_v47, %v767_v46  ;;  %v732_v57 = vadd.f32 %v731_v48, %v643_v52 }
 0x120   : > { %1304 = vst [vmem:[%s1590_s15 + $0x70] sm:$0xff] %v1284_v49  }
 0x121   : > { %v682_v51 = vpop.f32.mrf.mxu2 }
 0x122   : > { %v771_v53 = vpop.f32.mrf.mxu3  ;;  %v683_v59 = vadd.f32 %v1582_v50, %v682_v51 }
 0x123   : > { %v644_v54 = vpop.f32.mrf.mxu0 }
 0x124   : > { %v645_v55 = vadd.f32 %v1582_v50, %v644_v54  ;;  %v733_v56 = vpop.f32.mrf.mxu1  ;;  %v772_v0 = vadd.f32 %v771_v53, %v683_v59 }
 0x126   : > { %v734_v58 = vadd.f32 %v733_v56, %v645_v55 }
 0x128   : > { %v1249_v60 = vpack.c.bf16 %v734_v58, %v732_v57 }
 0x129   : > { %v684_v61 = vpop.f32.mrf.mxu2 }
 0x12a   : > { %1297 = vst [vmem:[%s1590_s15 + $0x38] sm:$0xff] %v1249_v60   ;;  %v685_v62 = vadd.f32 %v1582_v50, %v684_v61  ;;  %v773_v63 = vpop.f32.mrf.mxu3 }
 0x12c   : > { %v774_v1 = vadd.f32 %v773_v63, %v685_v62 }
 0x12e   : > { %v1289_v2 = vpack.c.bf16 %v774_v1, %v772_v0 }
 0x130   : > { %1305 = vst [vmem:[%s1590_s15 + $0x78] sm:$0xff] %v1289_v2  }
 0x131 PF: > { %s14_s14 = sadd.s32 1, %s1414_s14   ;;  %s1651_s12 = smov %s1410_s13 }
 0x132   : > { %p11_p8 = scmp.ge.s32.totalorder %s14_s14, 4   ;;  %s1652_s13 = smov %s1654_s16 }
 0x134   :  { %13 = sbr.rel (!%p11_p8) target bundleno = 2 (0x2), region = 71 }
 0x139   :  { %868 = vsyncpa [#allocation3], 1 }
 0x13a   :  { %870 = vsyncpa [#allocation3 + $0x1], 1 }

// kernel: resnet_forward.32
= control target key start
LH: loop header
LB: loop body
LE: loop exit
PB: predicated region body
PF: predicated region fallthrough
CT: control target
= control target key end

     0   :  { %8 = vsyncpa [#allocation3], 0  ;;  %s207_s15 = smov [#allocation2]   ;;  %s261_s0 = inlined_call_operand.vmem [shape: bf16[16,128], index: 0, kind: input, shape index: {}]   ;;  %s262_s1 = inlined_call_operand.vmem [shape: bf16[128,128], index: 1, kind: input, shape index: {}]   ;;  %s263_s2 = inlined_call_operand.hbm [shape: f32[1,128], index: 2, kind: input, shape index: {}]   ;;  %s264_s3 = inlined_call_operand.vmem [shape: bf16[16,128], index: 3, kind: output, shape index: {}]  }
   0x1   :  { %s18_s14 = sshll.u32 %s263_s2, 4  ;;  %s20_s16 = sshll.u32 %s207_s15, 4  ;;  %s19_s14 = int_to_ptr.hbm [resolvable:$true] %s18_s14  ;;  %s21_s16 = int_to_ptr.vmem [resolvable:$true] %s20_s16 }
   0x2   :  { %23 = dma.hbm_to_vmem [thread:$0]  %s19_s14, 16, %s21_s16, [#allocation3]  }
   0x3   :  { %205 = dma.done.wait [#allocation3], 16  }
   0x4   :  { %206 = vsyncadd [#allocation3], 4294967280  ;;  %v173_v0 = vld [vmem:[%s262_s1 + $0x38] sm:$0xff]  ;;  %v172_v1 = vld [vmem:[%s262_s1 + $0x30] sm:$0xff] }
   0x5   :  { %104 = vmatpush.bf16.msra.mxu0 %v173_v0  ;;  %v171_v2 = vld [vmem:[%s262_s1 + $0x28] sm:$0xff]  ;;  %v170_v3 = vld [vmem:[%s262_s1 + $0x20] sm:$0xff]  ;;  %v169_v4 = vld [vmem:[%s262_s1 + $0x18] sm:$0xff] }
   0x6   :  { %v168_v5 = vld [vmem:[%s262_s1 + $0x10] sm:$0xff]  ;;  %v167_v6 = vld [vmem:[%s262_s1 + $0x8] sm:$0xff]  ;;  %v166_v7 = vld [vmem:[%s262_s1] sm:$0xff] }
   0x7   :  { %v165_v8 = vld [vmem:[%s261_s0] sm:$0xff] }
   0x8   :  { %v180_v10 = vld [vmem:[#allocation2] ss:$0 sm:$0xff] }
   0x9   :  { %105 = vmatpush.bf16.msra.mxu0 %v172_v1 }
   0xd   :  { %106 = vmatpush.bf16.msra.mxu0 %v171_v2 }
  0x11   :  { %107 = vmatpush.bf16.msra.mxu0 %v170_v3 }
  0x15   :  { %108 = vmatpush.bf16.msra.mxu0 %v169_v4 }
  0x19   :  { %109 = vmatpush.bf16.msra.mxu0 %v168_v5 }
  0x1d   :  { %110 = vmatpush.bf16.msra.mxu0 %v167_v6 }
  0x21   :  { %111 = vmatpush.bf16.msra.mxu0 %v166_v7 }
  0x24   :  { %112 = vmatmul.bf16.vlgmr.msra.gmra.mxu0 %v165_v8 }
  0xa1   :  { %v113_v9 = vpop.f32.mrf.mxu0 }
  0xa2   :  { %v114_v11 = vadd.f32 %v180_v10, %v113_v9 }
  0xa4   :  { %v118_v14 = vmax.f32 %v114_v11, 0.0 }
  0xa9   :  { %v115_v12 = vpop.f32.mrf.mxu0 }
  0xaa   :  { %v116_v13 = vadd.f32 %v180_v10, %v115_v12 }
  0xac   :  { %v119_v15 = vmax.f32 %v116_v13, 0.0 }
  0xae   :  { %v177_v16 = vpack.c.bf16 %v119_v15, %v118_v14 }
  0xb0   :  { %178 = vst [vmem:[%s264_s3] sm:$0xff] %v177_v16  }
  0xb1   :  { %128 = vsyncpa [#allocation3], 1 }

// kernel: resnet_forward.39
= control target key start
LH: loop header
LB: loop body
LE: loop exit
PB: predicated region body
PF: predicated region fallthrough
CT: control target
= control target key end

     0   :  { %8 = vsyncpa [#allocation3], 0  ;;  %s205_s15 = smov [#allocation2]   ;;  %s259_s0 = inlined_call_operand.vmem [shape: bf16[16,128], index: 0, kind: input, shape index: {}]   ;;  %s260_s1 = inlined_call_operand.vmem [shape: bf16[128,128], index: 1, kind: input, shape index: {}]   ;;  %s261_s2 = inlined_call_operand.hbm [shape: f32[1,128], index: 2, kind: input, shape index: {}]   ;;  %s262_s3 = inlined_call_operand.vmem [shape: bf16[16,128], index: 3, kind: output, shape index: {}]  }
   0x1   :  { %s18_s14 = sshll.u32 %s261_s2, 4  ;;  %s20_s16 = sshll.u32 %s205_s15, 4  ;;  %s19_s14 = int_to_ptr.hbm [resolvable:$true] %s18_s14  ;;  %s21_s16 = int_to_ptr.vmem [resolvable:$true] %s20_s16 }
   0x2   :  { %23 = dma.hbm_to_vmem [thread:$0]  %s19_s14, 16, %s21_s16, [#allocation3]  }
   0x3   :  { %203 = dma.done.wait [#allocation3], 16  }
   0x4   :  { %204 = vsyncadd [#allocation3], 4294967280  ;;  %v171_v0 = vld [vmem:[%s260_s1 + $0x38] sm:$0xff]  ;;  %v170_v1 = vld [vmem:[%s260_s1 + $0x30] sm:$0xff] }
   0x5   :  { %104 = vmatpush.bf16.msra.mxu0 %v171_v0  ;;  %v169_v2 = vld [vmem:[%s260_s1 + $0x28] sm:$0xff]  ;;  %v168_v3 = vld [vmem:[%s260_s1 + $0x20] sm:$0xff]  ;;  %v167_v4 = vld [vmem:[%s260_s1 + $0x18] sm:$0xff] }
   0x6   :  { %v166_v5 = vld [vmem:[%s260_s1 + $0x10] sm:$0xff]  ;;  %v165_v6 = vld [vmem:[%s260_s1 + $0x8] sm:$0xff]  ;;  %v164_v7 = vld [vmem:[%s260_s1] sm:$0xff] }
   0x7   :  { %v163_v8 = vld [vmem:[%s259_s0] sm:$0xff] }
   0x8   :  { %v178_v10 = vld [vmem:[#allocation2] ss:$0 sm:$0xff] }
   0x9   :  { %105 = vmatpush.bf16.msra.mxu0 %v170_v1 }
   0xd   :  { %106 = vmatpush.bf16.msra.mxu0 %v169_v2 }
  0x11   :  { %107 = vmatpush.bf16.msra.mxu0 %v168_v3 }
  0x15   :  { %108 = vmatpush.bf16.msra.mxu0 %v167_v4 }
  0x19   :  { %109 = vmatpush.bf16.msra.mxu0 %v166_v5 }
  0x1d   :  { %110 = vmatpush.bf16.msra.mxu0 %v165_v6 }
  0x21   :  { %111 = vmatpush.bf16.msra.mxu0 %v164_v7 }
  0x24   :  { %112 = vmatmul.bf16.vlgmr.msra.gmra.mxu0 %v163_v8 }
  0xa1   :  { %v113_v9 = vpop.f32.mrf.mxu0 }
  0xa2   :  { %v114_v12 = vadd.f32 %v178_v10, %v113_v9 }
  0xa9   :  { %v115_v11 = vpop.f32.mrf.mxu0 }
  0xaa   :  { %v116_v13 = vadd.f32 %v178_v10, %v115_v11 }
  0xac   :  { %v175_v14 = vpack.c.bf16 %v116_v13, %v114_v12 }
  0xae   :  { %176 = vst [vmem:[%s262_s3] sm:$0xff] %v175_v14  }
  0xaf   :  { %126 = vsyncpa [#allocation3], 1 }

// kernel: resnet_forward.40
= control target key start
LH: loop header
LB: loop body
LE: loop exit
PB: predicated region body
PF: predicated region fallthrough
CT: control target
= control target key end

     0   :  { %9 = vsyncpa [#allocation3], 0  ;;  %s220_s18 = smov [#allocation2]   ;;  %s282_s0 = inlined_call_operand.vmem [shape: bf16[16,128], index: 0, kind: input, shape index: {}]   ;;  %s283_s1 = inlined_call_operand.vmem [shape: bf16[128,128], index: 1, kind: input, shape index: {}]   ;;  %s284_s2 = inlined_call_operand.hbm [shape: f32[1,128], index: 2, kind: input, shape index: {}]   ;;  %s285_s3 = inlined_call_operand.vmem [shape: bf16[16,128], index: 3, kind: input, shape index: {}]   ;;  %s286_s4 = inlined_call_operand.vmem [shape: bf16[16,128], index: 4, kind: output, shape index: {}]  }
   0x1   :  { %s19_s17 = sshll.u32 %s284_s2, 4  ;;  %s21_s19 = sshll.u32 %s220_s18, 4  ;;  %s20_s17 = int_to_ptr.hbm [resolvable:$true] %s19_s17  ;;  %s22_s19 = int_to_ptr.vmem [resolvable:$true] %s21_s19 }
   0x2   :  { %24 = dma.hbm_to_vmem [thread:$0]  %s20_s17, 16, %s22_s19, [#allocation3]  }
   0x3   :  { %218 = dma.done.wait [#allocation3], 16  }
   0x4   :  { %219 = vsyncadd [#allocation3], 4294967280  ;;  %v182_v0 = vld [vmem:[%s283_s1 + $0x38] sm:$0xff]  ;;  %v181_v1 = vld [vmem:[%s283_s1 + $0x30] sm:$0xff] }
   0x5   :  { %107 = vmatpush.bf16.msra.mxu0 %v182_v0  ;;  %v180_v2 = vld [vmem:[%s283_s1 + $0x28] sm:$0xff]  ;;  %v179_v3 = vld [vmem:[%s283_s1 + $0x20] sm:$0xff]  ;;  %v178_v4 = vld [vmem:[%s283_s1 + $0x18] sm:$0xff] }
   0x6   :  { %v177_v5 = vld [vmem:[%s283_s1 + $0x10] sm:$0xff]  ;;  %v176_v6 = vld [vmem:[%s283_s1 + $0x8] sm:$0xff]  ;;  %v175_v7 = vld [vmem:[%s283_s1] sm:$0xff] }
   0x7   :  { %v174_v8 = vld [vmem:[%s282_s0] sm:$0xff] }
   0x8   :  { %v193_v10 = vld [vmem:[#allocation2] ss:$0 sm:$0xff] }
   0x9   :  { %108 = vmatpush.bf16.msra.mxu0 %v181_v1  ;;  %v184_v11 = vld [vmem:[%s285_s3] sm:$0xff]  }
   0xa   :  { %v185_v13 = vunpack.c.l.bf16 %v184_v11  ;;  %v186_v14 = vunpack.c.h.bf16 %v184_v11 }
   0xd   :  { %109 = vmatpush.bf16.msra.mxu0 %v180_v2 }
  0x11   :  { %110 = vmatpush.bf16.msra.mxu0 %v179_v3 }
  0x15   :  { %111 = vmatpush.bf16.msra.mxu0 %v178_v4 }
  0x19   :  { %112 = vmatpush.bf16.msra.mxu0 %v177_v5 }
  0x1d   :  { %113 = vmatpush.bf16.msra.mxu0 %v176_v6 }
  0x21   :  { %114 = vmatpush.bf16.msra.mxu0 %v175_v7 }
  0x24   :  { %115 = vmatmul.bf16.vlgmr.msra.gmra.mxu0 %v174_v8 }
  0xa1   :  { %v116_v9 = vpop.f32.mrf.mxu0 }
  0xa2   :  { %v117_v12 = vadd.f32 %v193_v10, %v116_v9 }
  0xa4   :  { %v125_v16 = vadd.f32 %v185_v13, %v117_v12 }
  0xa6   :  { %v127_v19 = vmax.f32 %v125_v16, 0.0 }
  0xa9   :  { %v118_v15 = vpop.f32.mrf.mxu0 }
  0xaa   :  { %v119_v17 = vadd.f32 %v193_v10, %v118_v15 }
  0xac   :  { %v126_v18 = vadd.f32 %v186_v14, %v119_v17 }
  0xae   :  { %v128_v20 = vmax.f32 %v126_v18, 0.0 }
  0xb0   :  { %v190_v21 = vpack.c.bf16 %v128_v20, %v127_v19 }
  0xb2   :  { %191 = vst [vmem:[%s286_s4] sm:$0xff] %v190_v21  }
  0xb3   :  { %137 = vsyncpa [#allocation3], 1 }

// kernel: resnet_forward.33
= control target key start
LH: loop header
LB: loop body
LE: loop exit
PB: predicated region body
PF: predicated region fallthrough
CT: control target
= control target key end

     0   :  { %8 = vsyncpa [#allocation3], 0  ;;  %s209_s15 = smov [#allocation2]   ;;  %s263_s0 = inlined_call_operand.vmem [shape: bf16[16,128], index: 0, kind: input, shape index: {}]   ;;  %s264_s1 = inlined_call_operand.vmem [shape: bf16[128,128], index: 1, kind: input, shape index: {}]   ;;  %s265_s2 = inlined_call_operand.hbm [shape: f32[1,128], index: 2, kind: input, shape index: {}]   ;;  %s266_s3 = inlined_call_operand.vmem [shape: bf16[16,128], index: 3, kind: output, shape index: {}]  }
   0x1   :  { %s18_s14 = sshll.u32 %s265_s2, 4  ;;  %s20_s16 = sshll.u32 %s209_s15, 4  ;;  %s19_s14 = int_to_ptr.hbm [resolvable:$true] %s18_s14  ;;  %s21_s16 = int_to_ptr.vmem [resolvable:$true] %s20_s16 }
   0x2   :  { %23 = dma.hbm_to_vmem [thread:$0]  %s19_s14, 16, %s21_s16, [#allocation3]  }
   0x3   :  { %207 = dma.done.wait [#allocation3], 16  }
   0x4   :  { %208 = vsyncadd [#allocation3], 4294967280  ;;  %v175_v0 = vld [vmem:[%s264_s1 + $0x38] sm:$0xff]  ;;  %v174_v1 = vld [vmem:[%s264_s1 + $0x30] sm:$0xff] }
   0x5   :  { %104 = vmatpush.bf16.msra.mxu0 %v175_v0  ;;  %v173_v2 = vld [vmem:[%s264_s1 + $0x28] sm:$0xff]  ;;  %v172_v3 = vld [vmem:[%s264_s1 + $0x20] sm:$0xff]  ;;  %v171_v4 = vld [vmem:[%s264_s1 + $0x18] sm:$0xff] }
   0x6   :  { %v170_v5 = vld [vmem:[%s264_s1 + $0x10] sm:$0xff]  ;;  %v169_v6 = vld [vmem:[%s264_s1 + $0x8] sm:$0xff]  ;;  %v168_v7 = vld [vmem:[%s264_s1] sm:$0xff] }
   0x7   :  { %v167_v8 = vld [vmem:[%s263_s0] sm:$0xff] }
   0x8   :  { %v182_v10 = vld [vmem:[#allocation2] ss:$0 sm:$0xff] }
   0x9   :  { %105 = vmatpush.bf16.msra.mxu0 %v174_v1 }
   0xd   :  { %106 = vmatpush.bf16.msra.mxu0 %v173_v2 }
  0x11   :  { %107 = vmatpush.bf16.msra.mxu0 %v172_v3 }
  0x15   :  { %108 = vmatpush.bf16.msra.mxu0 %v171_v4 }
  0x19   :  { %109 = vmatpush.bf16.msra.mxu0 %v170_v5 }
  0x1d   :  { %110 = vmatpush.bf16.msra.mxu0 %v169_v6 }
  0x21   :  { %111 = vmatpush.bf16.msra.mxu0 %v168_v7 }
  0x24   :  { %112 = vmatmul.bf16.vlgmr.msra.gmra.mxu0 %v167_v8 }
  0xa1   :  { %v113_v9 = vpop.f32.mrf.mxu0 }
  0xa2   :  { %v114_v11 = vadd.f32 %v182_v10, %v113_v9 }
  0xa4   :  { %v118_v13 = vmul.f32 2.0, %v114_v11 }
  0xa6   :  { %v120_v16 = vmax.f32 %v118_v13, 0.0 }
  0xa9   :  { %v115_v12 = vpop.f32.mrf.mxu0 }
  0xaa   :  { %v116_v14 = vadd.f32 %v182_v10, %v115_v12 }
  0xac   :  { %v119_v15 = vmul.f32 2.0, %v116_v14 }
  0xae   :  { %v121_v17 = vmax.f32 %v119_v15, 0.0 }
  0xb0   :  { %v179_v18 = vpack.c.bf16 %v121_v17, %v120_v16 }
  0xb2   :  { %180 = vst [vmem:[%s266_s3] sm:$0xff] %v179_v18  }
  0xb3   :  { %130 = vsyncpa [#allocation3], 1 }

// kernel: resnet_forward.45
= control target key start
LH: loop header
LB: loop body
LE: loop exit
PB: predicated region body
PF: predicated region fallthrough
CT: control target
= control target key end

     0   :  { %s377_s1 = inlined_call_operand.vmem [shape: bf16[128,256], index: 1, kind: input, shape index: {}]   ;;  %s378_s0 = inlined_call_operand.vmem [shape: bf16[16,128], index: 0, kind: input, shape index: {}]   ;;  %s379_s2 = inlined_call_operand.vmem [shape: f32[1,256], index: 2, kind: input, shape index: {}]   ;;  %s380_s3 = inlined_call_operand.vmem [shape: bf16[16,256], index: 3, kind: output, shape index: {}]  }
   0x1   :  { %v226_v0 = vld [vmem:[%s377_s1 + $0x70] sm:$0xf]  ;;  %v248_v1 = vld [vmem:[%s377_s1 + $0x74] sm:$0xf0]  ;;  %v247_v2 = vld [vmem:[%s377_s1 + $0x74] sm:$0xf] }
   0x2   :  { %v227_v3 = vor.u32 %v248_v1, %v226_v0  ;;  %v228_v4 = vld [vmem:[%s377_s1 + $0x78] sm:$0xf0]  ;;  %v218_v5 = vld [vmem:[%s377_s1 + $0x60] sm:$0xf]  ;;  %v246_v6 = vld [vmem:[%s377_s1 + $0x64] sm:$0xf0] }
   0x3   :  { %v231_v7 = vor.u32 %v247_v2, %v228_v4  ;;  %v245_v8 = vld [vmem:[%s377_s1 + $0x64] sm:$0xf]  ;;  %v220_v9 = vld [vmem:[%s377_s1 + $0x68] sm:$0xf0]  ;;  %v219_v10 = vor.u32 %v246_v6, %v218_v5  ;;  %v210_v12 = vld [vmem:[%s377_s1 + $0x50] sm:$0xf] }
   0x4   :  { %124 = vmatpush.bf16.msra.mxu0 %v227_v3  ;;  %v223_v11 = vor.u32 %v245_v8, %v220_v9  ;;  %v244_v13 = vld [vmem:[%s377_s1 + $0x54] sm:$0xf0]  ;;  %v243_v14 = vld [vmem:[%s377_s1 + $0x54] sm:$0xf]  ;;  %v212_v15 = vld [vmem:[%s377_s1 + $0x58] sm:$0xf0] }
   0x5   :  { %138 = vmatpush.bf16.msra.mxu1 %v231_v7  ;;  %v211_v16 = vor.u32 %v244_v13, %v210_v12  ;;  %v215_v17 = vor.u32 %v243_v14, %v212_v15  ;;  %v202_v18 = vld [vmem:[%s377_s1 + $0x40] sm:$0xf]  ;;  %v242_v19 = vld [vmem:[%s377_s1 + $0x44] sm:$0xf0]  ;;  %v241_v20 = vld [vmem:[%s377_s1 + $0x44] sm:$0xf] }
   0x6   :  { %v204_v21 = vld [vmem:[%s377_s1 + $0x48] sm:$0xf0]  ;;  %v203_v22 = vor.u32 %v242_v19, %v202_v18  ;;  %v194_v24 = vld [vmem:[%s377_s1 + $0x30] sm:$0xf]  ;;  %v240_v25 = vld [vmem:[%s377_s1 + $0x34] sm:$0xf0] }
   0x7   :  { %v207_v23 = vor.u32 %v241_v20, %v204_v21  ;;  %v239_v26 = vld [vmem:[%s377_s1 + $0x34] sm:$0xf]  ;;  %v196_v27 = vld [vmem:[%s377_s1 + $0x38] sm:$0xf0]  ;;  %v195_v28 = vor.u32 %v240_v25, %v194_v24  ;;  %v186_v30 = vld [vmem:[%s377_s1 + $0x20] sm:$0xf] }
   0x8   :  { %125 = vmatpush.bf16.msra.mxu0 %v219_v10  ;;  %v199_v29 = vor.u32 %v239_v26, %v196_v27  ;;  %v238_v31 = vld [vmem:[%s377_s1 + $0x24] sm:$0xf0]  ;;  %v237_v32 = vld [vmem:[%s377_s1 + $0x24] sm:$0xf]  ;;  %v188_v33 = vld [vmem:[%s377_s1 + $0x28] sm:$0xf0] }
   0x9   :  { %139 = vmatpush.bf16.msra.mxu1 %v223_v11  ;;  %v187_v34 = vor.u32 %v238_v31, %v186_v30  ;;  %v191_v35 = vor.u32 %v237_v32, %v188_v33  ;;  %v178_v36 = vld [vmem:[%s377_s1 + $0x10] sm:$0xf]  ;;  %v236_v37 = vld [vmem:[%s377_s1 + $0x14] sm:$0xf0]  ;;  %v235_v38 = vld [vmem:[%s377_s1 + $0x14] sm:$0xf] }
   0xa   :  { %v180_v39 = vld [vmem:[%s377_s1 + $0x18] sm:$0xf0]  ;;  %v179_v40 = vor.u32 %v236_v37, %v178_v36  ;;  %v170_v42 = vld [vmem:[%s377_s1] sm:$0xf]  ;;  %v234_v43 = vld [vmem:[%s377_s1 + $0x4] sm:$0xf0] }
   0xb   :  { %v183_v41 = vor.u32 %v235_v38, %v180_v39  ;;  %v233_v44 = vld [vmem:[%s377_s1 + $0x4] sm:$0xf]  ;;  %v172_v45 = vld [vmem:[%s377_s1 + $0x8] sm:$0xf0]  ;;  %v171_v46 = vor.u32 %v234_v43, %v170_v42  ;;  %v32_v49 = vld [vmem:[%s379_s2] sm:$0x3] }
   0xc   :  { %126 = vmatpush.bf16.msra.mxu0 %v211_v16  ;;  %v175_v47 = vor.u32 %v233_v44, %v172_v45  ;;  %v232_v48 = vld [vmem:[%s378_s0] sm:$0xff]  ;;  %v34_v50 = vperm.slane %v32_v49, 0  ;;  %v35_v51 = vperm.slane %v32_v49, 1 }
   0xd   :  { %140 = vmatpush.bf16.msra.mxu1 %v215_v17 }
  0x10   :  { %127 = vmatpush.bf16.msra.mxu0 %v203_v22 }
  0x11   :  { %141 = vmatpush.bf16.msra.mxu1 %v207_v23 }
  0x14   :  { %128 = vmatpush.bf16.msra.mxu0 %v195_v28 }
  0x15   :  { %142 = vmatpush.bf16.msra.mxu1 %v199_v29 }
  0x18   :  { %129 = vmatpush.bf16.msra.mxu0 %v187_v34 }
  0x19   :  { %143 = vmatpush.bf16.msra.mxu1 %v191_v35 }
  0x1c   :  { %130 = vmatpush.bf16.msra.mxu0 %v179_v40 }
  0x1d   :  { %144 = vmatpush.bf16.msra.mxu1 %v183_v41 }
  0x20   :  { %131 = vmatpush.bf16.msra.mxu0 %v171_v46 }
  0x21   :  { %145 = vmatpush.bf16.msra.mxu1 %v175_v47 }
  0x23   :  { %132 = vmatmul.bf16.vlgmr.msra.gmra.mxu0 %v232_v48 }
  0x24   :  { %146 = vmatmul.bf16.vlgmr.msra.gmra.mxu1 %v232_v48 }
  0xa0   :  { %v133_v52 = vpop.f32.mrf.mxu0 }
  0xa1   :  { %v134_v53 = vadd.f32 %v133_v52, %v34_v50  ;;  %v147_v54 = vpop.f32.mrf.mxu1 }
  0xa2   :  { %v148_v55 = vadd.f32 %v147_v54, %v35_v51 }
  0xa3   :  { %v152_v56 = vmax.f32 %v134_v53, 0.0 }
  0xa4   :  { %v153_v57 = vmax.f32 %v148_v55, 0.0 }
  0xa6   :  { %v156_v58 = vpack.c.bf16 %v153_v57, %v152_v56 }
  0xa8   :  { %158 = vst [vmem:[%s380_s3] sm:$0xff] %v156_v58  ;;  %v135_v59 = vpop.f32.mrf.mxu0 }
  0xa9   :  { %v136_v60 = vadd.f32 %v135_v59, %v34_v50  ;;  %v149_v61 = vpop.f32.mrf.mxu1 }
  0xaa   :  { %v150_v62 = vadd.f32 %v149_v61, %v35_v51 }
  0xab   :  { %v154_v63 = vmax.f32 %v136_v60, 0.0 }
  0xac   :  { %v155_v0 = vmax.f32 %v150_v62, 0.0 }
  0xae   :  { %v157_v1 = vpack.c.bf16 %v155_v0, %v154_v63 }
  0xb0   :  { %159 = vst [vmem:[%s380_s3 + $0x8] sm:$0xff] %v157_v1 }

// kernel: resnet_forward.46
= control target key start
LH: loop header
LB: loop body
LE: loop exit
PB: predicated region body
PF: predicated region fallthrough
CT: control target
= control target key end

     0   :  { %8 = vsyncpa [#allocation3], 0  ;;  %s287_s15 = smov [#allocation2]   ;;  %s416_s0 = inlined_call_operand.vmem [shape: bf16[16,128], index: 0, kind: input, shape index: {}]   ;;  %s417_s1 = inlined_call_operand.vmem [shape: bf16[128,256], index: 1, kind: input, shape index: {}]   ;;  %s418_s2 = inlined_call_operand.hbm [shape: f32[1,256], index: 2, kind: input, shape index: {}]   ;;  %s419_s3 = inlined_call_operand.vmem [shape: bf16[16,256], index: 3, kind: output, shape index: {}]  }
   0x1   :  { %s18_s14 = sshll.u32 %s418_s2, 4  ;;  %s20_s16 = sshll.u32 %s287_s15, 4  ;;  %s19_s14 = int_to_ptr.hbm [resolvable:$true] %s18_s14  ;;  %s21_s16 = int_to_ptr.vmem [resolvable:$true] %s20_s16 }
   0x2   :  { %23 = dma.hbm_to_vmem [thread:$0]  %s19_s14, 32, %s21_s16, [#allocation3]  }
   0x3   :  { %285 = dma.done.wait [#allocation3], 32  }
   0x4   :  { %286 = vsyncadd [#allocation3], 4294967264  ;;  %v237_v0 = vld [vmem:[%s417_s1 + $0x70] sm:$0xf]  ;;  %v259_v1 = vld [vmem:[%s417_s1 + $0x74] sm:$0xf0] }
   0x5   :  { %v258_v2 = vld [vmem:[%s417_s1 + $0x74] sm:$0xf]  ;;  %v238_v3 = vor.u32 %v259_v1, %v237_v0  ;;  %v239_v4 = vld [vmem:[%s417_s1 + $0x78] sm:$0xf0]  ;;  %v229_v5 = vld [vmem:[%s417_s1 + $0x60] sm:$0xf] }
   0x6   :  { %v257_v6 = vld [vmem:[%s417_s1 + $0x64] sm:$0xf0]  ;;  %v242_v7 = vor.u32 %v258_v2, %v239_v4  ;;  %v256_v8 = vld [vmem:[%s417_s1 + $0x64] sm:$0xf]  ;;  %v231_v9 = vld [vmem:[%s417_s1 + $0x68] sm:$0xf0] }
   0x7   :  { %138 = vmatpush.bf16.msra.mxu0 %v238_v3  ;;  %v230_v10 = vor.u32 %v257_v6, %v229_v5  ;;  %v234_v11 = vor.u32 %v256_v8, %v231_v9  ;;  %v221_v12 = vld [vmem:[%s417_s1 + $0x50] sm:$0xf]  ;;  %v255_v13 = vld [vmem:[%s417_s1 + $0x54] sm:$0xf0]  ;;  %v254_v14 = vld [vmem:[%s417_s1 + $0x54] sm:$0xf] }
   0x8   :  { %152 = vmatpush.bf16.msra.mxu1 %v242_v7  ;;  %v223_v15 = vld [vmem:[%s417_s1 + $0x58] sm:$0xf0]  ;;  %v222_v16 = vor.u32 %v255_v13, %v221_v12  ;;  %v213_v18 = vld [vmem:[%s417_s1 + $0x40] sm:$0xf]  ;;  %v253_v19 = vld [vmem:[%s417_s1 + $0x44] sm:$0xf0] }
   0x9   :  { %v226_v17 = vor.u32 %v254_v14, %v223_v15  ;;  %v252_v20 = vld [vmem:[%s417_s1 + $0x44] sm:$0xf]  ;;  %v215_v21 = vld [vmem:[%s417_s1 + $0x48] sm:$0xf0]  ;;  %v214_v22 = vor.u32 %v253_v19, %v213_v18  ;;  %v205_v24 = vld [vmem:[%s417_s1 + $0x30] sm:$0xf] }
   0xa   :  { %v218_v23 = vor.u32 %v252_v20, %v215_v21  ;;  %v251_v25 = vld [vmem:[%s417_s1 + $0x34] sm:$0xf0]  ;;  %v250_v26 = vld [vmem:[%s417_s1 + $0x34] sm:$0xf]  ;;  %v207_v27 = vld [vmem:[%s417_s1 + $0x38] sm:$0xf0] }
   0xb   :  { %139 = vmatpush.bf16.msra.mxu0 %v230_v10  ;;  %v206_v28 = vor.u32 %v251_v25, %v205_v24  ;;  %v210_v29 = vor.u32 %v250_v26, %v207_v27  ;;  %v197_v30 = vld [vmem:[%s417_s1 + $0x20] sm:$0xf]  ;;  %v249_v31 = vld [vmem:[%s417_s1 + $0x24] sm:$0xf0]  ;;  %v248_v32 = vld [vmem:[%s417_s1 + $0x24] sm:$0xf] }
   0xc   :  { %153 = vmatpush.bf16.msra.mxu1 %v234_v11  ;;  %v199_v33 = vld [vmem:[%s417_s1 + $0x28] sm:$0xf0]  ;;  %v198_v34 = vor.u32 %v249_v31, %v197_v30  ;;  %v189_v36 = vld [vmem:[%s417_s1 + $0x10] sm:$0xf]  ;;  %v247_v37 = vld [vmem:[%s417_s1 + $0x14] sm:$0xf0] }
   0xd   :  { %v202_v35 = vor.u32 %v248_v32, %v199_v33  ;;  %v246_v38 = vld [vmem:[%s417_s1 + $0x14] sm:$0xf]  ;;  %v191_v39 = vld [vmem:[%s417_s1 + $0x18] sm:$0xf0]  ;;  %v190_v40 = vor.u32 %v247_v37, %v189_v36  ;;  %v181_v42 = vld [vmem:[%s417_s1] sm:$0xf] }
   0xe   :  { %v194_v41 = vor.u32 %v246_v38, %v191_v39  ;;  %v245_v43 = vld [vmem:[%s417_s1 + $0x4] sm:$0xf0]  ;;  %v244_v44 = vld [vmem:[%s417_s1 + $0x4] sm:$0xf]  ;;  %v183_v45 = vld [vmem:[%s417_s1 + $0x8] sm:$0xf0] }
   0xf   :  { %140 = vmatpush.bf16.msra.mxu0 %v222_v16  ;;  %v182_v46 = vor.u32 %v245_v43, %v181_v42  ;;  %v186_v47 = vor.u32 %v244_v44, %v183_v45  ;;  %v243_v48 = vld [vmem:[%s416_s0] sm:$0xff] }
  0x10   :  { %154 = vmatpush.bf16.msra.mxu1 %v226_v17  ;;  %v46_v49 = vld [vmem:[#allocation2] sm:$0x3] }
  0x11   :  { %v48_v50 = vperm.slane %v46_v49, 0  ;;  %v49_v51 = vperm.slane %v46_v49, 1 }
  0x13   :  { %141 = vmatpush.bf16.msra.mxu0 %v214_v22 }
  0x14   :  { %155 = vmatpush.bf16.msra.mxu1 %v218_v23 }
  0x17   :  { %142 = vmatpush.bf16.msra.mxu0 %v206_v28 }
  0x18   :  { %156 = vmatpush.bf16.msra.mxu1 %v210_v29 }
  0x1b   :  { %143 = vmatpush.bf16.msra.mxu0 %v198_v34 }
  0x1c   :  { %157 = vmatpush.bf16.msra.mxu1 %v202_v35 }
  0x1f   :  { %144 = vmatpush.bf16.msra.mxu0 %v190_v40 }
  0x20   :  { %158 = vmatpush.bf16.msra.mxu1 %v194_v41 }
  0x23   :  { %145 = vmatpush.bf16.msra.mxu0 %v182_v46 }
  0x24   :  { %159 = vmatpush.bf16.msra.mxu1 %v186_v47 }
  0x26   :  { %146 = vmatmul.bf16.vlgmr.msra.gmra.mxu0 %v243_v48 }
  0x27   :  { %160 = vmatmul.bf16.vlgmr.msra.gmra.mxu1 %v243_v48 }
  0xa3   :  { %v147_v52 = vpop.f32.mrf.mxu0 }
  0xa4   :  { %v148_v53 = vadd.f32 %v147_v52, %v48_v50  ;;  %v161_v54 = vpop.f32.mrf.mxu1 }
  0xa5   :  { %v162_v55 = vadd.f32 %v161_v54, %v49_v51 }
  0xa7   :  { %v166_v56 = vpack.c.bf16 %v162_v55, %v148_v53 }
  0xa9   :  { %168 = vst [vmem:[%s419_s3] sm:$0xff] %v166_v56 }
  0xab   :  { %v149_v57 = vpop.f32.mrf.mxu0 }
  0xac   :  { %v150_v58 = vadd.f32 %v149_v57, %v48_v50  ;;  %v163_v59 = vpop.f32.mrf.mxu1 }
  0xad   :  { %v164_v60 = vadd.f32 %v163_v59, %v49_v51 }
  0xaf   :  { %v167_v61 = vpack.c.bf16 %v164_v60, %v150_v58 }
  0xb1   :  { %169 = vst [vmem:[%s419_s3 + $0x8] sm:$0xff] %v167_v61 }
  0xb2   :  { %174 = vsyncpa [#allocation3], 1 }

// kernel: resnet_forward.48
= control target key start
LH: loop header
LB: loop body
LE: loop exit
PB: predicated region body
PF: predicated region fallthrough
CT: control target
= control target key end

     0   :  { %8 = vsyncpa [#allocation3], 0  ;;  %s504_s15 = smov [#allocation2]   ;;  %s738_s0 = inlined_call_operand.vmem [shape: bf16[16,256], index: 0, kind: input, shape index: {}]   ;;  %s739_s1 = inlined_call_operand.vmem [shape: bf16[256,256], index: 1, kind: input, shape index: {}]   ;;  %s740_s2 = inlined_call_operand.hbm [shape: f32[1,256], index: 2, kind: input, shape index: {}]   ;;  %s741_s3 = inlined_call_operand.vmem [shape: bf16[16,256], index: 3, kind: output, shape index: {}]  }
   0x1   :  { %s18_s14 = sshll.u32 %s740_s2, 4  ;;  %s20_s16 = sshll.u32 %s504_s15, 4  ;;  %s19_s14 = int_to_ptr.hbm [resolvable:$true] %s18_s14  ;;  %s21_s16 = int_to_ptr.vmem [resolvable:$true] %s20_s16 }
   0x2   :  { %23 = dma.hbm_to_vmem [thread:$0]  %s19_s14, 32, %s21_s16, [#allocation3]  }
   0x3   :  { %502 = dma.done.wait [#allocation3], 32  }
   0x4   :  { %503 = vsyncadd [#allocation3], 4294967264  ;;  %v373_v0 = vld [vmem:[%s739_s1 + $0x70] sm:$0xf]  ;;  %v460_v1 = vld [vmem:[%s739_s1 + $0x74] sm:$0xf0] }
   0x5   :  { %v437_v2 = vld [vmem:[%s739_s1 + $0xf0] sm:$0xf]  ;;  %v374_v3 = vor.u32 %v460_v1, %v373_v0  ;;  %v476_v4 = vld [vmem:[%s739_s1 + $0xf4] sm:$0xf0]  ;;  %v459_v5 = vld [vmem:[%s739_s1 + $0x74] sm:$0xf] }
   0x6   :  { %v375_v6 = vld [vmem:[%s739_s1 + $0x78] sm:$0xf0]  ;;  %v438_v7 = vor.u32 %v476_v4, %v437_v2  ;;  %v475_v9 = vld [vmem:[%s739_s1 + $0xf4] sm:$0xf]  ;;  %v365_v11 = vld [vmem:[%s739_s1 + $0x60] sm:$0xf] }
   0x7   :  { %v378_v8 = vor.u32 %v459_v5, %v375_v6  ;;  %v439_v10 = vld [vmem:[%s739_s1 + $0xf8] sm:$0xf0]  ;;  %238 = vmatpush.bf16.msra.mxu0 %v374_v3  ;;  %v458_v13 = vld [vmem:[%s739_s1 + $0x64] sm:$0xf0]  ;;  %v429_v14 = vld [vmem:[%s739_s1 + $0xe0] sm:$0xf] }
   0x8   :  { %v442_v12 = vor.u32 %v475_v9, %v439_v10  ;;  %v474_v15 = vld [vmem:[%s739_s1 + $0xe4] sm:$0xf0]  ;;  %252 = vmatpush.bf16.msra.mxu1 %v438_v7  ;;  %v366_v16 = vor.u32 %v458_v13, %v365_v11  ;;  %v457_v18 = vld [vmem:[%s739_s1 + $0x64] sm:$0xf]  ;;  %v367_v19 = vld [vmem:[%s739_s1 + $0x68] sm:$0xf0] }
   0x9   :  { %266 = vmatpush.bf16.msra.mxu2 %v378_v8  ;;  %v430_v17 = vor.u32 %v474_v15, %v429_v14  ;;  %v473_v20 = vld [vmem:[%s739_s1 + $0xe4] sm:$0xf]  ;;  %v370_v21 = vor.u32 %v457_v18, %v367_v19  ;;  %v431_v22 = vld [vmem:[%s739_s1 + $0xe8] sm:$0xf0]  ;;  %v357_v23 = vld [vmem:[%s739_s1 + $0x50] sm:$0xf] }
   0xa   :  { %280 = vmatpush.bf16.msra.mxu3 %v442_v12  ;;  %v456_v24 = vld [vmem:[%s739_s1 + $0x54] sm:$0xf0]  ;;  %v434_v25 = vor.u32 %v473_v20, %v431_v22  ;;  %v421_v26 = vld [vmem:[%s739_s1 + $0xd0] sm:$0xf]  ;;  %v455_v28 = vld [vmem:[%s739_s1 + $0x54] sm:$0xf] }
   0xb   :  { %v472_v27 = vld [vmem:[%s739_s1 + $0xd4] sm:$0xf0]  ;;  %239 = vmatpush.bf16.msra.mxu0 %v366_v16  ;;  %v358_v29 = vor.u32 %v456_v24, %v357_v23  ;;  %v359_v30 = vld [vmem:[%s739_s1 + $0x58] sm:$0xf0]  ;;  %v471_v31 = vld [vmem:[%s739_s1 + $0xd4] sm:$0xf] }
   0xc   :  { %v423_v32 = vld [vmem:[%s739_s1 + $0xd8] sm:$0xf0]  ;;  %253 = vmatpush.bf16.msra.mxu1 %v430_v17  ;;  %v422_v33 = vor.u32 %v472_v27, %v421_v26  ;;  %v362_v34 = vor.u32 %v455_v28, %v359_v30  ;;  %v349_v35 = vld [vmem:[%s739_s1 + $0x40] sm:$0xf]  ;;  %v454_v36 = vld [vmem:[%s739_s1 + $0x44] sm:$0xf0] }
   0xd   :  { %267 = vmatpush.bf16.msra.mxu2 %v370_v21  ;;  %v413_v37 = vld [vmem:[%s739_s1 + $0xc0] sm:$0xf]  ;;  %v426_v38 = vor.u32 %v471_v31, %v423_v32  ;;  %v470_v39 = vld [vmem:[%s739_s1 + $0xc4] sm:$0xf0]  ;;  %v453_v40 = vld [vmem:[%s739_s1 + $0x44] sm:$0xf]  ;;  %v350_v44 = vor.u32 %v454_v36, %v349_v35 }
   0xe   :  { %281 = vmatpush.bf16.msra.mxu3 %v434_v25  ;;  %v351_v41 = vld [vmem:[%s739_s1 + $0x48] sm:$0xf0]  ;;  %v469_v42 = vld [vmem:[%s739_s1 + $0xc4] sm:$0xf]  ;;  %v414_v45 = vor.u32 %v470_v39, %v413_v37  ;;  %v341_v47 = vld [vmem:[%s739_s1 + $0x30] sm:$0xf] }
   0xf   :  { %v415_v43 = vld [vmem:[%s739_s1 + $0xc8] sm:$0xf0]  ;;  %240 = vmatpush.bf16.msra.mxu0 %v358_v29  ;;  %v354_v46 = vor.u32 %v453_v40, %v351_v41  ;;  %v452_v48 = vld [vmem:[%s739_s1 + $0x34] sm:$0xf0]  ;;  %v405_v49 = vld [vmem:[%s739_s1 + $0xb0] sm:$0xf] }
  0x10   :  { %254 = vmatpush.bf16.msra.mxu1 %v422_v33  ;;  %v418_v50 = vor.u32 %v469_v42, %v415_v43  ;;  %v468_v51 = vld [vmem:[%s739_s1 + $0xb4] sm:$0xf0]  ;;  %v451_v52 = vld [vmem:[%s739_s1 + $0x34] sm:$0xf]  ;;  %v343_v53 = vld [vmem:[%s739_s1 + $0x38] sm:$0xf0]  ;;  %v342_v56 = vor.u32 %v452_v48, %v341_v47 }
  0x11   :  { %268 = vmatpush.bf16.msra.mxu2 %v362_v34  ;;  %v467_v54 = vld [vmem:[%s739_s1 + $0xb4] sm:$0xf]  ;;  %v407_v55 = vld [vmem:[%s739_s1 + $0xb8] sm:$0xf0]  ;;  %v406_v57 = vor.u32 %v468_v51, %v405_v49  ;;  %v346_v58 = vor.u32 %v451_v52, %v343_v53  ;;  %v333_v59 = vld [vmem:[%s739_s1 + $0x20] sm:$0xf] }
  0x12   :  { %282 = vmatpush.bf16.msra.mxu3 %v426_v38  ;;  %v450_v60 = vld [vmem:[%s739_s1 + $0x24] sm:$0xf0]  ;;  %v397_v61 = vld [vmem:[%s739_s1 + $0xa0] sm:$0xf]  ;;  %v410_v62 = vor.u32 %v467_v54, %v407_v55  ;;  %v449_v0 = vld [vmem:[%s739_s1 + $0x24] sm:$0xf] }
  0x13   :  { %241 = vmatpush.bf16.msra.mxu0 %v350_v44  ;;  %v466_v63 = vld [vmem:[%s739_s1 + $0xa4] sm:$0xf0]  ;;  %v335_v1 = vld [vmem:[%s739_s1 + $0x28] sm:$0xf0]  ;;  %v465_v2 = vld [vmem:[%s739_s1 + $0xa4] sm:$0xf]  ;;  %v334_v4 = vor.u32 %v450_v60, %v333_v59 }
  0x14   :  { %255 = vmatpush.bf16.msra.mxu1 %v414_v45  ;;  %v399_v3 = vld [vmem:[%s739_s1 + $0xa8] sm:$0xf0]  ;;  %v398_v5 = vor.u32 %v466_v63, %v397_v61  ;;  %v338_v6 = vor.u32 %v449_v0, %v335_v1  ;;  %v325_v7 = vld [vmem:[%s739_s1 + $0x10] sm:$0xf]  ;;  %v448_v8 = vld [vmem:[%s739_s1 + $0x14] sm:$0xf0] }
  0x15   :  { %269 = vmatpush.bf16.msra.mxu2 %v354_v46  ;;  %v389_v9 = vld [vmem:[%s739_s1 + $0x90] sm:$0xf]  ;;  %v402_v10 = vor.u32 %v465_v2, %v399_v3  ;;  %v464_v11 = vld [vmem:[%s739_s1 + $0x94] sm:$0xf0]  ;;  %v447_v12 = vld [vmem:[%s739_s1 + $0x14] sm:$0xf]  ;;  %v326_v16 = vor.u32 %v448_v8, %v325_v7 }
  0x16   :  { %283 = vmatpush.bf16.msra.mxu3 %v418_v50  ;;  %v327_v13 = vld [vmem:[%s739_s1 + $0x18] sm:$0xf0]  ;;  %v463_v14 = vld [vmem:[%s739_s1 + $0x94] sm:$0xf]  ;;  %v390_v17 = vor.u32 %v464_v11, %v389_v9  ;;  %v317_v19 = vld [vmem:[%s739_s1] sm:$0xf] }
  0x17   :  { %242 = vmatpush.bf16.msra.mxu0 %v342_v56  ;;  %v391_v15 = vld [vmem:[%s739_s1 + $0x98] sm:$0xf0]  ;;  %v330_v18 = vor.u32 %v447_v12, %v327_v13  ;;  %v446_v20 = vld [vmem:[%s739_s1 + $0x4] sm:$0xf0]  ;;  %v381_v21 = vld [vmem:[%s739_s1 + $0x80] sm:$0xf] }
  0x18   :  { %256 = vmatpush.bf16.msra.mxu1 %v406_v57  ;;  %v394_v22 = vor.u32 %v463_v14, %v391_v15  ;;  %v462_v23 = vld [vmem:[%s739_s1 + $0x84] sm:$0xf0]  ;;  %v445_v24 = vld [vmem:[%s739_s1 + $0x4] sm:$0xf]  ;;  %v319_v25 = vld [vmem:[%s739_s1 + $0x8] sm:$0xf0]  ;;  %v318_v28 = vor.u32 %v446_v20, %v317_v19 }
  0x19   :  { %270 = vmatpush.bf16.msra.mxu2 %v346_v58  ;;  %v461_v26 = vld [vmem:[%s739_s1 + $0x84] sm:$0xf]  ;;  %v383_v27 = vld [vmem:[%s739_s1 + $0x88] sm:$0xf0]  ;;  %v309_v29 = vld [vmem:[%s738_s0] sm:$0xf]  ;;  %v382_v31 = vor.u32 %v462_v23, %v381_v21  ;;  %v322_v32 = vor.u32 %v445_v24, %v319_v25 }
  0x1a   :  { %284 = vmatpush.bf16.msra.mxu3 %v410_v62  ;;  %v444_v30 = vld [vmem:[%s738_s0 + $0x4] sm:$0xf0]  ;;  %v443_v33 = vld [vmem:[%s738_s0 + $0x4] sm:$0xf]  ;;  %v311_v34 = vld [vmem:[%s738_s0 + $0x8] sm:$0xf0]  ;;  %v386_v35 = vor.u32 %v461_v26, %v383_v27 }
  0x1b   :  { %243 = vmatpush.bf16.msra.mxu0 %v334_v4  ;;  %v310_v36 = vor.u32 %v444_v30, %v309_v29  ;;  %v314_v37 = vor.u32 %v443_v33, %v311_v34  ;;  %v62_v38 = vld [vmem:[#allocation2] sm:$0x3] }
  0x1c   :  { %257 = vmatpush.bf16.msra.mxu1 %v398_v5  ;;  %v64_v39 = vperm.slane %v62_v38, 0  ;;  %v65_v42 = vperm.slane %v62_v38, 1 }
  0x1d   :  { %271 = vmatpush.bf16.msra.mxu2 %v338_v6 }
  0x1e   :  { %285 = vmatpush.bf16.msra.mxu3 %v402_v10 }
  0x1f   :  { %244 = vmatpush.bf16.msra.mxu0 %v326_v16 }
  0x20   :  { %258 = vmatpush.bf16.msra.mxu1 %v390_v17 }
  0x21   :  { %272 = vmatpush.bf16.msra.mxu2 %v330_v18 }
  0x22   :  { %286 = vmatpush.bf16.msra.mxu3 %v394_v22 }
  0x23   :  { %245 = vmatpush.bf16.msra.mxu0 %v318_v28 }
  0x24   :  { %259 = vmatpush.bf16.msra.mxu1 %v382_v31 }
  0x25   :  { %273 = vmatpush.bf16.msra.mxu2 %v322_v32 }
  0x26   :  { %287 = vmatpush.bf16.msra.mxu3 %v386_v35  ;;  %246 = vmatmul.bf16.vlgmr.msra.gmra.mxu0 %v310_v36 }
  0x27   :  { %260 = vmatmul.bf16.vlgmr.msra.gmra.mxu1 %v314_v37 }
  0x28   :  { %274 = vmatmul.bf16.vlgmr.msra.gmra.mxu2 %v310_v36 }
  0x29   :  { %288 = vmatmul.bf16.vlgmr.msra.gmra.mxu3 %v314_v37 }
  0xa3   :  { %v247_v40 = vpop.f32.mrf.mxu0 }
  0xa4   :  { %v248_v41 = vadd.f32 %v247_v40, %v64_v39  ;;  %v261_v43 = vpop.f32.mrf.mxu1 }
  0xa6   :  { %v262_v44 = vadd.f32 %v261_v43, %v248_v41 }
  0xa8   :  { %v294_v49 = vmax.f32 %v262_v44, 0.0 }
  0xab   :  { %v275_v45 = vpop.f32.mrf.mxu2  ;;  %v249_v48 = vpop.f32.mrf.mxu0 }
  0xac   :  { %v276_v46 = vadd.f32 %v275_v45, %v65_v42  ;;  %v289_v47 = vpop.f32.mrf.mxu3  ;;  %v250_v52 = vadd.f32 %v249_v48, %v64_v39  ;;  %v263_v54 = vpop.f32.mrf.mxu1 }
  0xae   :  { %v290_v50 = vadd.f32 %v289_v47, %v276_v46  ;;  %v264_v56 = vadd.f32 %v263_v54, %v250_v52 }
  0xb0   :  { %v295_v51 = vmax.f32 %v290_v50, 0.0  ;;  %v296_v60 = vmax.f32 %v264_v56, 0.0 }
  0xb2   :  { %v298_v53 = vpack.c.bf16 %v295_v51, %v294_v49 }
  0xb3   :  { %v277_v55 = vpop.f32.mrf.mxu2 }
  0xb4   :  { %300 = vst [vmem:[%s741_s3] sm:$0xff] %v298_v53  ;;  %v278_v57 = vadd.f32 %v277_v55, %v65_v42  ;;  %v291_v58 = vpop.f32.mrf.mxu3 }
  0xb6   :  { %v292_v59 = vadd.f32 %v291_v58, %v278_v57 }
  0xb8   :  { %v297_v61 = vmax.f32 %v292_v59, 0.0 }
  0xba   :  { %v299_v62 = vpack.c.bf16 %v297_v61, %v296_v60 }
  0xbc   :  { %301 = vst [vmem:[%s741_s3 + $0x8] sm:$0xff] %v299_v62 }
  0xbd   :  { %306 = vsyncpa [#allocation3], 1 }

// kernel: resnet_forward.47
= control target key start
LH: loop header
LB: loop body
LE: loop exit
PB: predicated region body
PF: predicated region fallthrough
CT: control target
= control target key end

     0   :  { %9 = vsyncpa [#allocation3], 0  ;;  %s517_s18 = smov [#allocation2]   ;;  %s762_s0 = inlined_call_operand.vmem [shape: bf16[16,256], index: 0, kind: input, shape index: {}]   ;;  %s763_s1 = inlined_call_operand.vmem [shape: bf16[256,256], index: 1, kind: input, shape index: {}]   ;;  %s764_s2 = inlined_call_operand.hbm [shape: f32[1,256], index: 2, kind: input, shape index: {}]   ;;  %s765_s3 = inlined_call_operand.vmem [shape: bf16[16,256], index: 3, kind: input, shape index: {}]   ;;  %s766_s4 = inlined_call_operand.vmem [shape: bf16[16,256], index: 4, kind: output, shape index: {}]  }
   0x1   :  { %s19_s17 = sshll.u32 %s764_s2, 4  ;;  %s21_s19 = sshll.u32 %s517_s18, 4  ;;  %s20_s17 = int_to_ptr.hbm [resolvable:$true] %s19_s17  ;;  %s22_s19 = int_to_ptr.vmem [resolvable:$true] %s21_s19 }
   0x2   :  { %24 = dma.hbm_to_vmem [thread:$0]  %s20_s17, 32, %s22_s19, [#allocation3]  }
   0x3   :  { %515 = dma.done.wait [#allocation3], 32  }
   0x4   :  { %516 = vsyncadd [#allocation3], 4294967264  ;;  %v386_v0 = vld [vmem:[%s763_s1 + $0x70] sm:$0xf]  ;;  %v473_v1 = vld [vmem:[%s763_s1 + $0x74] sm:$0xf0] }
   0x5   :  { %v450_v2 = vld [vmem:[%s763_s1 + $0xf0] sm:$0xf]  ;;  %v387_v3 = vor.u32 %v473_v1, %v386_v0  ;;  %v489_v4 = vld [vmem:[%s763_s1 + $0xf4] sm:$0xf0]  ;;  %v472_v5 = vld [vmem:[%s763_s1 + $0x74] sm:$0xf] }
   0x6   :  { %v388_v6 = vld [vmem:[%s763_s1 + $0x78] sm:$0xf0]  ;;  %v451_v7 = vor.u32 %v489_v4, %v450_v2  ;;  %v488_v9 = vld [vmem:[%s763_s1 + $0xf4] sm:$0xf]  ;;  %v378_v11 = vld [vmem:[%s763_s1 + $0x60] sm:$0xf] }
   0x7   :  { %v391_v8 = vor.u32 %v472_v5, %v388_v6  ;;  %v452_v10 = vld [vmem:[%s763_s1 + $0xf8] sm:$0xf0]  ;;  %241 = vmatpush.bf16.msra.mxu0 %v387_v3  ;;  %v471_v13 = vld [vmem:[%s763_s1 + $0x64] sm:$0xf0]  ;;  %v442_v14 = vld [vmem:[%s763_s1 + $0xe0] sm:$0xf] }
   0x8   :  { %v455_v12 = vor.u32 %v488_v9, %v452_v10  ;;  %v487_v15 = vld [vmem:[%s763_s1 + $0xe4] sm:$0xf0]  ;;  %255 = vmatpush.bf16.msra.mxu1 %v451_v7  ;;  %v379_v16 = vor.u32 %v471_v13, %v378_v11  ;;  %v470_v18 = vld [vmem:[%s763_s1 + $0x64] sm:$0xf]  ;;  %v380_v19 = vld [vmem:[%s763_s1 + $0x68] sm:$0xf0] }
   0x9   :  { %269 = vmatpush.bf16.msra.mxu2 %v391_v8  ;;  %v443_v17 = vor.u32 %v487_v15, %v442_v14  ;;  %v486_v20 = vld [vmem:[%s763_s1 + $0xe4] sm:$0xf]  ;;  %v383_v21 = vor.u32 %v470_v18, %v380_v19  ;;  %v444_v22 = vld [vmem:[%s763_s1 + $0xe8] sm:$0xf0]  ;;  %v370_v23 = vld [vmem:[%s763_s1 + $0x50] sm:$0xf] }
   0xa   :  { %283 = vmatpush.bf16.msra.mxu3 %v455_v12  ;;  %v469_v24 = vld [vmem:[%s763_s1 + $0x54] sm:$0xf0]  ;;  %v447_v25 = vor.u32 %v486_v20, %v444_v22  ;;  %v434_v26 = vld [vmem:[%s763_s1 + $0xd0] sm:$0xf]  ;;  %v468_v28 = vld [vmem:[%s763_s1 + $0x54] sm:$0xf] }
   0xb   :  { %v485_v27 = vld [vmem:[%s763_s1 + $0xd4] sm:$0xf0]  ;;  %242 = vmatpush.bf16.msra.mxu0 %v379_v16  ;;  %v371_v29 = vor.u32 %v469_v24, %v370_v23  ;;  %v372_v30 = vld [vmem:[%s763_s1 + $0x58] sm:$0xf0]  ;;  %v484_v31 = vld [vmem:[%s763_s1 + $0xd4] sm:$0xf] }
   0xc   :  { %v436_v32 = vld [vmem:[%s763_s1 + $0xd8] sm:$0xf0]  ;;  %256 = vmatpush.bf16.msra.mxu1 %v443_v17  ;;  %v435_v33 = vor.u32 %v485_v27, %v434_v26  ;;  %v375_v34 = vor.u32 %v468_v28, %v372_v30  ;;  %v362_v35 = vld [vmem:[%s763_s1 + $0x40] sm:$0xf]  ;;  %v467_v36 = vld [vmem:[%s763_s1 + $0x44] sm:$0xf0] }
   0xd   :  { %270 = vmatpush.bf16.msra.mxu2 %v383_v21  ;;  %v426_v37 = vld [vmem:[%s763_s1 + $0xc0] sm:$0xf]  ;;  %v439_v38 = vor.u32 %v484_v31, %v436_v32  ;;  %v483_v39 = vld [vmem:[%s763_s1 + $0xc4] sm:$0xf0]  ;;  %v466_v40 = vld [vmem:[%s763_s1 + $0x44] sm:$0xf]  ;;  %v363_v44 = vor.u32 %v467_v36, %v362_v35 }
   0xe   :  { %284 = vmatpush.bf16.msra.mxu3 %v447_v25  ;;  %v364_v41 = vld [vmem:[%s763_s1 + $0x48] sm:$0xf0]  ;;  %v482_v42 = vld [vmem:[%s763_s1 + $0xc4] sm:$0xf]  ;;  %v427_v45 = vor.u32 %v483_v39, %v426_v37  ;;  %v354_v47 = vld [vmem:[%s763_s1 + $0x30] sm:$0xf] }
   0xf   :  { %v428_v43 = vld [vmem:[%s763_s1 + $0xc8] sm:$0xf0]  ;;  %243 = vmatpush.bf16.msra.mxu0 %v371_v29  ;;  %v367_v46 = vor.u32 %v466_v40, %v364_v41  ;;  %v465_v48 = vld [vmem:[%s763_s1 + $0x34] sm:$0xf0]  ;;  %v418_v49 = vld [vmem:[%s763_s1 + $0xb0] sm:$0xf] }
  0x10   :  { %257 = vmatpush.bf16.msra.mxu1 %v435_v33  ;;  %v431_v50 = vor.u32 %v482_v42, %v428_v43  ;;  %v481_v51 = vld [vmem:[%s763_s1 + $0xb4] sm:$0xf0]  ;;  %v464_v52 = vld [vmem:[%s763_s1 + $0x34] sm:$0xf]  ;;  %v356_v53 = vld [vmem:[%s763_s1 + $0x38] sm:$0xf0]  ;;  %v355_v56 = vor.u32 %v465_v48, %v354_v47 }
  0x11   :  { %271 = vmatpush.bf16.msra.mxu2 %v375_v34  ;;  %v480_v54 = vld [vmem:[%s763_s1 + $0xb4] sm:$0xf]  ;;  %v420_v55 = vld [vmem:[%s763_s1 + $0xb8] sm:$0xf0]  ;;  %v419_v57 = vor.u32 %v481_v51, %v418_v49  ;;  %v359_v58 = vor.u32 %v464_v52, %v356_v53  ;;  %v346_v59 = vld [vmem:[%s763_s1 + $0x20] sm:$0xf] }
  0x12   :  { %285 = vmatpush.bf16.msra.mxu3 %v439_v38  ;;  %v463_v60 = vld [vmem:[%s763_s1 + $0x24] sm:$0xf0]  ;;  %v410_v61 = vld [vmem:[%s763_s1 + $0xa0] sm:$0xf]  ;;  %v423_v62 = vor.u32 %v480_v54, %v420_v55  ;;  %v462_v0 = vld [vmem:[%s763_s1 + $0x24] sm:$0xf] }
  0x13   :  { %244 = vmatpush.bf16.msra.mxu0 %v363_v44  ;;  %v479_v63 = vld [vmem:[%s763_s1 + $0xa4] sm:$0xf0]  ;;  %v348_v1 = vld [vmem:[%s763_s1 + $0x28] sm:$0xf0]  ;;  %v478_v2 = vld [vmem:[%s763_s1 + $0xa4] sm:$0xf]  ;;  %v347_v4 = vor.u32 %v463_v60, %v346_v59 }
  0x14   :  { %258 = vmatpush.bf16.msra.mxu1 %v427_v45  ;;  %v412_v3 = vld [vmem:[%s763_s1 + $0xa8] sm:$0xf0]  ;;  %v411_v5 = vor.u32 %v479_v63, %v410_v61  ;;  %v351_v6 = vor.u32 %v462_v0, %v348_v1  ;;  %v338_v7 = vld [vmem:[%s763_s1 + $0x10] sm:$0xf]  ;;  %v461_v8 = vld [vmem:[%s763_s1 + $0x14] sm:$0xf0] }
  0x15   :  { %272 = vmatpush.bf16.msra.mxu2 %v367_v46  ;;  %v402_v9 = vld [vmem:[%s763_s1 + $0x90] sm:$0xf]  ;;  %v415_v10 = vor.u32 %v478_v2, %v412_v3  ;;  %v477_v11 = vld [vmem:[%s763_s1 + $0x94] sm:$0xf0]  ;;  %v460_v12 = vld [vmem:[%s763_s1 + $0x14] sm:$0xf]  ;;  %v339_v16 = vor.u32 %v461_v8, %v338_v7 }
  0x16   :  { %286 = vmatpush.bf16.msra.mxu3 %v431_v50  ;;  %v340_v13 = vld [vmem:[%s763_s1 + $0x18] sm:$0xf0]  ;;  %v476_v14 = vld [vmem:[%s763_s1 + $0x94] sm:$0xf]  ;;  %v403_v17 = vor.u32 %v477_v11, %v402_v9  ;;  %v330_v19 = vld [vmem:[%s763_s1] sm:$0xf] }
  0x17   :  { %245 = vmatpush.bf16.msra.mxu0 %v355_v56  ;;  %v404_v15 = vld [vmem:[%s763_s1 + $0x98] sm:$0xf0]  ;;  %v343_v18 = vor.u32 %v460_v12, %v340_v13  ;;  %v459_v20 = vld [vmem:[%s763_s1 + $0x4] sm:$0xf0]  ;;  %v394_v21 = vld [vmem:[%s763_s1 + $0x80] sm:$0xf] }
  0x18   :  { %259 = vmatpush.bf16.msra.mxu1 %v419_v57  ;;  %v407_v22 = vor.u32 %v476_v14, %v404_v15  ;;  %v475_v23 = vld [vmem:[%s763_s1 + $0x84] sm:$0xf0]  ;;  %v458_v24 = vld [vmem:[%s763_s1 + $0x4] sm:$0xf]  ;;  %v332_v25 = vld [vmem:[%s763_s1 + $0x8] sm:$0xf0]  ;;  %v331_v28 = vor.u32 %v459_v20, %v330_v19 }
  0x19   :  { %273 = vmatpush.bf16.msra.mxu2 %v359_v58  ;;  %v474_v26 = vld [vmem:[%s763_s1 + $0x84] sm:$0xf]  ;;  %v396_v27 = vld [vmem:[%s763_s1 + $0x88] sm:$0xf0]  ;;  %v322_v29 = vld [vmem:[%s762_s0] sm:$0xf]  ;;  %v395_v31 = vor.u32 %v475_v23, %v394_v21  ;;  %v335_v32 = vor.u32 %v458_v24, %v332_v25 }
  0x1a   :  { %287 = vmatpush.bf16.msra.mxu3 %v423_v62  ;;  %v457_v30 = vld [vmem:[%s762_s0 + $0x4] sm:$0xf0]  ;;  %v456_v33 = vld [vmem:[%s762_s0 + $0x4] sm:$0xf]  ;;  %v324_v34 = vld [vmem:[%s762_s0 + $0x8] sm:$0xf0]  ;;  %v399_v35 = vor.u32 %v474_v26, %v396_v27 }
  0x1b   :  { %246 = vmatpush.bf16.msra.mxu0 %v347_v4  ;;  %v323_v36 = vor.u32 %v457_v30, %v322_v29  ;;  %v327_v37 = vor.u32 %v456_v33, %v324_v34  ;;  %v65_v38 = vld [vmem:[#allocation2] sm:$0x3]  ;;  %v298_v55 = vld [vmem:[%s765_s3 + $0x8] sm:$0xff] }
  0x1c   :  { %260 = vmatpush.bf16.msra.mxu1 %v411_v5  ;;  %v67_v39 = vperm.slane %v65_v38, 0  ;;  %v297_v42 = vld [vmem:[%s765_s3] sm:$0xff]  ;;  %v68_v46 = vperm.slane %v65_v38, 1  ;;  %v301_v61 = vunpack.c.l.bf16 %v298_v55  ;;  %v302_v1 = vunpack.c.h.bf16 %v298_v55 }
  0x1d   :  { %274 = vmatpush.bf16.msra.mxu2 %v351_v6  ;;  %v299_v45 = vunpack.c.l.bf16 %v297_v42  ;;  %v300_v51 = vunpack.c.h.bf16 %v297_v42 }
  0x1e   :  { %288 = vmatpush.bf16.msra.mxu3 %v415_v10 }
  0x1f   :  { %247 = vmatpush.bf16.msra.mxu0 %v339_v16 }
  0x20   :  { %261 = vmatpush.bf16.msra.mxu1 %v403_v17 }
  0x21   :  { %275 = vmatpush.bf16.msra.mxu2 %v343_v18 }
  0x22   :  { %289 = vmatpush.bf16.msra.mxu3 %v407_v22 }
  0x23   :  { %248 = vmatpush.bf16.msra.mxu0 %v331_v28 }
  0x24   :  { %262 = vmatpush.bf16.msra.mxu1 %v395_v31 }
  0x25   :  { %276 = vmatpush.bf16.msra.mxu2 %v335_v32 }
  0x26   :  { %290 = vmatpush.bf16.msra.mxu3 %v399_v35  ;;  %249 = vmatmul.bf16.vlgmr.msra.gmra.mxu0 %v323_v36 }
  0x27   :  { %263 = vmatmul.bf16.vlgmr.msra.gmra.mxu1 %v327_v37 }
  0x28   :  { %277 = vmatmul.bf16.vlgmr.msra.gmra.mxu2 %v323_v36 }
  0x29   :  { %291 = vmatmul.bf16.vlgmr.msra.gmra.mxu3 %v327_v37 }
  0xa3   :  { %v250_v40 = vpop.f32.mrf.mxu0 }
  0xa4   :  { %v251_v41 = vadd.f32 %v250_v40, %v67_v39  ;;  %v264_v43 = vpop.f32.mrf.mxu1 }
  0xa6   :  { %v265_v44 = vadd.f32 %v264_v43, %v251_v41 }
  0xa8   :  { %v303_v48 = vadd.f32 %v299_v45, %v265_v44 }
  0xaa   :  { %v307_v56 = vmax.f32 %v303_v48, 0.0 }
  0xab   :  { %v278_v47 = vpop.f32.mrf.mxu2  ;;  %v252_v52 = vpop.f32.mrf.mxu0 }
  0xac   :  { %v279_v49 = vadd.f32 %v278_v47, %v68_v46  ;;  %v292_v50 = vpop.f32.mrf.mxu3  ;;  %v253_v54 = vadd.f32 %v252_v52, %v67_v39  ;;  %v266_v58 = vpop.f32.mrf.mxu1 }
  0xae   :  { %v293_v53 = vadd.f32 %v292_v50, %v279_v49  ;;  %v267_v60 = vadd.f32 %v266_v58, %v253_v54 }
  0xb0   :  { %v304_v57 = vadd.f32 %v300_v51, %v293_v53  ;;  %v305_v3 = vadd.f32 %v301_v61, %v267_v60 }
  0xb2   :  { %v308_v59 = vmax.f32 %v304_v57, 0.0  ;;  %v309_v6 = vmax.f32 %v305_v3, 0.0 }
  0xb3   :  { %v280_v62 = vpop.f32.mrf.mxu2 }
  0xb4   :  { %v311_v63 = vpack.c.bf16 %v308_v59, %v307_v56  ;;  %v281_v0 = vadd.f32 %v280_v62, %v68_v46  ;;  %v294_v2 = vpop.f32.mrf.mxu3 }
  0xb6   :  { %313 = vst [vmem:[%s766_s4] sm:$0xff] %v311_v63  ;;  %v295_v4 = vadd.f32 %v294_v2, %v281_v0 }
  0xb8   :  { %v306_v5 = vadd.f32 %v302_v1, %v295_v4 }
  0xba   :  { %v310_v7 = vmax.f32 %v306_v5, 0.0 }
  0xbc   :  { %v312_v8 = vpack.c.bf16 %v310_v7, %v309_v6 }
  0xbe   :  { %314 = vst [vmem:[%s766_s4 + $0x8] sm:$0xff] %v312_v8 }
  0xbf   :  { %319 = vsyncpa [#allocation3], 1 }

// kernel: resnet_forward.49
= control target key start
LH: loop header
LB: loop body
LE: loop exit
PB: predicated region body
PF: predicated region fallthrough
CT: control target
= control target key end

     0   :  { %8 = vsyncpa [#allocation3], 0  ;;  %s508_s15 = smov [#allocation2]   ;;  %s742_s0 = inlined_call_operand.vmem [shape: bf16[16,256], index: 0, kind: input, shape index: {}]   ;;  %s743_s1 = inlined_call_operand.vmem [shape: bf16[256,256], index: 1, kind: input, shape index: {}]   ;;  %s744_s2 = inlined_call_operand.hbm [shape: f32[1,256], index: 2, kind: input, shape index: {}]   ;;  %s745_s3 = inlined_call_operand.vmem [shape: bf16[16,256], index: 3, kind: output, shape index: {}]  }
   0x1   :  { %s18_s14 = sshll.u32 %s744_s2, 4  ;;  %s20_s16 = sshll.u32 %s508_s15, 4  ;;  %s19_s14 = int_to_ptr.hbm [resolvable:$true] %s18_s14  ;;  %s21_s16 = int_to_ptr.vmem [resolvable:$true] %s20_s16 }
   0x2   :  { %23 = dma.hbm_to_vmem [thread:$0]  %s19_s14, 32, %s21_s16, [#allocation3]  }
   0x3   :  { %506 = dma.done.wait [#allocation3], 32  }
   0x4   :  { %507 = vsyncadd [#allocation3], 4294967264  ;;  %v377_v0 = vld [vmem:[%s743_s1 + $0x70] sm:$0xf]  ;;  %v464_v1 = vld [vmem:[%s743_s1 + $0x74] sm:$0xf0] }
   0x5   :  { %v441_v2 = vld [vmem:[%s743_s1 + $0xf0] sm:$0xf]  ;;  %v378_v3 = vor.u32 %v464_v1, %v377_v0  ;;  %v480_v4 = vld [vmem:[%s743_s1 + $0xf4] sm:$0xf0]  ;;  %v463_v5 = vld [vmem:[%s743_s1 + $0x74] sm:$0xf] }
   0x6   :  { %v379_v6 = vld [vmem:[%s743_s1 + $0x78] sm:$0xf0]  ;;  %v442_v7 = vor.u32 %v480_v4, %v441_v2  ;;  %v479_v9 = vld [vmem:[%s743_s1 + $0xf4] sm:$0xf]  ;;  %v369_v11 = vld [vmem:[%s743_s1 + $0x60] sm:$0xf] }
   0x7   :  { %v382_v8 = vor.u32 %v463_v5, %v379_v6  ;;  %v443_v10 = vld [vmem:[%s743_s1 + $0xf8] sm:$0xf0]  ;;  %238 = vmatpush.bf16.msra.mxu0 %v378_v3  ;;  %v462_v13 = vld [vmem:[%s743_s1 + $0x64] sm:$0xf0]  ;;  %v433_v14 = vld [vmem:[%s743_s1 + $0xe0] sm:$0xf] }
   0x8   :  { %v446_v12 = vor.u32 %v479_v9, %v443_v10  ;;  %v478_v15 = vld [vmem:[%s743_s1 + $0xe4] sm:$0xf0]  ;;  %252 = vmatpush.bf16.msra.mxu1 %v442_v7  ;;  %v370_v16 = vor.u32 %v462_v13, %v369_v11  ;;  %v461_v18 = vld [vmem:[%s743_s1 + $0x64] sm:$0xf]  ;;  %v371_v19 = vld [vmem:[%s743_s1 + $0x68] sm:$0xf0] }
   0x9   :  { %266 = vmatpush.bf16.msra.mxu2 %v382_v8  ;;  %v434_v17 = vor.u32 %v478_v15, %v433_v14  ;;  %v477_v20 = vld [vmem:[%s743_s1 + $0xe4] sm:$0xf]  ;;  %v374_v21 = vor.u32 %v461_v18, %v371_v19  ;;  %v435_v22 = vld [vmem:[%s743_s1 + $0xe8] sm:$0xf0]  ;;  %v361_v23 = vld [vmem:[%s743_s1 + $0x50] sm:$0xf] }
   0xa   :  { %280 = vmatpush.bf16.msra.mxu3 %v446_v12  ;;  %v460_v24 = vld [vmem:[%s743_s1 + $0x54] sm:$0xf0]  ;;  %v438_v25 = vor.u32 %v477_v20, %v435_v22  ;;  %v425_v26 = vld [vmem:[%s743_s1 + $0xd0] sm:$0xf]  ;;  %v459_v28 = vld [vmem:[%s743_s1 + $0x54] sm:$0xf] }
   0xb   :  { %v476_v27 = vld [vmem:[%s743_s1 + $0xd4] sm:$0xf0]  ;;  %239 = vmatpush.bf16.msra.mxu0 %v370_v16  ;;  %v362_v29 = vor.u32 %v460_v24, %v361_v23  ;;  %v363_v30 = vld [vmem:[%s743_s1 + $0x58] sm:$0xf0]  ;;  %v475_v31 = vld [vmem:[%s743_s1 + $0xd4] sm:$0xf] }
   0xc   :  { %v427_v32 = vld [vmem:[%s743_s1 + $0xd8] sm:$0xf0]  ;;  %253 = vmatpush.bf16.msra.mxu1 %v434_v17  ;;  %v426_v33 = vor.u32 %v476_v27, %v425_v26  ;;  %v366_v34 = vor.u32 %v459_v28, %v363_v30  ;;  %v353_v35 = vld [vmem:[%s743_s1 + $0x40] sm:$0xf]  ;;  %v458_v36 = vld [vmem:[%s743_s1 + $0x44] sm:$0xf0] }
   0xd   :  { %267 = vmatpush.bf16.msra.mxu2 %v374_v21  ;;  %v417_v37 = vld [vmem:[%s743_s1 + $0xc0] sm:$0xf]  ;;  %v430_v38 = vor.u32 %v475_v31, %v427_v32  ;;  %v474_v39 = vld [vmem:[%s743_s1 + $0xc4] sm:$0xf0]  ;;  %v457_v40 = vld [vmem:[%s743_s1 + $0x44] sm:$0xf]  ;;  %v354_v44 = vor.u32 %v458_v36, %v353_v35 }
   0xe   :  { %281 = vmatpush.bf16.msra.mxu3 %v438_v25  ;;  %v355_v41 = vld [vmem:[%s743_s1 + $0x48] sm:$0xf0]  ;;  %v473_v42 = vld [vmem:[%s743_s1 + $0xc4] sm:$0xf]  ;;  %v418_v45 = vor.u32 %v474_v39, %v417_v37  ;;  %v345_v47 = vld [vmem:[%s743_s1 + $0x30] sm:$0xf] }
   0xf   :  { %v419_v43 = vld [vmem:[%s743_s1 + $0xc8] sm:$0xf0]  ;;  %240 = vmatpush.bf16.msra.mxu0 %v362_v29  ;;  %v358_v46 = vor.u32 %v457_v40, %v355_v41  ;;  %v456_v48 = vld [vmem:[%s743_s1 + $0x34] sm:$0xf0]  ;;  %v409_v49 = vld [vmem:[%s743_s1 + $0xb0] sm:$0xf] }
  0x10   :  { %254 = vmatpush.bf16.msra.mxu1 %v426_v33  ;;  %v422_v50 = vor.u32 %v473_v42, %v419_v43  ;;  %v472_v51 = vld [vmem:[%s743_s1 + $0xb4] sm:$0xf0]  ;;  %v455_v52 = vld [vmem:[%s743_s1 + $0x34] sm:$0xf]  ;;  %v347_v53 = vld [vmem:[%s743_s1 + $0x38] sm:$0xf0]  ;;  %v346_v56 = vor.u32 %v456_v48, %v345_v47 }
  0x11   :  { %268 = vmatpush.bf16.msra.mxu2 %v366_v34  ;;  %v471_v54 = vld [vmem:[%s743_s1 + $0xb4] sm:$0xf]  ;;  %v411_v55 = vld [vmem:[%s743_s1 + $0xb8] sm:$0xf0]  ;;  %v410_v57 = vor.u32 %v472_v51, %v409_v49  ;;  %v350_v58 = vor.u32 %v455_v52, %v347_v53  ;;  %v337_v59 = vld [vmem:[%s743_s1 + $0x20] sm:$0xf] }
  0x12   :  { %282 = vmatpush.bf16.msra.mxu3 %v430_v38  ;;  %v454_v60 = vld [vmem:[%s743_s1 + $0x24] sm:$0xf0]  ;;  %v401_v61 = vld [vmem:[%s743_s1 + $0xa0] sm:$0xf]  ;;  %v414_v62 = vor.u32 %v471_v54, %v411_v55  ;;  %v453_v0 = vld [vmem:[%s743_s1 + $0x24] sm:$0xf] }
  0x13   :  { %241 = vmatpush.bf16.msra.mxu0 %v354_v44  ;;  %v470_v63 = vld [vmem:[%s743_s1 + $0xa4] sm:$0xf0]  ;;  %v339_v1 = vld [vmem:[%s743_s1 + $0x28] sm:$0xf0]  ;;  %v469_v2 = vld [vmem:[%s743_s1 + $0xa4] sm:$0xf]  ;;  %v338_v4 = vor.u32 %v454_v60, %v337_v59 }
  0x14   :  { %255 = vmatpush.bf16.msra.mxu1 %v418_v45  ;;  %v403_v3 = vld [vmem:[%s743_s1 + $0xa8] sm:$0xf0]  ;;  %v402_v5 = vor.u32 %v470_v63, %v401_v61  ;;  %v342_v6 = vor.u32 %v453_v0, %v339_v1  ;;  %v329_v7 = vld [vmem:[%s743_s1 + $0x10] sm:$0xf]  ;;  %v452_v8 = vld [vmem:[%s743_s1 + $0x14] sm:$0xf0] }
  0x15   :  { %269 = vmatpush.bf16.msra.mxu2 %v358_v46  ;;  %v393_v9 = vld [vmem:[%s743_s1 + $0x90] sm:$0xf]  ;;  %v406_v10 = vor.u32 %v469_v2, %v403_v3  ;;  %v468_v11 = vld [vmem:[%s743_s1 + $0x94] sm:$0xf0]  ;;  %v451_v12 = vld [vmem:[%s743_s1 + $0x14] sm:$0xf]  ;;  %v330_v16 = vor.u32 %v452_v8, %v329_v7 }
  0x16   :  { %283 = vmatpush.bf16.msra.mxu3 %v422_v50  ;;  %v331_v13 = vld [vmem:[%s743_s1 + $0x18] sm:$0xf0]  ;;  %v467_v14 = vld [vmem:[%s743_s1 + $0x94] sm:$0xf]  ;;  %v394_v17 = vor.u32 %v468_v11, %v393_v9  ;;  %v321_v19 = vld [vmem:[%s743_s1] sm:$0xf] }
  0x17   :  { %242 = vmatpush.bf16.msra.mxu0 %v346_v56  ;;  %v395_v15 = vld [vmem:[%s743_s1 + $0x98] sm:$0xf0]  ;;  %v334_v18 = vor.u32 %v451_v12, %v331_v13  ;;  %v450_v20 = vld [vmem:[%s743_s1 + $0x4] sm:$0xf0]  ;;  %v385_v21 = vld [vmem:[%s743_s1 + $0x80] sm:$0xf] }
  0x18   :  { %256 = vmatpush.bf16.msra.mxu1 %v410_v57  ;;  %v398_v22 = vor.u32 %v467_v14, %v395_v15  ;;  %v466_v23 = vld [vmem:[%s743_s1 + $0x84] sm:$0xf0]  ;;  %v449_v24 = vld [vmem:[%s743_s1 + $0x4] sm:$0xf]  ;;  %v323_v25 = vld [vmem:[%s743_s1 + $0x8] sm:$0xf0]  ;;  %v322_v28 = vor.u32 %v450_v20, %v321_v19 }
  0x19   :  { %270 = vmatpush.bf16.msra.mxu2 %v350_v58  ;;  %v465_v26 = vld [vmem:[%s743_s1 + $0x84] sm:$0xf]  ;;  %v387_v27 = vld [vmem:[%s743_s1 + $0x88] sm:$0xf0]  ;;  %v313_v29 = vld [vmem:[%s742_s0] sm:$0xf]  ;;  %v386_v31 = vor.u32 %v466_v23, %v385_v21  ;;  %v326_v32 = vor.u32 %v449_v24, %v323_v25 }
  0x1a   :  { %284 = vmatpush.bf16.msra.mxu3 %v414_v62  ;;  %v448_v30 = vld [vmem:[%s742_s0 + $0x4] sm:$0xf0]  ;;  %v447_v33 = vld [vmem:[%s742_s0 + $0x4] sm:$0xf]  ;;  %v315_v34 = vld [vmem:[%s742_s0 + $0x8] sm:$0xf0]  ;;  %v390_v35 = vor.u32 %v465_v26, %v387_v27 }
  0x1b   :  { %243 = vmatpush.bf16.msra.mxu0 %v338_v4  ;;  %v314_v36 = vor.u32 %v448_v30, %v313_v29  ;;  %v318_v37 = vor.u32 %v447_v33, %v315_v34  ;;  %v62_v38 = vld [vmem:[#allocation2] sm:$0x3] }
  0x1c   :  { %257 = vmatpush.bf16.msra.mxu1 %v402_v5  ;;  %v64_v39 = vperm.slane %v62_v38, 0  ;;  %v65_v44 = vperm.slane %v62_v38, 1 }
  0x1d   :  { %271 = vmatpush.bf16.msra.mxu2 %v342_v6 }
  0x1e   :  { %285 = vmatpush.bf16.msra.mxu3 %v406_v10 }
  0x1f   :  { %244 = vmatpush.bf16.msra.mxu0 %v330_v16 }
  0x20   :  { %258 = vmatpush.bf16.msra.mxu1 %v394_v17 }
  0x21   :  { %272 = vmatpush.bf16.msra.mxu2 %v334_v18 }
  0x22   :  { %286 = vmatpush.bf16.msra.mxu3 %v398_v22 }
  0x23   :  { %245 = vmatpush.bf16.msra.mxu0 %v322_v28 }
  0x24   :  { %259 = vmatpush.bf16.msra.mxu1 %v386_v31 }
  0x25   :  { %273 = vmatpush.bf16.msra.mxu2 %v326_v32 }
  0x26   :  { %287 = vmatpush.bf16.msra.mxu3 %v390_v35  ;;  %246 = vmatmul.bf16.vlgmr.msra.gmra.mxu0 %v314_v36 }
  0x27   :  { %260 = vmatmul.bf16.vlgmr.msra.gmra.mxu1 %v318_v37 }
  0x28   :  { %274 = vmatmul.bf16.vlgmr.msra.gmra.mxu2 %v314_v36 }
  0x29   :  { %288 = vmatmul.bf16.vlgmr.msra.gmra.mxu3 %v318_v37 }
  0xa3   :  { %v247_v40 = vpop.f32.mrf.mxu0 }
  0xa4   :  { %v248_v41 = vadd.f32 %v247_v40, %v64_v39  ;;  %v261_v42 = vpop.f32.mrf.mxu1 }
  0xa6   :  { %v262_v43 = vadd.f32 %v261_v42, %v248_v41 }
  0xa8   :  { %v294_v46 = vmul.f32 2.0, %v262_v43 }
  0xaa   :  { %v298_v52 = vmax.f32 %v294_v46, 0.0 }
  0xab   :  { %v275_v45 = vpop.f32.mrf.mxu2  ;;  %v249_v49 = vpop.f32.mrf.mxu0 }
  0xac   :  { %v276_v47 = vadd.f32 %v275_v45, %v65_v44  ;;  %v289_v48 = vpop.f32.mrf.mxu3  ;;  %v250_v51 = vadd.f32 %v249_v49, %v64_v39  ;;  %v263_v54 = vpop.f32.mrf.mxu1 }
  0xae   :  { %v290_v50 = vadd.f32 %v289_v48, %v276_v47  ;;  %v264_v56 = vadd.f32 %v263_v54, %v250_v51 }
  0xb0   :  { %v295_v53 = vmul.f32 2.0, %v290_v50  ;;  %v296_v61 = vmul.f32 2.0, %v264_v56 }
  0xb2   :  { %v299_v55 = vmax.f32 %v295_v53, 0.0  ;;  %v300_v0 = vmax.f32 %v296_v61, 0.0 }
  0xb3   :  { %v277_v57 = vpop.f32.mrf.mxu2 }
  0xb4   :  { %v302_v58 = vpack.c.bf16 %v299_v55, %v298_v52  ;;  %v278_v59 = vadd.f32 %v277_v57, %v65_v44  ;;  %v291_v60 = vpop.f32.mrf.mxu3 }
  0xb6   :  { %304 = vst [vmem:[%s745_s3] sm:$0xff] %v302_v58  ;;  %v292_v62 = vadd.f32 %v291_v60, %v278_v59 }
  0xb8   :  { %v297_v63 = vmul.f32 2.0, %v292_v62 }
  0xba   :  { %v301_v1 = vmax.f32 %v297_v63, 0.0 }
  0xbc   :  { %v303_v2 = vpack.c.bf16 %v301_v1, %v300_v0 }
  0xbe   :  { %305 = vst [vmem:[%s745_s3 + $0x8] sm:$0xff] %v303_v2 }
  0xbf   :  { %310 = vsyncpa [#allocation3], 1 }

// kernel: resnet_forward.52
= control target key start
LH: loop header
LB: loop body
LE: loop exit
PB: predicated region body
PF: predicated region fallthrough
CT: control target
= control target key end

     0   :  { %s1132_s12 = smov 0   ;;  %s1134_s13 = smov 0   ;;  %s1358_s0 = inlined_call_operand.vmem [shape: bf16[16,256], index: 0, kind: input, shape index: {}]   ;;  %s1359_s1 = inlined_call_operand.vmem [shape: bf16[256,512], index: 1, kind: input, shape index: {}]   ;;  %s1360_s2 = inlined_call_operand.vmem [shape: f32[1,512], index: 2, kind: input, shape index: {}]   ;;  %s1361_s3 = inlined_call_operand.vmem [shape: bf16[16,512], index: 3, kind: output, shape index: {}]  }
   0x1   :  { %s1136_s14 = smov 0   ;;  %s1138_s15 = smov 0  }
   0x2   :  { %s1140_s16 = smov 0  }
   0x3 LB: > { %s28_s17 = sadd.s32 1, %s1106_s15  ;;  %s843_s18 = sadd.s32 4294967295, %s1110_s16   ;;  %s1110_s16 = sphi %s1140_s16, %s13_s16   ;;  %s1106_s15 = sphi %s1138_s15, %s1366_s15   ;;  %s1102_s14 = sphi %s1136_s14, %s1365_s14   ;;  %s1098_s13 = sphi %s1134_s13, %s1364_s13   ;;  %s1094_s12 = sphi %s1132_s12, %s1363_s12  }
   0x4   : > { %p30_p0 = scmp.ge.s32.totalorder %s28_s17, 2  ;;  %p76_p1 = scmp.ne.s32.totalorder %s1098_s13, %s1094_s12 }
   0x5   : > { %p77_p2 = scmp.eq.s32.totalorder %s1110_s16, 0  ;;  %p134_p4 = scmp.eq.s32.totalorder %s843_s18, 1 }
   0x6   : > { %s1368_s17 = smov (%p30_p0, %s28_s17), 0  ;;  %s69_s20 = sadd.s32 1, %s1098_s13 }
   0x7   : > { %p78_p3 = por %p77_p2, %p76_p1  ;;  %s65_s19 = ssub.s32 %s1106_s15, %s1368_s17 }
   0x8   : > { %p67_p5 = scmp.eq.s32.totalorder %s65_s19, 0  ;;  %p1167_p6 = por %p134_p4, %p76_p1 }
   0x9   : > { %p847_p7 = scmp.ge.s32.totalorder %s1110_s16, 2 }
   0xa   : > { %s1172_s22 = scalar_select %p67_p5, %s1098_s13, %s69_s20  }
   0xb   : > { %171 = sbr.rel (%p847_p7) target bundleno = 52 (0x34), region = 20 }
  0x10   : > { %174 = sbr.rel (!%p78_p3) target bundleno = 52 (0x34), region = 24  ;;  %s176_s23 = sand.u32 (%p78_p3), 1, %s1098_s13  }
  0x11   : > { %s996_s24 = sshll.u32 (%p78_p3), %s1106_s15, 3  ;;  %s848_s25 = sshll.u32 (%p78_p3), %s176_s23, 8 }
  0x12   : > { %s1180_s28 = scalar_lea.vmem (%p78_p3), %s1359_s1, %s996_s24  ;;  %s1185_s29 = scalar_lea.vmem (%p78_p3), [#allocation2], %s848_s25 }
  0x13   : > { %v275_v0 = vld [vmem:[%s1180_s28] sm:$0xff] (%p78_p3)  ;;  %v277_v1 = vld [vmem:[%s1180_s28 + $0x10] sm:$0xff] (%p78_p3) }
  0x14   : > { %v279_v2 = vld [vmem:[%s1180_s28 + $0x20] sm:$0xff] (%p78_p3)  ;;  %276 = vst [vmem:[%s1185_s29] sm:$0xff] (%p78_p3), %v275_v0  ;;  %v281_v3 = vld [vmem:[%s1180_s28 + $0x30] sm:$0xff] (%p78_p3) }
  0x15   : > { %278 = vst [vmem:[%s1185_s29 + $0x8] sm:$0xff] %v277_v1  ;;  %v283_v4 = vld [vmem:[%s1180_s28 + $0x40] sm:$0xff]  ;;  %v285_v5 = vld [vmem:[%s1180_s28 + $0x50] sm:$0xff] }
  0x16   : > { %280 = vst [vmem:[%s1185_s29 + $0x10] sm:$0xff] %v279_v2  ;;  %v287_v6 = vld [vmem:[%s1180_s28 + $0x60] sm:$0xff]  ;;  %v289_v7 = vld [vmem:[%s1180_s28 + $0x70] sm:$0xff] }
  0x17   : > { %282 = vst [vmem:[%s1185_s29 + $0x18] sm:$0xff] %v281_v3  ;;  %v291_v8 = vld [vmem:[%s1180_s28 + $0x80] sm:$0xff]  ;;  %v293_v9 = vld [vmem:[%s1180_s28 + $0x90] sm:$0xff] }
  0x18   : > { %284 = vst [vmem:[%s1185_s29 + $0x20] sm:$0xff] %v283_v4  ;;  %v295_v10 = vld [vmem:[%s1180_s28 + $0xa0] sm:$0xff]  ;;  %v297_v11 = vld [vmem:[%s1180_s28 + $0xb0] sm:$0xff] }
  0x19   : > { %286 = vst [vmem:[%s1185_s29 + $0x28] sm:$0xff] %v285_v5  ;;  %v299_v12 = vld [vmem:[%s1180_s28 + $0xc0] sm:$0xff]  ;;  %v301_v13 = vld [vmem:[%s1180_s28 + $0xd0] sm:$0xff] }
  0x1a   : > { %288 = vst [vmem:[%s1185_s29 + $0x30] sm:$0xff] %v287_v6  ;;  %v303_v14 = vld [vmem:[%s1180_s28 + $0xe0] sm:$0xff]  ;;  %v305_v15 = vld [vmem:[%s1180_s28 + $0xf0] sm:$0xff] }
  0x1b   : > { %290 = vst [vmem:[%s1185_s29 + $0x38] sm:$0xff] %v289_v7  ;;  %v307_v16 = vld [vmem:[%s1180_s28 + $0x100] sm:$0xff]  ;;  %v309_v17 = vld [vmem:[%s1180_s28 + $0x110] sm:$0xff] }
  0x1c   : > { %292 = vst [vmem:[%s1185_s29 + $0x40] sm:$0xff] %v291_v8  ;;  %v311_v18 = vld [vmem:[%s1180_s28 + $0x120] sm:$0xff]  ;;  %v313_v19 = vld [vmem:[%s1180_s28 + $0x130] sm:$0xff] }
  0x1d   : > { %294 = vst [vmem:[%s1185_s29 + $0x48] sm:$0xff] %v293_v9  ;;  %v315_v20 = vld [vmem:[%s1180_s28 + $0x140] sm:$0xff]  ;;  %v317_v21 = vld [vmem:[%s1180_s28 + $0x150] sm:$0xff] }
  0x1e   : > { %296 = vst [vmem:[%s1185_s29 + $0x50] sm:$0xff] %v295_v10  ;;  %v319_v22 = vld [vmem:[%s1180_s28 + $0x160] sm:$0xff]  ;;  %v321_v23 = vld [vmem:[%s1180_s28 + $0x170] sm:$0xff] }
  0x1f   : > { %298 = vst [vmem:[%s1185_s29 + $0x58] sm:$0xff] %v297_v11  ;;  %v323_v24 = vld [vmem:[%s1180_s28 + $0x180] sm:$0xff]  ;;  %v325_v25 = vld [vmem:[%s1180_s28 + $0x190] sm:$0xff] }
  0x20   : > { %300 = vst [vmem:[%s1185_s29 + $0x60] sm:$0xff] %v299_v12  ;;  %v327_v26 = vld [vmem:[%s1180_s28 + $0x1a0] sm:$0xff]  ;;  %v329_v27 = vld [vmem:[%s1180_s28 + $0x1b0] sm:$0xff] }
  0x21   : > { %302 = vst [vmem:[%s1185_s29 + $0x68] sm:$0xff] %v301_v13  ;;  %v331_v28 = vld [vmem:[%s1180_s28 + $0x1c0] sm:$0xff]  ;;  %v333_v29 = vld [vmem:[%s1180_s28 + $0x1d0] sm:$0xff] }
  0x22   : > { %304 = vst [vmem:[%s1185_s29 + $0x70] sm:$0xff] %v303_v14  ;;  %v335_v30 = vld [vmem:[%s1180_s28 + $0x1e0] sm:$0xff]  ;;  %v337_v31 = vld [vmem:[%s1180_s28 + $0x1f0] sm:$0xff] }
  0x23   : > { %306 = vst [vmem:[%s1185_s29 + $0x78] sm:$0xff] %v305_v15 }
  0x24   : > { %308 = vst [vmem:[%s1185_s29 + $0x80] sm:$0xff] %v307_v16 }
  0x25   : > { %310 = vst [vmem:[%s1185_s29 + $0x88] sm:$0xff] %v309_v17 }
  0x26   : > { %312 = vst [vmem:[%s1185_s29 + $0x90] sm:$0xff] %v311_v18 }
  0x27   : > { %314 = vst [vmem:[%s1185_s29 + $0x98] sm:$0xff] %v313_v19 }
  0x28   : > { %316 = vst [vmem:[%s1185_s29 + $0xa0] sm:$0xff] %v315_v20 }
  0x29   : > { %318 = vst [vmem:[%s1185_s29 + $0xa8] sm:$0xff] %v317_v21 }
  0x2a   : > { %320 = vst [vmem:[%s1185_s29 + $0xb0] sm:$0xff] %v319_v22 }
  0x2b   : > { %322 = vst [vmem:[%s1185_s29 + $0xb8] sm:$0xff] %v321_v23 }
  0x2c   : > { %324 = vst [vmem:[%s1185_s29 + $0xc0] sm:$0xff] %v323_v24 }
  0x2d   : > { %326 = vst [vmem:[%s1185_s29 + $0xc8] sm:$0xff] %v325_v25 }
  0x2e   : > { %328 = vst [vmem:[%s1185_s29 + $0xd0] sm:$0xff] %v327_v26 }
  0x2f   : > { %330 = vst [vmem:[%s1185_s29 + $0xd8] sm:$0xff] %v329_v27 }
  0x30   : > { %332 = vst [vmem:[%s1185_s29 + $0xe0] sm:$0xff] %v331_v28 }
  0x31   : > { %334 = vst [vmem:[%s1185_s29 + $0xe8] sm:$0xff] %v333_v29 }
  0x32   : > { %336 = vst [vmem:[%s1185_s29 + $0xf0] sm:$0xff] %v335_v30 }
  0x33   : > { %338 = vst [vmem:[%s1185_s29 + $0xf8] sm:$0xff] %v337_v31 }
  0x34 PF: > { %p851_p8 = scmp.ge.s32.totalorder %s1110_s16, 1  ;;  %p351_p9 = scmp.lt.s32.totalorder %s1110_s16, 3 }
  0x36   : > { %p352_p10 = pnand %p851_p8, %p351_p9 }
  0x37   : > { %s358_s30 = sand.u32 (!%p352_p10), 1, %s1094_s12   ;;  %s854_s20 = sshll.u32 (!%p352_p10), %s1102_s14, 1 }
  0x38   : > { %355 = sbr.rel (%p352_p10) target bundleno = 253 (0xfd), region = 66  ;;  %s852_s4 = sshll.u32 (!%p352_p10), %s358_s30, 8 }
  0x39   : > { %s1253_s5 = scalar_lea.vmem (!%p352_p10), [#allocation2], %s852_s4  ;;  %p409_p11 = scmp.lt.s32.totalorder (!%p352_p10), %s854_s20, 3 }
  0x3a   : > { %s853_s26 = sshll.u32 (!%p352_p10), %s358_s30, 4 }
  0x3b   : > { %s393_s27 = scalar_lea.vmem (!%p352_p10), [#allocation3], %s853_s26 }
  0x3d   : > { %v921_v32 = vld [vmem:[%s1253_s5 + $0x70] sm:$0xf]  ;;  %v1014_v33 = vld [vmem:[%s1253_s5 + $0x74] sm:$0xf0]  ;;  %v1013_v37 = vld [vmem:[%s1253_s5 + $0x74] sm:$0xf] }
  0x3e   : > { %v985_v34 = vld [vmem:[%s1253_s5 + $0xf0] sm:$0xf]  ;;  %v922_v35 = vor.u32 %v1014_v33, %v921_v32  ;;  %v1030_v36 = vld [vmem:[%s1253_s5 + $0xf4] sm:$0xf0]  ;;  %v923_v38 = vld [vmem:[%s1253_s5 + $0x78] sm:$0xf0] }
  0x3f   : > { %v986_v39 = vor.u32 %v1030_v36, %v985_v34  ;;  %v926_v40 = vor.u32 %v1013_v37, %v923_v38  ;;  %v1029_v41 = vld [vmem:[%s1253_s5 + $0xf4] sm:$0xf]  ;;  %v987_v42 = vld [vmem:[%s1253_s5 + $0xf8] sm:$0xf0]  ;;  %v913_v43 = vld [vmem:[%s1253_s5 + $0x60] sm:$0xf] }
  0x40   : > { %625 = vmatpush.bf16.msra.mxu0 %v922_v35  ;;  %v990_v44 = vor.u32 %v1029_v41, %v987_v42  ;;  %v1012_v45 = vld [vmem:[%s1253_s5 + $0x64] sm:$0xf0]  ;;  %v977_v46 = vld [vmem:[%s1253_s5 + $0xe0] sm:$0xf]  ;;  %v1011_v50 = vld [vmem:[%s1253_s5 + $0x64] sm:$0xf] }
  0x41   : > { %v1028_v47 = vld [vmem:[%s1253_s5 + $0xe4] sm:$0xf0]  ;;  %639 = vmatpush.bf16.msra.mxu1 %v986_v39  ;;  %653 = vmatpush.bf16.msra.mxu2 %v926_v40  ;;  %v914_v48 = vor.u32 %v1012_v45, %v913_v43  ;;  %v915_v51 = vld [vmem:[%s1253_s5 + $0x68] sm:$0xf0]  ;;  %v1027_v52 = vld [vmem:[%s1253_s5 + $0xe4] sm:$0xf] }
  0x42   : > { %v978_v49 = vor.u32 %v1028_v47, %v977_v46  ;;  %667 = vmatpush.bf16.msra.mxu3 %v990_v44  ;;  %v918_v53 = vor.u32 %v1011_v50, %v915_v51  ;;  %v979_v54 = vld [vmem:[%s1253_s5 + $0xe8] sm:$0xf0]  ;;  %v905_v55 = vld [vmem:[%s1253_s5 + $0x50] sm:$0xf]  ;;  %v1010_v56 = vld [vmem:[%s1253_s5 + $0x54] sm:$0xf0] }
  0x43   : > { %v982_v57 = vor.u32 %v1027_v52, %v979_v54  ;;  %v969_v58 = vld [vmem:[%s1253_s5 + $0xd0] sm:$0xf]  ;;  %v1026_v59 = vld [vmem:[%s1253_s5 + $0xd4] sm:$0xf0]  ;;  %v1009_v60 = vld [vmem:[%s1253_s5 + $0x54] sm:$0xf]  ;;  %v906_v61 = vor.u32 %v1010_v56, %v905_v55 }
  0x44   : > { %626 = vmatpush.bf16.msra.mxu0 %v914_v48  ;;  %v907_v62 = vld [vmem:[%s1253_s5 + $0x58] sm:$0xf0]  ;;  %v1025_v63 = vld [vmem:[%s1253_s5 + $0xd4] sm:$0xf]  ;;  %v970_v1 = vor.u32 %v1026_v59, %v969_v58  ;;  %v897_v3 = vld [vmem:[%s1253_s5 + $0x40] sm:$0xf] }
  0x45   : > { %v971_v0 = vld [vmem:[%s1253_s5 + $0xd8] sm:$0xf0]  ;;  %640 = vmatpush.bf16.msra.mxu1 %v978_v49  ;;  %654 = vmatpush.bf16.msra.mxu2 %v918_v53  ;;  %v910_v2 = vor.u32 %v1009_v60, %v907_v62  ;;  %v1008_v4 = vld [vmem:[%s1253_s5 + $0x44] sm:$0xf0]  ;;  %v961_v5 = vld [vmem:[%s1253_s5 + $0xc0] sm:$0xf] }
  0x46   : > { %668 = vmatpush.bf16.msra.mxu3 %v982_v57  ;;  %v974_v6 = vor.u32 %v1025_v63, %v971_v0  ;;  %v1024_v7 = vld [vmem:[%s1253_s5 + $0xc4] sm:$0xf0]  ;;  %v1007_v8 = vld [vmem:[%s1253_s5 + $0x44] sm:$0xf]  ;;  %v899_v9 = vld [vmem:[%s1253_s5 + $0x48] sm:$0xf0]  ;;  %v898_v12 = vor.u32 %v1008_v4, %v897_v3 }
  0x47   : > { %v1023_v10 = vld [vmem:[%s1253_s5 + $0xc4] sm:$0xf]  ;;  %v963_v11 = vld [vmem:[%s1253_s5 + $0xc8] sm:$0xf0]  ;;  %v962_v13 = vor.u32 %v1024_v7, %v961_v5  ;;  %v902_v14 = vor.u32 %v1007_v8, %v899_v9  ;;  %v889_v15 = vld [vmem:[%s1253_s5 + $0x30] sm:$0xf] }
  0x48   : > { %627 = vmatpush.bf16.msra.mxu0 %v906_v61  ;;  %v1006_v16 = vld [vmem:[%s1253_s5 + $0x34] sm:$0xf0]  ;;  %v953_v17 = vld [vmem:[%s1253_s5 + $0xb0] sm:$0xf]  ;;  %v966_v18 = vor.u32 %v1023_v10, %v963_v11  ;;  %v1005_v20 = vld [vmem:[%s1253_s5 + $0x34] sm:$0xf] }
  0x49   : > { %641 = vmatpush.bf16.msra.mxu1 %v970_v1  ;;  %655 = vmatpush.bf16.msra.mxu2 %v910_v2  ;;  %v1022_v19 = vld [vmem:[%s1253_s5 + $0xb4] sm:$0xf0]  ;;  %v891_v21 = vld [vmem:[%s1253_s5 + $0x38] sm:$0xf0]  ;;  %v1021_v22 = vld [vmem:[%s1253_s5 + $0xb4] sm:$0xf]  ;;  %v890_v24 = vor.u32 %v1006_v16, %v889_v15 }
  0x4a   : > { %669 = vmatpush.bf16.msra.mxu3 %v974_v6  ;;  %v955_v23 = vld [vmem:[%s1253_s5 + $0xb8] sm:$0xf0]  ;;  %v954_v25 = vor.u32 %v1022_v19, %v953_v17  ;;  %v894_v26 = vor.u32 %v1005_v20, %v891_v21  ;;  %v881_v27 = vld [vmem:[%s1253_s5 + $0x20] sm:$0xf]  ;;  %v1004_v28 = vld [vmem:[%s1253_s5 + $0x24] sm:$0xf0] }
  0x4b   : > { %v945_v29 = vld [vmem:[%s1253_s5 + $0xa0] sm:$0xf]  ;;  %v958_v30 = vor.u32 %v1021_v22, %v955_v23  ;;  %v1020_v31 = vld [vmem:[%s1253_s5 + $0xa4] sm:$0xf0]  ;;  %v1003_v32 = vld [vmem:[%s1253_s5 + $0x24] sm:$0xf]  ;;  %v882_v36 = vor.u32 %v1004_v28, %v881_v27 }
  0x4c   : > { %628 = vmatpush.bf16.msra.mxu0 %v898_v12  ;;  %v883_v33 = vld [vmem:[%s1253_s5 + $0x28] sm:$0xf0]  ;;  %v1019_v34 = vld [vmem:[%s1253_s5 + $0xa4] sm:$0xf]  ;;  %v946_v37 = vor.u32 %v1020_v31, %v945_v29  ;;  %v873_v39 = vld [vmem:[%s1253_s5 + $0x10] sm:$0xf] }
  0x4d   : > { %642 = vmatpush.bf16.msra.mxu1 %v962_v13  ;;  %656 = vmatpush.bf16.msra.mxu2 %v902_v14  ;;  %v947_v35 = vld [vmem:[%s1253_s5 + $0xa8] sm:$0xf0]  ;;  %v886_v38 = vor.u32 %v1003_v32, %v883_v33  ;;  %v1002_v40 = vld [vmem:[%s1253_s5 + $0x14] sm:$0xf0]  ;;  %v937_v41 = vld [vmem:[%s1253_s5 + $0x90] sm:$0xf] }
  0x4e   : > { %670 = vmatpush.bf16.msra.mxu3 %v966_v18  ;;  %v950_v42 = vor.u32 %v1019_v34, %v947_v35  ;;  %v1018_v43 = vld [vmem:[%s1253_s5 + $0x94] sm:$0xf0]  ;;  %v1001_v44 = vld [vmem:[%s1253_s5 + $0x14] sm:$0xf]  ;;  %v875_v45 = vld [vmem:[%s1253_s5 + $0x18] sm:$0xf0]  ;;  %v874_v48 = vor.u32 %v1002_v40, %v873_v39 }
  0x4f   : > { %v1017_v46 = vld [vmem:[%s1253_s5 + $0x94] sm:$0xf]  ;;  %v939_v47 = vld [vmem:[%s1253_s5 + $0x98] sm:$0xf0]  ;;  %v938_v49 = vor.u32 %v1018_v43, %v937_v41  ;;  %v878_v50 = vor.u32 %v1001_v44, %v875_v45  ;;  %v865_v51 = vld [vmem:[%s1253_s5] sm:$0xf] }
  0x50   : > { %629 = vmatpush.bf16.msra.mxu0 %v890_v24  ;;  %v1000_v52 = vld [vmem:[%s1253_s5 + $0x4] sm:$0xf0]  ;;  %v929_v53 = vld [vmem:[%s1253_s5 + $0x80] sm:$0xf]  ;;  %v942_v54 = vor.u32 %v1017_v46, %v939_v47  ;;  %v999_v56 = vld [vmem:[%s1253_s5 + $0x4] sm:$0xf] }
  0x51   : > { %643 = vmatpush.bf16.msra.mxu1 %v954_v25  ;;  %657 = vmatpush.bf16.msra.mxu2 %v894_v26  ;;  %v1016_v55 = vld [vmem:[%s1253_s5 + $0x84] sm:$0xf0]  ;;  %v867_v57 = vld [vmem:[%s1253_s5 + $0x8] sm:$0xf0]  ;;  %v1015_v58 = vld [vmem:[%s1253_s5 + $0x84] sm:$0xf]  ;;  %v866_v60 = vor.u32 %v1000_v52, %v865_v51 }
  0x52   : > { %671 = vmatpush.bf16.msra.mxu3 %v958_v30  ;;  %v931_v59 = vld [vmem:[%s1253_s5 + $0x88] sm:$0xf0]  ;;  %v857_v61 = vld [vmem:[%s1358_s0] sm:$0xf]  ;;  %v998_v62 = vld [vmem:[%s1358_s0 + $0x4] sm:$0xf0]  ;;  %v930_v63 = vor.u32 %v1016_v55, %v929_v53  ;;  %v870_v0 = vor.u32 %v999_v56, %v867_v57 }
  0x53   : > { %v997_v1 = vld [vmem:[%s1358_s0 + $0x4] sm:$0xf]  ;;  %v859_v2 = vld [vmem:[%s1358_s0 + $0x8] sm:$0xf0]  ;;  %v934_v3 = vor.u32 %v1015_v58, %v931_v59  ;;  %v858_v4 = vor.u32 %v998_v62, %v857_v61  ;;  %s1370_s20 = smov (!%p409_p11, %s854_s20), 3  ;;  %s1031_s12 = sshll.u32 (%p1167_p6), %s1102_s14, 3 }
  0x54   : > { %630 = vmatpush.bf16.msra.mxu0 %v882_v36  ;;  %v862_v5 = vor.u32 %v997_v1, %v859_v2  ;;  %s411_s25 = scalar_lea.vmem %s1360_s2, %s1370_s20  ;;  %s701_s30 = scalar_lea.vmem (%p1167_p6), %s1361_s3, %s1031_s12 }
  0x55   : > { %644 = vmatpush.bf16.msra.mxu1 %v946_v37  ;;  %658 = vmatpush.bf16.msra.mxu2 %v886_v38  ;;  %v449_v6 = vld [vmem:[%s411_s25] sm:$0x3] }
  0x56   : > { %672 = vmatpush.bf16.msra.mxu3 %v950_v42  ;;  %v451_v7 = vperm.slane %v449_v6, 0  ;;  %v452_v10 = vperm.slane %v449_v6, 1 }
  0x58   : > { %631 = vmatpush.bf16.msra.mxu0 %v874_v48 }
  0x59   : > { %645 = vmatpush.bf16.msra.mxu1 %v938_v49  ;;  %659 = vmatpush.bf16.msra.mxu2 %v878_v50 }
  0x5a   : > { %673 = vmatpush.bf16.msra.mxu3 %v942_v54 }
  0x5c   : > { %632 = vmatpush.bf16.msra.mxu0 %v866_v60 }
  0x5d   : > { %646 = vmatpush.bf16.msra.mxu1 %v930_v63  ;;  %660 = vmatpush.bf16.msra.mxu2 %v870_v0 }
  0x5e   : > { %674 = vmatpush.bf16.msra.mxu3 %v934_v3 }
  0x5f   : > { %633 = vmatmul.bf16.vlgmr.msra.gmra.mxu0 %v858_v4 }
  0x60   : > { %647 = vmatmul.bf16.vlgmr.msra.gmra.mxu1 %v862_v5  ;;  %661 = vmatmul.bf16.vlgmr.msra.gmra.mxu2 %v858_v4 }
  0x61   : > { %675 = vmatmul.bf16.vlgmr.msra.gmra.mxu3 %v862_v5 }
  0xdc   : > { %v634_v8 = vpop.f32.mrf.mxu0 }
  0xdd   : > { %v635_v9 = vadd.f32 %v634_v8, %v451_v7  ;;  %v648_v11 = vpop.f32.mrf.mxu1 }
  0xdf   : > { %v649_v12 = vadd.f32 %v648_v11, %v635_v9 }
  0xe1   : > { %v681_v17 = vmax.f32 %v649_v12, 0.0 }
  0xe3   : > { %v662_v13 = vpop.f32.mrf.mxu2 }
  0xe4   : > { %v663_v14 = vadd.f32 %v662_v13, %v452_v10  ;;  %v676_v15 = vpop.f32.mrf.mxu3  ;;  %v636_v16 = vpop.f32.mrf.mxu0 }
  0xe5   : > { %v637_v20 = vadd.f32 %v636_v16, %v451_v7  ;;  %v650_v22 = vpop.f32.mrf.mxu1 }
  0xe6   : > { %v677_v18 = vadd.f32 %v676_v15, %v663_v14 }
  0xe7   : > { %v651_v24 = vadd.f32 %v650_v22, %v637_v20 }
  0xe8   : > { %v682_v19 = vmax.f32 %v677_v18, 0.0 }
  0xe9   : > { %v683_v28 = vmax.f32 %v651_v24, 0.0 }
  0xea   : > { %v685_v21 = vpack.c.bf16 %v682_v19, %v681_v17 }
  0xeb   : > { %v664_v23 = vpop.f32.mrf.mxu2 }
  0xec   : > { %687 = vst [vmem:[%s393_s27] sm:$0xff] %v685_v21  ;;  %v665_v25 = vadd.f32 %v664_v23, %v452_v10  ;;  %v678_v26 = vpop.f32.mrf.mxu3 }
  0xee   : > { %v679_v27 = vadd.f32 %v678_v26, %v665_v25 }
  0xf0   : > { %v684_v29 = vmax.f32 %v679_v27, 0.0  ;;  %695 = sbr.rel (!%p1167_p6) target bundleno = 253 (0xfd), region = 74 }
  0xf2   : > { %v686_v30 = vpack.c.bf16 %v684_v29, %v683_v28 }
  0xf3   : > { %v732_v31 = vld [vmem:[%s393_s27] sm:$0xff] (%p1167_p6) }
  0xf4   : > { %688 = vst [vmem:[%s393_s27 + $0x8] sm:$0xff] %v686_v30 }
  0xf5   : > { %733 = vst [vmem:[%s701_s30] sm:$0xff] %v732_v31 }
  0xfb   : > { %v734_v32 = vld [vmem:[%s393_s27 + $0x8] sm:$0xff] }
  0xfc   : > { %735 = vst [vmem:[%s701_s30 + $0x10] sm:$0xff] %v734_v32 }
  0xfd PF: > { %s13_s16 = sadd.s32 1, %s1110_s16   ;;  %s1363_s12 = smov %s1098_s13 }
  0xfe   : > { %p10_p12 = scmp.ge.s32.totalorder %s13_s16, 4   ;;  %s1364_s13 = smov %s1172_s22 }
  0xff   : > { %s1365_s14 = smov %s1106_s15  ;;  %s1366_s15 = smov %s1368_s17 }
 0x100   :  { %12 = sbr.rel (!%p10_p12) target bundleno = 3 (0x3), region = 149 }

// kernel: resnet_forward.53
= control target key start
LH: loop header
LB: loop body
LE: loop exit
PB: predicated region body
PF: predicated region fallthrough
CT: control target
= control target key end

     0   :  { %s1128_s12 = smov 0   ;;  %s1130_s13 = smov 0   ;;  %s1354_s0 = inlined_call_operand.vmem [shape: bf16[16,256], index: 0, kind: input, shape index: {}]   ;;  %s1355_s1 = inlined_call_operand.vmem [shape: bf16[256,512], index: 1, kind: input, shape index: {}]   ;;  %s1356_s2 = inlined_call_operand.vmem [shape: f32[1,512], index: 2, kind: input, shape index: {}]   ;;  %s1357_s3 = inlined_call_operand.vmem [shape: bf16[16,512], index: 3, kind: output, shape index: {}]  }
   0x1   :  { %s1132_s14 = smov 0   ;;  %s1134_s15 = smov 0  }
   0x2   :  { %s1136_s16 = smov 0  }
   0x3 LB: > { %s28_s17 = sadd.s32 1, %s1102_s15  ;;  %s839_s18 = sadd.s32 4294967295, %s1106_s16   ;;  %s1106_s16 = sphi %s1136_s16, %s13_s16   ;;  %s1102_s15 = sphi %s1134_s15, %s1362_s15   ;;  %s1098_s14 = sphi %s1132_s14, %s1361_s14   ;;  %s1094_s13 = sphi %s1130_s13, %s1360_s13   ;;  %s1090_s12 = sphi %s1128_s12, %s1359_s12  }
   0x4   : > { %p30_p0 = scmp.ge.s32.totalorder %s28_s17, 2  ;;  %p76_p1 = scmp.ne.s32.totalorder %s1094_s13, %s1090_s12 }
   0x5   : > { %p77_p2 = scmp.eq.s32.totalorder %s1106_s16, 0  ;;  %p134_p4 = scmp.eq.s32.totalorder %s839_s18, 1 }
   0x6   : > { %s1364_s17 = smov (%p30_p0, %s28_s17), 0  ;;  %s69_s20 = sadd.s32 1, %s1094_s13 }
   0x7   : > { %p78_p3 = por %p77_p2, %p76_p1  ;;  %s65_s19 = ssub.s32 %s1102_s15, %s1364_s17 }
   0x8   : > { %p67_p5 = scmp.eq.s32.totalorder %s65_s19, 0  ;;  %p1163_p6 = por %p134_p4, %p76_p1 }
   0x9   : > { %p843_p7 = scmp.ge.s32.totalorder %s1106_s16, 2 }
   0xa   : > { %s1168_s22 = scalar_select %p67_p5, %s1094_s13, %s69_s20  }
   0xb   : > { %171 = sbr.rel (%p843_p7) target bundleno = 52 (0x34), region = 20 }
  0x10   : > { %174 = sbr.rel (!%p78_p3) target bundleno = 52 (0x34), region = 24  ;;  %s176_s23 = sand.u32 (%p78_p3), 1, %s1094_s13  }
  0x11   : > { %s992_s24 = sshll.u32 (%p78_p3), %s1102_s15, 3  ;;  %s844_s25 = sshll.u32 (%p78_p3), %s176_s23, 8 }
  0x12   : > { %s1176_s28 = scalar_lea.vmem (%p78_p3), %s1355_s1, %s992_s24  ;;  %s1181_s29 = scalar_lea.vmem (%p78_p3), [#allocation2], %s844_s25 }
  0x13   : > { %v275_v0 = vld [vmem:[%s1176_s28] sm:$0xff] (%p78_p3)  ;;  %v277_v1 = vld [vmem:[%s1176_s28 + $0x10] sm:$0xff] (%p78_p3) }
  0x14   : > { %v279_v2 = vld [vmem:[%s1176_s28 + $0x20] sm:$0xff] (%p78_p3)  ;;  %276 = vst [vmem:[%s1181_s29] sm:$0xff] (%p78_p3), %v275_v0  ;;  %v281_v3 = vld [vmem:[%s1176_s28 + $0x30] sm:$0xff] (%p78_p3) }
  0x15   : > { %278 = vst [vmem:[%s1181_s29 + $0x8] sm:$0xff] %v277_v1  ;;  %v283_v4 = vld [vmem:[%s1176_s28 + $0x40] sm:$0xff]  ;;  %v285_v5 = vld [vmem:[%s1176_s28 + $0x50] sm:$0xff] }
  0x16   : > { %280 = vst [vmem:[%s1181_s29 + $0x10] sm:$0xff] %v279_v2  ;;  %v287_v6 = vld [vmem:[%s1176_s28 + $0x60] sm:$0xff]  ;;  %v289_v7 = vld [vmem:[%s1176_s28 + $0x70] sm:$0xff] }
  0x17   : > { %282 = vst [vmem:[%s1181_s29 + $0x18] sm:$0xff] %v281_v3  ;;  %v291_v8 = vld [vmem:[%s1176_s28 + $0x80] sm:$0xff]  ;;  %v293_v9 = vld [vmem:[%s1176_s28 + $0x90] sm:$0xff] }
  0x18   : > { %284 = vst [vmem:[%s1181_s29 + $0x20] sm:$0xff] %v283_v4  ;;  %v295_v10 = vld [vmem:[%s1176_s28 + $0xa0] sm:$0xff]  ;;  %v297_v11 = vld [vmem:[%s1176_s28 + $0xb0] sm:$0xff] }
  0x19   : > { %286 = vst [vmem:[%s1181_s29 + $0x28] sm:$0xff] %v285_v5  ;;  %v299_v12 = vld [vmem:[%s1176_s28 + $0xc0] sm:$0xff]  ;;  %v301_v13 = vld [vmem:[%s1176_s28 + $0xd0] sm:$0xff] }
  0x1a   : > { %288 = vst [vmem:[%s1181_s29 + $0x30] sm:$0xff] %v287_v6  ;;  %v303_v14 = vld [vmem:[%s1176_s28 + $0xe0] sm:$0xff]  ;;  %v305_v15 = vld [vmem:[%s1176_s28 + $0xf0] sm:$0xff] }
  0x1b   : > { %290 = vst [vmem:[%s1181_s29 + $0x38] sm:$0xff] %v289_v7  ;;  %v307_v16 = vld [vmem:[%s1176_s28 + $0x100] sm:$0xff]  ;;  %v309_v17 = vld [vmem:[%s1176_s28 + $0x110] sm:$0xff] }
  0x1c   : > { %292 = vst [vmem:[%s1181_s29 + $0x40] sm:$0xff] %v291_v8  ;;  %v311_v18 = vld [vmem:[%s1176_s28 + $0x120] sm:$0xff]  ;;  %v313_v19 = vld [vmem:[%s1176_s28 + $0x130] sm:$0xff] }
  0x1d   : > { %294 = vst [vmem:[%s1181_s29 + $0x48] sm:$0xff] %v293_v9  ;;  %v315_v20 = vld [vmem:[%s1176_s28 + $0x140] sm:$0xff]  ;;  %v317_v21 = vld [vmem:[%s1176_s28 + $0x150] sm:$0xff] }
  0x1e   : > { %296 = vst [vmem:[%s1181_s29 + $0x50] sm:$0xff] %v295_v10  ;;  %v319_v22 = vld [vmem:[%s1176_s28 + $0x160] sm:$0xff]  ;;  %v321_v23 = vld [vmem:[%s1176_s28 + $0x170] sm:$0xff] }
  0x1f   : > { %298 = vst [vmem:[%s1181_s29 + $0x58] sm:$0xff] %v297_v11  ;;  %v323_v24 = vld [vmem:[%s1176_s28 + $0x180] sm:$0xff]  ;;  %v325_v25 = vld [vmem:[%s1176_s28 + $0x190] sm:$0xff] }
  0x20   : > { %300 = vst [vmem:[%s1181_s29 + $0x60] sm:$0xff] %v299_v12  ;;  %v327_v26 = vld [vmem:[%s1176_s28 + $0x1a0] sm:$0xff]  ;;  %v329_v27 = vld [vmem:[%s1176_s28 + $0x1b0] sm:$0xff] }
  0x21   : > { %302 = vst [vmem:[%s1181_s29 + $0x68] sm:$0xff] %v301_v13  ;;  %v331_v28 = vld [vmem:[%s1176_s28 + $0x1c0] sm:$0xff]  ;;  %v333_v29 = vld [vmem:[%s1176_s28 + $0x1d0] sm:$0xff] }
  0x22   : > { %304 = vst [vmem:[%s1181_s29 + $0x70] sm:$0xff] %v303_v14  ;;  %v335_v30 = vld [vmem:[%s1176_s28 + $0x1e0] sm:$0xff]  ;;  %v337_v31 = vld [vmem:[%s1176_s28 + $0x1f0] sm:$0xff] }
  0x23   : > { %306 = vst [vmem:[%s1181_s29 + $0x78] sm:$0xff] %v305_v15 }
  0x24   : > { %308 = vst [vmem:[%s1181_s29 + $0x80] sm:$0xff] %v307_v16 }
  0x25   : > { %310 = vst [vmem:[%s1181_s29 + $0x88] sm:$0xff] %v309_v17 }
  0x26   : > { %312 = vst [vmem:[%s1181_s29 + $0x90] sm:$0xff] %v311_v18 }
  0x27   : > { %314 = vst [vmem:[%s1181_s29 + $0x98] sm:$0xff] %v313_v19 }
  0x28   : > { %316 = vst [vmem:[%s1181_s29 + $0xa0] sm:$0xff] %v315_v20 }
  0x29   : > { %318 = vst [vmem:[%s1181_s29 + $0xa8] sm:$0xff] %v317_v21 }
  0x2a   : > { %320 = vst [vmem:[%s1181_s29 + $0xb0] sm:$0xff] %v319_v22 }
  0x2b   : > { %322 = vst [vmem:[%s1181_s29 + $0xb8] sm:$0xff] %v321_v23 }
  0x2c   : > { %324 = vst [vmem:[%s1181_s29 + $0xc0] sm:$0xff] %v323_v24 }
  0x2d   : > { %326 = vst [vmem:[%s1181_s29 + $0xc8] sm:$0xff] %v325_v25 }
  0x2e   : > { %328 = vst [vmem:[%s1181_s29 + $0xd0] sm:$0xff] %v327_v26 }
  0x2f   : > { %330 = vst [vmem:[%s1181_s29 + $0xd8] sm:$0xff] %v329_v27 }
  0x30   : > { %332 = vst [vmem:[%s1181_s29 + $0xe0] sm:$0xff] %v331_v28 }
  0x31   : > { %334 = vst [vmem:[%s1181_s29 + $0xe8] sm:$0xff] %v333_v29 }
  0x32   : > { %336 = vst [vmem:[%s1181_s29 + $0xf0] sm:$0xff] %v335_v30 }
  0x33   : > { %338 = vst [vmem:[%s1181_s29 + $0xf8] sm:$0xff] %v337_v31 }
  0x34 PF: > { %p847_p8 = scmp.ge.s32.totalorder %s1106_s16, 1  ;;  %p351_p9 = scmp.lt.s32.totalorder %s1106_s16, 3 }
  0x36   : > { %p352_p10 = pnand %p847_p8, %p351_p9 }
  0x37   : > { %s358_s30 = sand.u32 (!%p352_p10), 1, %s1090_s12   ;;  %s850_s20 = sshll.u32 (!%p352_p10), %s1098_s14, 1 }
  0x38   : > { %355 = sbr.rel (%p352_p10) target bundleno = 251 (0xfb), region = 66  ;;  %s848_s4 = sshll.u32 (!%p352_p10), %s358_s30, 8 }
  0x39   : > { %s1249_s5 = scalar_lea.vmem (!%p352_p10), [#allocation2], %s848_s4  ;;  %p409_p11 = scmp.lt.s32.totalorder (!%p352_p10), %s850_s20, 3 }
  0x3a   : > { %s849_s26 = sshll.u32 (!%p352_p10), %s358_s30, 4 }
  0x3b   : > { %s393_s27 = scalar_lea.vmem (!%p352_p10), [#allocation3], %s849_s26 }
  0x3d   : > { %v917_v32 = vld [vmem:[%s1249_s5 + $0x70] sm:$0xf]  ;;  %v1010_v33 = vld [vmem:[%s1249_s5 + $0x74] sm:$0xf0]  ;;  %v1009_v37 = vld [vmem:[%s1249_s5 + $0x74] sm:$0xf] }
  0x3e   : > { %v981_v34 = vld [vmem:[%s1249_s5 + $0xf0] sm:$0xf]  ;;  %v918_v35 = vor.u32 %v1010_v33, %v917_v32  ;;  %v1026_v36 = vld [vmem:[%s1249_s5 + $0xf4] sm:$0xf0]  ;;  %v919_v38 = vld [vmem:[%s1249_s5 + $0x78] sm:$0xf0] }
  0x3f   : > { %v982_v39 = vor.u32 %v1026_v36, %v981_v34  ;;  %v922_v40 = vor.u32 %v1009_v37, %v919_v38  ;;  %v1025_v41 = vld [vmem:[%s1249_s5 + $0xf4] sm:$0xf]  ;;  %v983_v42 = vld [vmem:[%s1249_s5 + $0xf8] sm:$0xf0]  ;;  %v909_v43 = vld [vmem:[%s1249_s5 + $0x60] sm:$0xf] }
  0x40   : > { %625 = vmatpush.bf16.msra.mxu0 %v918_v35  ;;  %v986_v44 = vor.u32 %v1025_v41, %v983_v42  ;;  %v1008_v45 = vld [vmem:[%s1249_s5 + $0x64] sm:$0xf0]  ;;  %v973_v46 = vld [vmem:[%s1249_s5 + $0xe0] sm:$0xf]  ;;  %v1007_v50 = vld [vmem:[%s1249_s5 + $0x64] sm:$0xf] }
  0x41   : > { %v1024_v47 = vld [vmem:[%s1249_s5 + $0xe4] sm:$0xf0]  ;;  %639 = vmatpush.bf16.msra.mxu1 %v982_v39  ;;  %653 = vmatpush.bf16.msra.mxu2 %v922_v40  ;;  %v910_v48 = vor.u32 %v1008_v45, %v909_v43  ;;  %v911_v51 = vld [vmem:[%s1249_s5 + $0x68] sm:$0xf0]  ;;  %v1023_v52 = vld [vmem:[%s1249_s5 + $0xe4] sm:$0xf] }
  0x42   : > { %v974_v49 = vor.u32 %v1024_v47, %v973_v46  ;;  %667 = vmatpush.bf16.msra.mxu3 %v986_v44  ;;  %v914_v53 = vor.u32 %v1007_v50, %v911_v51  ;;  %v975_v54 = vld [vmem:[%s1249_s5 + $0xe8] sm:$0xf0]  ;;  %v901_v55 = vld [vmem:[%s1249_s5 + $0x50] sm:$0xf]  ;;  %v1006_v56 = vld [vmem:[%s1249_s5 + $0x54] sm:$0xf0] }
  0x43   : > { %v978_v57 = vor.u32 %v1023_v52, %v975_v54  ;;  %v965_v58 = vld [vmem:[%s1249_s5 + $0xd0] sm:$0xf]  ;;  %v1022_v59 = vld [vmem:[%s1249_s5 + $0xd4] sm:$0xf0]  ;;  %v1005_v60 = vld [vmem:[%s1249_s5 + $0x54] sm:$0xf]  ;;  %v902_v61 = vor.u32 %v1006_v56, %v901_v55 }
  0x44   : > { %626 = vmatpush.bf16.msra.mxu0 %v910_v48  ;;  %v903_v62 = vld [vmem:[%s1249_s5 + $0x58] sm:$0xf0]  ;;  %v1021_v63 = vld [vmem:[%s1249_s5 + $0xd4] sm:$0xf]  ;;  %v966_v1 = vor.u32 %v1022_v59, %v965_v58  ;;  %v893_v3 = vld [vmem:[%s1249_s5 + $0x40] sm:$0xf] }
  0x45   : > { %v967_v0 = vld [vmem:[%s1249_s5 + $0xd8] sm:$0xf0]  ;;  %640 = vmatpush.bf16.msra.mxu1 %v974_v49  ;;  %654 = vmatpush.bf16.msra.mxu2 %v914_v53  ;;  %v906_v2 = vor.u32 %v1005_v60, %v903_v62  ;;  %v1004_v4 = vld [vmem:[%s1249_s5 + $0x44] sm:$0xf0]  ;;  %v957_v5 = vld [vmem:[%s1249_s5 + $0xc0] sm:$0xf] }
  0x46   : > { %668 = vmatpush.bf16.msra.mxu3 %v978_v57  ;;  %v970_v6 = vor.u32 %v1021_v63, %v967_v0  ;;  %v1020_v7 = vld [vmem:[%s1249_s5 + $0xc4] sm:$0xf0]  ;;  %v1003_v8 = vld [vmem:[%s1249_s5 + $0x44] sm:$0xf]  ;;  %v895_v9 = vld [vmem:[%s1249_s5 + $0x48] sm:$0xf0]  ;;  %v894_v12 = vor.u32 %v1004_v4, %v893_v3 }
  0x47   : > { %v1019_v10 = vld [vmem:[%s1249_s5 + $0xc4] sm:$0xf]  ;;  %v959_v11 = vld [vmem:[%s1249_s5 + $0xc8] sm:$0xf0]  ;;  %v958_v13 = vor.u32 %v1020_v7, %v957_v5  ;;  %v898_v14 = vor.u32 %v1003_v8, %v895_v9  ;;  %v885_v15 = vld [vmem:[%s1249_s5 + $0x30] sm:$0xf] }
  0x48   : > { %627 = vmatpush.bf16.msra.mxu0 %v902_v61  ;;  %v1002_v16 = vld [vmem:[%s1249_s5 + $0x34] sm:$0xf0]  ;;  %v949_v17 = vld [vmem:[%s1249_s5 + $0xb0] sm:$0xf]  ;;  %v962_v18 = vor.u32 %v1019_v10, %v959_v11  ;;  %v1001_v20 = vld [vmem:[%s1249_s5 + $0x34] sm:$0xf] }
  0x49   : > { %641 = vmatpush.bf16.msra.mxu1 %v966_v1  ;;  %655 = vmatpush.bf16.msra.mxu2 %v906_v2  ;;  %v1018_v19 = vld [vmem:[%s1249_s5 + $0xb4] sm:$0xf0]  ;;  %v887_v21 = vld [vmem:[%s1249_s5 + $0x38] sm:$0xf0]  ;;  %v1017_v22 = vld [vmem:[%s1249_s5 + $0xb4] sm:$0xf]  ;;  %v886_v24 = vor.u32 %v1002_v16, %v885_v15 }
  0x4a   : > { %669 = vmatpush.bf16.msra.mxu3 %v970_v6  ;;  %v951_v23 = vld [vmem:[%s1249_s5 + $0xb8] sm:$0xf0]  ;;  %v950_v25 = vor.u32 %v1018_v19, %v949_v17  ;;  %v890_v26 = vor.u32 %v1001_v20, %v887_v21  ;;  %v877_v27 = vld [vmem:[%s1249_s5 + $0x20] sm:$0xf]  ;;  %v1000_v28 = vld [vmem:[%s1249_s5 + $0x24] sm:$0xf0] }
  0x4b   : > { %v941_v29 = vld [vmem:[%s1249_s5 + $0xa0] sm:$0xf]  ;;  %v954_v30 = vor.u32 %v1017_v22, %v951_v23  ;;  %v1016_v31 = vld [vmem:[%s1249_s5 + $0xa4] sm:$0xf0]  ;;  %v999_v32 = vld [vmem:[%s1249_s5 + $0x24] sm:$0xf]  ;;  %v878_v36 = vor.u32 %v1000_v28, %v877_v27 }
  0x4c   : > { %628 = vmatpush.bf16.msra.mxu0 %v894_v12  ;;  %v879_v33 = vld [vmem:[%s1249_s5 + $0x28] sm:$0xf0]  ;;  %v1015_v34 = vld [vmem:[%s1249_s5 + $0xa4] sm:$0xf]  ;;  %v942_v37 = vor.u32 %v1016_v31, %v941_v29  ;;  %v869_v39 = vld [vmem:[%s1249_s5 + $0x10] sm:$0xf] }
  0x4d   : > { %642 = vmatpush.bf16.msra.mxu1 %v958_v13  ;;  %656 = vmatpush.bf16.msra.mxu2 %v898_v14  ;;  %v943_v35 = vld [vmem:[%s1249_s5 + $0xa8] sm:$0xf0]  ;;  %v882_v38 = vor.u32 %v999_v32, %v879_v33  ;;  %v998_v40 = vld [vmem:[%s1249_s5 + $0x14] sm:$0xf0]  ;;  %v933_v41 = vld [vmem:[%s1249_s5 + $0x90] sm:$0xf] }
  0x4e   : > { %670 = vmatpush.bf16.msra.mxu3 %v962_v18  ;;  %v946_v42 = vor.u32 %v1015_v34, %v943_v35  ;;  %v1014_v43 = vld [vmem:[%s1249_s5 + $0x94] sm:$0xf0]  ;;  %v997_v44 = vld [vmem:[%s1249_s5 + $0x14] sm:$0xf]  ;;  %v871_v45 = vld [vmem:[%s1249_s5 + $0x18] sm:$0xf0]  ;;  %v870_v48 = vor.u32 %v998_v40, %v869_v39 }
  0x4f   : > { %v1013_v46 = vld [vmem:[%s1249_s5 + $0x94] sm:$0xf]  ;;  %v935_v47 = vld [vmem:[%s1249_s5 + $0x98] sm:$0xf0]  ;;  %v934_v49 = vor.u32 %v1014_v43, %v933_v41  ;;  %v874_v50 = vor.u32 %v997_v44, %v871_v45  ;;  %v861_v51 = vld [vmem:[%s1249_s5] sm:$0xf] }
  0x50   : > { %629 = vmatpush.bf16.msra.mxu0 %v886_v24  ;;  %v996_v52 = vld [vmem:[%s1249_s5 + $0x4] sm:$0xf0]  ;;  %v925_v53 = vld [vmem:[%s1249_s5 + $0x80] sm:$0xf]  ;;  %v938_v54 = vor.u32 %v1013_v46, %v935_v47  ;;  %v995_v56 = vld [vmem:[%s1249_s5 + $0x4] sm:$0xf] }
  0x51   : > { %643 = vmatpush.bf16.msra.mxu1 %v950_v25  ;;  %657 = vmatpush.bf16.msra.mxu2 %v890_v26  ;;  %v1012_v55 = vld [vmem:[%s1249_s5 + $0x84] sm:$0xf0]  ;;  %v863_v57 = vld [vmem:[%s1249_s5 + $0x8] sm:$0xf0]  ;;  %v1011_v58 = vld [vmem:[%s1249_s5 + $0x84] sm:$0xf]  ;;  %v862_v60 = vor.u32 %v996_v52, %v861_v51 }
  0x52   : > { %671 = vmatpush.bf16.msra.mxu3 %v954_v30  ;;  %v927_v59 = vld [vmem:[%s1249_s5 + $0x88] sm:$0xf0]  ;;  %v853_v61 = vld [vmem:[%s1354_s0] sm:$0xf]  ;;  %v994_v62 = vld [vmem:[%s1354_s0 + $0x4] sm:$0xf0]  ;;  %v926_v63 = vor.u32 %v1012_v55, %v925_v53  ;;  %v866_v0 = vor.u32 %v995_v56, %v863_v57 }
  0x53   : > { %v993_v1 = vld [vmem:[%s1354_s0 + $0x4] sm:$0xf]  ;;  %v855_v2 = vld [vmem:[%s1354_s0 + $0x8] sm:$0xf0]  ;;  %v930_v3 = vor.u32 %v1011_v58, %v927_v59  ;;  %v854_v4 = vor.u32 %v994_v62, %v853_v61  ;;  %s1366_s20 = smov (!%p409_p11, %s850_s20), 3  ;;  %s1027_s12 = sshll.u32 (%p1163_p6), %s1098_s14, 3 }
  0x54   : > { %630 = vmatpush.bf16.msra.mxu0 %v878_v36  ;;  %v858_v5 = vor.u32 %v993_v1, %v855_v2  ;;  %s411_s25 = scalar_lea.vmem %s1356_s2, %s1366_s20  ;;  %s697_s30 = scalar_lea.vmem (%p1163_p6), %s1357_s3, %s1027_s12 }
  0x55   : > { %644 = vmatpush.bf16.msra.mxu1 %v942_v37  ;;  %658 = vmatpush.bf16.msra.mxu2 %v882_v38  ;;  %v449_v6 = vld [vmem:[%s411_s25] sm:$0x3] }
  0x56   : > { %672 = vmatpush.bf16.msra.mxu3 %v946_v42  ;;  %v451_v7 = vperm.slane %v449_v6, 0  ;;  %v452_v10 = vperm.slane %v449_v6, 1 }
  0x58   : > { %631 = vmatpush.bf16.msra.mxu0 %v870_v48 }
  0x59   : > { %645 = vmatpush.bf16.msra.mxu1 %v934_v49  ;;  %659 = vmatpush.bf16.msra.mxu2 %v874_v50 }
  0x5a   : > { %673 = vmatpush.bf16.msra.mxu3 %v938_v54 }
  0x5c   : > { %632 = vmatpush.bf16.msra.mxu0 %v862_v60 }
  0x5d   : > { %646 = vmatpush.bf16.msra.mxu1 %v926_v63  ;;  %660 = vmatpush.bf16.msra.mxu2 %v866_v0 }
  0x5e   : > { %674 = vmatpush.bf16.msra.mxu3 %v930_v3 }
  0x5f   : > { %633 = vmatmul.bf16.vlgmr.msra.gmra.mxu0 %v854_v4 }
  0x60   : > { %647 = vmatmul.bf16.vlgmr.msra.gmra.mxu1 %v858_v5  ;;  %661 = vmatmul.bf16.vlgmr.msra.gmra.mxu2 %v854_v4 }
  0x61   : > { %675 = vmatmul.bf16.vlgmr.msra.gmra.mxu3 %v858_v5 }
  0xdc   : > { %v634_v8 = vpop.f32.mrf.mxu0 }
  0xdd   : > { %v635_v9 = vadd.f32 %v634_v8, %v451_v7  ;;  %v648_v11 = vpop.f32.mrf.mxu1 }
  0xdf   : > { %v649_v13 = vadd.f32 %v648_v11, %v635_v9 }
  0xe3   : > { %v662_v12 = vpop.f32.mrf.mxu2 }
  0xe4   : > { %v663_v14 = vadd.f32 %v662_v12, %v452_v10  ;;  %v676_v15 = vpop.f32.mrf.mxu3  ;;  %v636_v17 = vpop.f32.mrf.mxu0 }
  0xe5   : > { %v637_v19 = vadd.f32 %v636_v17, %v451_v7  ;;  %v650_v22 = vpop.f32.mrf.mxu1 }
  0xe6   : > { %v677_v16 = vadd.f32 %v676_v15, %v663_v14 }
  0xe7   : > { %v651_v24 = vadd.f32 %v650_v22, %v637_v19 }
  0xe8   : > { %v681_v18 = vpack.c.bf16 %v677_v16, %v649_v13 }
  0xea   : > { %683 = vst [vmem:[%s393_s27] sm:$0xff] %v681_v18 }
  0xeb   : > { %v664_v20 = vpop.f32.mrf.mxu2 }
  0xec   : > { %v665_v21 = vadd.f32 %v664_v20, %v452_v10  ;;  %v678_v23 = vpop.f32.mrf.mxu3 }
  0xee   : > { %v679_v25 = vadd.f32 %v678_v23, %v665_v21  ;;  %691 = sbr.rel (!%p1163_p6) target bundleno = 251 (0xfb), region = 74 }
  0xf0   : > { %v682_v26 = vpack.c.bf16 %v679_v25, %v651_v24 }
  0xf1   : > { %v728_v27 = vld [vmem:[%s393_s27] sm:$0xff] (%p1163_p6) }
  0xf2   : > { %684 = vst [vmem:[%s393_s27 + $0x8] sm:$0xff] %v682_v26 }
  0xf3   : > { %729 = vst [vmem:[%s697_s30] sm:$0xff] %v728_v27 }
  0xf9   : > { %v730_v28 = vld [vmem:[%s393_s27 + $0x8] sm:$0xff] }
  0xfa   : > { %731 = vst [vmem:[%s697_s30 + $0x10] sm:$0xff] %v730_v28 }
  0xfb PF: > { %s13_s16 = sadd.s32 1, %s1106_s16   ;;  %s1359_s12 = smov %s1094_s13 }
  0xfc   : > { %p10_p12 = scmp.ge.s32.totalorder %s13_s16, 4   ;;  %s1360_s13 = smov %s1168_s22 }
  0xfd   : > { %s1361_s14 = smov %s1102_s15  ;;  %s1362_s15 = smov %s1364_s17 }
  0xfe   :  { %12 = sbr.rel (!%p10_p12) target bundleno = 3 (0x3), region = 149 }

// kernel: resnet_forward.54
= control target key start
LH: loop header
LB: loop body
LE: loop exit
PB: predicated region body
PF: predicated region fallthrough
CT: control target
= control target key end

     0   :  { %s1825_s15 = smov 0   ;;  %s1827_s16 = smov 0   ;;  %s2224_s0 = inlined_call_operand.vmem [shape: bf16[16,512], index: 0, kind: input, shape index: {}]   ;;  %s2225_s1 = inlined_call_operand.vmem [shape: bf16[512,512], index: 1, kind: input, shape index: {}]   ;;  %s2226_s2 = inlined_call_operand.vmem [shape: f32[1,512], index: 2, kind: input, shape index: {}]   ;;  %s2227_s3 = inlined_call_operand.vmem [shape: bf16[16,512], index: 3, kind: input, shape index: {}]   ;;  %s2228_s4 = inlined_call_operand.vmem [shape: bf16[16,512], index: 4, kind: output, shape index: {}]  }
   0x1   :  { %s1829_s17 = smov 0   ;;  %s1831_s18 = smov 0  }
   0x2   :  { %s1833_s19 = smov 0  }
   0x3 LB: > { %s29_s20 = sadd.s32 1, %s1794_s18  ;;  %s1356_s21 = sadd.s32 4294967295, %s1798_s19   ;;  %s1798_s19 = sphi %s1833_s19, %s14_s19   ;;  %s1794_s18 = sphi %s1831_s18, %s2234_s18   ;;  %s1790_s17 = sphi %s1829_s17, %s2233_s17   ;;  %s1786_s16 = sphi %s1827_s16, %s2232_s16   ;;  %s1782_s15 = sphi %s1825_s15, %s2231_s15  }
   0x4   : > { %p31_p0 = scmp.ge.s32.totalorder %s29_s20, 2  ;;  %p77_p1 = scmp.ne.s32.totalorder %s1786_s16, %s1782_s15 }
   0x5   : > { %p78_p2 = scmp.eq.s32.totalorder %s1798_s19, 0  ;;  %p163_p4 = scmp.eq.s32.totalorder %s1356_s21, 1 }
   0x6   : > { %s2236_s20 = smov (%p31_p0, %s29_s20), 0  ;;  %s70_s24 = sadd.s32 1, %s1786_s16 }
   0x7   : > { %p1857_p3 = por %p78_p2, %p77_p1  ;;  %s66_s23 = ssub.s32 %s1794_s18, %s2236_s20 }
   0x8   : > { %p68_p5 = scmp.eq.s32.totalorder %s66_s23, 0  ;;  %p1864_p6 = por %p163_p4, %p77_p1 }
   0x9   : > { %p1360_p7 = scmp.ge.s32.totalorder %s1798_s19, 2 }
   0xa   : > { %s1869_s26 = scalar_select %p68_p5, %s1786_s16, %s70_s24  }
   0xb   : > { %200 = sbr.rel (%p1360_p7) target bundleno = 90 (0x5a), region = 20 }
  0x10   : > { %203 = sbr.rel (!%p1857_p3) target bundleno = 84 (0x54), region = 24  ;;  %s205_s27 = sand.u32 (%p1857_p3), 1, %s1786_s16  }
  0x11   : > { %s1649_s28 = sshll.u32 (%p1857_p3), %s1794_s18, 3  ;;  %s1361_s29 = sshll.u32 (%p1857_p3), %s205_s27, 9 }
  0x12   : > { %s1879_s6 = scalar_lea.vmem (%p1857_p3), %s2225_s1, %s1649_s28  ;;  %s1884_s7 = scalar_lea.vmem (%p1857_p3), [#allocation2], %s1361_s29 }
  0x13   : > { %v368_v0 = vld [vmem:[%s1879_s6] sm:$0xff] (%p1857_p3)  ;;  %v370_v1 = vld [vmem:[%s1879_s6 + $0x10] sm:$0xff] (%p1857_p3) }
  0x14   : > { %v372_v2 = vld [vmem:[%s1879_s6 + $0x20] sm:$0xff] (%p1857_p3)  ;;  %369 = vst [vmem:[%s1884_s7] sm:$0xff] (%p1857_p3), %v368_v0  ;;  %v374_v3 = vld [vmem:[%s1879_s6 + $0x30] sm:$0xff] (%p1857_p3) }
  0x15   : > { %371 = vst [vmem:[%s1884_s7 + $0x8] sm:$0xff] %v370_v1  ;;  %v376_v4 = vld [vmem:[%s1879_s6 + $0x40] sm:$0xff]  ;;  %v378_v5 = vld [vmem:[%s1879_s6 + $0x50] sm:$0xff] }
  0x16   : > { %373 = vst [vmem:[%s1884_s7 + $0x10] sm:$0xff] %v372_v2  ;;  %v380_v6 = vld [vmem:[%s1879_s6 + $0x60] sm:$0xff]  ;;  %v382_v7 = vld [vmem:[%s1879_s6 + $0x70] sm:$0xff] }
  0x17   : > { %375 = vst [vmem:[%s1884_s7 + $0x18] sm:$0xff] %v374_v3  ;;  %v384_v8 = vld [vmem:[%s1879_s6 + $0x80] sm:$0xff]  ;;  %v386_v9 = vld [vmem:[%s1879_s6 + $0x90] sm:$0xff] }
  0x18   : > { %377 = vst [vmem:[%s1884_s7 + $0x20] sm:$0xff] %v376_v4  ;;  %v388_v10 = vld [vmem:[%s1879_s6 + $0xa0] sm:$0xff]  ;;  %v390_v11 = vld [vmem:[%s1879_s6 + $0xb0] sm:$0xff] }
  0x19   : > { %379 = vst [vmem:[%s1884_s7 + $0x28] sm:$0xff] %v378_v5  ;;  %v392_v12 = vld [vmem:[%s1879_s6 + $0xc0] sm:$0xff]  ;;  %v394_v13 = vld [vmem:[%s1879_s6 + $0xd0] sm:$0xff] }
  0x1a   : > { %381 = vst [vmem:[%s1884_s7 + $0x30] sm:$0xff] %v380_v6  ;;  %v396_v14 = vld [vmem:[%s1879_s6 + $0xe0] sm:$0xff]  ;;  %v398_v15 = vld [vmem:[%s1879_s6 + $0xf0] sm:$0xff] }
  0x1b   : > { %383 = vst [vmem:[%s1884_s7 + $0x38] sm:$0xff] %v382_v7  ;;  %v400_v16 = vld [vmem:[%s1879_s6 + $0x100] sm:$0xff]  ;;  %v402_v17 = vld [vmem:[%s1879_s6 + $0x110] sm:$0xff] }
  0x1c   : > { %385 = vst [vmem:[%s1884_s7 + $0x40] sm:$0xff] %v384_v8  ;;  %v404_v18 = vld [vmem:[%s1879_s6 + $0x120] sm:$0xff]  ;;  %v406_v19 = vld [vmem:[%s1879_s6 + $0x130] sm:$0xff] }
  0x1d   : > { %387 = vst [vmem:[%s1884_s7 + $0x48] sm:$0xff] %v386_v9  ;;  %v408_v20 = vld [vmem:[%s1879_s6 + $0x140] sm:$0xff]  ;;  %v410_v21 = vld [vmem:[%s1879_s6 + $0x150] sm:$0xff] }
  0x1e   : > { %389 = vst [vmem:[%s1884_s7 + $0x50] sm:$0xff] %v388_v10  ;;  %v412_v22 = vld [vmem:[%s1879_s6 + $0x160] sm:$0xff]  ;;  %v414_v23 = vld [vmem:[%s1879_s6 + $0x170] sm:$0xff] }
  0x1f   : > { %391 = vst [vmem:[%s1884_s7 + $0x58] sm:$0xff] %v390_v11  ;;  %v416_v24 = vld [vmem:[%s1879_s6 + $0x180] sm:$0xff]  ;;  %v418_v25 = vld [vmem:[%s1879_s6 + $0x190] sm:$0xff] }
  0x20   : > { %393 = vst [vmem:[%s1884_s7 + $0x60] sm:$0xff] %v392_v12  ;;  %v420_v26 = vld [vmem:[%s1879_s6 + $0x1a0] sm:$0xff]  ;;  %v422_v27 = vld [vmem:[%s1879_s6 + $0x1b0] sm:$0xff] }
  0x21   : > { %395 = vst [vmem:[%s1884_s7 + $0x68] sm:$0xff] %v394_v13  ;;  %v424_v28 = vld [vmem:[%s1879_s6 + $0x1c0] sm:$0xff]  ;;  %v426_v29 = vld [vmem:[%s1879_s6 + $0x1d0] sm:$0xff] }
  0x22   : > { %397 = vst [vmem:[%s1884_s7 + $0x70] sm:$0xff] %v396_v14  ;;  %v428_v30 = vld [vmem:[%s1879_s6 + $0x1e0] sm:$0xff]  ;;  %v430_v31 = vld [vmem:[%s1879_s6 + $0x1f0] sm:$0xff] }
  0x23   : > { %399 = vst [vmem:[%s1884_s7 + $0x78] sm:$0xff] %v398_v15  ;;  %v432_v32 = vld [vmem:[%s1879_s6 + $0x200] sm:$0xff]  ;;  %v434_v33 = vld [vmem:[%s1879_s6 + $0x210] sm:$0xff] }
  0x24   : > { %401 = vst [vmem:[%s1884_s7 + $0x80] sm:$0xff] %v400_v16  ;;  %v436_v34 = vld [vmem:[%s1879_s6 + $0x220] sm:$0xff]  ;;  %v438_v35 = vld [vmem:[%s1879_s6 + $0x230] sm:$0xff] }
  0x25   : > { %403 = vst [vmem:[%s1884_s7 + $0x88] sm:$0xff] %v402_v17  ;;  %v440_v36 = vld [vmem:[%s1879_s6 + $0x240] sm:$0xff]  ;;  %v442_v37 = vld [vmem:[%s1879_s6 + $0x250] sm:$0xff] }
  0x26   : > { %405 = vst [vmem:[%s1884_s7 + $0x90] sm:$0xff] %v404_v18  ;;  %v444_v38 = vld [vmem:[%s1879_s6 + $0x260] sm:$0xff]  ;;  %v446_v39 = vld [vmem:[%s1879_s6 + $0x270] sm:$0xff] }
  0x27   : > { %407 = vst [vmem:[%s1884_s7 + $0x98] sm:$0xff] %v406_v19  ;;  %v448_v40 = vld [vmem:[%s1879_s6 + $0x280] sm:$0xff]  ;;  %v450_v41 = vld [vmem:[%s1879_s6 + $0x290] sm:$0xff] }
  0x28   : > { %409 = vst [vmem:[%s1884_s7 + $0xa0] sm:$0xff] %v408_v20  ;;  %v452_v42 = vld [vmem:[%s1879_s6 + $0x2a0] sm:$0xff]  ;;  %v454_v43 = vld [vmem:[%s1879_s6 + $0x2b0] sm:$0xff] }
  0x29   : > { %411 = vst [vmem:[%s1884_s7 + $0xa8] sm:$0xff] %v410_v21  ;;  %v456_v44 = vld [vmem:[%s1879_s6 + $0x2c0] sm:$0xff]  ;;  %v458_v45 = vld [vmem:[%s1879_s6 + $0x2d0] sm:$0xff] }
  0x2a   : > { %413 = vst [vmem:[%s1884_s7 + $0xb0] sm:$0xff] %v412_v22  ;;  %v460_v46 = vld [vmem:[%s1879_s6 + $0x2e0] sm:$0xff]  ;;  %v462_v47 = vld [vmem:[%s1879_s6 + $0x2f0] sm:$0xff] }
  0x2b   : > { %415 = vst [vmem:[%s1884_s7 + $0xb8] sm:$0xff] %v414_v23  ;;  %v464_v48 = vld [vmem:[%s1879_s6 + $0x300] sm:$0xff]  ;;  %v466_v49 = vld [vmem:[%s1879_s6 + $0x310] sm:$0xff] }
  0x2c   : > { %417 = vst [vmem:[%s1884_s7 + $0xc0] sm:$0xff] %v416_v24  ;;  %v468_v50 = vld [vmem:[%s1879_s6 + $0x320] sm:$0xff]  ;;  %v470_v51 = vld [vmem:[%s1879_s6 + $0x330] sm:$0xff] }
  0x2d   : > { %419 = vst [vmem:[%s1884_s7 + $0xc8] sm:$0xff] %v418_v25  ;;  %v472_v52 = vld [vmem:[%s1879_s6 + $0x340] sm:$0xff]  ;;  %v474_v53 = vld [vmem:[%s1879_s6 + $0x350] sm:$0xff] }
  0x2e   : > { %421 = vst [vmem:[%s1884_s7 + $0xd0] sm:$0xff] %v420_v26  ;;  %v476_v54 = vld [vmem:[%s1879_s6 + $0x360] sm:$0xff]  ;;  %v478_v55 = vld [vmem:[%s1879_s6 + $0x370] sm:$0xff] }
  0x2f   : > { %423 = vst [vmem:[%s1884_s7 + $0xd8] sm:$0xff] %v422_v27  ;;  %v480_v56 = vld [vmem:[%s1879_s6 + $0x380] sm:$0xff]  ;;  %v482_v57 = vld [vmem:[%s1879_s6 + $0x390] sm:$0xff] }
  0x30   : > { %425 = vst [vmem:[%s1884_s7 + $0xe0] sm:$0xff] %v424_v28  ;;  %v484_v58 = vld [vmem:[%s1879_s6 + $0x3a0] sm:$0xff]  ;;  %v486_v59 = vld [vmem:[%s1879_s6 + $0x3b0] sm:$0xff] }
  0x31   : > { %427 = vst [vmem:[%s1884_s7 + $0xe8] sm:$0xff] %v426_v29  ;;  %v488_v60 = vld [vmem:[%s1879_s6 + $0x3c0] sm:$0xff]  ;;  %v490_v61 = vld [vmem:[%s1879_s6 + $0x3d0] sm:$0xff] }
  0x32   : > { %429 = vst [vmem:[%s1884_s7 + $0xf0] sm:$0xff] %v428_v30  ;;  %v492_v62 = vld [vmem:[%s1879_s6 + $0x3e0] sm:$0xff]  ;;  %v494_v63 = vld [vmem:[%s1879_s6 + $0x3f0] sm:$0xff] }
  0x33   : > { %431 = vst [vmem:[%s1884_s7 + $0xf8] sm:$0xff] %v430_v31 }
  0x34   : > { %433 = vst [vmem:[%s1884_s7 + $0x100] sm:$0xff] %v432_v32 }
  0x35   : > { %435 = vst [vmem:[%s1884_s7 + $0x108] sm:$0xff] %v434_v33 }
  0x36   : > { %437 = vst [vmem:[%s1884_s7 + $0x110] sm:$0xff] %v436_v34 }
  0x37   : > { %439 = vst [vmem:[%s1884_s7 + $0x118] sm:$0xff] %v438_v35 }
  0x38   : > { %441 = vst [vmem:[%s1884_s7 + $0x120] sm:$0xff] %v440_v36 }
  0x39   : > { %443 = vst [vmem:[%s1884_s7 + $0x128] sm:$0xff] %v442_v37 }
  0x3a   : > { %445 = vst [vmem:[%s1884_s7 + $0x130] sm:$0xff] %v444_v38 }
  0x3b   : > { %447 = vst [vmem:[%s1884_s7 + $0x138] sm:$0xff] %v446_v39 }
  0x3c   : > { %449 = vst [vmem:[%s1884_s7 + $0x140] sm:$0xff] %v448_v40 }
  0x3d   : > { %451 = vst [vmem:[%s1884_s7 + $0x148] sm:$0xff] %v450_v41 }
  0x3e   : > { %453 = vst [vmem:[%s1884_s7 + $0x150] sm:$0xff] %v452_v42 }
  0x3f   : > { %455 = vst [vmem:[%s1884_s7 + $0x158] sm:$0xff] %v454_v43 }
  0x40   : > { %457 = vst [vmem:[%s1884_s7 + $0x160] sm:$0xff] %v456_v44 }
  0x41   : > { %459 = vst [vmem:[%s1884_s7 + $0x168] sm:$0xff] %v458_v45 }
  0x42   : > { %461 = vst [vmem:[%s1884_s7 + $0x170] sm:$0xff] %v460_v46 }
  0x43   : > { %463 = vst [vmem:[%s1884_s7 + $0x178] sm:$0xff] %v462_v47 }
  0x44   : > { %465 = vst [vmem:[%s1884_s7 + $0x180] sm:$0xff] %v464_v48 }
  0x45   : > { %467 = vst [vmem:[%s1884_s7 + $0x188] sm:$0xff] %v466_v49 }
  0x46   : > { %469 = vst [vmem:[%s1884_s7 + $0x190] sm:$0xff] %v468_v50 }
  0x47   : > { %471 = vst [vmem:[%s1884_s7 + $0x198] sm:$0xff] %v470_v51 }
  0x48   : > { %473 = vst [vmem:[%s1884_s7 + $0x1a0] sm:$0xff] %v472_v52 }
  0x49   : > { %475 = vst [vmem:[%s1884_s7 + $0x1a8] sm:$0xff] %v474_v53 }
  0x4a   : > { %477 = vst [vmem:[%s1884_s7 + $0x1b0] sm:$0xff] %v476_v54 }
  0x4b   : > { %479 = vst [vmem:[%s1884_s7 + $0x1b8] sm:$0xff] %v478_v55 }
  0x4c   : > { %481 = vst [vmem:[%s1884_s7 + $0x1c0] sm:$0xff] %v480_v56 }
  0x4d   : > { %483 = vst [vmem:[%s1884_s7 + $0x1c8] sm:$0xff] %v482_v57 }
  0x4e   : > { %485 = vst [vmem:[%s1884_s7 + $0x1d0] sm:$0xff] %v484_v58 }
  0x4f   : > { %487 = vst [vmem:[%s1884_s7 + $0x1d8] sm:$0xff] %v486_v59 }
  0x50   : > { %489 = vst [vmem:[%s1884_s7 + $0x1e0] sm:$0xff] %v488_v60 }
  0x51   : > { %491 = vst [vmem:[%s1884_s7 + $0x1e8] sm:$0xff] %v490_v61 }
  0x52   : > { %493 = vst [vmem:[%s1884_s7 + $0x1f0] sm:$0xff] %v492_v62 }
  0x53   : > { %495 = vst [vmem:[%s1884_s7 + $0x1f8] sm:$0xff] %v494_v63 }
  0x54 PF: > { %509 = sbr.rel (!%p1857_p3) target bundleno = 90 (0x5a), region = 66  ;;  %s511_s8 = sand.u32 (%p1857_p3), 1, %s1786_s16  }
  0x55   : > { %s1650_s9 = sshll.u32 (%p1857_p3), %s1794_s18, 3  ;;  %s1364_s10 = sshll.u32 (%p1857_p3), %s511_s8, 4 }
  0x56   : > { %s519_s13 = scalar_lea.vmem (%p1857_p3), %s2227_s3, %s1650_s9  ;;  %s513_s14 = scalar_lea.vmem (%p1857_p3), [#allocation3], %s1364_s10 }
  0x57   : > { %v550_v0 = vld [vmem:[%s519_s13] sm:$0xff] (%p1857_p3)  ;;  %v552_v1 = vld [vmem:[%s519_s13 + $0x10] sm:$0xff] (%p1857_p3) }
  0x58   : > { %551 = vst [vmem:[%s513_s14] sm:$0xff] (%p1857_p3), %v550_v0 }
  0x59   : > { %553 = vst [vmem:[%s513_s14 + $0x8] sm:$0xff] %v552_v1 }
  0x5a PF: > { %p1367_p8 = scmp.ge.s32.totalorder %s1798_s19, 1  ;;  %p558_p9 = scmp.lt.s32.totalorder %s1798_s19, 3 }
  0x5c   : > { %p559_p10 = pnand %p1367_p8, %p558_p9 }
  0x5d   : > { %s565_s21 = sand.u32 (!%p559_p10), 1, %s1782_s15  }
  0x5e   : > { %562 = sbr.rel (%p559_p10) target bundleno = 326 (0x146), region = 104  ;;  %s1368_s22 = sshll.u32 (!%p559_p10), %s565_s21, 9 }
  0x5f   : > { %s2023_s23 = scalar_lea.vmem (!%p559_p10), [#allocation2], %s1368_s22  ;;  %s2199_s29 = sshll.u32 (!%p559_p10), %s565_s21, 4 }
  0x60   : > { %s574_s30 = scalar_lea.vmem (!%p559_p10), [#allocation3], %s2199_s29  ;;  %s613_s15 = scalar_lea.vmem (!%p559_p10), [#allocation4], %s2199_s29 }
  0x63   : > { %v1446_v2 = vld [vmem:[%s2023_s23 + $0x70] sm:$0xf]  ;;  %v1670_v3 = vld [vmem:[%s2023_s23 + $0x74] sm:$0xf0]  ;;  %v1438_v13 = vld [vmem:[%s2023_s23 + $0x60] sm:$0xf] }
  0x64   : > { %v1510_v4 = vld [vmem:[%s2023_s23 + $0xf0] sm:$0xf]  ;;  %v1447_v5 = vor.u32 %v1670_v3, %v1446_v2  ;;  %v1686_v6 = vld [vmem:[%s2023_s23 + $0xf4] sm:$0xf0]  ;;  %v1668_v15 = vld [vmem:[%s2023_s23 + $0x64] sm:$0xf0] }
  0x65   : > { %v1574_v7 = vld [vmem:[%s2023_s23 + $0x170] sm:$0xf]  ;;  %v1702_v8 = vld [vmem:[%s2023_s23 + $0x174] sm:$0xf0]  ;;  %v1511_v9 = vor.u32 %v1686_v6, %v1510_v4  ;;  %v1502_v16 = vld [vmem:[%s2023_s23 + $0xe0] sm:$0xf]  ;;  %v1439_v18 = vor.u32 %v1668_v15, %v1438_v13 }
  0x66   : > { %v1575_v10 = vor.u32 %v1702_v8, %v1574_v7  ;;  %v1638_v11 = vld [vmem:[%s2023_s23 + $0x1f0] sm:$0xf]  ;;  %v1718_v12 = vld [vmem:[%s2023_s23 + $0x1f4] sm:$0xf0]  ;;  %1051 = vmatpush.bf16.msra.mxu0 %v1447_v5  ;;  %v1684_v17 = vld [vmem:[%s2023_s23 + $0xe4] sm:$0xf0] }
  0x67   : > { %v1639_v14 = vor.u32 %v1718_v12, %v1638_v11  ;;  %1065 = vmatpush.bf16.msra.mxu1 %v1511_v9  ;;  %v1503_v19 = vor.u32 %v1684_v17, %v1502_v16  ;;  %v1566_v20 = vld [vmem:[%s2023_s23 + $0x160] sm:$0xf]  ;;  %v1700_v21 = vld [vmem:[%s2023_s23 + $0x164] sm:$0xf0]  ;;  %v1430_v25 = vld [vmem:[%s2023_s23 + $0x50] sm:$0xf] }
  0x68   : > { %1079 = vmatpush.bf16.msra.mxu2 %v1575_v10  ;;  %v1630_v22 = vld [vmem:[%s2023_s23 + $0x1e0] sm:$0xf]  ;;  %v1567_v23 = vor.u32 %v1700_v21, %v1566_v20  ;;  %v1716_v24 = vld [vmem:[%s2023_s23 + $0x1e4] sm:$0xf0]  ;;  %v1666_v26 = vld [vmem:[%s2023_s23 + $0x54] sm:$0xf0] }
  0x69   : > { %1093 = vmatpush.bf16.msra.mxu3 %v1639_v14  ;;  %v1631_v27 = vor.u32 %v1716_v24, %v1630_v22  ;;  %v1494_v28 = vld [vmem:[%s2023_s23 + $0xd0] sm:$0xf]  ;;  %v1682_v29 = vld [vmem:[%s2023_s23 + $0xd4] sm:$0xf0]  ;;  %v1431_v31 = vor.u32 %v1666_v26, %v1430_v25  ;;  %v1422_v37 = vld [vmem:[%s2023_s23 + $0x40] sm:$0xf] }
  0x6a   : > { %v1558_v30 = vld [vmem:[%s2023_s23 + $0x150] sm:$0xf]  ;;  %1052 = vmatpush.bf16.msra.mxu0 %v1439_v18  ;;  %v1698_v32 = vld [vmem:[%s2023_s23 + $0x154] sm:$0xf0]  ;;  %v1495_v35 = vor.u32 %v1682_v29, %v1494_v28  ;;  %v1664_v38 = vld [vmem:[%s2023_s23 + $0x44] sm:$0xf0] }
  0x6b   : > { %v1622_v33 = vld [vmem:[%s2023_s23 + $0x1d0] sm:$0xf]  ;;  %v1714_v34 = vld [vmem:[%s2023_s23 + $0x1d4] sm:$0xf0]  ;;  %1066 = vmatpush.bf16.msra.mxu1 %v1503_v19  ;;  %v1559_v36 = vor.u32 %v1698_v32, %v1558_v30  ;;  %v1486_v39 = vld [vmem:[%s2023_s23 + $0xc0] sm:$0xf]  ;;  %v1423_v46 = vor.u32 %v1664_v38, %v1422_v37 }
  0x6c   : > { %1080 = vmatpush.bf16.msra.mxu2 %v1567_v23  ;;  %v1623_v40 = vor.u32 %v1714_v34, %v1622_v33  ;;  %v1680_v41 = vld [vmem:[%s2023_s23 + $0xc4] sm:$0xf0]  ;;  %v1550_v42 = vld [vmem:[%s2023_s23 + $0x140] sm:$0xf]  ;;  %v1414_v49 = vld [vmem:[%s2023_s23 + $0x30] sm:$0xf] }
  0x6d   : > { %1094 = vmatpush.bf16.msra.mxu3 %v1631_v27  ;;  %v1696_v43 = vld [vmem:[%s2023_s23 + $0x144] sm:$0xf0]  ;;  %v1614_v44 = vld [vmem:[%s2023_s23 + $0x1c0] sm:$0xf]  ;;  %v1487_v47 = vor.u32 %v1680_v41, %v1486_v39  ;;  %v1662_v50 = vld [vmem:[%s2023_s23 + $0x34] sm:$0xf0] }
  0x6e   : > { %v1712_v45 = vld [vmem:[%s2023_s23 + $0x1c4] sm:$0xf0]  ;;  %1053 = vmatpush.bf16.msra.mxu0 %v1431_v31  ;;  %v1551_v48 = vor.u32 %v1696_v43, %v1550_v42  ;;  %v1478_v51 = vld [vmem:[%s2023_s23 + $0xb0] sm:$0xf]  ;;  %v1678_v53 = vld [vmem:[%s2023_s23 + $0xb4] sm:$0xf0]  ;;  %v1415_v58 = vor.u32 %v1662_v50, %v1414_v49 }
  0x6f   : > { %1067 = vmatpush.bf16.msra.mxu1 %v1495_v35  ;;  %v1615_v52 = vor.u32 %v1712_v45, %v1614_v44  ;;  %v1542_v54 = vld [vmem:[%s2023_s23 + $0x130] sm:$0xf]  ;;  %v1694_v55 = vld [vmem:[%s2023_s23 + $0x134] sm:$0xf0]  ;;  %v1479_v59 = vor.u32 %v1678_v53, %v1478_v51  ;;  %v1406_v61 = vld [vmem:[%s2023_s23 + $0x20] sm:$0xf] }
  0x70   : > { %1081 = vmatpush.bf16.msra.mxu2 %v1559_v36  ;;  %v1606_v56 = vld [vmem:[%s2023_s23 + $0x1b0] sm:$0xf]  ;;  %v1710_v57 = vld [vmem:[%s2023_s23 + $0x1b4] sm:$0xf0]  ;;  %v1543_v60 = vor.u32 %v1694_v55, %v1542_v54  ;;  %v1660_v62 = vld [vmem:[%s2023_s23 + $0x24] sm:$0xf0] }
  0x71   : > { %1095 = vmatpush.bf16.msra.mxu3 %v1623_v40  ;;  %v1470_v63 = vld [vmem:[%s2023_s23 + $0xa0] sm:$0xf]  ;;  %v1607_v0 = vor.u32 %v1710_v57, %v1606_v56  ;;  %v1676_v1 = vld [vmem:[%s2023_s23 + $0xa4] sm:$0xf0]  ;;  %v1407_v6 = vor.u32 %v1660_v62, %v1406_v61  ;;  %v1398_v9 = vld [vmem:[%s2023_s23 + $0x10] sm:$0xf] }
  0x72   : > { %1054 = vmatpush.bf16.msra.mxu0 %v1423_v46  ;;  %v1534_v2 = vld [vmem:[%s2023_s23 + $0x120] sm:$0xf]  ;;  %v1692_v3 = vld [vmem:[%s2023_s23 + $0x124] sm:$0xf0]  ;;  %v1471_v7 = vor.u32 %v1676_v1, %v1470_v63  ;;  %v1658_v10 = vld [vmem:[%s2023_s23 + $0x14] sm:$0xf0] }
  0x73   : > { %1068 = vmatpush.bf16.msra.mxu1 %v1487_v47  ;;  %v1598_v4 = vld [vmem:[%s2023_s23 + $0x1a0] sm:$0xf]  ;;  %v1708_v5 = vld [vmem:[%s2023_s23 + $0x1a4] sm:$0xf0]  ;;  %v1535_v8 = vor.u32 %v1692_v3, %v1534_v2  ;;  %v1462_v11 = vld [vmem:[%s2023_s23 + $0x90] sm:$0xf]  ;;  %v1399_v19 = vor.u32 %v1658_v10, %v1398_v9 }
  0x74   : > { %1082 = vmatpush.bf16.msra.mxu2 %v1551_v48  ;;  %v1599_v12 = vor.u32 %v1708_v5, %v1598_v4  ;;  %v1674_v13 = vld [vmem:[%s2023_s23 + $0x94] sm:$0xf0]  ;;  %v1526_v14 = vld [vmem:[%s2023_s23 + $0x110] sm:$0xf]  ;;  %v1390_v18 = vld [vmem:[%s2023_s23] sm:$0xf] }
  0x75   : > { %1096 = vmatpush.bf16.msra.mxu3 %v1615_v52  ;;  %v1690_v15 = vld [vmem:[%s2023_s23 + $0x114] sm:$0xf0]  ;;  %v1590_v16 = vld [vmem:[%s2023_s23 + $0x190] sm:$0xf]  ;;  %v1656_v20 = vld [vmem:[%s2023_s23 + $0x4] sm:$0xf0]  ;;  %v1463_v23 = vor.u32 %v1674_v13, %v1462_v11 }
  0x76   : > { %1055 = vmatpush.bf16.msra.mxu0 %v1415_v58  ;;  %v1706_v17 = vld [vmem:[%s2023_s23 + $0x194] sm:$0xf0]  ;;  %v1454_v21 = vld [vmem:[%s2023_s23 + $0x80] sm:$0xf]  ;;  %v1672_v22 = vld [vmem:[%s2023_s23 + $0x84] sm:$0xf0]  ;;  %v1527_v24 = vor.u32 %v1690_v15, %v1526_v14  ;;  %v1391_v35 = vor.u32 %v1656_v20, %v1390_v18 }
  0x77   : > { %1069 = vmatpush.bf16.msra.mxu1 %v1479_v59  ;;  %v1518_v25 = vld [vmem:[%s2023_s23 + $0x100] sm:$0xf]  ;;  %v1688_v26 = vld [vmem:[%s2023_s23 + $0x104] sm:$0xf0]  ;;  %v1591_v28 = vor.u32 %v1706_v17, %v1590_v16  ;;  %v1669_v30 = vld [vmem:[%s2023_s23 + $0x74] sm:$0xf]  ;;  %v1455_v39 = vor.u32 %v1672_v22, %v1454_v21 }
  0x78   : > { %1083 = vmatpush.bf16.msra.mxu2 %v1543_v60  ;;  %v1582_v27 = vld [vmem:[%s2023_s23 + $0x180] sm:$0xf]  ;;  %v1704_v29 = vld [vmem:[%s2023_s23 + $0x184] sm:$0xf0]  ;;  %v1448_v31 = vld [vmem:[%s2023_s23 + $0x78] sm:$0xf0]  ;;  %v1519_v40 = vor.u32 %v1688_v26, %v1518_v25 }
  0x79   : > { %1097 = vmatpush.bf16.msra.mxu3 %v1607_v0  ;;  %v1685_v32 = vld [vmem:[%s2023_s23 + $0xf4] sm:$0xf]  ;;  %v1512_v33 = vld [vmem:[%s2023_s23 + $0xf8] sm:$0xf0]  ;;  %v1667_v41 = vld [vmem:[%s2023_s23 + $0x64] sm:$0xf]  ;;  %v1583_v45 = vor.u32 %v1704_v29, %v1582_v27  ;;  %v1451_v46 = vor.u32 %v1669_v30, %v1448_v31 }
  0x7a   : > { %1056 = vmatpush.bf16.msra.mxu0 %v1407_v6  ;;  %v1701_v34 = vld [vmem:[%s2023_s23 + $0x174] sm:$0xf]  ;;  %v1576_v36 = vld [vmem:[%s2023_s23 + $0x178] sm:$0xf0]  ;;  %v1440_v42 = vld [vmem:[%s2023_s23 + $0x68] sm:$0xf0]  ;;  %v1515_v51 = vor.u32 %v1685_v32, %v1512_v33 }
  0x7b   : > { %1070 = vmatpush.bf16.msra.mxu1 %v1471_v7  ;;  %v1717_v37 = vld [vmem:[%s2023_s23 + $0x1f4] sm:$0xf]  ;;  %v1640_v38 = vld [vmem:[%s2023_s23 + $0x1f8] sm:$0xf0]  ;;  %v1382_v43 = vld [vmem:[%s2224_s0 + $0x8] sm:$0xf]  ;;  %v1579_v52 = vor.u32 %v1701_v34, %v1576_v36  ;;  %v1443_v1 = vor.u32 %v1667_v41, %v1440_v42 }
  0x7c   : > { %1084 = vmatpush.bf16.msra.mxu2 %v1535_v8  ;;  %v1654_v44 = vld [vmem:[%s2224_s0 + $0x14] sm:$0xf0]  ;;  %v1683_v47 = vld [vmem:[%s2023_s23 + $0xe4] sm:$0xf]  ;;  %v1504_v48 = vld [vmem:[%s2023_s23 + $0xe8] sm:$0xf0]  ;;  %v1643_v56 = vor.u32 %v1717_v37, %v1640_v38 }
  0x7d   : > { %1098 = vmatpush.bf16.msra.mxu3 %v1599_v12  ;;  %v1699_v49 = vld [vmem:[%s2023_s23 + $0x164] sm:$0xf]  ;;  %v1568_v50 = vld [vmem:[%s2023_s23 + $0x168] sm:$0xf0]  ;;  %v1374_v53 = vld [vmem:[%s2224_s0] sm:$0xf]  ;;  %v2118_v57 = vor.u32 %v1654_v44, %v1382_v43  ;;  %v1507_v3 = vor.u32 %v1683_v47, %v1504_v48 }
  0x7e   : > { %1057 = vmatpush.bf16.msra.mxu0 %v1399_v19  ;;  %v1653_v54 = vld [vmem:[%s2224_s0 + $0xc] sm:$0xf0]  ;;  %v1652_v55 = vld [vmem:[%s2224_s0 + $0xc] sm:$0xf]  ;;  %v1384_v58 = vld [vmem:[%s2224_s0 + $0x18] sm:$0xf0]  ;;  %v1571_v4 = vor.u32 %v1699_v49, %v1568_v50 }
  0x7f   : > { %1071 = vmatpush.bf16.msra.mxu1 %v1463_v23  ;;  %v1651_v59 = vld [vmem:[%s2224_s0 + $0x4] sm:$0xf]  ;;  %v1376_v60 = vld [vmem:[%s2224_s0 + $0x10] sm:$0xf0]  ;;  %v1632_v62 = vld [vmem:[%s2023_s23 + $0x1e8] sm:$0xf0]  ;;  %v2131_v63 = vor.u32 %v1653_v54, %v1374_v53  ;;  %v2133_v0 = vor.u32 %v1652_v55, %v1384_v58 }
  0x80   : > { %1085 = vmatpush.bf16.msra.mxu2 %v1527_v24  ;;  %v1715_v61 = vld [vmem:[%s2023_s23 + $0x1e4] sm:$0xf]  ;;  %v2135_v2 = vor.u32 %v1651_v59, %v1376_v60  ;;  %v1665_v5 = vld [vmem:[%s2023_s23 + $0x54] sm:$0xf]  ;;  %v1432_v6 = vld [vmem:[%s2023_s23 + $0x58] sm:$0xf0] }
  0x81   : > { %1099 = vmatpush.bf16.msra.mxu3 %v1591_v28  ;;  %v1681_v7 = vld [vmem:[%s2023_s23 + $0xd4] sm:$0xf]  ;;  %v1635_v8 = vor.u32 %v1715_v61, %v1632_v62  ;;  %v1496_v9 = vld [vmem:[%s2023_s23 + $0xd8] sm:$0xf0]  ;;  %v1435_v14 = vor.u32 %v1665_v5, %v1432_v6  ;;  %v1663_v17 = vld [vmem:[%s2023_s23 + $0x44] sm:$0xf] }
  0x82   : > { %1058 = vmatpush.bf16.msra.mxu0 %v1391_v35  ;;  %v1697_v10 = vld [vmem:[%s2023_s23 + $0x154] sm:$0xf]  ;;  %v1560_v11 = vld [vmem:[%s2023_s23 + $0x158] sm:$0xf0]  ;;  %v1499_v15 = vor.u32 %v1681_v7, %v1496_v9  ;;  %v1424_v18 = vld [vmem:[%s2023_s23 + $0x48] sm:$0xf0] }
  0x83   : > { %1072 = vmatpush.bf16.msra.mxu1 %v1455_v39  ;;  %v1713_v12 = vld [vmem:[%s2023_s23 + $0x1d4] sm:$0xf]  ;;  %v1624_v13 = vld [vmem:[%s2023_s23 + $0x1d8] sm:$0xf0]  ;;  %v1563_v16 = vor.u32 %v1697_v10, %v1560_v11  ;;  %v1679_v19 = vld [vmem:[%s2023_s23 + $0xc4] sm:$0xf]  ;;  %v1427_v26 = vor.u32 %v1663_v17, %v1424_v18 }
  0x84   : > { %1086 = vmatpush.bf16.msra.mxu2 %v1519_v40  ;;  %v1627_v20 = vor.u32 %v1713_v12, %v1624_v13  ;;  %v1488_v21 = vld [vmem:[%s2023_s23 + $0xc8] sm:$0xf0]  ;;  %v1695_v22 = vld [vmem:[%s2023_s23 + $0x144] sm:$0xf]  ;;  %v1661_v29 = vld [vmem:[%s2023_s23 + $0x34] sm:$0xf] }
  0x85   : > { %1100 = vmatpush.bf16.msra.mxu3 %v1583_v45  ;;  %1059 = vmatmul.bf16.vlgmr.msra.gmra.mxu0 %v2131_v63  ;;  %v1552_v23 = vld [vmem:[%s2023_s23 + $0x148] sm:$0xf0]  ;;  %v1711_v24 = vld [vmem:[%s2023_s23 + $0x1c4] sm:$0xf]  ;;  %v1491_v27 = vor.u32 %v1679_v19, %v1488_v21  ;;  %v1416_v30 = vld [vmem:[%s2023_s23 + $0x38] sm:$0xf0] }
  0x86   : > { %1107 = vmatpush.bf16.msrb.mxu0 %v1451_v46  ;;  %1073 = vmatmul.bf16.vlgmr.msra.gmra.mxu1 %v2135_v2  ;;  %v1616_v25 = vld [vmem:[%s2023_s23 + $0x1c8] sm:$0xf0]  ;;  %v1555_v28 = vor.u32 %v1695_v22, %v1552_v23  ;;  %v1677_v31 = vld [vmem:[%s2023_s23 + $0xb4] sm:$0xf]  ;;  %v1480_v33 = vld [vmem:[%s2023_s23 + $0xb8] sm:$0xf0]  ;;  %v1419_v38 = vor.u32 %v1661_v29, %v1416_v30 }
  0x87   : > { %1121 = vmatpush.bf16.msrb.mxu1 %v1515_v51  ;;  %1087 = vmatmul.bf16.vlgmr.msra.gmra.mxu2 %v2118_v57  ;;  %v1619_v32 = vor.u32 %v1711_v24, %v1616_v25  ;;  %v1693_v34 = vld [vmem:[%s2023_s23 + $0x134] sm:$0xf]  ;;  %v1544_v35 = vld [vmem:[%s2023_s23 + $0x138] sm:$0xf0]  ;;  %v1483_v39 = vor.u32 %v1677_v31, %v1480_v33  ;;  %v1659_v41 = vld [vmem:[%s2023_s23 + $0x24] sm:$0xf] }
  0x88   : > { %1135 = vmatpush.bf16.msrb.mxu2 %v1579_v52  ;;  %1101 = vmatmul.bf16.vlgmr.msra.gmra.mxu3 %v2133_v0  ;;  %v1709_v36 = vld [vmem:[%s2023_s23 + $0x1b4] sm:$0xf]  ;;  %v1608_v37 = vld [vmem:[%s2023_s23 + $0x1b8] sm:$0xf0]  ;;  %v1547_v40 = vor.u32 %v1693_v34, %v1544_v35  ;;  %v1408_v42 = vld [vmem:[%s2023_s23 + $0x28] sm:$0xf0] }
  0x89   : > { %1149 = vmatpush.bf16.msrb.mxu3 %v1643_v56  ;;  %v1675_v43 = vld [vmem:[%s2023_s23 + $0xa4] sm:$0xf]  ;;  %v1611_v44 = vor.u32 %v1709_v36, %v1608_v37  ;;  %v1472_v45 = vld [vmem:[%s2023_s23 + $0xa8] sm:$0xf0]  ;;  %v1411_v50 = vor.u32 %v1659_v41, %v1408_v42  ;;  %v1657_v53 = vld [vmem:[%s2023_s23 + $0x14] sm:$0xf] }
  0x8a   : > { %1108 = vmatpush.bf16.msrb.mxu0 %v1443_v1  ;;  %v1691_v46 = vld [vmem:[%s2023_s23 + $0x124] sm:$0xf]  ;;  %v1536_v47 = vld [vmem:[%s2023_s23 + $0x128] sm:$0xf0]  ;;  %v1475_v51 = vor.u32 %v1675_v43, %v1472_v45  ;;  %v1400_v54 = vld [vmem:[%s2023_s23 + $0x18] sm:$0xf0] }
  0x8b   : > { %1122 = vmatpush.bf16.msrb.mxu1 %v1507_v3  ;;  %v1707_v48 = vld [vmem:[%s2023_s23 + $0x1a4] sm:$0xf]  ;;  %v1600_v49 = vld [vmem:[%s2023_s23 + $0x1a8] sm:$0xf0]  ;;  %v1539_v52 = vor.u32 %v1691_v46, %v1536_v47  ;;  %v1673_v55 = vld [vmem:[%s2023_s23 + $0x94] sm:$0xf]  ;;  %v1403_v1 = vor.u32 %v1657_v53, %v1400_v54 }
  0x8c   : > { %1136 = vmatpush.bf16.msrb.mxu2 %v1571_v4  ;;  %v1603_v56 = vor.u32 %v1707_v48, %v1600_v49  ;;  %v1464_v58 = vld [vmem:[%s2023_s23 + $0x98] sm:$0xf0]  ;;  %v1689_v59 = vld [vmem:[%s2023_s23 + $0x114] sm:$0xf]  ;;  %v1655_v5 = vld [vmem:[%s2023_s23 + $0x4] sm:$0xf] }
  0x8d   : > { %1150 = vmatpush.bf16.msrb.mxu3 %v1635_v8  ;;  %v1528_v60 = vld [vmem:[%s2023_s23 + $0x118] sm:$0xf0]  ;;  %v1705_v61 = vld [vmem:[%s2023_s23 + $0x194] sm:$0xf]  ;;  %v1467_v3 = vor.u32 %v1673_v55, %v1464_v58  ;;  %v1392_v6 = vld [vmem:[%s2023_s23 + $0x8] sm:$0xf0] }
  0x8e   : > { %1109 = vmatpush.bf16.msrb.mxu0 %v1435_v14  ;;  %v1592_v62 = vld [vmem:[%s2023_s23 + $0x198] sm:$0xf0]  ;;  %v1531_v4 = vor.u32 %v1689_v59, %v1528_v60  ;;  %v1671_v7 = vld [vmem:[%s2023_s23 + $0x84] sm:$0xf]  ;;  %v1456_v9 = vld [vmem:[%s2023_s23 + $0x88] sm:$0xf0]  ;;  %v1395_v14 = vor.u32 %v1655_v5, %v1392_v6 }
  0x8f   : > { %1123 = vmatpush.bf16.msrb.mxu1 %v1499_v15  ;;  %v1595_v8 = vor.u32 %v1705_v61, %v1592_v62  ;;  %v1687_v10 = vld [vmem:[%s2023_s23 + $0x104] sm:$0xf]  ;;  %v1520_v11 = vld [vmem:[%s2023_s23 + $0x108] sm:$0xf0]  ;;  %v1459_v15 = vor.u32 %v1671_v7, %v1456_v9  ;;  %s1719_s21 = sshll.u32 (%p1864_p6), %s1790_s17, 3 }
  0x90   : > { %1137 = vmatpush.bf16.msrb.mxu2 %v1563_v16  ;;  %v1703_v12 = vld [vmem:[%s2023_s23 + $0x184] sm:$0xf]  ;;  %v1584_v13 = vld [vmem:[%s2023_s23 + $0x188] sm:$0xf0]  ;;  %v1523_v16 = vor.u32 %v1687_v10, %v1520_v11  ;;  %s1371_s23 = sshll.u32 %s1790_s17, 1  ;;  %s1193_s7 = scalar_lea.vmem (%p1864_p6), %s2228_s4, %s1719_s21 }
  0x91   : > { %1151 = vmatpush.bf16.msrb.mxu3 %v1627_v20  ;;  %v1587_v17 = vor.u32 %v1703_v12, %v1584_v13  ;;  %p629_p11 = scmp.lt.s32.totalorder %s1371_s23, 3  ;;  %v1163_v31 = vld [vmem:[%s574_s30] sm:$0xff] }
  0x92   : > { %1110 = vmatpush.bf16.msrb.mxu0 %v1427_v26  ;;  %v1165_v35 = vunpack.c.l.bf16 %v1163_v31 }
  0x93   : > { %1124 = vmatpush.bf16.msrb.mxu1 %v1491_v27  ;;  %s2238_s23 = smov (!%p629_p11, %s1371_s23), 3 }
  0x94   : > { %1138 = vmatpush.bf16.msrb.mxu2 %v1555_v28  ;;  %s631_s28 = scalar_lea.vmem %s2226_s2, %s2238_s23 }
  0x95   : > { %1152 = vmatpush.bf16.msrb.mxu3 %v1619_v32  ;;  %v705_v20 = vld [vmem:[%s631_s28] sm:$0x3] }
  0x96   : > { %1111 = vmatpush.bf16.msrb.mxu0 %v1419_v38  ;;  %v707_v22 = vperm.slane %v705_v20, 0 }
  0x97   : > { %1125 = vmatpush.bf16.msrb.mxu1 %v1483_v39 }
  0x98   : > { %1139 = vmatpush.bf16.msrb.mxu2 %v1547_v40  ;;  %v1166_v40 = vunpack.c.h.bf16 %v1163_v31 }
  0x99   : > { %1153 = vmatpush.bf16.msrb.mxu3 %v1611_v44  ;;  %v1164_v44 = vld [vmem:[%s574_s30 + $0x8] sm:$0xff] }
  0x9a   : > { %1112 = vmatpush.bf16.msrb.mxu0 %v1411_v50  ;;  %v1167_v48 = vunpack.c.l.bf16 %v1164_v44  ;;  %v1168_v58 = vunpack.c.h.bf16 %v1164_v44 }
  0x9b   : > { %1126 = vmatpush.bf16.msrb.mxu1 %v1475_v51 }
  0x9c   : > { %1140 = vmatpush.bf16.msrb.mxu2 %v1539_v52 }
  0x9d   : > { %1154 = vmatpush.bf16.msrb.mxu3 %v1603_v56 }
  0x9e   : > { %1113 = vmatpush.bf16.msrb.mxu0 %v1403_v1 }
  0x9f   : > { %1127 = vmatpush.bf16.msrb.mxu1 %v1467_v3 }
  0xa0   : > { %1141 = vmatpush.bf16.msrb.mxu2 %v1531_v4 }
  0xa1   : > { %1155 = vmatpush.bf16.msrb.mxu3 %v1595_v8 }
  0xa2   : > { %1114 = vmatpush.bf16.msrb.mxu0 %v1395_v14 }
  0xa3   : > { %1128 = vmatpush.bf16.msrb.mxu1 %v1459_v15 }
  0xa4   : > { %1142 = vmatpush.bf16.msrb.mxu2 %v1523_v16 }
  0xa5   : > { %1156 = vmatpush.bf16.msrb.mxu3 %v1587_v17  ;;  %1115 = vmatmul.bf16.vlgmr.msrb.gmra.mxu0 %v2131_v63 }
  0xa6   : > { %1129 = vmatmul.bf16.vlgmr.msrb.gmra.mxu1 %v2135_v2 }
  0xa7   : > { %1143 = vmatmul.bf16.vlgmr.msrb.gmra.mxu2 %v2118_v57  ;;  %v708_v57 = vperm.slane %v705_v20, 1 }
  0xa8   : > { %1157 = vmatmul.bf16.vlgmr.msrb.gmra.mxu3 %v2133_v0 }
 0x102   : > { %v1060_v18 = vpop.f32.mrf.mxu0 }
 0x103   : > { %v1074_v19 = vpop.f32.mrf.mxu1  ;;  %v1061_v2 = vadd.f32 %v1060_v18, %v707_v22 }
 0x105   : > { %v1075_v0 = vadd.f32 %v1074_v19, %v1061_v2 }
 0x10a   : > { %v1088_v21 = vpop.f32.mrf.mxu2  ;;  %v1062_v23 = vpop.f32.mrf.mxu0 }
 0x10b   : > { %v1102_v63 = vpop.f32.mrf.mxu3  ;;  %v1076_v24 = vpop.f32.mrf.mxu1  ;;  %v1089_v29 = vadd.f32 %v1088_v21, %v1075_v0  ;;  %v1063_v30 = vadd.f32 %v1062_v23, %v707_v22 }
 0x10d   : > { %v1103_v34 = vadd.f32 %v1102_v63, %v1089_v29  ;;  %v1077_v36 = vadd.f32 %v1076_v24, %v1063_v30 }
 0x10f   : > { %v1169_v42 = vadd.f32 %v1165_v35, %v1103_v34 }
 0x111   : > { %v1173_v50 = vmax.f32 %v1169_v42, 0.0 }
 0x112   : > { %v1090_v25 = vpop.f32.mrf.mxu2 }
 0x113   : > { %v1104_v26 = vpop.f32.mrf.mxu3  ;;  %v1091_v43 = vadd.f32 %v1090_v25, %v1077_v36 }
 0x115   : > { %v1105_v51 = vadd.f32 %v1104_v26, %v1091_v43 }
 0x117   : > { %v1171_v60 = vadd.f32 %v1167_v48, %v1105_v51 }
 0x119   : > { %v1175_v1 = vmax.f32 %v1171_v60, 0.0 }
 0x122   : > { %v1116_v27 = vpop.f32.mrf.mxu0 }
 0x123   : > { %v1117_v28 = vadd.f32 %v1116_v27, %v708_v57  ;;  %v1130_v32 = vpop.f32.mrf.mxu1 }
 0x125   : > { %v1131_v33 = vadd.f32 %v1130_v32, %v1117_v28 }
 0x12a   : > { %v1144_v37 = vpop.f32.mrf.mxu2  ;;  %v1118_v41 = vpop.f32.mrf.mxu0 }
 0x12b   : > { %v1145_v38 = vadd.f32 %v1144_v37, %v1131_v33  ;;  %v1158_v39 = vpop.f32.mrf.mxu3  ;;  %v1119_v46 = vadd.f32 %v1118_v41, %v708_v57  ;;  %v1132_v49 = vpop.f32.mrf.mxu1 }
 0x12d   : > { %v1159_v45 = vadd.f32 %v1158_v39, %v1145_v38  ;;  %v1133_v53 = vadd.f32 %v1132_v49, %v1119_v46 }
 0x12f   : > { %v1170_v47 = vadd.f32 %v1166_v40, %v1159_v45 }
 0x131   : > { %v1174_v52 = vmax.f32 %v1170_v47, 0.0 }
 0x132   : > { %v1146_v54 = vpop.f32.mrf.mxu2 }
 0x133   : > { %v1177_v55 = vpack.c.bf16 %v1174_v52, %v1173_v50  ;;  %v1147_v56 = vadd.f32 %v1146_v54, %v1133_v53  ;;  %v1160_v59 = vpop.f32.mrf.mxu3 }
 0x135   : > { %1179 = vst [vmem:[%s613_s15] sm:$0xff] %v1177_v55  ;;  %v1161_v61 = vadd.f32 %v1160_v59, %v1147_v56 }
 0x137   : > { %v1172_v62 = vadd.f32 %v1168_v58, %v1161_v61 }
 0x139   : > { %v1176_v3 = vmax.f32 %v1172_v62, 0.0  ;;  %1187 = sbr.rel (!%p1864_p6) target bundleno = 326 (0x146), region = 116 }
 0x13b   : > { %v1178_v4 = vpack.c.bf16 %v1176_v3, %v1175_v1 }
 0x13c   : > { %v1224_v5 = vld [vmem:[%s613_s15] sm:$0xff] (%p1864_p6) }
 0x13d   : > { %1180 = vst [vmem:[%s613_s15 + $0x8] sm:$0xff] %v1178_v4 }
 0x13e   : > { %1225 = vst [vmem:[%s1193_s7] sm:$0xff] %v1224_v5 }
 0x144   : > { %v1226_v6 = vld [vmem:[%s613_s15 + $0x8] sm:$0xff] }
 0x145   : > { %1227 = vst [vmem:[%s1193_s7 + $0x10] sm:$0xff] %v1226_v6 }
 0x146 PF: > { %s14_s19 = sadd.s32 1, %s1798_s19   ;;  %s2231_s15 = smov %s1786_s16 }
 0x147   : > { %p11_p12 = scmp.ge.s32.totalorder %s14_s19, 4   ;;  %s2232_s16 = smov %s1869_s26 }
 0x148   : > { %s2233_s17 = smov %s1794_s18  ;;  %s2234_s18 = smov %s2236_s20 }
 0x149   :  { %13 = sbr.rel (!%p11_p12) target bundleno = 3 (0x3), region = 199 }

// kernel: resnet_forward.55
= control target key start
LH: loop header
LB: loop body
LE: loop exit
PB: predicated region body
PF: predicated region fallthrough
CT: control target
= control target key end

     0   :  { %s1690_s12 = smov 0   ;;  %s1692_s13 = smov 0   ;;  %s2072_s0 = inlined_call_operand.vmem [shape: bf16[16,512], index: 0, kind: input, shape index: {}]   ;;  %s2073_s1 = inlined_call_operand.vmem [shape: bf16[512,512], index: 1, kind: input, shape index: {}]   ;;  %s2074_s2 = inlined_call_operand.vmem [shape: f32[1,512], index: 2, kind: input, shape index: {}]   ;;  %s2075_s3 = inlined_call_operand.vmem [shape: bf16[16,512], index: 3, kind: output, shape index: {}]  }
   0x1   :  { %s1694_s14 = smov 0   ;;  %s1696_s15 = smov 0  }
   0x2   :  { %s1698_s16 = smov 0  }
   0x3 LB: > { %s28_s17 = sadd.s32 1, %s1664_s15  ;;  %s1231_s18 = sadd.s32 4294967295, %s1668_s16   ;;  %s1668_s16 = sphi %s1698_s16, %s13_s16   ;;  %s1664_s15 = sphi %s1696_s15, %s2080_s15   ;;  %s1660_s14 = sphi %s1694_s14, %s2079_s14   ;;  %s1656_s13 = sphi %s1692_s13, %s2078_s13   ;;  %s1652_s12 = sphi %s1690_s12, %s2077_s12  }
   0x4   : > { %p30_p0 = scmp.ge.s32.totalorder %s28_s17, 2  ;;  %p76_p1 = scmp.ne.s32.totalorder %s1656_s13, %s1652_s12 }
   0x5   : > { %p77_p2 = scmp.eq.s32.totalorder %s1668_s16, 0  ;;  %p134_p4 = scmp.eq.s32.totalorder %s1231_s18, 1 }
   0x6   : > { %s2082_s17 = smov (%p30_p0, %s28_s17), 0  ;;  %s69_s20 = sadd.s32 1, %s1656_s13 }
   0x7   : > { %p78_p3 = por %p77_p2, %p76_p1  ;;  %s65_s19 = ssub.s32 %s1664_s15, %s2082_s17 }
   0x8   : > { %p67_p5 = scmp.eq.s32.totalorder %s65_s19, 0  ;;  %p1725_p6 = por %p134_p4, %p76_p1 }
   0x9   : > { %p1235_p7 = scmp.ge.s32.totalorder %s1668_s16, 2 }
   0xa   : > { %s1730_s22 = scalar_select %p67_p5, %s1656_s13, %s69_s20  }
   0xb   : > { %171 = sbr.rel (%p1235_p7) target bundleno = 84 (0x54), region = 20 }
  0x10   : > { %174 = sbr.rel (!%p78_p3) target bundleno = 84 (0x54), region = 24  ;;  %s176_s23 = sand.u32 (%p78_p3), 1, %s1656_s13  }
  0x11   : > { %s1520_s24 = sshll.u32 (%p78_p3), %s1664_s15, 3  ;;  %s1236_s25 = sshll.u32 (%p78_p3), %s176_s23, 9 }
  0x12   : > { %s1738_s28 = scalar_lea.vmem (%p78_p3), %s2073_s1, %s1520_s24  ;;  %s1743_s29 = scalar_lea.vmem (%p78_p3), [#allocation2], %s1236_s25 }
  0x13   : > { %v339_v0 = vld [vmem:[%s1738_s28] sm:$0xff] (%p78_p3)  ;;  %v341_v1 = vld [vmem:[%s1738_s28 + $0x10] sm:$0xff] (%p78_p3) }
  0x14   : > { %v343_v2 = vld [vmem:[%s1738_s28 + $0x20] sm:$0xff] (%p78_p3)  ;;  %340 = vst [vmem:[%s1743_s29] sm:$0xff] (%p78_p3), %v339_v0  ;;  %v345_v3 = vld [vmem:[%s1738_s28 + $0x30] sm:$0xff] (%p78_p3) }
  0x15   : > { %342 = vst [vmem:[%s1743_s29 + $0x8] sm:$0xff] %v341_v1  ;;  %v347_v4 = vld [vmem:[%s1738_s28 + $0x40] sm:$0xff]  ;;  %v349_v5 = vld [vmem:[%s1738_s28 + $0x50] sm:$0xff] }
  0x16   : > { %344 = vst [vmem:[%s1743_s29 + $0x10] sm:$0xff] %v343_v2  ;;  %v351_v6 = vld [vmem:[%s1738_s28 + $0x60] sm:$0xff]  ;;  %v353_v7 = vld [vmem:[%s1738_s28 + $0x70] sm:$0xff] }
  0x17   : > { %346 = vst [vmem:[%s1743_s29 + $0x18] sm:$0xff] %v345_v3  ;;  %v355_v8 = vld [vmem:[%s1738_s28 + $0x80] sm:$0xff]  ;;  %v357_v9 = vld [vmem:[%s1738_s28 + $0x90] sm:$0xff] }
  0x18   : > { %348 = vst [vmem:[%s1743_s29 + $0x20] sm:$0xff] %v347_v4  ;;  %v359_v10 = vld [vmem:[%s1738_s28 + $0xa0] sm:$0xff]  ;;  %v361_v11 = vld [vmem:[%s1738_s28 + $0xb0] sm:$0xff] }
  0x19   : > { %350 = vst [vmem:[%s1743_s29 + $0x28] sm:$0xff] %v349_v5  ;;  %v363_v12 = vld [vmem:[%s1738_s28 + $0xc0] sm:$0xff]  ;;  %v365_v13 = vld [vmem:[%s1738_s28 + $0xd0] sm:$0xff] }
  0x1a   : > { %352 = vst [vmem:[%s1743_s29 + $0x30] sm:$0xff] %v351_v6  ;;  %v367_v14 = vld [vmem:[%s1738_s28 + $0xe0] sm:$0xff]  ;;  %v369_v15 = vld [vmem:[%s1738_s28 + $0xf0] sm:$0xff] }
  0x1b   : > { %354 = vst [vmem:[%s1743_s29 + $0x38] sm:$0xff] %v353_v7  ;;  %v371_v16 = vld [vmem:[%s1738_s28 + $0x100] sm:$0xff]  ;;  %v373_v17 = vld [vmem:[%s1738_s28 + $0x110] sm:$0xff] }
  0x1c   : > { %356 = vst [vmem:[%s1743_s29 + $0x40] sm:$0xff] %v355_v8  ;;  %v375_v18 = vld [vmem:[%s1738_s28 + $0x120] sm:$0xff]  ;;  %v377_v19 = vld [vmem:[%s1738_s28 + $0x130] sm:$0xff] }
  0x1d   : > { %358 = vst [vmem:[%s1743_s29 + $0x48] sm:$0xff] %v357_v9  ;;  %v379_v20 = vld [vmem:[%s1738_s28 + $0x140] sm:$0xff]  ;;  %v381_v21 = vld [vmem:[%s1738_s28 + $0x150] sm:$0xff] }
  0x1e   : > { %360 = vst [vmem:[%s1743_s29 + $0x50] sm:$0xff] %v359_v10  ;;  %v383_v22 = vld [vmem:[%s1738_s28 + $0x160] sm:$0xff]  ;;  %v385_v23 = vld [vmem:[%s1738_s28 + $0x170] sm:$0xff] }
  0x1f   : > { %362 = vst [vmem:[%s1743_s29 + $0x58] sm:$0xff] %v361_v11  ;;  %v387_v24 = vld [vmem:[%s1738_s28 + $0x180] sm:$0xff]  ;;  %v389_v25 = vld [vmem:[%s1738_s28 + $0x190] sm:$0xff] }
  0x20   : > { %364 = vst [vmem:[%s1743_s29 + $0x60] sm:$0xff] %v363_v12  ;;  %v391_v26 = vld [vmem:[%s1738_s28 + $0x1a0] sm:$0xff]  ;;  %v393_v27 = vld [vmem:[%s1738_s28 + $0x1b0] sm:$0xff] }
  0x21   : > { %366 = vst [vmem:[%s1743_s29 + $0x68] sm:$0xff] %v365_v13  ;;  %v395_v28 = vld [vmem:[%s1738_s28 + $0x1c0] sm:$0xff]  ;;  %v397_v29 = vld [vmem:[%s1738_s28 + $0x1d0] sm:$0xff] }
  0x22   : > { %368 = vst [vmem:[%s1743_s29 + $0x70] sm:$0xff] %v367_v14  ;;  %v399_v30 = vld [vmem:[%s1738_s28 + $0x1e0] sm:$0xff]  ;;  %v401_v31 = vld [vmem:[%s1738_s28 + $0x1f0] sm:$0xff] }
  0x23   : > { %370 = vst [vmem:[%s1743_s29 + $0x78] sm:$0xff] %v369_v15  ;;  %v403_v32 = vld [vmem:[%s1738_s28 + $0x200] sm:$0xff]  ;;  %v405_v33 = vld [vmem:[%s1738_s28 + $0x210] sm:$0xff] }
  0x24   : > { %372 = vst [vmem:[%s1743_s29 + $0x80] sm:$0xff] %v371_v16  ;;  %v407_v34 = vld [vmem:[%s1738_s28 + $0x220] sm:$0xff]  ;;  %v409_v35 = vld [vmem:[%s1738_s28 + $0x230] sm:$0xff] }
  0x25   : > { %374 = vst [vmem:[%s1743_s29 + $0x88] sm:$0xff] %v373_v17  ;;  %v411_v36 = vld [vmem:[%s1738_s28 + $0x240] sm:$0xff]  ;;  %v413_v37 = vld [vmem:[%s1738_s28 + $0x250] sm:$0xff] }
  0x26   : > { %376 = vst [vmem:[%s1743_s29 + $0x90] sm:$0xff] %v375_v18  ;;  %v415_v38 = vld [vmem:[%s1738_s28 + $0x260] sm:$0xff]  ;;  %v417_v39 = vld [vmem:[%s1738_s28 + $0x270] sm:$0xff] }
  0x27   : > { %378 = vst [vmem:[%s1743_s29 + $0x98] sm:$0xff] %v377_v19  ;;  %v419_v40 = vld [vmem:[%s1738_s28 + $0x280] sm:$0xff]  ;;  %v421_v41 = vld [vmem:[%s1738_s28 + $0x290] sm:$0xff] }
  0x28   : > { %380 = vst [vmem:[%s1743_s29 + $0xa0] sm:$0xff] %v379_v20  ;;  %v423_v42 = vld [vmem:[%s1738_s28 + $0x2a0] sm:$0xff]  ;;  %v425_v43 = vld [vmem:[%s1738_s28 + $0x2b0] sm:$0xff] }
  0x29   : > { %382 = vst [vmem:[%s1743_s29 + $0xa8] sm:$0xff] %v381_v21  ;;  %v427_v44 = vld [vmem:[%s1738_s28 + $0x2c0] sm:$0xff]  ;;  %v429_v45 = vld [vmem:[%s1738_s28 + $0x2d0] sm:$0xff] }
  0x2a   : > { %384 = vst [vmem:[%s1743_s29 + $0xb0] sm:$0xff] %v383_v22  ;;  %v431_v46 = vld [vmem:[%s1738_s28 + $0x2e0] sm:$0xff]  ;;  %v433_v47 = vld [vmem:[%s1738_s28 + $0x2f0] sm:$0xff] }
  0x2b   : > { %386 = vst [vmem:[%s1743_s29 + $0xb8] sm:$0xff] %v385_v23  ;;  %v435_v48 = vld [vmem:[%s1738_s28 + $0x300] sm:$0xff]  ;;  %v437_v49 = vld [vmem:[%s1738_s28 + $0x310] sm:$0xff] }
  0x2c   : > { %388 = vst [vmem:[%s1743_s29 + $0xc0] sm:$0xff] %v387_v24  ;;  %v439_v50 = vld [vmem:[%s1738_s28 + $0x320] sm:$0xff]  ;;  %v441_v51 = vld [vmem:[%s1738_s28 + $0x330] sm:$0xff] }
  0x2d   : > { %390 = vst [vmem:[%s1743_s29 + $0xc8] sm:$0xff] %v389_v25  ;;  %v443_v52 = vld [vmem:[%s1738_s28 + $0x340] sm:$0xff]  ;;  %v445_v53 = vld [vmem:[%s1738_s28 + $0x350] sm:$0xff] }
  0x2e   : > { %392 = vst [vmem:[%s1743_s29 + $0xd0] sm:$0xff] %v391_v26  ;;  %v447_v54 = vld [vmem:[%s1738_s28 + $0x360] sm:$0xff]  ;;  %v449_v55 = vld [vmem:[%s1738_s28 + $0x370] sm:$0xff] }
  0x2f   : > { %394 = vst [vmem:[%s1743_s29 + $0xd8] sm:$0xff] %v393_v27  ;;  %v451_v56 = vld [vmem:[%s1738_s28 + $0x380] sm:$0xff]  ;;  %v453_v57 = vld [vmem:[%s1738_s28 + $0x390] sm:$0xff] }
  0x30   : > { %396 = vst [vmem:[%s1743_s29 + $0xe0] sm:$0xff] %v395_v28  ;;  %v455_v58 = vld [vmem:[%s1738_s28 + $0x3a0] sm:$0xff]  ;;  %v457_v59 = vld [vmem:[%s1738_s28 + $0x3b0] sm:$0xff] }
  0x31   : > { %398 = vst [vmem:[%s1743_s29 + $0xe8] sm:$0xff] %v397_v29  ;;  %v459_v60 = vld [vmem:[%s1738_s28 + $0x3c0] sm:$0xff]  ;;  %v461_v61 = vld [vmem:[%s1738_s28 + $0x3d0] sm:$0xff] }
  0x32   : > { %400 = vst [vmem:[%s1743_s29 + $0xf0] sm:$0xff] %v399_v30  ;;  %v463_v62 = vld [vmem:[%s1738_s28 + $0x3e0] sm:$0xff]  ;;  %v465_v63 = vld [vmem:[%s1738_s28 + $0x3f0] sm:$0xff] }
  0x33   : > { %402 = vst [vmem:[%s1743_s29 + $0xf8] sm:$0xff] %v401_v31 }
  0x34   : > { %404 = vst [vmem:[%s1743_s29 + $0x100] sm:$0xff] %v403_v32 }
  0x35   : > { %406 = vst [vmem:[%s1743_s29 + $0x108] sm:$0xff] %v405_v33 }
  0x36   : > { %408 = vst [vmem:[%s1743_s29 + $0x110] sm:$0xff] %v407_v34 }
  0x37   : > { %410 = vst [vmem:[%s1743_s29 + $0x118] sm:$0xff] %v409_v35 }
  0x38   : > { %412 = vst [vmem:[%s1743_s29 + $0x120] sm:$0xff] %v411_v36 }
  0x39   : > { %414 = vst [vmem:[%s1743_s29 + $0x128] sm:$0xff] %v413_v37 }
  0x3a   : > { %416 = vst [vmem:[%s1743_s29 + $0x130] sm:$0xff] %v415_v38 }
  0x3b   : > { %418 = vst [vmem:[%s1743_s29 + $0x138] sm:$0xff] %v417_v39 }
  0x3c   : > { %420 = vst [vmem:[%s1743_s29 + $0x140] sm:$0xff] %v419_v40 }
  0x3d   : > { %422 = vst [vmem:[%s1743_s29 + $0x148] sm:$0xff] %v421_v41 }
  0x3e   : > { %424 = vst [vmem:[%s1743_s29 + $0x150] sm:$0xff] %v423_v42 }
  0x3f   : > { %426 = vst [vmem:[%s1743_s29 + $0x158] sm:$0xff] %v425_v43 }
  0x40   : > { %428 = vst [vmem:[%s1743_s29 + $0x160] sm:$0xff] %v427_v44 }
  0x41   : > { %430 = vst [vmem:[%s1743_s29 + $0x168] sm:$0xff] %v429_v45 }
  0x42   : > { %432 = vst [vmem:[%s1743_s29 + $0x170] sm:$0xff] %v431_v46 }
  0x43   : > { %434 = vst [vmem:[%s1743_s29 + $0x178] sm:$0xff] %v433_v47 }
  0x44   : > { %436 = vst [vmem:[%s1743_s29 + $0x180] sm:$0xff] %v435_v48 }
  0x45   : > { %438 = vst [vmem:[%s1743_s29 + $0x188] sm:$0xff] %v437_v49 }
  0x46   : > { %440 = vst [vmem:[%s1743_s29 + $0x190] sm:$0xff] %v439_v50 }
  0x47   : > { %442 = vst [vmem:[%s1743_s29 + $0x198] sm:$0xff] %v441_v51 }
  0x48   : > { %444 = vst [vmem:[%s1743_s29 + $0x1a0] sm:$0xff] %v443_v52 }
  0x49   : > { %446 = vst [vmem:[%s1743_s29 + $0x1a8] sm:$0xff] %v445_v53 }
  0x4a   : > { %448 = vst [vmem:[%s1743_s29 + $0x1b0] sm:$0xff] %v447_v54 }
  0x4b   : > { %450 = vst [vmem:[%s1743_s29 + $0x1b8] sm:$0xff] %v449_v55 }
  0x4c   : > { %452 = vst [vmem:[%s1743_s29 + $0x1c0] sm:$0xff] %v451_v56 }
  0x4d   : > { %454 = vst [vmem:[%s1743_s29 + $0x1c8] sm:$0xff] %v453_v57 }
  0x4e   : > { %456 = vst [vmem:[%s1743_s29 + $0x1d0] sm:$0xff] %v455_v58 }
  0x4f   : > { %458 = vst [vmem:[%s1743_s29 + $0x1d8] sm:$0xff] %v457_v59 }
  0x50   : > { %460 = vst [vmem:[%s1743_s29 + $0x1e0] sm:$0xff] %v459_v60 }
  0x51   : > { %462 = vst [vmem:[%s1743_s29 + $0x1e8] sm:$0xff] %v461_v61 }
  0x52   : > { %464 = vst [vmem:[%s1743_s29 + $0x1f0] sm:$0xff] %v463_v62 }
  0x53   : > { %466 = vst [vmem:[%s1743_s29 + $0x1f8] sm:$0xff] %v465_v63 }
  0x54 PF: > { %p1239_p8 = scmp.ge.s32.totalorder %s1668_s16, 1  ;;  %p479_p9 = scmp.lt.s32.totalorder %s1668_s16, 3 }
  0x56   : > { %p480_p10 = pnand %p1239_p8, %p479_p9 }
  0x57   : > { %s486_s30 = sand.u32 (!%p480_p10), 1, %s1652_s12  }
  0x58   : > { %483 = sbr.rel (%p480_p10) target bundleno = 318 (0x13e), region = 66  ;;  %s1240_s4 = sshll.u32 (!%p480_p10), %s486_s30, 9 }
  0x59   : > { %s1875_s5 = scalar_lea.vmem (!%p480_p10), [#allocation2], %s1240_s4  ;;  %s1242_s4 = sshll.u32 (!%p480_p10), %s1660_s14, 1 }
  0x5a   : > { %p537_p11 = scmp.lt.s32.totalorder (!%p480_p10), %s1242_s4, 3  ;;  %s1241_s8 = sshll.u32 (!%p480_p10), %s486_s30, 4 }
  0x5b   : > { %s521_s9 = scalar_lea.vmem (!%p480_p10), [#allocation3], %s1241_s8 }
  0x5d   : > { %v1317_v0 = vld [vmem:[%s1875_s5 + $0x70] sm:$0xf]  ;;  %v1540_v1 = vld [vmem:[%s1875_s5 + $0x74] sm:$0xf0]  ;;  %v1309_v11 = vld [vmem:[%s1875_s5 + $0x60] sm:$0xf] }
  0x5e   : > { %v1381_v2 = vld [vmem:[%s1875_s5 + $0xf0] sm:$0xf]  ;;  %v1318_v3 = vor.u32 %v1540_v1, %v1317_v0  ;;  %v1556_v4 = vld [vmem:[%s1875_s5 + $0xf4] sm:$0xf0]  ;;  %v1538_v13 = vld [vmem:[%s1875_s5 + $0x64] sm:$0xf0] }
  0x5f   : > { %v1445_v5 = vld [vmem:[%s1875_s5 + $0x170] sm:$0xf]  ;;  %v1572_v6 = vld [vmem:[%s1875_s5 + $0x174] sm:$0xf0]  ;;  %v1382_v7 = vor.u32 %v1556_v4, %v1381_v2  ;;  %v1373_v14 = vld [vmem:[%s1875_s5 + $0xe0] sm:$0xf]  ;;  %v1310_v16 = vor.u32 %v1538_v13, %v1309_v11 }
  0x60   : > { %v1446_v8 = vor.u32 %v1572_v6, %v1445_v5  ;;  %v1509_v9 = vld [vmem:[%s1875_s5 + $0x1f0] sm:$0xf]  ;;  %v1588_v10 = vld [vmem:[%s1875_s5 + $0x1f4] sm:$0xf0]  ;;  %957 = vmatpush.bf16.msra.mxu0 %v1318_v3  ;;  %v1554_v15 = vld [vmem:[%s1875_s5 + $0xe4] sm:$0xf0] }
  0x61   : > { %v1510_v12 = vor.u32 %v1588_v10, %v1509_v9  ;;  %971 = vmatpush.bf16.msra.mxu1 %v1382_v7  ;;  %v1374_v17 = vor.u32 %v1554_v15, %v1373_v14  ;;  %v1437_v18 = vld [vmem:[%s1875_s5 + $0x160] sm:$0xf]  ;;  %v1570_v19 = vld [vmem:[%s1875_s5 + $0x164] sm:$0xf0]  ;;  %v1301_v23 = vld [vmem:[%s1875_s5 + $0x50] sm:$0xf] }
  0x62   : > { %985 = vmatpush.bf16.msra.mxu2 %v1446_v8  ;;  %v1501_v20 = vld [vmem:[%s1875_s5 + $0x1e0] sm:$0xf]  ;;  %v1438_v21 = vor.u32 %v1570_v19, %v1437_v18  ;;  %v1586_v22 = vld [vmem:[%s1875_s5 + $0x1e4] sm:$0xf0]  ;;  %v1536_v24 = vld [vmem:[%s1875_s5 + $0x54] sm:$0xf0] }
  0x63   : > { %999 = vmatpush.bf16.msra.mxu3 %v1510_v12  ;;  %v1502_v25 = vor.u32 %v1586_v22, %v1501_v20  ;;  %v1365_v26 = vld [vmem:[%s1875_s5 + $0xd0] sm:$0xf]  ;;  %v1552_v27 = vld [vmem:[%s1875_s5 + $0xd4] sm:$0xf0]  ;;  %v1302_v29 = vor.u32 %v1536_v24, %v1301_v23  ;;  %v1293_v35 = vld [vmem:[%s1875_s5 + $0x40] sm:$0xf] }
  0x64   : > { %v1429_v28 = vld [vmem:[%s1875_s5 + $0x150] sm:$0xf]  ;;  %958 = vmatpush.bf16.msra.mxu0 %v1310_v16  ;;  %v1568_v30 = vld [vmem:[%s1875_s5 + $0x154] sm:$0xf0]  ;;  %v1366_v33 = vor.u32 %v1552_v27, %v1365_v26  ;;  %v1534_v36 = vld [vmem:[%s1875_s5 + $0x44] sm:$0xf0] }
  0x65   : > { %v1493_v31 = vld [vmem:[%s1875_s5 + $0x1d0] sm:$0xf]  ;;  %v1584_v32 = vld [vmem:[%s1875_s5 + $0x1d4] sm:$0xf0]  ;;  %972 = vmatpush.bf16.msra.mxu1 %v1374_v17  ;;  %v1430_v34 = vor.u32 %v1568_v30, %v1429_v28  ;;  %v1357_v37 = vld [vmem:[%s1875_s5 + $0xc0] sm:$0xf]  ;;  %v1294_v44 = vor.u32 %v1534_v36, %v1293_v35 }
  0x66   : > { %986 = vmatpush.bf16.msra.mxu2 %v1438_v21  ;;  %v1494_v38 = vor.u32 %v1584_v32, %v1493_v31  ;;  %v1550_v39 = vld [vmem:[%s1875_s5 + $0xc4] sm:$0xf0]  ;;  %v1421_v40 = vld [vmem:[%s1875_s5 + $0x140] sm:$0xf]  ;;  %v1285_v47 = vld [vmem:[%s1875_s5 + $0x30] sm:$0xf] }
  0x67   : > { %1000 = vmatpush.bf16.msra.mxu3 %v1502_v25  ;;  %v1566_v41 = vld [vmem:[%s1875_s5 + $0x144] sm:$0xf0]  ;;  %v1485_v42 = vld [vmem:[%s1875_s5 + $0x1c0] sm:$0xf]  ;;  %v1358_v45 = vor.u32 %v1550_v39, %v1357_v37  ;;  %v1532_v48 = vld [vmem:[%s1875_s5 + $0x34] sm:$0xf0] }
  0x68   : > { %v1582_v43 = vld [vmem:[%s1875_s5 + $0x1c4] sm:$0xf0]  ;;  %959 = vmatpush.bf16.msra.mxu0 %v1302_v29  ;;  %v1422_v46 = vor.u32 %v1566_v41, %v1421_v40  ;;  %v1349_v49 = vld [vmem:[%s1875_s5 + $0xb0] sm:$0xf]  ;;  %v1548_v51 = vld [vmem:[%s1875_s5 + $0xb4] sm:$0xf0]  ;;  %v1286_v56 = vor.u32 %v1532_v48, %v1285_v47 }
  0x69   : > { %973 = vmatpush.bf16.msra.mxu1 %v1366_v33  ;;  %v1486_v50 = vor.u32 %v1582_v43, %v1485_v42  ;;  %v1413_v52 = vld [vmem:[%s1875_s5 + $0x130] sm:$0xf]  ;;  %v1564_v53 = vld [vmem:[%s1875_s5 + $0x134] sm:$0xf0]  ;;  %v1350_v57 = vor.u32 %v1548_v51, %v1349_v49  ;;  %v1277_v59 = vld [vmem:[%s1875_s5 + $0x20] sm:$0xf] }
  0x6a   : > { %987 = vmatpush.bf16.msra.mxu2 %v1430_v34  ;;  %v1477_v54 = vld [vmem:[%s1875_s5 + $0x1b0] sm:$0xf]  ;;  %v1580_v55 = vld [vmem:[%s1875_s5 + $0x1b4] sm:$0xf0]  ;;  %v1414_v58 = vor.u32 %v1564_v53, %v1413_v52  ;;  %v1530_v60 = vld [vmem:[%s1875_s5 + $0x24] sm:$0xf0] }
  0x6b   : > { %1001 = vmatpush.bf16.msra.mxu3 %v1494_v38  ;;  %v1341_v61 = vld [vmem:[%s1875_s5 + $0xa0] sm:$0xf]  ;;  %v1478_v62 = vor.u32 %v1580_v55, %v1477_v54  ;;  %v1546_v63 = vld [vmem:[%s1875_s5 + $0xa4] sm:$0xf0]  ;;  %v1278_v4 = vor.u32 %v1530_v60, %v1277_v59  ;;  %v1269_v7 = vld [vmem:[%s1875_s5 + $0x10] sm:$0xf] }
  0x6c   : > { %960 = vmatpush.bf16.msra.mxu0 %v1294_v44  ;;  %v1405_v0 = vld [vmem:[%s1875_s5 + $0x120] sm:$0xf]  ;;  %v1562_v1 = vld [vmem:[%s1875_s5 + $0x124] sm:$0xf0]  ;;  %v1342_v5 = vor.u32 %v1546_v63, %v1341_v61  ;;  %v1528_v8 = vld [vmem:[%s1875_s5 + $0x14] sm:$0xf0] }
  0x6d   : > { %974 = vmatpush.bf16.msra.mxu1 %v1358_v45  ;;  %v1469_v2 = vld [vmem:[%s1875_s5 + $0x1a0] sm:$0xf]  ;;  %v1578_v3 = vld [vmem:[%s1875_s5 + $0x1a4] sm:$0xf0]  ;;  %v1406_v6 = vor.u32 %v1562_v1, %v1405_v0  ;;  %v1333_v9 = vld [vmem:[%s1875_s5 + $0x90] sm:$0xf]  ;;  %v1270_v17 = vor.u32 %v1528_v8, %v1269_v7 }
  0x6e   : > { %988 = vmatpush.bf16.msra.mxu2 %v1422_v46  ;;  %v1470_v10 = vor.u32 %v1578_v3, %v1469_v2  ;;  %v1544_v11 = vld [vmem:[%s1875_s5 + $0x94] sm:$0xf0]  ;;  %v1397_v12 = vld [vmem:[%s1875_s5 + $0x110] sm:$0xf]  ;;  %v1261_v16 = vld [vmem:[%s1875_s5] sm:$0xf] }
  0x6f   : > { %1002 = vmatpush.bf16.msra.mxu3 %v1486_v50  ;;  %v1560_v13 = vld [vmem:[%s1875_s5 + $0x114] sm:$0xf0]  ;;  %v1461_v14 = vld [vmem:[%s1875_s5 + $0x190] sm:$0xf]  ;;  %v1526_v18 = vld [vmem:[%s1875_s5 + $0x4] sm:$0xf0]  ;;  %v1334_v21 = vor.u32 %v1544_v11, %v1333_v9 }
  0x70   : > { %961 = vmatpush.bf16.msra.mxu0 %v1286_v56  ;;  %v1576_v15 = vld [vmem:[%s1875_s5 + $0x194] sm:$0xf0]  ;;  %v1325_v19 = vld [vmem:[%s1875_s5 + $0x80] sm:$0xf]  ;;  %v1542_v20 = vld [vmem:[%s1875_s5 + $0x84] sm:$0xf0]  ;;  %v1398_v22 = vor.u32 %v1560_v13, %v1397_v12  ;;  %v1262_v33 = vor.u32 %v1526_v18, %v1261_v16 }
  0x71   : > { %975 = vmatpush.bf16.msra.mxu1 %v1350_v57  ;;  %v1389_v23 = vld [vmem:[%s1875_s5 + $0x100] sm:$0xf]  ;;  %v1558_v24 = vld [vmem:[%s1875_s5 + $0x104] sm:$0xf0]  ;;  %v1462_v26 = vor.u32 %v1576_v15, %v1461_v14  ;;  %v1539_v28 = vld [vmem:[%s1875_s5 + $0x74] sm:$0xf]  ;;  %v1326_v37 = vor.u32 %v1542_v20, %v1325_v19 }
  0x72   : > { %989 = vmatpush.bf16.msra.mxu2 %v1414_v58  ;;  %v1453_v25 = vld [vmem:[%s1875_s5 + $0x180] sm:$0xf]  ;;  %v1574_v27 = vld [vmem:[%s1875_s5 + $0x184] sm:$0xf0]  ;;  %v1319_v29 = vld [vmem:[%s1875_s5 + $0x78] sm:$0xf0]  ;;  %v1390_v38 = vor.u32 %v1558_v24, %v1389_v23 }
  0x73   : > { %1003 = vmatpush.bf16.msra.mxu3 %v1478_v62  ;;  %v1555_v30 = vld [vmem:[%s1875_s5 + $0xf4] sm:$0xf]  ;;  %v1383_v31 = vld [vmem:[%s1875_s5 + $0xf8] sm:$0xf0]  ;;  %v1537_v39 = vld [vmem:[%s1875_s5 + $0x64] sm:$0xf]  ;;  %v1454_v43 = vor.u32 %v1574_v27, %v1453_v25  ;;  %v1322_v44 = vor.u32 %v1539_v28, %v1319_v29 }
  0x74   : > { %962 = vmatpush.bf16.msra.mxu0 %v1278_v4  ;;  %v1571_v32 = vld [vmem:[%s1875_s5 + $0x174] sm:$0xf]  ;;  %v1447_v34 = vld [vmem:[%s1875_s5 + $0x178] sm:$0xf0]  ;;  %v1311_v40 = vld [vmem:[%s1875_s5 + $0x68] sm:$0xf0]  ;;  %v1386_v49 = vor.u32 %v1555_v30, %v1383_v31 }
  0x75   : > { %976 = vmatpush.bf16.msra.mxu1 %v1342_v5  ;;  %v1587_v35 = vld [vmem:[%s1875_s5 + $0x1f4] sm:$0xf]  ;;  %v1511_v36 = vld [vmem:[%s1875_s5 + $0x1f8] sm:$0xf0]  ;;  %v1253_v41 = vld [vmem:[%s2072_s0 + $0x8] sm:$0xf]  ;;  %v1450_v50 = vor.u32 %v1571_v32, %v1447_v34  ;;  %v1314_v63 = vor.u32 %v1537_v39, %v1311_v40 }
  0x76   : > { %990 = vmatpush.bf16.msra.mxu2 %v1406_v6  ;;  %v1524_v42 = vld [vmem:[%s2072_s0 + $0x14] sm:$0xf0]  ;;  %v1553_v45 = vld [vmem:[%s1875_s5 + $0xe4] sm:$0xf]  ;;  %v1375_v46 = vld [vmem:[%s1875_s5 + $0xe8] sm:$0xf0]  ;;  %v1514_v54 = vor.u32 %v1587_v35, %v1511_v36 }
  0x77   : > { %1004 = vmatpush.bf16.msra.mxu3 %v1470_v10  ;;  %v1569_v47 = vld [vmem:[%s1875_s5 + $0x164] sm:$0xf]  ;;  %v1439_v48 = vld [vmem:[%s1875_s5 + $0x168] sm:$0xf0]  ;;  %v1245_v51 = vld [vmem:[%s2072_s0] sm:$0xf]  ;;  %v1970_v55 = vor.u32 %v1524_v42, %v1253_v41  ;;  %v1378_v1 = vor.u32 %v1553_v45, %v1375_v46 }
  0x78   : > { %963 = vmatpush.bf16.msra.mxu0 %v1270_v17  ;;  %v1523_v52 = vld [vmem:[%s2072_s0 + $0xc] sm:$0xf0]  ;;  %v1522_v53 = vld [vmem:[%s2072_s0 + $0xc] sm:$0xf]  ;;  %v1255_v56 = vld [vmem:[%s2072_s0 + $0x18] sm:$0xf0]  ;;  %v1442_v2 = vor.u32 %v1569_v47, %v1439_v48 }
  0x79   : > { %977 = vmatpush.bf16.msra.mxu1 %v1334_v21  ;;  %v1521_v57 = vld [vmem:[%s2072_s0 + $0x4] sm:$0xf]  ;;  %v1247_v58 = vld [vmem:[%s2072_s0 + $0x10] sm:$0xf0]  ;;  %v1503_v60 = vld [vmem:[%s1875_s5 + $0x1e8] sm:$0xf0]  ;;  %v1983_v61 = vor.u32 %v1523_v52, %v1245_v51  ;;  %v1985_v62 = vor.u32 %v1522_v53, %v1255_v56 }
  0x7a   : > { %991 = vmatpush.bf16.msra.mxu2 %v1398_v22  ;;  %v1585_v59 = vld [vmem:[%s1875_s5 + $0x1e4] sm:$0xf]  ;;  %v1987_v0 = vor.u32 %v1521_v57, %v1247_v58  ;;  %v1535_v3 = vld [vmem:[%s1875_s5 + $0x54] sm:$0xf]  ;;  %v1303_v4 = vld [vmem:[%s1875_s5 + $0x58] sm:$0xf0] }
  0x7b   : > { %1005 = vmatpush.bf16.msra.mxu3 %v1462_v26  ;;  %v1551_v5 = vld [vmem:[%s1875_s5 + $0xd4] sm:$0xf]  ;;  %v1506_v6 = vor.u32 %v1585_v59, %v1503_v60  ;;  %v1367_v7 = vld [vmem:[%s1875_s5 + $0xd8] sm:$0xf0]  ;;  %v1306_v12 = vor.u32 %v1535_v3, %v1303_v4  ;;  %v1533_v15 = vld [vmem:[%s1875_s5 + $0x44] sm:$0xf] }
  0x7c   : > { %964 = vmatpush.bf16.msra.mxu0 %v1262_v33  ;;  %v1567_v8 = vld [vmem:[%s1875_s5 + $0x154] sm:$0xf]  ;;  %v1431_v9 = vld [vmem:[%s1875_s5 + $0x158] sm:$0xf0]  ;;  %v1370_v13 = vor.u32 %v1551_v5, %v1367_v7  ;;  %v1295_v16 = vld [vmem:[%s1875_s5 + $0x48] sm:$0xf0] }
  0x7d   : > { %978 = vmatpush.bf16.msra.mxu1 %v1326_v37  ;;  %v1583_v10 = vld [vmem:[%s1875_s5 + $0x1d4] sm:$0xf]  ;;  %v1495_v11 = vld [vmem:[%s1875_s5 + $0x1d8] sm:$0xf0]  ;;  %v1434_v14 = vor.u32 %v1567_v8, %v1431_v9  ;;  %v1549_v17 = vld [vmem:[%s1875_s5 + $0xc4] sm:$0xf]  ;;  %v1298_v24 = vor.u32 %v1533_v15, %v1295_v16 }
  0x7e   : > { %992 = vmatpush.bf16.msra.mxu2 %v1390_v38  ;;  %v1498_v18 = vor.u32 %v1583_v10, %v1495_v11  ;;  %v1359_v19 = vld [vmem:[%s1875_s5 + $0xc8] sm:$0xf0]  ;;  %v1565_v20 = vld [vmem:[%s1875_s5 + $0x144] sm:$0xf]  ;;  %v1531_v27 = vld [vmem:[%s1875_s5 + $0x34] sm:$0xf] }
  0x7f   : > { %1006 = vmatpush.bf16.msra.mxu3 %v1454_v43  ;;  %965 = vmatmul.bf16.vlgmr.msra.gmra.mxu0 %v1983_v61  ;;  %v1423_v21 = vld [vmem:[%s1875_s5 + $0x148] sm:$0xf0]  ;;  %v1581_v22 = vld [vmem:[%s1875_s5 + $0x1c4] sm:$0xf]  ;;  %v1362_v25 = vor.u32 %v1549_v17, %v1359_v19  ;;  %v1287_v28 = vld [vmem:[%s1875_s5 + $0x38] sm:$0xf0] }
  0x80   : > { %1013 = vmatpush.bf16.msrb.mxu0 %v1322_v44  ;;  %979 = vmatmul.bf16.vlgmr.msra.gmra.mxu1 %v1987_v0  ;;  %v1487_v23 = vld [vmem:[%s1875_s5 + $0x1c8] sm:$0xf0]  ;;  %v1426_v26 = vor.u32 %v1565_v20, %v1423_v21  ;;  %v1547_v29 = vld [vmem:[%s1875_s5 + $0xb4] sm:$0xf]  ;;  %v1351_v31 = vld [vmem:[%s1875_s5 + $0xb8] sm:$0xf0]  ;;  %v1290_v36 = vor.u32 %v1531_v27, %v1287_v28 }
  0x81   : > { %1027 = vmatpush.bf16.msrb.mxu1 %v1386_v49  ;;  %993 = vmatmul.bf16.vlgmr.msra.gmra.mxu2 %v1970_v55  ;;  %v1490_v30 = vor.u32 %v1581_v22, %v1487_v23  ;;  %v1563_v32 = vld [vmem:[%s1875_s5 + $0x134] sm:$0xf]  ;;  %v1415_v33 = vld [vmem:[%s1875_s5 + $0x138] sm:$0xf0]  ;;  %v1354_v37 = vor.u32 %v1547_v29, %v1351_v31  ;;  %v1529_v39 = vld [vmem:[%s1875_s5 + $0x24] sm:$0xf] }
  0x82   : > { %1041 = vmatpush.bf16.msrb.mxu2 %v1450_v50  ;;  %1007 = vmatmul.bf16.vlgmr.msra.gmra.mxu3 %v1985_v62  ;;  %v1579_v34 = vld [vmem:[%s1875_s5 + $0x1b4] sm:$0xf]  ;;  %v1479_v35 = vld [vmem:[%s1875_s5 + $0x1b8] sm:$0xf0]  ;;  %v1418_v38 = vor.u32 %v1563_v32, %v1415_v33  ;;  %v1279_v40 = vld [vmem:[%s1875_s5 + $0x28] sm:$0xf0] }
  0x83   : > { %1055 = vmatpush.bf16.msrb.mxu3 %v1514_v54  ;;  %v1545_v41 = vld [vmem:[%s1875_s5 + $0xa4] sm:$0xf]  ;;  %v1482_v42 = vor.u32 %v1579_v34, %v1479_v35  ;;  %v1343_v43 = vld [vmem:[%s1875_s5 + $0xa8] sm:$0xf0]  ;;  %v1282_v48 = vor.u32 %v1529_v39, %v1279_v40  ;;  %v1527_v51 = vld [vmem:[%s1875_s5 + $0x14] sm:$0xf] }
  0x84   : > { %1014 = vmatpush.bf16.msrb.mxu0 %v1314_v63  ;;  %v1561_v44 = vld [vmem:[%s1875_s5 + $0x124] sm:$0xf]  ;;  %v1407_v45 = vld [vmem:[%s1875_s5 + $0x128] sm:$0xf0]  ;;  %v1346_v49 = vor.u32 %v1545_v41, %v1343_v43  ;;  %v1271_v52 = vld [vmem:[%s1875_s5 + $0x18] sm:$0xf0] }
  0x85   : > { %1028 = vmatpush.bf16.msrb.mxu1 %v1378_v1  ;;  %v1577_v46 = vld [vmem:[%s1875_s5 + $0x1a4] sm:$0xf]  ;;  %v1471_v47 = vld [vmem:[%s1875_s5 + $0x1a8] sm:$0xf0]  ;;  %v1410_v50 = vor.u32 %v1561_v44, %v1407_v45  ;;  %v1543_v53 = vld [vmem:[%s1875_s5 + $0x94] sm:$0xf]  ;;  %v1274_v63 = vor.u32 %v1527_v51, %v1271_v52 }
  0x86   : > { %1042 = vmatpush.bf16.msrb.mxu2 %v1442_v2  ;;  %v1474_v54 = vor.u32 %v1577_v46, %v1471_v47  ;;  %v1335_v56 = vld [vmem:[%s1875_s5 + $0x98] sm:$0xf0]  ;;  %v1559_v57 = vld [vmem:[%s1875_s5 + $0x114] sm:$0xf]  ;;  %v1525_v3 = vld [vmem:[%s1875_s5 + $0x4] sm:$0xf] }
  0x87   : > { %1056 = vmatpush.bf16.msrb.mxu3 %v1506_v6  ;;  %v1399_v58 = vld [vmem:[%s1875_s5 + $0x118] sm:$0xf0]  ;;  %v1575_v59 = vld [vmem:[%s1875_s5 + $0x194] sm:$0xf]  ;;  %v1338_v1 = vor.u32 %v1543_v53, %v1335_v56  ;;  %v1263_v4 = vld [vmem:[%s1875_s5 + $0x8] sm:$0xf0] }
  0x88   : > { %1015 = vmatpush.bf16.msrb.mxu0 %v1306_v12  ;;  %v1463_v60 = vld [vmem:[%s1875_s5 + $0x198] sm:$0xf0]  ;;  %v1402_v2 = vor.u32 %v1559_v57, %v1399_v58  ;;  %v1541_v5 = vld [vmem:[%s1875_s5 + $0x84] sm:$0xf]  ;;  %v1327_v7 = vld [vmem:[%s1875_s5 + $0x88] sm:$0xf0]  ;;  %v1266_v12 = vor.u32 %v1525_v3, %v1263_v4 }
  0x89   : > { %1029 = vmatpush.bf16.msrb.mxu1 %v1370_v13  ;;  %v1466_v6 = vor.u32 %v1575_v59, %v1463_v60  ;;  %v1557_v8 = vld [vmem:[%s1875_s5 + $0x104] sm:$0xf]  ;;  %v1391_v9 = vld [vmem:[%s1875_s5 + $0x108] sm:$0xf0]  ;;  %v1330_v13 = vor.u32 %v1541_v5, %v1327_v7  ;;  %s2084_s4 = smov (!%p537_p11, %s1242_s4), 3  ;;  %s1589_s12 = sshll.u32 (%p1725_p6), %s1660_s14, 3 }
  0x8a   : > { %1043 = vmatpush.bf16.msrb.mxu2 %v1434_v14  ;;  %v1573_v10 = vld [vmem:[%s1875_s5 + $0x184] sm:$0xf]  ;;  %v1455_v11 = vld [vmem:[%s1875_s5 + $0x188] sm:$0xf0]  ;;  %v1394_v14 = vor.u32 %v1557_v8, %v1391_v9  ;;  %s539_s7 = scalar_lea.vmem %s2074_s2, %s2084_s4  ;;  %s1089_s11 = scalar_lea.vmem (%p1725_p6), %s2075_s3, %s1589_s12 }
  0x8b   : > { %1057 = vmatpush.bf16.msrb.mxu3 %v1498_v18  ;;  %v1458_v15 = vor.u32 %v1573_v10, %v1455_v11  ;;  %v611_v18 = vld [vmem:[%s539_s7] sm:$0x3] }
  0x8c   : > { %1016 = vmatpush.bf16.msrb.mxu0 %v1298_v24  ;;  %v613_v21 = vperm.slane %v611_v18, 0  ;;  %v614_v23 = vperm.slane %v611_v18, 1 }
  0x8d   : > { %1030 = vmatpush.bf16.msrb.mxu1 %v1362_v25 }
  0x8e   : > { %1044 = vmatpush.bf16.msrb.mxu2 %v1426_v26 }
  0x8f   : > { %1058 = vmatpush.bf16.msrb.mxu3 %v1490_v30 }
  0x90   : > { %1017 = vmatpush.bf16.msrb.mxu0 %v1290_v36 }
  0x91   : > { %1031 = vmatpush.bf16.msrb.mxu1 %v1354_v37 }
  0x92   : > { %1045 = vmatpush.bf16.msrb.mxu2 %v1418_v38 }
  0x93   : > { %1059 = vmatpush.bf16.msrb.mxu3 %v1482_v42 }
  0x94   : > { %1018 = vmatpush.bf16.msrb.mxu0 %v1282_v48 }
  0x95   : > { %1032 = vmatpush.bf16.msrb.mxu1 %v1346_v49 }
  0x96   : > { %1046 = vmatpush.bf16.msrb.mxu2 %v1410_v50 }
  0x97   : > { %1060 = vmatpush.bf16.msrb.mxu3 %v1474_v54 }
  0x98   : > { %1019 = vmatpush.bf16.msrb.mxu0 %v1274_v63 }
  0x99   : > { %1033 = vmatpush.bf16.msrb.mxu1 %v1338_v1 }
  0x9a   : > { %1047 = vmatpush.bf16.msrb.mxu2 %v1402_v2 }
  0x9b   : > { %1061 = vmatpush.bf16.msrb.mxu3 %v1466_v6 }
  0x9c   : > { %1020 = vmatpush.bf16.msrb.mxu0 %v1266_v12 }
  0x9d   : > { %1034 = vmatpush.bf16.msrb.mxu1 %v1330_v13 }
  0x9e   : > { %1048 = vmatpush.bf16.msrb.mxu2 %v1394_v14 }
  0x9f   : > { %1062 = vmatpush.bf16.msrb.mxu3 %v1458_v15  ;;  %1021 = vmatmul.bf16.vlgmr.msrb.gmra.mxu0 %v1983_v61 }
  0xa0   : > { %1035 = vmatmul.bf16.vlgmr.msrb.gmra.mxu1 %v1987_v0 }
  0xa1   : > { %1049 = vmatmul.bf16.vlgmr.msrb.gmra.mxu2 %v1970_v55 }
  0xa2   : > { %1063 = vmatmul.bf16.vlgmr.msrb.gmra.mxu3 %v1985_v62 }
  0xfc   : > { %v966_v16 = vpop.f32.mrf.mxu0 }
  0xfd   : > { %v980_v17 = vpop.f32.mrf.mxu1  ;;  %v967_v0 = vadd.f32 %v966_v16, %v613_v21 }
  0xff   : > { %v981_v62 = vadd.f32 %v980_v17, %v967_v0 }
 0x104   : > { %v994_v19 = vpop.f32.mrf.mxu2  ;;  %v968_v61 = vpop.f32.mrf.mxu0 }
 0x105   : > { %v1008_v20 = vpop.f32.mrf.mxu3  ;;  %v982_v22 = vpop.f32.mrf.mxu1  ;;  %v995_v28 = vadd.f32 %v994_v19, %v981_v62  ;;  %v969_v29 = vadd.f32 %v968_v61, %v613_v21 }
 0x107   : > { %v1009_v32 = vadd.f32 %v1008_v20, %v995_v28  ;;  %v983_v33 = vadd.f32 %v982_v22, %v969_v29 }
 0x109   : > { %v1069_v39 = vmax.f32 %v1009_v32, 0.0 }
 0x10c   : > { %v996_v55 = vpop.f32.mrf.mxu2 }
 0x10d   : > { %v1010_v24 = vpop.f32.mrf.mxu3  ;;  %v997_v40 = vadd.f32 %v996_v55, %v983_v33 }
 0x10f   : > { %v1011_v46 = vadd.f32 %v1010_v24, %v997_v40 }
 0x111   : > { %v1071_v50 = vmax.f32 %v1011_v46, 0.0 }
 0x11c   : > { %v1022_v25 = vpop.f32.mrf.mxu0 }
 0x11d   : > { %v1023_v26 = vadd.f32 %v1022_v25, %v614_v23  ;;  %v1036_v27 = vpop.f32.mrf.mxu1 }
 0x11f   : > { %v1037_v30 = vadd.f32 %v1036_v27, %v1023_v26 }
 0x124   : > { %v1050_v31 = vpop.f32.mrf.mxu2  ;;  %v1024_v36 = vpop.f32.mrf.mxu0 }
 0x125   : > { %v1051_v34 = vadd.f32 %v1050_v31, %v1037_v30  ;;  %v1064_v35 = vpop.f32.mrf.mxu3  ;;  %v1025_v38 = vadd.f32 %v1024_v36, %v614_v23  ;;  %v1038_v42 = vpop.f32.mrf.mxu1 }
 0x127   : > { %v1065_v37 = vadd.f32 %v1064_v35, %v1051_v34  ;;  %v1039_v44 = vadd.f32 %v1038_v42, %v1025_v38 }
 0x129   : > { %v1070_v41 = vmax.f32 %v1065_v37, 0.0 }
 0x12b   : > { %v1073_v43 = vpack.c.bf16 %v1070_v41, %v1069_v39 }
 0x12c   : > { %v1052_v45 = vpop.f32.mrf.mxu2 }
 0x12d   : > { %1075 = vst [vmem:[%s521_s9] sm:$0xff] %v1073_v43  ;;  %v1053_v47 = vadd.f32 %v1052_v45, %v1039_v44  ;;  %v1066_v48 = vpop.f32.mrf.mxu3 }
 0x12f   : > { %v1067_v49 = vadd.f32 %v1066_v48, %v1053_v47 }
 0x131   : > { %v1072_v51 = vmax.f32 %v1067_v49, 0.0  ;;  %1083 = sbr.rel (!%p1725_p6) target bundleno = 318 (0x13e), region = 74 }
 0x133   : > { %v1074_v52 = vpack.c.bf16 %v1072_v51, %v1071_v50 }
 0x134   : > { %v1120_v53 = vld [vmem:[%s521_s9] sm:$0xff] (%p1725_p6) }
 0x135   : > { %1076 = vst [vmem:[%s521_s9 + $0x8] sm:$0xff] %v1074_v52 }
 0x136   : > { %1121 = vst [vmem:[%s1089_s11] sm:$0xff] %v1120_v53 }
 0x13c   : > { %v1122_v54 = vld [vmem:[%s521_s9 + $0x8] sm:$0xff] }
 0x13d   : > { %1123 = vst [vmem:[%s1089_s11 + $0x10] sm:$0xff] %v1122_v54 }
 0x13e PF: > { %s13_s16 = sadd.s32 1, %s1668_s16   ;;  %s2077_s12 = smov %s1656_s13 }
 0x13f   : > { %p10_p12 = scmp.ge.s32.totalorder %s13_s16, 4   ;;  %s2078_s13 = smov %s1730_s22 }
 0x140   : > { %s2079_s14 = smov %s1664_s15  ;;  %s2080_s15 = smov %s2082_s17 }
 0x141   :  { %12 = sbr.rel (!%p10_p12) target bundleno = 3 (0x3), region = 149 }

// kernel: resnet_forward.56
= control target key start
LH: loop header
LB: loop body
LE: loop exit
PB: predicated region body
PF: predicated region fallthrough
CT: control target
= control target key end

     0   :  { %s1694_s12 = smov 0   ;;  %s1696_s13 = smov 0   ;;  %s2076_s0 = inlined_call_operand.vmem [shape: bf16[16,512], index: 0, kind: input, shape index: {}]   ;;  %s2077_s1 = inlined_call_operand.vmem [shape: bf16[512,512], index: 1, kind: input, shape index: {}]   ;;  %s2078_s2 = inlined_call_operand.vmem [shape: f32[1,512], index: 2, kind: input, shape index: {}]   ;;  %s2079_s3 = inlined_call_operand.vmem [shape: bf16[16,512], index: 3, kind: output, shape index: {}]  }
   0x1   :  { %s1698_s14 = smov 0   ;;  %s1700_s15 = smov 0  }
   0x2   :  { %s1702_s16 = smov 0  }
   0x3 LB: > { %s28_s17 = sadd.s32 1, %s1668_s15  ;;  %s1235_s18 = sadd.s32 4294967295, %s1672_s16   ;;  %s1672_s16 = sphi %s1702_s16, %s13_s16   ;;  %s1668_s15 = sphi %s1700_s15, %s2084_s15   ;;  %s1664_s14 = sphi %s1698_s14, %s2083_s14   ;;  %s1660_s13 = sphi %s1696_s13, %s2082_s13   ;;  %s1656_s12 = sphi %s1694_s12, %s2081_s12  }
   0x4   : > { %p30_p0 = scmp.ge.s32.totalorder %s28_s17, 2  ;;  %p76_p1 = scmp.ne.s32.totalorder %s1660_s13, %s1656_s12 }
   0x5   : > { %p77_p2 = scmp.eq.s32.totalorder %s1672_s16, 0  ;;  %p134_p4 = scmp.eq.s32.totalorder %s1235_s18, 1 }
   0x6   : > { %s2086_s17 = smov (%p30_p0, %s28_s17), 0  ;;  %s69_s20 = sadd.s32 1, %s1660_s13 }
   0x7   : > { %p78_p3 = por %p77_p2, %p76_p1  ;;  %s65_s19 = ssub.s32 %s1668_s15, %s2086_s17 }
   0x8   : > { %p67_p5 = scmp.eq.s32.totalorder %s65_s19, 0  ;;  %p1729_p6 = por %p134_p4, %p76_p1 }
   0x9   : > { %p1239_p7 = scmp.ge.s32.totalorder %s1672_s16, 2 }
   0xa   : > { %s1734_s22 = scalar_select %p67_p5, %s1660_s13, %s69_s20  }
   0xb   : > { %171 = sbr.rel (%p1239_p7) target bundleno = 84 (0x54), region = 20 }
  0x10   : > { %174 = sbr.rel (!%p78_p3) target bundleno = 84 (0x54), region = 24  ;;  %s176_s23 = sand.u32 (%p78_p3), 1, %s1660_s13  }
  0x11   : > { %s1524_s24 = sshll.u32 (%p78_p3), %s1668_s15, 3  ;;  %s1240_s25 = sshll.u32 (%p78_p3), %s176_s23, 9 }
  0x12   : > { %s1742_s28 = scalar_lea.vmem (%p78_p3), %s2077_s1, %s1524_s24  ;;  %s1747_s29 = scalar_lea.vmem (%p78_p3), [#allocation2], %s1240_s25 }
  0x13   : > { %v339_v0 = vld [vmem:[%s1742_s28] sm:$0xff] (%p78_p3)  ;;  %v341_v1 = vld [vmem:[%s1742_s28 + $0x10] sm:$0xff] (%p78_p3) }
  0x14   : > { %v343_v2 = vld [vmem:[%s1742_s28 + $0x20] sm:$0xff] (%p78_p3)  ;;  %340 = vst [vmem:[%s1747_s29] sm:$0xff] (%p78_p3), %v339_v0  ;;  %v345_v3 = vld [vmem:[%s1742_s28 + $0x30] sm:$0xff] (%p78_p3) }
  0x15   : > { %342 = vst [vmem:[%s1747_s29 + $0x8] sm:$0xff] %v341_v1  ;;  %v347_v4 = vld [vmem:[%s1742_s28 + $0x40] sm:$0xff]  ;;  %v349_v5 = vld [vmem:[%s1742_s28 + $0x50] sm:$0xff] }
  0x16   : > { %344 = vst [vmem:[%s1747_s29 + $0x10] sm:$0xff] %v343_v2  ;;  %v351_v6 = vld [vmem:[%s1742_s28 + $0x60] sm:$0xff]  ;;  %v353_v7 = vld [vmem:[%s1742_s28 + $0x70] sm:$0xff] }
  0x17   : > { %346 = vst [vmem:[%s1747_s29 + $0x18] sm:$0xff] %v345_v3  ;;  %v355_v8 = vld [vmem:[%s1742_s28 + $0x80] sm:$0xff]  ;;  %v357_v9 = vld [vmem:[%s1742_s28 + $0x90] sm:$0xff] }
  0x18   : > { %348 = vst [vmem:[%s1747_s29 + $0x20] sm:$0xff] %v347_v4  ;;  %v359_v10 = vld [vmem:[%s1742_s28 + $0xa0] sm:$0xff]  ;;  %v361_v11 = vld [vmem:[%s1742_s28 + $0xb0] sm:$0xff] }
  0x19   : > { %350 = vst [vmem:[%s1747_s29 + $0x28] sm:$0xff] %v349_v5  ;;  %v363_v12 = vld [vmem:[%s1742_s28 + $0xc0] sm:$0xff]  ;;  %v365_v13 = vld [vmem:[%s1742_s28 + $0xd0] sm:$0xff] }
  0x1a   : > { %352 = vst [vmem:[%s1747_s29 + $0x30] sm:$0xff] %v351_v6  ;;  %v367_v14 = vld [vmem:[%s1742_s28 + $0xe0] sm:$0xff]  ;;  %v369_v15 = vld [vmem:[%s1742_s28 + $0xf0] sm:$0xff] }
  0x1b   : > { %354 = vst [vmem:[%s1747_s29 + $0x38] sm:$0xff] %v353_v7  ;;  %v371_v16 = vld [vmem:[%s1742_s28 + $0x100] sm:$0xff]  ;;  %v373_v17 = vld [vmem:[%s1742_s28 + $0x110] sm:$0xff] }
  0x1c   : > { %356 = vst [vmem:[%s1747_s29 + $0x40] sm:$0xff] %v355_v8  ;;  %v375_v18 = vld [vmem:[%s1742_s28 + $0x120] sm:$0xff]  ;;  %v377_v19 = vld [vmem:[%s1742_s28 + $0x130] sm:$0xff] }
  0x1d   : > { %358 = vst [vmem:[%s1747_s29 + $0x48] sm:$0xff] %v357_v9  ;;  %v379_v20 = vld [vmem:[%s1742_s28 + $0x140] sm:$0xff]  ;;  %v381_v21 = vld [vmem:[%s1742_s28 + $0x150] sm:$0xff] }
  0x1e   : > { %360 = vst [vmem:[%s1747_s29 + $0x50] sm:$0xff] %v359_v10  ;;  %v383_v22 = vld [vmem:[%s1742_s28 + $0x160] sm:$0xff]  ;;  %v385_v23 = vld [vmem:[%s1742_s28 + $0x170] sm:$0xff] }
  0x1f   : > { %362 = vst [vmem:[%s1747_s29 + $0x58] sm:$0xff] %v361_v11  ;;  %v387_v24 = vld [vmem:[%s1742_s28 + $0x180] sm:$0xff]  ;;  %v389_v25 = vld [vmem:[%s1742_s28 + $0x190] sm:$0xff] }
  0x20   : > { %364 = vst [vmem:[%s1747_s29 + $0x60] sm:$0xff] %v363_v12  ;;  %v391_v26 = vld [vmem:[%s1742_s28 + $0x1a0] sm:$0xff]  ;;  %v393_v27 = vld [vmem:[%s1742_s28 + $0x1b0] sm:$0xff] }
  0x21   : > { %366 = vst [vmem:[%s1747_s29 + $0x68] sm:$0xff] %v365_v13  ;;  %v395_v28 = vld [vmem:[%s1742_s28 + $0x1c0] sm:$0xff]  ;;  %v397_v29 = vld [vmem:[%s1742_s28 + $0x1d0] sm:$0xff] }
  0x22   : > { %368 = vst [vmem:[%s1747_s29 + $0x70] sm:$0xff] %v367_v14  ;;  %v399_v30 = vld [vmem:[%s1742_s28 + $0x1e0] sm:$0xff]  ;;  %v401_v31 = vld [vmem:[%s1742_s28 + $0x1f0] sm:$0xff] }
  0x23   : > { %370 = vst [vmem:[%s1747_s29 + $0x78] sm:$0xff] %v369_v15  ;;  %v403_v32 = vld [vmem:[%s1742_s28 + $0x200] sm:$0xff]  ;;  %v405_v33 = vld [vmem:[%s1742_s28 + $0x210] sm:$0xff] }
  0x24   : > { %372 = vst [vmem:[%s1747_s29 + $0x80] sm:$0xff] %v371_v16  ;;  %v407_v34 = vld [vmem:[%s1742_s28 + $0x220] sm:$0xff]  ;;  %v409_v35 = vld [vmem:[%s1742_s28 + $0x230] sm:$0xff] }
  0x25   : > { %374 = vst [vmem:[%s1747_s29 + $0x88] sm:$0xff] %v373_v17  ;;  %v411_v36 = vld [vmem:[%s1742_s28 + $0x240] sm:$0xff]  ;;  %v413_v37 = vld [vmem:[%s1742_s28 + $0x250] sm:$0xff] }
  0x26   : > { %376 = vst [vmem:[%s1747_s29 + $0x90] sm:$0xff] %v375_v18  ;;  %v415_v38 = vld [vmem:[%s1742_s28 + $0x260] sm:$0xff]  ;;  %v417_v39 = vld [vmem:[%s1742_s28 + $0x270] sm:$0xff] }
  0x27   : > { %378 = vst [vmem:[%s1747_s29 + $0x98] sm:$0xff] %v377_v19  ;;  %v419_v40 = vld [vmem:[%s1742_s28 + $0x280] sm:$0xff]  ;;  %v421_v41 = vld [vmem:[%s1742_s28 + $0x290] sm:$0xff] }
  0x28   : > { %380 = vst [vmem:[%s1747_s29 + $0xa0] sm:$0xff] %v379_v20  ;;  %v423_v42 = vld [vmem:[%s1742_s28 + $0x2a0] sm:$0xff]  ;;  %v425_v43 = vld [vmem:[%s1742_s28 + $0x2b0] sm:$0xff] }
  0x29   : > { %382 = vst [vmem:[%s1747_s29 + $0xa8] sm:$0xff] %v381_v21  ;;  %v427_v44 = vld [vmem:[%s1742_s28 + $0x2c0] sm:$0xff]  ;;  %v429_v45 = vld [vmem:[%s1742_s28 + $0x2d0] sm:$0xff] }
  0x2a   : > { %384 = vst [vmem:[%s1747_s29 + $0xb0] sm:$0xff] %v383_v22  ;;  %v431_v46 = vld [vmem:[%s1742_s28 + $0x2e0] sm:$0xff]  ;;  %v433_v47 = vld [vmem:[%s1742_s28 + $0x2f0] sm:$0xff] }
  0x2b   : > { %386 = vst [vmem:[%s1747_s29 + $0xb8] sm:$0xff] %v385_v23  ;;  %v435_v48 = vld [vmem:[%s1742_s28 + $0x300] sm:$0xff]  ;;  %v437_v49 = vld [vmem:[%s1742_s28 + $0x310] sm:$0xff] }
  0x2c   : > { %388 = vst [vmem:[%s1747_s29 + $0xc0] sm:$0xff] %v387_v24  ;;  %v439_v50 = vld [vmem:[%s1742_s28 + $0x320] sm:$0xff]  ;;  %v441_v51 = vld [vmem:[%s1742_s28 + $0x330] sm:$0xff] }
  0x2d   : > { %390 = vst [vmem:[%s1747_s29 + $0xc8] sm:$0xff] %v389_v25  ;;  %v443_v52 = vld [vmem:[%s1742_s28 + $0x340] sm:$0xff]  ;;  %v445_v53 = vld [vmem:[%s1742_s28 + $0x350] sm:$0xff] }
  0x2e   : > { %392 = vst [vmem:[%s1747_s29 + $0xd0] sm:$0xff] %v391_v26  ;;  %v447_v54 = vld [vmem:[%s1742_s28 + $0x360] sm:$0xff]  ;;  %v449_v55 = vld [vmem:[%s1742_s28 + $0x370] sm:$0xff] }
  0x2f   : > { %394 = vst [vmem:[%s1747_s29 + $0xd8] sm:$0xff] %v393_v27  ;;  %v451_v56 = vld [vmem:[%s1742_s28 + $0x380] sm:$0xff]  ;;  %v453_v57 = vld [vmem:[%s1742_s28 + $0x390] sm:$0xff] }
  0x30   : > { %396 = vst [vmem:[%s1747_s29 + $0xe0] sm:$0xff] %v395_v28  ;;  %v455_v58 = vld [vmem:[%s1742_s28 + $0x3a0] sm:$0xff]  ;;  %v457_v59 = vld [vmem:[%s1742_s28 + $0x3b0] sm:$0xff] }
  0x31   : > { %398 = vst [vmem:[%s1747_s29 + $0xe8] sm:$0xff] %v397_v29  ;;  %v459_v60 = vld [vmem:[%s1742_s28 + $0x3c0] sm:$0xff]  ;;  %v461_v61 = vld [vmem:[%s1742_s28 + $0x3d0] sm:$0xff] }
  0x32   : > { %400 = vst [vmem:[%s1747_s29 + $0xf0] sm:$0xff] %v399_v30  ;;  %v463_v62 = vld [vmem:[%s1742_s28 + $0x3e0] sm:$0xff]  ;;  %v465_v63 = vld [vmem:[%s1742_s28 + $0x3f0] sm:$0xff] }
  0x33   : > { %402 = vst [vmem:[%s1747_s29 + $0xf8] sm:$0xff] %v401_v31 }
  0x34   : > { %404 = vst [vmem:[%s1747_s29 + $0x100] sm:$0xff] %v403_v32 }
  0x35   : > { %406 = vst [vmem:[%s1747_s29 + $0x108] sm:$0xff] %v405_v33 }
  0x36   : > { %408 = vst [vmem:[%s1747_s29 + $0x110] sm:$0xff] %v407_v34 }
  0x37   : > { %410 = vst [vmem:[%s1747_s29 + $0x118] sm:$0xff] %v409_v35 }
  0x38   : > { %412 = vst [vmem:[%s1747_s29 + $0x120] sm:$0xff] %v411_v36 }
  0x39   : > { %414 = vst [vmem:[%s1747_s29 + $0x128] sm:$0xff] %v413_v37 }
  0x3a   : > { %416 = vst [vmem:[%s1747_s29 + $0x130] sm:$0xff] %v415_v38 }
  0x3b   : > { %418 = vst [vmem:[%s1747_s29 + $0x138] sm:$0xff] %v417_v39 }
  0x3c   : > { %420 = vst [vmem:[%s1747_s29 + $0x140] sm:$0xff] %v419_v40 }
  0x3d   : > { %422 = vst [vmem:[%s1747_s29 + $0x148] sm:$0xff] %v421_v41 }
  0x3e   : > { %424 = vst [vmem:[%s1747_s29 + $0x150] sm:$0xff] %v423_v42 }
  0x3f   : > { %426 = vst [vmem:[%s1747_s29 + $0x158] sm:$0xff] %v425_v43 }
  0x40   : > { %428 = vst [vmem:[%s1747_s29 + $0x160] sm:$0xff] %v427_v44 }
  0x41   : > { %430 = vst [vmem:[%s1747_s29 + $0x168] sm:$0xff] %v429_v45 }
  0x42   : > { %432 = vst [vmem:[%s1747_s29 + $0x170] sm:$0xff] %v431_v46 }
  0x43   : > { %434 = vst [vmem:[%s1747_s29 + $0x178] sm:$0xff] %v433_v47 }
  0x44   : > { %436 = vst [vmem:[%s1747_s29 + $0x180] sm:$0xff] %v435_v48 }
  0x45   : > { %438 = vst [vmem:[%s1747_s29 + $0x188] sm:$0xff] %v437_v49 }
  0x46   : > { %440 = vst [vmem:[%s1747_s29 + $0x190] sm:$0xff] %v439_v50 }
  0x47   : > { %442 = vst [vmem:[%s1747_s29 + $0x198] sm:$0xff] %v441_v51 }
  0x48   : > { %444 = vst [vmem:[%s1747_s29 + $0x1a0] sm:$0xff] %v443_v52 }
  0x49   : > { %446 = vst [vmem:[%s1747_s29 + $0x1a8] sm:$0xff] %v445_v53 }
  0x4a   : > { %448 = vst [vmem:[%s1747_s29 + $0x1b0] sm:$0xff] %v447_v54 }
  0x4b   : > { %450 = vst [vmem:[%s1747_s29 + $0x1b8] sm:$0xff] %v449_v55 }
  0x4c   : > { %452 = vst [vmem:[%s1747_s29 + $0x1c0] sm:$0xff] %v451_v56 }
  0x4d   : > { %454 = vst [vmem:[%s1747_s29 + $0x1c8] sm:$0xff] %v453_v57 }
  0x4e   : > { %456 = vst [vmem:[%s1747_s29 + $0x1d0] sm:$0xff] %v455_v58 }
  0x4f   : > { %458 = vst [vmem:[%s1747_s29 + $0x1d8] sm:$0xff] %v457_v59 }
  0x50   : > { %460 = vst [vmem:[%s1747_s29 + $0x1e0] sm:$0xff] %v459_v60 }
  0x51   : > { %462 = vst [vmem:[%s1747_s29 + $0x1e8] sm:$0xff] %v461_v61 }
  0x52   : > { %464 = vst [vmem:[%s1747_s29 + $0x1f0] sm:$0xff] %v463_v62 }
  0x53   : > { %466 = vst [vmem:[%s1747_s29 + $0x1f8] sm:$0xff] %v465_v63 }
  0x54 PF: > { %p1243_p8 = scmp.ge.s32.totalorder %s1672_s16, 1  ;;  %p479_p9 = scmp.lt.s32.totalorder %s1672_s16, 3 }
  0x56   : > { %p480_p10 = pnand %p1243_p8, %p479_p9 }
  0x57   : > { %s486_s30 = sand.u32 (!%p480_p10), 1, %s1656_s12  }
  0x58   : > { %483 = sbr.rel (%p480_p10) target bundleno = 320 (0x140), region = 66  ;;  %s1244_s4 = sshll.u32 (!%p480_p10), %s486_s30, 9 }
  0x59   : > { %s1879_s5 = scalar_lea.vmem (!%p480_p10), [#allocation2], %s1244_s4  ;;  %s1246_s4 = sshll.u32 (!%p480_p10), %s1664_s14, 1 }
  0x5a   : > { %p537_p11 = scmp.lt.s32.totalorder (!%p480_p10), %s1246_s4, 3  ;;  %s1245_s8 = sshll.u32 (!%p480_p10), %s486_s30, 4 }
  0x5b   : > { %s521_s9 = scalar_lea.vmem (!%p480_p10), [#allocation3], %s1245_s8 }
  0x5d   : > { %v1321_v0 = vld [vmem:[%s1879_s5 + $0x70] sm:$0xf]  ;;  %v1544_v1 = vld [vmem:[%s1879_s5 + $0x74] sm:$0xf0]  ;;  %v1313_v11 = vld [vmem:[%s1879_s5 + $0x60] sm:$0xf] }
  0x5e   : > { %v1385_v2 = vld [vmem:[%s1879_s5 + $0xf0] sm:$0xf]  ;;  %v1322_v3 = vor.u32 %v1544_v1, %v1321_v0  ;;  %v1560_v4 = vld [vmem:[%s1879_s5 + $0xf4] sm:$0xf0]  ;;  %v1542_v13 = vld [vmem:[%s1879_s5 + $0x64] sm:$0xf0] }
  0x5f   : > { %v1449_v5 = vld [vmem:[%s1879_s5 + $0x170] sm:$0xf]  ;;  %v1576_v6 = vld [vmem:[%s1879_s5 + $0x174] sm:$0xf0]  ;;  %v1386_v7 = vor.u32 %v1560_v4, %v1385_v2  ;;  %v1377_v14 = vld [vmem:[%s1879_s5 + $0xe0] sm:$0xf]  ;;  %v1314_v16 = vor.u32 %v1542_v13, %v1313_v11 }
  0x60   : > { %v1450_v8 = vor.u32 %v1576_v6, %v1449_v5  ;;  %v1513_v9 = vld [vmem:[%s1879_s5 + $0x1f0] sm:$0xf]  ;;  %v1592_v10 = vld [vmem:[%s1879_s5 + $0x1f4] sm:$0xf0]  ;;  %957 = vmatpush.bf16.msra.mxu0 %v1322_v3  ;;  %v1558_v15 = vld [vmem:[%s1879_s5 + $0xe4] sm:$0xf0] }
  0x61   : > { %v1514_v12 = vor.u32 %v1592_v10, %v1513_v9  ;;  %971 = vmatpush.bf16.msra.mxu1 %v1386_v7  ;;  %v1378_v17 = vor.u32 %v1558_v15, %v1377_v14  ;;  %v1441_v18 = vld [vmem:[%s1879_s5 + $0x160] sm:$0xf]  ;;  %v1574_v19 = vld [vmem:[%s1879_s5 + $0x164] sm:$0xf0]  ;;  %v1305_v23 = vld [vmem:[%s1879_s5 + $0x50] sm:$0xf] }
  0x62   : > { %985 = vmatpush.bf16.msra.mxu2 %v1450_v8  ;;  %v1505_v20 = vld [vmem:[%s1879_s5 + $0x1e0] sm:$0xf]  ;;  %v1442_v21 = vor.u32 %v1574_v19, %v1441_v18  ;;  %v1590_v22 = vld [vmem:[%s1879_s5 + $0x1e4] sm:$0xf0]  ;;  %v1540_v24 = vld [vmem:[%s1879_s5 + $0x54] sm:$0xf0] }
  0x63   : > { %999 = vmatpush.bf16.msra.mxu3 %v1514_v12  ;;  %v1506_v25 = vor.u32 %v1590_v22, %v1505_v20  ;;  %v1369_v26 = vld [vmem:[%s1879_s5 + $0xd0] sm:$0xf]  ;;  %v1556_v27 = vld [vmem:[%s1879_s5 + $0xd4] sm:$0xf0]  ;;  %v1306_v29 = vor.u32 %v1540_v24, %v1305_v23  ;;  %v1297_v35 = vld [vmem:[%s1879_s5 + $0x40] sm:$0xf] }
  0x64   : > { %v1433_v28 = vld [vmem:[%s1879_s5 + $0x150] sm:$0xf]  ;;  %958 = vmatpush.bf16.msra.mxu0 %v1314_v16  ;;  %v1572_v30 = vld [vmem:[%s1879_s5 + $0x154] sm:$0xf0]  ;;  %v1370_v33 = vor.u32 %v1556_v27, %v1369_v26  ;;  %v1538_v36 = vld [vmem:[%s1879_s5 + $0x44] sm:$0xf0] }
  0x65   : > { %v1497_v31 = vld [vmem:[%s1879_s5 + $0x1d0] sm:$0xf]  ;;  %v1588_v32 = vld [vmem:[%s1879_s5 + $0x1d4] sm:$0xf0]  ;;  %972 = vmatpush.bf16.msra.mxu1 %v1378_v17  ;;  %v1434_v34 = vor.u32 %v1572_v30, %v1433_v28  ;;  %v1361_v37 = vld [vmem:[%s1879_s5 + $0xc0] sm:$0xf]  ;;  %v1298_v44 = vor.u32 %v1538_v36, %v1297_v35 }
  0x66   : > { %986 = vmatpush.bf16.msra.mxu2 %v1442_v21  ;;  %v1498_v38 = vor.u32 %v1588_v32, %v1497_v31  ;;  %v1554_v39 = vld [vmem:[%s1879_s5 + $0xc4] sm:$0xf0]  ;;  %v1425_v40 = vld [vmem:[%s1879_s5 + $0x140] sm:$0xf]  ;;  %v1289_v47 = vld [vmem:[%s1879_s5 + $0x30] sm:$0xf] }
  0x67   : > { %1000 = vmatpush.bf16.msra.mxu3 %v1506_v25  ;;  %v1570_v41 = vld [vmem:[%s1879_s5 + $0x144] sm:$0xf0]  ;;  %v1489_v42 = vld [vmem:[%s1879_s5 + $0x1c0] sm:$0xf]  ;;  %v1362_v45 = vor.u32 %v1554_v39, %v1361_v37  ;;  %v1536_v48 = vld [vmem:[%s1879_s5 + $0x34] sm:$0xf0] }
  0x68   : > { %v1586_v43 = vld [vmem:[%s1879_s5 + $0x1c4] sm:$0xf0]  ;;  %959 = vmatpush.bf16.msra.mxu0 %v1306_v29  ;;  %v1426_v46 = vor.u32 %v1570_v41, %v1425_v40  ;;  %v1353_v49 = vld [vmem:[%s1879_s5 + $0xb0] sm:$0xf]  ;;  %v1552_v51 = vld [vmem:[%s1879_s5 + $0xb4] sm:$0xf0]  ;;  %v1290_v56 = vor.u32 %v1536_v48, %v1289_v47 }
  0x69   : > { %973 = vmatpush.bf16.msra.mxu1 %v1370_v33  ;;  %v1490_v50 = vor.u32 %v1586_v43, %v1489_v42  ;;  %v1417_v52 = vld [vmem:[%s1879_s5 + $0x130] sm:$0xf]  ;;  %v1568_v53 = vld [vmem:[%s1879_s5 + $0x134] sm:$0xf0]  ;;  %v1354_v57 = vor.u32 %v1552_v51, %v1353_v49  ;;  %v1281_v59 = vld [vmem:[%s1879_s5 + $0x20] sm:$0xf] }
  0x6a   : > { %987 = vmatpush.bf16.msra.mxu2 %v1434_v34  ;;  %v1481_v54 = vld [vmem:[%s1879_s5 + $0x1b0] sm:$0xf]  ;;  %v1584_v55 = vld [vmem:[%s1879_s5 + $0x1b4] sm:$0xf0]  ;;  %v1418_v58 = vor.u32 %v1568_v53, %v1417_v52  ;;  %v1534_v60 = vld [vmem:[%s1879_s5 + $0x24] sm:$0xf0] }
  0x6b   : > { %1001 = vmatpush.bf16.msra.mxu3 %v1498_v38  ;;  %v1345_v61 = vld [vmem:[%s1879_s5 + $0xa0] sm:$0xf]  ;;  %v1482_v62 = vor.u32 %v1584_v55, %v1481_v54  ;;  %v1550_v63 = vld [vmem:[%s1879_s5 + $0xa4] sm:$0xf0]  ;;  %v1282_v4 = vor.u32 %v1534_v60, %v1281_v59  ;;  %v1273_v7 = vld [vmem:[%s1879_s5 + $0x10] sm:$0xf] }
  0x6c   : > { %960 = vmatpush.bf16.msra.mxu0 %v1298_v44  ;;  %v1409_v0 = vld [vmem:[%s1879_s5 + $0x120] sm:$0xf]  ;;  %v1566_v1 = vld [vmem:[%s1879_s5 + $0x124] sm:$0xf0]  ;;  %v1346_v5 = vor.u32 %v1550_v63, %v1345_v61  ;;  %v1532_v8 = vld [vmem:[%s1879_s5 + $0x14] sm:$0xf0] }
  0x6d   : > { %974 = vmatpush.bf16.msra.mxu1 %v1362_v45  ;;  %v1473_v2 = vld [vmem:[%s1879_s5 + $0x1a0] sm:$0xf]  ;;  %v1582_v3 = vld [vmem:[%s1879_s5 + $0x1a4] sm:$0xf0]  ;;  %v1410_v6 = vor.u32 %v1566_v1, %v1409_v0  ;;  %v1337_v9 = vld [vmem:[%s1879_s5 + $0x90] sm:$0xf]  ;;  %v1274_v17 = vor.u32 %v1532_v8, %v1273_v7 }
  0x6e   : > { %988 = vmatpush.bf16.msra.mxu2 %v1426_v46  ;;  %v1474_v10 = vor.u32 %v1582_v3, %v1473_v2  ;;  %v1548_v11 = vld [vmem:[%s1879_s5 + $0x94] sm:$0xf0]  ;;  %v1401_v12 = vld [vmem:[%s1879_s5 + $0x110] sm:$0xf]  ;;  %v1265_v16 = vld [vmem:[%s1879_s5] sm:$0xf] }
  0x6f   : > { %1002 = vmatpush.bf16.msra.mxu3 %v1490_v50  ;;  %v1564_v13 = vld [vmem:[%s1879_s5 + $0x114] sm:$0xf0]  ;;  %v1465_v14 = vld [vmem:[%s1879_s5 + $0x190] sm:$0xf]  ;;  %v1530_v18 = vld [vmem:[%s1879_s5 + $0x4] sm:$0xf0]  ;;  %v1338_v21 = vor.u32 %v1548_v11, %v1337_v9 }
  0x70   : > { %961 = vmatpush.bf16.msra.mxu0 %v1290_v56  ;;  %v1580_v15 = vld [vmem:[%s1879_s5 + $0x194] sm:$0xf0]  ;;  %v1329_v19 = vld [vmem:[%s1879_s5 + $0x80] sm:$0xf]  ;;  %v1546_v20 = vld [vmem:[%s1879_s5 + $0x84] sm:$0xf0]  ;;  %v1402_v22 = vor.u32 %v1564_v13, %v1401_v12  ;;  %v1266_v33 = vor.u32 %v1530_v18, %v1265_v16 }
  0x71   : > { %975 = vmatpush.bf16.msra.mxu1 %v1354_v57  ;;  %v1393_v23 = vld [vmem:[%s1879_s5 + $0x100] sm:$0xf]  ;;  %v1562_v24 = vld [vmem:[%s1879_s5 + $0x104] sm:$0xf0]  ;;  %v1466_v26 = vor.u32 %v1580_v15, %v1465_v14  ;;  %v1543_v28 = vld [vmem:[%s1879_s5 + $0x74] sm:$0xf]  ;;  %v1330_v37 = vor.u32 %v1546_v20, %v1329_v19 }
  0x72   : > { %989 = vmatpush.bf16.msra.mxu2 %v1418_v58  ;;  %v1457_v25 = vld [vmem:[%s1879_s5 + $0x180] sm:$0xf]  ;;  %v1578_v27 = vld [vmem:[%s1879_s5 + $0x184] sm:$0xf0]  ;;  %v1323_v29 = vld [vmem:[%s1879_s5 + $0x78] sm:$0xf0]  ;;  %v1394_v38 = vor.u32 %v1562_v24, %v1393_v23 }
  0x73   : > { %1003 = vmatpush.bf16.msra.mxu3 %v1482_v62  ;;  %v1559_v30 = vld [vmem:[%s1879_s5 + $0xf4] sm:$0xf]  ;;  %v1387_v31 = vld [vmem:[%s1879_s5 + $0xf8] sm:$0xf0]  ;;  %v1541_v39 = vld [vmem:[%s1879_s5 + $0x64] sm:$0xf]  ;;  %v1458_v43 = vor.u32 %v1578_v27, %v1457_v25  ;;  %v1326_v44 = vor.u32 %v1543_v28, %v1323_v29 }
  0x74   : > { %962 = vmatpush.bf16.msra.mxu0 %v1282_v4  ;;  %v1575_v32 = vld [vmem:[%s1879_s5 + $0x174] sm:$0xf]  ;;  %v1451_v34 = vld [vmem:[%s1879_s5 + $0x178] sm:$0xf0]  ;;  %v1315_v40 = vld [vmem:[%s1879_s5 + $0x68] sm:$0xf0]  ;;  %v1390_v49 = vor.u32 %v1559_v30, %v1387_v31 }
  0x75   : > { %976 = vmatpush.bf16.msra.mxu1 %v1346_v5  ;;  %v1591_v35 = vld [vmem:[%s1879_s5 + $0x1f4] sm:$0xf]  ;;  %v1515_v36 = vld [vmem:[%s1879_s5 + $0x1f8] sm:$0xf0]  ;;  %v1257_v41 = vld [vmem:[%s2076_s0 + $0x8] sm:$0xf]  ;;  %v1454_v50 = vor.u32 %v1575_v32, %v1451_v34  ;;  %v1318_v63 = vor.u32 %v1541_v39, %v1315_v40 }
  0x76   : > { %990 = vmatpush.bf16.msra.mxu2 %v1410_v6  ;;  %v1528_v42 = vld [vmem:[%s2076_s0 + $0x14] sm:$0xf0]  ;;  %v1557_v45 = vld [vmem:[%s1879_s5 + $0xe4] sm:$0xf]  ;;  %v1379_v46 = vld [vmem:[%s1879_s5 + $0xe8] sm:$0xf0]  ;;  %v1518_v54 = vor.u32 %v1591_v35, %v1515_v36 }
  0x77   : > { %1004 = vmatpush.bf16.msra.mxu3 %v1474_v10  ;;  %v1573_v47 = vld [vmem:[%s1879_s5 + $0x164] sm:$0xf]  ;;  %v1443_v48 = vld [vmem:[%s1879_s5 + $0x168] sm:$0xf0]  ;;  %v1249_v51 = vld [vmem:[%s2076_s0] sm:$0xf]  ;;  %v1974_v55 = vor.u32 %v1528_v42, %v1257_v41  ;;  %v1382_v1 = vor.u32 %v1557_v45, %v1379_v46 }
  0x78   : > { %963 = vmatpush.bf16.msra.mxu0 %v1274_v17  ;;  %v1527_v52 = vld [vmem:[%s2076_s0 + $0xc] sm:$0xf0]  ;;  %v1526_v53 = vld [vmem:[%s2076_s0 + $0xc] sm:$0xf]  ;;  %v1259_v56 = vld [vmem:[%s2076_s0 + $0x18] sm:$0xf0]  ;;  %v1446_v2 = vor.u32 %v1573_v47, %v1443_v48 }
  0x79   : > { %977 = vmatpush.bf16.msra.mxu1 %v1338_v21  ;;  %v1525_v57 = vld [vmem:[%s2076_s0 + $0x4] sm:$0xf]  ;;  %v1251_v58 = vld [vmem:[%s2076_s0 + $0x10] sm:$0xf0]  ;;  %v1507_v60 = vld [vmem:[%s1879_s5 + $0x1e8] sm:$0xf0]  ;;  %v1987_v61 = vor.u32 %v1527_v52, %v1249_v51  ;;  %v1989_v62 = vor.u32 %v1526_v53, %v1259_v56 }
  0x7a   : > { %991 = vmatpush.bf16.msra.mxu2 %v1402_v22  ;;  %v1589_v59 = vld [vmem:[%s1879_s5 + $0x1e4] sm:$0xf]  ;;  %v1991_v0 = vor.u32 %v1525_v57, %v1251_v58  ;;  %v1539_v3 = vld [vmem:[%s1879_s5 + $0x54] sm:$0xf]  ;;  %v1307_v4 = vld [vmem:[%s1879_s5 + $0x58] sm:$0xf0] }
  0x7b   : > { %1005 = vmatpush.bf16.msra.mxu3 %v1466_v26  ;;  %v1555_v5 = vld [vmem:[%s1879_s5 + $0xd4] sm:$0xf]  ;;  %v1510_v6 = vor.u32 %v1589_v59, %v1507_v60  ;;  %v1371_v7 = vld [vmem:[%s1879_s5 + $0xd8] sm:$0xf0]  ;;  %v1310_v12 = vor.u32 %v1539_v3, %v1307_v4  ;;  %v1537_v15 = vld [vmem:[%s1879_s5 + $0x44] sm:$0xf] }
  0x7c   : > { %964 = vmatpush.bf16.msra.mxu0 %v1266_v33  ;;  %v1571_v8 = vld [vmem:[%s1879_s5 + $0x154] sm:$0xf]  ;;  %v1435_v9 = vld [vmem:[%s1879_s5 + $0x158] sm:$0xf0]  ;;  %v1374_v13 = vor.u32 %v1555_v5, %v1371_v7  ;;  %v1299_v16 = vld [vmem:[%s1879_s5 + $0x48] sm:$0xf0] }
  0x7d   : > { %978 = vmatpush.bf16.msra.mxu1 %v1330_v37  ;;  %v1587_v10 = vld [vmem:[%s1879_s5 + $0x1d4] sm:$0xf]  ;;  %v1499_v11 = vld [vmem:[%s1879_s5 + $0x1d8] sm:$0xf0]  ;;  %v1438_v14 = vor.u32 %v1571_v8, %v1435_v9  ;;  %v1553_v17 = vld [vmem:[%s1879_s5 + $0xc4] sm:$0xf]  ;;  %v1302_v24 = vor.u32 %v1537_v15, %v1299_v16 }
  0x7e   : > { %992 = vmatpush.bf16.msra.mxu2 %v1394_v38  ;;  %v1502_v18 = vor.u32 %v1587_v10, %v1499_v11  ;;  %v1363_v19 = vld [vmem:[%s1879_s5 + $0xc8] sm:$0xf0]  ;;  %v1569_v20 = vld [vmem:[%s1879_s5 + $0x144] sm:$0xf]  ;;  %v1535_v27 = vld [vmem:[%s1879_s5 + $0x34] sm:$0xf] }
  0x7f   : > { %1006 = vmatpush.bf16.msra.mxu3 %v1458_v43  ;;  %965 = vmatmul.bf16.vlgmr.msra.gmra.mxu0 %v1987_v61  ;;  %v1427_v21 = vld [vmem:[%s1879_s5 + $0x148] sm:$0xf0]  ;;  %v1585_v22 = vld [vmem:[%s1879_s5 + $0x1c4] sm:$0xf]  ;;  %v1366_v25 = vor.u32 %v1553_v17, %v1363_v19  ;;  %v1291_v28 = vld [vmem:[%s1879_s5 + $0x38] sm:$0xf0] }
  0x80   : > { %1013 = vmatpush.bf16.msrb.mxu0 %v1326_v44  ;;  %979 = vmatmul.bf16.vlgmr.msra.gmra.mxu1 %v1991_v0  ;;  %v1491_v23 = vld [vmem:[%s1879_s5 + $0x1c8] sm:$0xf0]  ;;  %v1430_v26 = vor.u32 %v1569_v20, %v1427_v21  ;;  %v1551_v29 = vld [vmem:[%s1879_s5 + $0xb4] sm:$0xf]  ;;  %v1355_v31 = vld [vmem:[%s1879_s5 + $0xb8] sm:$0xf0]  ;;  %v1294_v36 = vor.u32 %v1535_v27, %v1291_v28 }
  0x81   : > { %1027 = vmatpush.bf16.msrb.mxu1 %v1390_v49  ;;  %993 = vmatmul.bf16.vlgmr.msra.gmra.mxu2 %v1974_v55  ;;  %v1494_v30 = vor.u32 %v1585_v22, %v1491_v23  ;;  %v1567_v32 = vld [vmem:[%s1879_s5 + $0x134] sm:$0xf]  ;;  %v1419_v33 = vld [vmem:[%s1879_s5 + $0x138] sm:$0xf0]  ;;  %v1358_v37 = vor.u32 %v1551_v29, %v1355_v31  ;;  %v1533_v39 = vld [vmem:[%s1879_s5 + $0x24] sm:$0xf] }
  0x82   : > { %1041 = vmatpush.bf16.msrb.mxu2 %v1454_v50  ;;  %1007 = vmatmul.bf16.vlgmr.msra.gmra.mxu3 %v1989_v62  ;;  %v1583_v34 = vld [vmem:[%s1879_s5 + $0x1b4] sm:$0xf]  ;;  %v1483_v35 = vld [vmem:[%s1879_s5 + $0x1b8] sm:$0xf0]  ;;  %v1422_v38 = vor.u32 %v1567_v32, %v1419_v33  ;;  %v1283_v40 = vld [vmem:[%s1879_s5 + $0x28] sm:$0xf0] }
  0x83   : > { %1055 = vmatpush.bf16.msrb.mxu3 %v1518_v54  ;;  %v1549_v41 = vld [vmem:[%s1879_s5 + $0xa4] sm:$0xf]  ;;  %v1486_v42 = vor.u32 %v1583_v34, %v1483_v35  ;;  %v1347_v43 = vld [vmem:[%s1879_s5 + $0xa8] sm:$0xf0]  ;;  %v1286_v48 = vor.u32 %v1533_v39, %v1283_v40  ;;  %v1531_v51 = vld [vmem:[%s1879_s5 + $0x14] sm:$0xf] }
  0x84   : > { %1014 = vmatpush.bf16.msrb.mxu0 %v1318_v63  ;;  %v1565_v44 = vld [vmem:[%s1879_s5 + $0x124] sm:$0xf]  ;;  %v1411_v45 = vld [vmem:[%s1879_s5 + $0x128] sm:$0xf0]  ;;  %v1350_v49 = vor.u32 %v1549_v41, %v1347_v43  ;;  %v1275_v52 = vld [vmem:[%s1879_s5 + $0x18] sm:$0xf0] }
  0x85   : > { %1028 = vmatpush.bf16.msrb.mxu1 %v1382_v1  ;;  %v1581_v46 = vld [vmem:[%s1879_s5 + $0x1a4] sm:$0xf]  ;;  %v1475_v47 = vld [vmem:[%s1879_s5 + $0x1a8] sm:$0xf0]  ;;  %v1414_v50 = vor.u32 %v1565_v44, %v1411_v45  ;;  %v1547_v53 = vld [vmem:[%s1879_s5 + $0x94] sm:$0xf]  ;;  %v1278_v63 = vor.u32 %v1531_v51, %v1275_v52 }
  0x86   : > { %1042 = vmatpush.bf16.msrb.mxu2 %v1446_v2  ;;  %v1478_v54 = vor.u32 %v1581_v46, %v1475_v47  ;;  %v1339_v56 = vld [vmem:[%s1879_s5 + $0x98] sm:$0xf0]  ;;  %v1563_v57 = vld [vmem:[%s1879_s5 + $0x114] sm:$0xf]  ;;  %v1529_v3 = vld [vmem:[%s1879_s5 + $0x4] sm:$0xf] }
  0x87   : > { %1056 = vmatpush.bf16.msrb.mxu3 %v1510_v6  ;;  %v1403_v58 = vld [vmem:[%s1879_s5 + $0x118] sm:$0xf0]  ;;  %v1579_v59 = vld [vmem:[%s1879_s5 + $0x194] sm:$0xf]  ;;  %v1342_v1 = vor.u32 %v1547_v53, %v1339_v56  ;;  %v1267_v4 = vld [vmem:[%s1879_s5 + $0x8] sm:$0xf0] }
  0x88   : > { %1015 = vmatpush.bf16.msrb.mxu0 %v1310_v12  ;;  %v1467_v60 = vld [vmem:[%s1879_s5 + $0x198] sm:$0xf0]  ;;  %v1406_v2 = vor.u32 %v1563_v57, %v1403_v58  ;;  %v1545_v5 = vld [vmem:[%s1879_s5 + $0x84] sm:$0xf]  ;;  %v1331_v7 = vld [vmem:[%s1879_s5 + $0x88] sm:$0xf0]  ;;  %v1270_v12 = vor.u32 %v1529_v3, %v1267_v4 }
  0x89   : > { %1029 = vmatpush.bf16.msrb.mxu1 %v1374_v13  ;;  %v1470_v6 = vor.u32 %v1579_v59, %v1467_v60  ;;  %v1561_v8 = vld [vmem:[%s1879_s5 + $0x104] sm:$0xf]  ;;  %v1395_v9 = vld [vmem:[%s1879_s5 + $0x108] sm:$0xf0]  ;;  %v1334_v13 = vor.u32 %v1545_v5, %v1331_v7  ;;  %s2088_s4 = smov (!%p537_p11, %s1246_s4), 3  ;;  %s1593_s12 = sshll.u32 (%p1729_p6), %s1664_s14, 3 }
  0x8a   : > { %1043 = vmatpush.bf16.msrb.mxu2 %v1438_v14  ;;  %v1577_v10 = vld [vmem:[%s1879_s5 + $0x184] sm:$0xf]  ;;  %v1459_v11 = vld [vmem:[%s1879_s5 + $0x188] sm:$0xf0]  ;;  %v1398_v14 = vor.u32 %v1561_v8, %v1395_v9  ;;  %s539_s7 = scalar_lea.vmem %s2078_s2, %s2088_s4  ;;  %s1093_s11 = scalar_lea.vmem (%p1729_p6), %s2079_s3, %s1593_s12 }
  0x8b   : > { %1057 = vmatpush.bf16.msrb.mxu3 %v1502_v18  ;;  %v1462_v15 = vor.u32 %v1577_v10, %v1459_v11  ;;  %v611_v18 = vld [vmem:[%s539_s7] sm:$0x3] }
  0x8c   : > { %1016 = vmatpush.bf16.msrb.mxu0 %v1302_v24  ;;  %v613_v20 = vperm.slane %v611_v18, 0  ;;  %v614_v23 = vperm.slane %v611_v18, 1 }
  0x8d   : > { %1030 = vmatpush.bf16.msrb.mxu1 %v1366_v25 }
  0x8e   : > { %1044 = vmatpush.bf16.msrb.mxu2 %v1430_v26 }
  0x8f   : > { %1058 = vmatpush.bf16.msrb.mxu3 %v1494_v30 }
  0x90   : > { %1017 = vmatpush.bf16.msrb.mxu0 %v1294_v36 }
  0x91   : > { %1031 = vmatpush.bf16.msrb.mxu1 %v1358_v37 }
  0x92   : > { %1045 = vmatpush.bf16.msrb.mxu2 %v1422_v38 }
  0x93   : > { %1059 = vmatpush.bf16.msrb.mxu3 %v1486_v42 }
  0x94   : > { %1018 = vmatpush.bf16.msrb.mxu0 %v1286_v48 }
  0x95   : > { %1032 = vmatpush.bf16.msrb.mxu1 %v1350_v49 }
  0x96   : > { %1046 = vmatpush.bf16.msrb.mxu2 %v1414_v50 }
  0x97   : > { %1060 = vmatpush.bf16.msrb.mxu3 %v1478_v54 }
  0x98   : > { %1019 = vmatpush.bf16.msrb.mxu0 %v1278_v63 }
  0x99   : > { %1033 = vmatpush.bf16.msrb.mxu1 %v1342_v1 }
  0x9a   : > { %1047 = vmatpush.bf16.msrb.mxu2 %v1406_v2 }
  0x9b   : > { %1061 = vmatpush.bf16.msrb.mxu3 %v1470_v6 }
  0x9c   : > { %1020 = vmatpush.bf16.msrb.mxu0 %v1270_v12 }
  0x9d   : > { %1034 = vmatpush.bf16.msrb.mxu1 %v1334_v13 }
  0x9e   : > { %1048 = vmatpush.bf16.msrb.mxu2 %v1398_v14 }
  0x9f   : > { %1062 = vmatpush.bf16.msrb.mxu3 %v1462_v15  ;;  %1021 = vmatmul.bf16.vlgmr.msrb.gmra.mxu0 %v1987_v61 }
  0xa0   : > { %1035 = vmatmul.bf16.vlgmr.msrb.gmra.mxu1 %v1991_v0 }
  0xa1   : > { %1049 = vmatmul.bf16.vlgmr.msrb.gmra.mxu2 %v1974_v55 }
  0xa2   : > { %1063 = vmatmul.bf16.vlgmr.msrb.gmra.mxu3 %v1989_v62 }
  0xfc   : > { %v966_v16 = vpop.f32.mrf.mxu0 }
  0xfd   : > { %v980_v17 = vpop.f32.mrf.mxu1  ;;  %v967_v22 = vadd.f32 %v966_v16, %v613_v20 }
  0xff   : > { %v981_v55 = vadd.f32 %v980_v17, %v967_v22 }
 0x104   : > { %v994_v19 = vpop.f32.mrf.mxu2  ;;  %v968_v61 = vpop.f32.mrf.mxu0 }
 0x105   : > { %v1008_v21 = vpop.f32.mrf.mxu3  ;;  %v982_v0 = vpop.f32.mrf.mxu1  ;;  %v995_v27 = vadd.f32 %v994_v19, %v981_v55  ;;  %v969_v28 = vadd.f32 %v968_v61, %v613_v20 }
 0x107   : > { %v1009_v31 = vadd.f32 %v1008_v21, %v995_v27  ;;  %v983_v32 = vadd.f32 %v982_v0, %v969_v28 }
 0x109   : > { %v1069_v37 = vmul.f32 2.0, %v1009_v31 }
 0x10b   : > { %v1073_v43 = vmax.f32 %v1069_v37, 0.0 }
 0x10c   : > { %v996_v24 = vpop.f32.mrf.mxu2 }
 0x10d   : > { %v1010_v62 = vpop.f32.mrf.mxu3  ;;  %v997_v38 = vadd.f32 %v996_v24, %v983_v32 }
 0x10f   : > { %v1011_v44 = vadd.f32 %v1010_v62, %v997_v38 }
 0x111   : > { %v1071_v51 = vmul.f32 2.0, %v1011_v44 }
 0x113   : > { %v1075_v54 = vmax.f32 %v1071_v51, 0.0 }
 0x11c   : > { %v1022_v25 = vpop.f32.mrf.mxu0 }
 0x11d   : > { %v1023_v26 = vadd.f32 %v1022_v25, %v614_v23  ;;  %v1036_v29 = vpop.f32.mrf.mxu1 }
 0x11f   : > { %v1037_v30 = vadd.f32 %v1036_v29, %v1023_v26 }
 0x124   : > { %v1050_v33 = vpop.f32.mrf.mxu2  ;;  %v1024_v36 = vpop.f32.mrf.mxu0 }
 0x125   : > { %v1051_v34 = vadd.f32 %v1050_v33, %v1037_v30  ;;  %v1064_v35 = vpop.f32.mrf.mxu3  ;;  %v1025_v40 = vadd.f32 %v1024_v36, %v614_v23  ;;  %v1038_v42 = vpop.f32.mrf.mxu1 }
 0x127   : > { %v1065_v39 = vadd.f32 %v1064_v35, %v1051_v34  ;;  %v1039_v46 = vadd.f32 %v1038_v42, %v1025_v40 }
 0x129   : > { %v1070_v41 = vmul.f32 2.0, %v1065_v39 }
 0x12b   : > { %v1074_v45 = vmax.f32 %v1070_v41, 0.0 }
 0x12c   : > { %v1052_v47 = vpop.f32.mrf.mxu2 }
 0x12d   : > { %v1077_v48 = vpack.c.bf16 %v1074_v45, %v1073_v43  ;;  %v1053_v49 = vadd.f32 %v1052_v47, %v1039_v46  ;;  %v1066_v50 = vpop.f32.mrf.mxu3 }
 0x12f   : > { %1079 = vst [vmem:[%s521_s9] sm:$0xff] %v1077_v48  ;;  %v1067_v52 = vadd.f32 %v1066_v50, %v1053_v49 }
 0x131   : > { %v1072_v53 = vmul.f32 2.0, %v1067_v52 }
 0x133   : > { %v1076_v56 = vmax.f32 %v1072_v53, 0.0  ;;  %1087 = sbr.rel (!%p1729_p6) target bundleno = 320 (0x140), region = 74 }
 0x135   : > { %v1078_v57 = vpack.c.bf16 %v1076_v56, %v1075_v54 }
 0x136   : > { %v1124_v58 = vld [vmem:[%s521_s9] sm:$0xff] (%p1729_p6) }
 0x137   : > { %1080 = vst [vmem:[%s521_s9 + $0x8] sm:$0xff] %v1078_v57 }
 0x138   : > { %1125 = vst [vmem:[%s1093_s11] sm:$0xff] %v1124_v58 }
 0x13e   : > { %v1126_v59 = vld [vmem:[%s521_s9 + $0x8] sm:$0xff] }
 0x13f   : > { %1127 = vst [vmem:[%s1093_s11 + $0x10] sm:$0xff] %v1126_v59 }
 0x140 PF: > { %s13_s16 = sadd.s32 1, %s1672_s16   ;;  %s2081_s12 = smov %s1660_s13 }
 0x141   : > { %p10_p12 = scmp.ge.s32.totalorder %s13_s16, 4   ;;  %s2082_s13 = smov %s1734_s22 }
 0x142   : > { %s2083_s14 = smov %s1668_s15  ;;  %s2084_s15 = smov %s2086_s17 }
 0x143   :  { %12 = sbr.rel (!%p10_p12) target bundleno = 3 (0x3), region = 149 }

// kernel: resnet_forward.59
= control target key start
LH: loop header
LB: loop body
LE: loop exit
PB: predicated region body
PF: predicated region fallthrough
CT: control target
= control target key end

     0   :  { %s1672_s12 = smov 0   ;;  %s1674_s13 = smov 0   ;;  %s2064_s0 = inlined_call_operand.vmem [shape: bf16[16,512], index: 0, kind: input, shape index: {}]   ;;  %s2065_s1 = inlined_call_operand.vmem [shape: bf16[512,1024], index: 1, kind: input, shape index: {}]   ;;  %s2066_s2 = inlined_call_operand.vmem [shape: f32[1,1024], index: 2, kind: input, shape index: {}]   ;;  %s2067_s3 = inlined_call_operand.vmem [shape: f32[16,1024], index: 3, kind: output, shape index: {}]  }
   0x1   :  { %s1676_s14 = smov 0   ;;  %s1678_s15 = smov 0  }
   0x2   :  { %s1680_s16 = smov 0  }
   0x3 LB: > { %s28_s17 = sadd.s32 1, %s1646_s15  ;;  %s1213_s18 = sadd.s32 4294967295, %s1650_s16   ;;  %s1650_s16 = sphi %s1680_s16, %s13_s16   ;;  %s1646_s15 = sphi %s1678_s15, %s2072_s15   ;;  %s1642_s14 = sphi %s1676_s14, %s2071_s14   ;;  %s1638_s13 = sphi %s1674_s13, %s2070_s13   ;;  %s1634_s12 = sphi %s1672_s12, %s2069_s12  }
   0x4   : > { %p30_p0 = scmp.ge.s32.totalorder %s28_s17, 4  ;;  %p76_p1 = scmp.ne.s32.totalorder %s1638_s13, %s1634_s12 }
   0x5   : > { %p77_p2 = scmp.eq.s32.totalorder %s1650_s16, 0  ;;  %p134_p4 = scmp.eq.s32.totalorder %s1213_s18, 3 }
   0x6   : > { %s2074_s17 = smov (%p30_p0, %s28_s17), 0  ;;  %s69_s20 = sadd.s32 1, %s1638_s13 }
   0x7   : > { %p78_p3 = por %p77_p2, %p76_p1  ;;  %s65_s19 = ssub.s32 %s1646_s15, %s2074_s17 }
   0x8   : > { %p67_p5 = scmp.eq.s32.totalorder %s65_s19, 0  ;;  %p1707_p6 = por %p134_p4, %p76_p1 }
   0x9   : > { %p1217_p7 = scmp.ge.s32.totalorder %s1650_s16, 4 }
   0xa   : > { %s1712_s22 = scalar_select %p67_p5, %s1638_s13, %s69_s20  }
   0xb   : > { %171 = sbr.rel (%p1217_p7) target bundleno = 84 (0x54), region = 20 }
  0x10   : > { %174 = sbr.rel (!%p78_p3) target bundleno = 84 (0x54), region = 24  ;;  %s176_s23 = sand.u32 (%p78_p3), 1, %s1638_s13  }
  0x11   : > { %s1502_s24 = sshll.u32 (%p78_p3), %s1646_s15, 3  ;;  %s1218_s25 = sshll.u32 (%p78_p3), %s176_s23, 9 }
  0x12   : > { %s1720_s28 = scalar_lea.vmem (%p78_p3), %s2065_s1, %s1502_s24  ;;  %s1725_s29 = scalar_lea.vmem (%p78_p3), [#allocation2], %s1218_s25 }
  0x13   : > { %v339_v0 = vld [vmem:[%s1720_s28] sm:$0xff] (%p78_p3) }
  0x14   : > { %v341_v1 = vld [vmem:[%s1720_s28 + $0x20] sm:$0xff] (%p78_p3)  ;;  %340 = vst [vmem:[%s1725_s29] sm:$0xff] (%p78_p3), %v339_v0 }
  0x15   : > { %v343_v2 = vld [vmem:[%s1720_s28 + $0x40] sm:$0xff]  ;;  %342 = vst [vmem:[%s1725_s29 + $0x8] sm:$0xff] %v341_v1 }
  0x16   : > { %v345_v3 = vld [vmem:[%s1720_s28 + $0x60] sm:$0xff]  ;;  %344 = vst [vmem:[%s1725_s29 + $0x10] sm:$0xff] %v343_v2 }
  0x17   : > { %v347_v4 = vld [vmem:[%s1720_s28 + $0x80] sm:$0xff]  ;;  %346 = vst [vmem:[%s1725_s29 + $0x18] sm:$0xff] %v345_v3 }
  0x18   : > { %v349_v5 = vld [vmem:[%s1720_s28 + $0xa0] sm:$0xff]  ;;  %348 = vst [vmem:[%s1725_s29 + $0x20] sm:$0xff] %v347_v4 }
  0x19   : > { %v351_v6 = vld [vmem:[%s1720_s28 + $0xc0] sm:$0xff]  ;;  %350 = vst [vmem:[%s1725_s29 + $0x28] sm:$0xff] %v349_v5 }
  0x1a   : > { %v353_v7 = vld [vmem:[%s1720_s28 + $0xe0] sm:$0xff]  ;;  %352 = vst [vmem:[%s1725_s29 + $0x30] sm:$0xff] %v351_v6 }
  0x1b   : > { %v355_v8 = vld [vmem:[%s1720_s28 + $0x100] sm:$0xff]  ;;  %354 = vst [vmem:[%s1725_s29 + $0x38] sm:$0xff] %v353_v7 }
  0x1c   : > { %v357_v9 = vld [vmem:[%s1720_s28 + $0x120] sm:$0xff]  ;;  %356 = vst [vmem:[%s1725_s29 + $0x40] sm:$0xff] %v355_v8 }
  0x1d   : > { %v359_v10 = vld [vmem:[%s1720_s28 + $0x140] sm:$0xff]  ;;  %358 = vst [vmem:[%s1725_s29 + $0x48] sm:$0xff] %v357_v9 }
  0x1e   : > { %v361_v11 = vld [vmem:[%s1720_s28 + $0x160] sm:$0xff]  ;;  %360 = vst [vmem:[%s1725_s29 + $0x50] sm:$0xff] %v359_v10 }
  0x1f   : > { %v363_v12 = vld [vmem:[%s1720_s28 + $0x180] sm:$0xff]  ;;  %362 = vst [vmem:[%s1725_s29 + $0x58] sm:$0xff] %v361_v11 }
  0x20   : > { %v365_v13 = vld [vmem:[%s1720_s28 + $0x1a0] sm:$0xff]  ;;  %364 = vst [vmem:[%s1725_s29 + $0x60] sm:$0xff] %v363_v12 }
  0x21   : > { %v367_v14 = vld [vmem:[%s1720_s28 + $0x1c0] sm:$0xff]  ;;  %366 = vst [vmem:[%s1725_s29 + $0x68] sm:$0xff] %v365_v13 }
  0x22   : > { %v369_v15 = vld [vmem:[%s1720_s28 + $0x1e0] sm:$0xff]  ;;  %368 = vst [vmem:[%s1725_s29 + $0x70] sm:$0xff] %v367_v14 }
  0x23   : > { %v371_v16 = vld [vmem:[%s1720_s28 + $0x200] sm:$0xff]  ;;  %370 = vst [vmem:[%s1725_s29 + $0x78] sm:$0xff] %v369_v15 }
  0x24   : > { %v373_v17 = vld [vmem:[%s1720_s28 + $0x220] sm:$0xff]  ;;  %372 = vst [vmem:[%s1725_s29 + $0x80] sm:$0xff] %v371_v16 }
  0x25   : > { %v375_v18 = vld [vmem:[%s1720_s28 + $0x240] sm:$0xff]  ;;  %374 = vst [vmem:[%s1725_s29 + $0x88] sm:$0xff] %v373_v17 }
  0x26   : > { %v377_v19 = vld [vmem:[%s1720_s28 + $0x260] sm:$0xff]  ;;  %376 = vst [vmem:[%s1725_s29 + $0x90] sm:$0xff] %v375_v18 }
  0x27   : > { %v379_v20 = vld [vmem:[%s1720_s28 + $0x280] sm:$0xff]  ;;  %378 = vst [vmem:[%s1725_s29 + $0x98] sm:$0xff] %v377_v19 }
  0x28   : > { %v381_v21 = vld [vmem:[%s1720_s28 + $0x2a0] sm:$0xff]  ;;  %380 = vst [vmem:[%s1725_s29 + $0xa0] sm:$0xff] %v379_v20 }
  0x29   : > { %v383_v22 = vld [vmem:[%s1720_s28 + $0x2c0] sm:$0xff]  ;;  %382 = vst [vmem:[%s1725_s29 + $0xa8] sm:$0xff] %v381_v21 }
  0x2a   : > { %v385_v23 = vld [vmem:[%s1720_s28 + $0x2e0] sm:$0xff]  ;;  %384 = vst [vmem:[%s1725_s29 + $0xb0] sm:$0xff] %v383_v22 }
  0x2b   : > { %v387_v24 = vld [vmem:[%s1720_s28 + $0x300] sm:$0xff]  ;;  %386 = vst [vmem:[%s1725_s29 + $0xb8] sm:$0xff] %v385_v23 }
  0x2c   : > { %v389_v25 = vld [vmem:[%s1720_s28 + $0x320] sm:$0xff]  ;;  %388 = vst [vmem:[%s1725_s29 + $0xc0] sm:$0xff] %v387_v24 }
  0x2d   : > { %v391_v26 = vld [vmem:[%s1720_s28 + $0x340] sm:$0xff]  ;;  %390 = vst [vmem:[%s1725_s29 + $0xc8] sm:$0xff] %v389_v25 }
  0x2e   : > { %v393_v27 = vld [vmem:[%s1720_s28 + $0x360] sm:$0xff]  ;;  %392 = vst [vmem:[%s1725_s29 + $0xd0] sm:$0xff] %v391_v26 }
  0x2f   : > { %v395_v28 = vld [vmem:[%s1720_s28 + $0x380] sm:$0xff]  ;;  %394 = vst [vmem:[%s1725_s29 + $0xd8] sm:$0xff] %v393_v27 }
  0x30   : > { %v397_v29 = vld [vmem:[%s1720_s28 + $0x3a0] sm:$0xff]  ;;  %396 = vst [vmem:[%s1725_s29 + $0xe0] sm:$0xff] %v395_v28 }
  0x31   : > { %v399_v30 = vld [vmem:[%s1720_s28 + $0x3c0] sm:$0xff]  ;;  %398 = vst [vmem:[%s1725_s29 + $0xe8] sm:$0xff] %v397_v29 }
  0x32   : > { %v401_v31 = vld [vmem:[%s1720_s28 + $0x3e0] sm:$0xff]  ;;  %400 = vst [vmem:[%s1725_s29 + $0xf0] sm:$0xff] %v399_v30 }
  0x33   : > { %v403_v32 = vld [vmem:[%s1720_s28 + $0x400] sm:$0xff]  ;;  %402 = vst [vmem:[%s1725_s29 + $0xf8] sm:$0xff] %v401_v31 }
  0x34   : > { %v405_v33 = vld [vmem:[%s1720_s28 + $0x420] sm:$0xff]  ;;  %404 = vst [vmem:[%s1725_s29 + $0x100] sm:$0xff] %v403_v32 }
  0x35   : > { %v407_v34 = vld [vmem:[%s1720_s28 + $0x440] sm:$0xff]  ;;  %406 = vst [vmem:[%s1725_s29 + $0x108] sm:$0xff] %v405_v33 }
  0x36   : > { %v409_v35 = vld [vmem:[%s1720_s28 + $0x460] sm:$0xff]  ;;  %408 = vst [vmem:[%s1725_s29 + $0x110] sm:$0xff] %v407_v34 }
  0x37   : > { %v411_v36 = vld [vmem:[%s1720_s28 + $0x480] sm:$0xff]  ;;  %410 = vst [vmem:[%s1725_s29 + $0x118] sm:$0xff] %v409_v35 }
  0x38   : > { %v413_v37 = vld [vmem:[%s1720_s28 + $0x4a0] sm:$0xff]  ;;  %412 = vst [vmem:[%s1725_s29 + $0x120] sm:$0xff] %v411_v36 }
  0x39   : > { %v415_v38 = vld [vmem:[%s1720_s28 + $0x4c0] sm:$0xff]  ;;  %414 = vst [vmem:[%s1725_s29 + $0x128] sm:$0xff] %v413_v37 }
  0x3a   : > { %v417_v39 = vld [vmem:[%s1720_s28 + $0x4e0] sm:$0xff]  ;;  %416 = vst [vmem:[%s1725_s29 + $0x130] sm:$0xff] %v415_v38 }
  0x3b   : > { %v419_v40 = vld [vmem:[%s1720_s28 + $0x500] sm:$0xff]  ;;  %418 = vst [vmem:[%s1725_s29 + $0x138] sm:$0xff] %v417_v39 }
  0x3c   : > { %v421_v41 = vld [vmem:[%s1720_s28 + $0x520] sm:$0xff]  ;;  %420 = vst [vmem:[%s1725_s29 + $0x140] sm:$0xff] %v419_v40 }
  0x3d   : > { %v423_v42 = vld [vmem:[%s1720_s28 + $0x540] sm:$0xff]  ;;  %422 = vst [vmem:[%s1725_s29 + $0x148] sm:$0xff] %v421_v41 }
  0x3e   : > { %v425_v43 = vld [vmem:[%s1720_s28 + $0x560] sm:$0xff]  ;;  %424 = vst [vmem:[%s1725_s29 + $0x150] sm:$0xff] %v423_v42 }
  0x3f   : > { %v427_v44 = vld [vmem:[%s1720_s28 + $0x580] sm:$0xff]  ;;  %426 = vst [vmem:[%s1725_s29 + $0x158] sm:$0xff] %v425_v43 }
  0x40   : > { %v429_v45 = vld [vmem:[%s1720_s28 + $0x5a0] sm:$0xff]  ;;  %428 = vst [vmem:[%s1725_s29 + $0x160] sm:$0xff] %v427_v44 }
  0x41   : > { %v431_v46 = vld [vmem:[%s1720_s28 + $0x5c0] sm:$0xff]  ;;  %430 = vst [vmem:[%s1725_s29 + $0x168] sm:$0xff] %v429_v45 }
  0x42   : > { %v433_v47 = vld [vmem:[%s1720_s28 + $0x5e0] sm:$0xff]  ;;  %432 = vst [vmem:[%s1725_s29 + $0x170] sm:$0xff] %v431_v46 }
  0x43   : > { %v435_v48 = vld [vmem:[%s1720_s28 + $0x600] sm:$0xff]  ;;  %434 = vst [vmem:[%s1725_s29 + $0x178] sm:$0xff] %v433_v47 }
  0x44   : > { %v437_v49 = vld [vmem:[%s1720_s28 + $0x620] sm:$0xff]  ;;  %436 = vst [vmem:[%s1725_s29 + $0x180] sm:$0xff] %v435_v48 }
  0x45   : > { %v439_v50 = vld [vmem:[%s1720_s28 + $0x640] sm:$0xff]  ;;  %438 = vst [vmem:[%s1725_s29 + $0x188] sm:$0xff] %v437_v49 }
  0x46   : > { %v441_v51 = vld [vmem:[%s1720_s28 + $0x660] sm:$0xff]  ;;  %440 = vst [vmem:[%s1725_s29 + $0x190] sm:$0xff] %v439_v50 }
  0x47   : > { %v443_v52 = vld [vmem:[%s1720_s28 + $0x680] sm:$0xff]  ;;  %442 = vst [vmem:[%s1725_s29 + $0x198] sm:$0xff] %v441_v51 }
  0x48   : > { %v445_v53 = vld [vmem:[%s1720_s28 + $0x6a0] sm:$0xff]  ;;  %444 = vst [vmem:[%s1725_s29 + $0x1a0] sm:$0xff] %v443_v52 }
  0x49   : > { %v447_v54 = vld [vmem:[%s1720_s28 + $0x6c0] sm:$0xff]  ;;  %446 = vst [vmem:[%s1725_s29 + $0x1a8] sm:$0xff] %v445_v53 }
  0x4a   : > { %v449_v55 = vld [vmem:[%s1720_s28 + $0x6e0] sm:$0xff]  ;;  %448 = vst [vmem:[%s1725_s29 + $0x1b0] sm:$0xff] %v447_v54 }
  0x4b   : > { %v451_v56 = vld [vmem:[%s1720_s28 + $0x700] sm:$0xff]  ;;  %450 = vst [vmem:[%s1725_s29 + $0x1b8] sm:$0xff] %v449_v55 }
  0x4c   : > { %v453_v57 = vld [vmem:[%s1720_s28 + $0x720] sm:$0xff]  ;;  %452 = vst [vmem:[%s1725_s29 + $0x1c0] sm:$0xff] %v451_v56 }
  0x4d   : > { %v455_v58 = vld [vmem:[%s1720_s28 + $0x740] sm:$0xff]  ;;  %454 = vst [vmem:[%s1725_s29 + $0x1c8] sm:$0xff] %v453_v57 }
  0x4e   : > { %v457_v59 = vld [vmem:[%s1720_s28 + $0x760] sm:$0xff]  ;;  %456 = vst [vmem:[%s1725_s29 + $0x1d0] sm:$0xff] %v455_v58 }
  0x4f   : > { %v459_v60 = vld [vmem:[%s1720_s28 + $0x780] sm:$0xff]  ;;  %458 = vst [vmem:[%s1725_s29 + $0x1d8] sm:$0xff] %v457_v59 }
  0x50   : > { %v461_v61 = vld [vmem:[%s1720_s28 + $0x7a0] sm:$0xff]  ;;  %460 = vst [vmem:[%s1725_s29 + $0x1e0] sm:$0xff] %v459_v60 }
  0x51   : > { %v463_v62 = vld [vmem:[%s1720_s28 + $0x7c0] sm:$0xff]  ;;  %462 = vst [vmem:[%s1725_s29 + $0x1e8] sm:$0xff] %v461_v61 }
  0x52   : > { %v465_v63 = vld [vmem:[%s1720_s28 + $0x7e0] sm:$0xff]  ;;  %464 = vst [vmem:[%s1725_s29 + $0x1f0] sm:$0xff] %v463_v62 }
  0x53   : > { %466 = vst [vmem:[%s1725_s29 + $0x1f8] sm:$0xff] %v465_v63 }
  0x54 PF: > { %p1221_p8 = scmp.ge.s32.totalorder %s1650_s16, 1  ;;  %p479_p9 = scmp.lt.s32.totalorder %s1650_s16, 5 }
  0x56   : > { %p480_p10 = pnand %p1221_p8, %p479_p9 }
  0x57   : > { %s486_s30 = sand.u32 (!%p480_p10), 1, %s1634_s12  }
  0x58   : > { %483 = sbr.rel (%p480_p10) target bundleno = 314 (0x13a), region = 66  ;;  %s1222_s4 = sshll.u32 (!%p480_p10), %s486_s30, 9 }
  0x59   : > { %s1857_s5 = scalar_lea.vmem (!%p480_p10), [#allocation2], %s1222_s4  ;;  %s1224_s4 = sshll.u32 (!%p480_p10), %s1642_s14, 1 }
  0x5a   : > { %p537_p11 = scmp.lt.s32.totalorder (!%p480_p10), %s1224_s4, 7  ;;  %s1223_s8 = sshll.u32 (!%p480_p10), %s486_s30, 5 }
  0x5b   : > { %s2033_s9 = scalar_lea.vmem (!%p480_p10), [#allocation3], %s1223_s8 }
  0x5d   : > { %v1299_v0 = vld [vmem:[%s1857_s5 + $0x70] sm:$0xf]  ;;  %v1522_v1 = vld [vmem:[%s1857_s5 + $0x74] sm:$0xf0]  ;;  %v1291_v11 = vld [vmem:[%s1857_s5 + $0x60] sm:$0xf] }
  0x5e   : > { %v1363_v2 = vld [vmem:[%s1857_s5 + $0xf0] sm:$0xf]  ;;  %v1300_v3 = vor.u32 %v1522_v1, %v1299_v0  ;;  %v1538_v4 = vld [vmem:[%s1857_s5 + $0xf4] sm:$0xf0]  ;;  %v1520_v13 = vld [vmem:[%s1857_s5 + $0x64] sm:$0xf0] }
  0x5f   : > { %v1427_v5 = vld [vmem:[%s1857_s5 + $0x170] sm:$0xf]  ;;  %v1554_v6 = vld [vmem:[%s1857_s5 + $0x174] sm:$0xf0]  ;;  %v1364_v7 = vor.u32 %v1538_v4, %v1363_v2  ;;  %v1355_v14 = vld [vmem:[%s1857_s5 + $0xe0] sm:$0xf]  ;;  %v1292_v16 = vor.u32 %v1520_v13, %v1291_v11 }
  0x60   : > { %v1428_v8 = vor.u32 %v1554_v6, %v1427_v5  ;;  %v1491_v9 = vld [vmem:[%s1857_s5 + $0x1f0] sm:$0xf]  ;;  %v1570_v10 = vld [vmem:[%s1857_s5 + $0x1f4] sm:$0xf0]  ;;  %957 = vmatpush.bf16.msra.mxu0 %v1300_v3  ;;  %v1536_v15 = vld [vmem:[%s1857_s5 + $0xe4] sm:$0xf0] }
  0x61   : > { %v1492_v12 = vor.u32 %v1570_v10, %v1491_v9  ;;  %971 = vmatpush.bf16.msra.mxu1 %v1364_v7  ;;  %v1356_v17 = vor.u32 %v1536_v15, %v1355_v14  ;;  %v1419_v18 = vld [vmem:[%s1857_s5 + $0x160] sm:$0xf]  ;;  %v1552_v19 = vld [vmem:[%s1857_s5 + $0x164] sm:$0xf0]  ;;  %v1283_v23 = vld [vmem:[%s1857_s5 + $0x50] sm:$0xf] }
  0x62   : > { %985 = vmatpush.bf16.msra.mxu2 %v1428_v8  ;;  %v1483_v20 = vld [vmem:[%s1857_s5 + $0x1e0] sm:$0xf]  ;;  %v1420_v21 = vor.u32 %v1552_v19, %v1419_v18  ;;  %v1568_v22 = vld [vmem:[%s1857_s5 + $0x1e4] sm:$0xf0]  ;;  %v1518_v24 = vld [vmem:[%s1857_s5 + $0x54] sm:$0xf0] }
  0x63   : > { %999 = vmatpush.bf16.msra.mxu3 %v1492_v12  ;;  %v1484_v25 = vor.u32 %v1568_v22, %v1483_v20  ;;  %v1347_v26 = vld [vmem:[%s1857_s5 + $0xd0] sm:$0xf]  ;;  %v1534_v27 = vld [vmem:[%s1857_s5 + $0xd4] sm:$0xf0]  ;;  %v1284_v29 = vor.u32 %v1518_v24, %v1283_v23  ;;  %v1275_v35 = vld [vmem:[%s1857_s5 + $0x40] sm:$0xf] }
  0x64   : > { %v1411_v28 = vld [vmem:[%s1857_s5 + $0x150] sm:$0xf]  ;;  %958 = vmatpush.bf16.msra.mxu0 %v1292_v16  ;;  %v1550_v30 = vld [vmem:[%s1857_s5 + $0x154] sm:$0xf0]  ;;  %v1348_v33 = vor.u32 %v1534_v27, %v1347_v26  ;;  %v1516_v36 = vld [vmem:[%s1857_s5 + $0x44] sm:$0xf0] }
  0x65   : > { %v1475_v31 = vld [vmem:[%s1857_s5 + $0x1d0] sm:$0xf]  ;;  %v1566_v32 = vld [vmem:[%s1857_s5 + $0x1d4] sm:$0xf0]  ;;  %972 = vmatpush.bf16.msra.mxu1 %v1356_v17  ;;  %v1412_v34 = vor.u32 %v1550_v30, %v1411_v28  ;;  %v1339_v37 = vld [vmem:[%s1857_s5 + $0xc0] sm:$0xf]  ;;  %v1276_v44 = vor.u32 %v1516_v36, %v1275_v35 }
  0x66   : > { %986 = vmatpush.bf16.msra.mxu2 %v1420_v21  ;;  %v1476_v38 = vor.u32 %v1566_v32, %v1475_v31  ;;  %v1532_v39 = vld [vmem:[%s1857_s5 + $0xc4] sm:$0xf0]  ;;  %v1403_v40 = vld [vmem:[%s1857_s5 + $0x140] sm:$0xf]  ;;  %v1267_v47 = vld [vmem:[%s1857_s5 + $0x30] sm:$0xf] }
  0x67   : > { %1000 = vmatpush.bf16.msra.mxu3 %v1484_v25  ;;  %v1548_v41 = vld [vmem:[%s1857_s5 + $0x144] sm:$0xf0]  ;;  %v1467_v42 = vld [vmem:[%s1857_s5 + $0x1c0] sm:$0xf]  ;;  %v1340_v45 = vor.u32 %v1532_v39, %v1339_v37  ;;  %v1514_v48 = vld [vmem:[%s1857_s5 + $0x34] sm:$0xf0] }
  0x68   : > { %v1564_v43 = vld [vmem:[%s1857_s5 + $0x1c4] sm:$0xf0]  ;;  %959 = vmatpush.bf16.msra.mxu0 %v1284_v29  ;;  %v1404_v46 = vor.u32 %v1548_v41, %v1403_v40  ;;  %v1331_v49 = vld [vmem:[%s1857_s5 + $0xb0] sm:$0xf]  ;;  %v1530_v51 = vld [vmem:[%s1857_s5 + $0xb4] sm:$0xf0]  ;;  %v1268_v56 = vor.u32 %v1514_v48, %v1267_v47 }
  0x69   : > { %973 = vmatpush.bf16.msra.mxu1 %v1348_v33  ;;  %v1468_v50 = vor.u32 %v1564_v43, %v1467_v42  ;;  %v1395_v52 = vld [vmem:[%s1857_s5 + $0x130] sm:$0xf]  ;;  %v1546_v53 = vld [vmem:[%s1857_s5 + $0x134] sm:$0xf0]  ;;  %v1332_v57 = vor.u32 %v1530_v51, %v1331_v49  ;;  %v1259_v59 = vld [vmem:[%s1857_s5 + $0x20] sm:$0xf] }
  0x6a   : > { %987 = vmatpush.bf16.msra.mxu2 %v1412_v34  ;;  %v1459_v54 = vld [vmem:[%s1857_s5 + $0x1b0] sm:$0xf]  ;;  %v1562_v55 = vld [vmem:[%s1857_s5 + $0x1b4] sm:$0xf0]  ;;  %v1396_v58 = vor.u32 %v1546_v53, %v1395_v52  ;;  %v1512_v60 = vld [vmem:[%s1857_s5 + $0x24] sm:$0xf0] }
  0x6b   : > { %1001 = vmatpush.bf16.msra.mxu3 %v1476_v38  ;;  %v1323_v61 = vld [vmem:[%s1857_s5 + $0xa0] sm:$0xf]  ;;  %v1460_v62 = vor.u32 %v1562_v55, %v1459_v54  ;;  %v1528_v63 = vld [vmem:[%s1857_s5 + $0xa4] sm:$0xf0]  ;;  %v1260_v4 = vor.u32 %v1512_v60, %v1259_v59  ;;  %v1251_v7 = vld [vmem:[%s1857_s5 + $0x10] sm:$0xf] }
  0x6c   : > { %960 = vmatpush.bf16.msra.mxu0 %v1276_v44  ;;  %v1387_v0 = vld [vmem:[%s1857_s5 + $0x120] sm:$0xf]  ;;  %v1544_v1 = vld [vmem:[%s1857_s5 + $0x124] sm:$0xf0]  ;;  %v1324_v5 = vor.u32 %v1528_v63, %v1323_v61  ;;  %v1510_v8 = vld [vmem:[%s1857_s5 + $0x14] sm:$0xf0] }
  0x6d   : > { %974 = vmatpush.bf16.msra.mxu1 %v1340_v45  ;;  %v1451_v2 = vld [vmem:[%s1857_s5 + $0x1a0] sm:$0xf]  ;;  %v1560_v3 = vld [vmem:[%s1857_s5 + $0x1a4] sm:$0xf0]  ;;  %v1388_v6 = vor.u32 %v1544_v1, %v1387_v0  ;;  %v1315_v9 = vld [vmem:[%s1857_s5 + $0x90] sm:$0xf]  ;;  %v1252_v17 = vor.u32 %v1510_v8, %v1251_v7 }
  0x6e   : > { %988 = vmatpush.bf16.msra.mxu2 %v1404_v46  ;;  %v1452_v10 = vor.u32 %v1560_v3, %v1451_v2  ;;  %v1526_v11 = vld [vmem:[%s1857_s5 + $0x94] sm:$0xf0]  ;;  %v1379_v12 = vld [vmem:[%s1857_s5 + $0x110] sm:$0xf]  ;;  %v1243_v16 = vld [vmem:[%s1857_s5] sm:$0xf] }
  0x6f   : > { %1002 = vmatpush.bf16.msra.mxu3 %v1468_v50  ;;  %v1542_v13 = vld [vmem:[%s1857_s5 + $0x114] sm:$0xf0]  ;;  %v1443_v14 = vld [vmem:[%s1857_s5 + $0x190] sm:$0xf]  ;;  %v1508_v18 = vld [vmem:[%s1857_s5 + $0x4] sm:$0xf0]  ;;  %v1316_v21 = vor.u32 %v1526_v11, %v1315_v9 }
  0x70   : > { %961 = vmatpush.bf16.msra.mxu0 %v1268_v56  ;;  %v1558_v15 = vld [vmem:[%s1857_s5 + $0x194] sm:$0xf0]  ;;  %v1307_v19 = vld [vmem:[%s1857_s5 + $0x80] sm:$0xf]  ;;  %v1524_v20 = vld [vmem:[%s1857_s5 + $0x84] sm:$0xf0]  ;;  %v1380_v22 = vor.u32 %v1542_v13, %v1379_v12  ;;  %v1244_v33 = vor.u32 %v1508_v18, %v1243_v16 }
  0x71   : > { %975 = vmatpush.bf16.msra.mxu1 %v1332_v57  ;;  %v1371_v23 = vld [vmem:[%s1857_s5 + $0x100] sm:$0xf]  ;;  %v1540_v24 = vld [vmem:[%s1857_s5 + $0x104] sm:$0xf0]  ;;  %v1444_v26 = vor.u32 %v1558_v15, %v1443_v14  ;;  %v1521_v28 = vld [vmem:[%s1857_s5 + $0x74] sm:$0xf]  ;;  %v1308_v37 = vor.u32 %v1524_v20, %v1307_v19 }
  0x72   : > { %989 = vmatpush.bf16.msra.mxu2 %v1396_v58  ;;  %v1435_v25 = vld [vmem:[%s1857_s5 + $0x180] sm:$0xf]  ;;  %v1556_v27 = vld [vmem:[%s1857_s5 + $0x184] sm:$0xf0]  ;;  %v1301_v29 = vld [vmem:[%s1857_s5 + $0x78] sm:$0xf0]  ;;  %v1372_v38 = vor.u32 %v1540_v24, %v1371_v23 }
  0x73   : > { %1003 = vmatpush.bf16.msra.mxu3 %v1460_v62  ;;  %v1537_v30 = vld [vmem:[%s1857_s5 + $0xf4] sm:$0xf]  ;;  %v1365_v31 = vld [vmem:[%s1857_s5 + $0xf8] sm:$0xf0]  ;;  %v1519_v39 = vld [vmem:[%s1857_s5 + $0x64] sm:$0xf]  ;;  %v1436_v43 = vor.u32 %v1556_v27, %v1435_v25  ;;  %v1304_v44 = vor.u32 %v1521_v28, %v1301_v29 }
  0x74   : > { %962 = vmatpush.bf16.msra.mxu0 %v1260_v4  ;;  %v1553_v32 = vld [vmem:[%s1857_s5 + $0x174] sm:$0xf]  ;;  %v1429_v34 = vld [vmem:[%s1857_s5 + $0x178] sm:$0xf0]  ;;  %v1293_v40 = vld [vmem:[%s1857_s5 + $0x68] sm:$0xf0]  ;;  %v1368_v49 = vor.u32 %v1537_v30, %v1365_v31 }
  0x75   : > { %976 = vmatpush.bf16.msra.mxu1 %v1324_v5  ;;  %v1569_v35 = vld [vmem:[%s1857_s5 + $0x1f4] sm:$0xf]  ;;  %v1493_v36 = vld [vmem:[%s1857_s5 + $0x1f8] sm:$0xf0]  ;;  %v1235_v41 = vld [vmem:[%s2064_s0 + $0x8] sm:$0xf]  ;;  %v1432_v50 = vor.u32 %v1553_v32, %v1429_v34  ;;  %v1296_v63 = vor.u32 %v1519_v39, %v1293_v40 }
  0x76   : > { %990 = vmatpush.bf16.msra.mxu2 %v1388_v6  ;;  %v1506_v42 = vld [vmem:[%s2064_s0 + $0x14] sm:$0xf0]  ;;  %v1535_v45 = vld [vmem:[%s1857_s5 + $0xe4] sm:$0xf]  ;;  %v1357_v46 = vld [vmem:[%s1857_s5 + $0xe8] sm:$0xf0]  ;;  %v1496_v54 = vor.u32 %v1569_v35, %v1493_v36 }
  0x77   : > { %1004 = vmatpush.bf16.msra.mxu3 %v1452_v10  ;;  %v1551_v47 = vld [vmem:[%s1857_s5 + $0x164] sm:$0xf]  ;;  %v1421_v48 = vld [vmem:[%s1857_s5 + $0x168] sm:$0xf0]  ;;  %v1227_v51 = vld [vmem:[%s2064_s0] sm:$0xf]  ;;  %v1952_v55 = vor.u32 %v1506_v42, %v1235_v41  ;;  %v1360_v1 = vor.u32 %v1535_v45, %v1357_v46 }
  0x78   : > { %963 = vmatpush.bf16.msra.mxu0 %v1252_v17  ;;  %v1505_v52 = vld [vmem:[%s2064_s0 + $0xc] sm:$0xf0]  ;;  %v1504_v53 = vld [vmem:[%s2064_s0 + $0xc] sm:$0xf]  ;;  %v1237_v56 = vld [vmem:[%s2064_s0 + $0x18] sm:$0xf0]  ;;  %v1424_v2 = vor.u32 %v1551_v47, %v1421_v48 }
  0x79   : > { %977 = vmatpush.bf16.msra.mxu1 %v1316_v21  ;;  %v1503_v57 = vld [vmem:[%s2064_s0 + $0x4] sm:$0xf]  ;;  %v1229_v58 = vld [vmem:[%s2064_s0 + $0x10] sm:$0xf0]  ;;  %v1485_v60 = vld [vmem:[%s1857_s5 + $0x1e8] sm:$0xf0]  ;;  %v1965_v61 = vor.u32 %v1505_v52, %v1227_v51  ;;  %v1967_v62 = vor.u32 %v1504_v53, %v1237_v56 }
  0x7a   : > { %991 = vmatpush.bf16.msra.mxu2 %v1380_v22  ;;  %v1567_v59 = vld [vmem:[%s1857_s5 + $0x1e4] sm:$0xf]  ;;  %v1969_v0 = vor.u32 %v1503_v57, %v1229_v58  ;;  %v1517_v3 = vld [vmem:[%s1857_s5 + $0x54] sm:$0xf]  ;;  %v1285_v4 = vld [vmem:[%s1857_s5 + $0x58] sm:$0xf0] }
  0x7b   : > { %1005 = vmatpush.bf16.msra.mxu3 %v1444_v26  ;;  %v1533_v5 = vld [vmem:[%s1857_s5 + $0xd4] sm:$0xf]  ;;  %v1488_v6 = vor.u32 %v1567_v59, %v1485_v60  ;;  %v1349_v7 = vld [vmem:[%s1857_s5 + $0xd8] sm:$0xf0]  ;;  %v1288_v12 = vor.u32 %v1517_v3, %v1285_v4  ;;  %v1515_v15 = vld [vmem:[%s1857_s5 + $0x44] sm:$0xf] }
  0x7c   : > { %964 = vmatpush.bf16.msra.mxu0 %v1244_v33  ;;  %v1549_v8 = vld [vmem:[%s1857_s5 + $0x154] sm:$0xf]  ;;  %v1413_v9 = vld [vmem:[%s1857_s5 + $0x158] sm:$0xf0]  ;;  %v1352_v13 = vor.u32 %v1533_v5, %v1349_v7  ;;  %v1277_v16 = vld [vmem:[%s1857_s5 + $0x48] sm:$0xf0] }
  0x7d   : > { %978 = vmatpush.bf16.msra.mxu1 %v1308_v37  ;;  %v1565_v10 = vld [vmem:[%s1857_s5 + $0x1d4] sm:$0xf]  ;;  %v1477_v11 = vld [vmem:[%s1857_s5 + $0x1d8] sm:$0xf0]  ;;  %v1416_v14 = vor.u32 %v1549_v8, %v1413_v9  ;;  %v1531_v17 = vld [vmem:[%s1857_s5 + $0xc4] sm:$0xf]  ;;  %v1280_v24 = vor.u32 %v1515_v15, %v1277_v16 }
  0x7e   : > { %992 = vmatpush.bf16.msra.mxu2 %v1372_v38  ;;  %v1480_v18 = vor.u32 %v1565_v10, %v1477_v11  ;;  %v1341_v19 = vld [vmem:[%s1857_s5 + $0xc8] sm:$0xf0]  ;;  %v1547_v20 = vld [vmem:[%s1857_s5 + $0x144] sm:$0xf]  ;;  %v1513_v27 = vld [vmem:[%s1857_s5 + $0x34] sm:$0xf] }
  0x7f   : > { %1006 = vmatpush.bf16.msra.mxu3 %v1436_v43  ;;  %965 = vmatmul.bf16.vlgmr.msra.gmra.mxu0 %v1965_v61  ;;  %v1405_v21 = vld [vmem:[%s1857_s5 + $0x148] sm:$0xf0]  ;;  %v1563_v22 = vld [vmem:[%s1857_s5 + $0x1c4] sm:$0xf]  ;;  %v1344_v25 = vor.u32 %v1531_v17, %v1341_v19  ;;  %v1269_v28 = vld [vmem:[%s1857_s5 + $0x38] sm:$0xf0] }
  0x80   : > { %1013 = vmatpush.bf16.msrb.mxu0 %v1304_v44  ;;  %979 = vmatmul.bf16.vlgmr.msra.gmra.mxu1 %v1969_v0  ;;  %v1469_v23 = vld [vmem:[%s1857_s5 + $0x1c8] sm:$0xf0]  ;;  %v1408_v26 = vor.u32 %v1547_v20, %v1405_v21  ;;  %v1529_v29 = vld [vmem:[%s1857_s5 + $0xb4] sm:$0xf]  ;;  %v1333_v31 = vld [vmem:[%s1857_s5 + $0xb8] sm:$0xf0]  ;;  %v1272_v36 = vor.u32 %v1513_v27, %v1269_v28 }
  0x81   : > { %1027 = vmatpush.bf16.msrb.mxu1 %v1368_v49  ;;  %993 = vmatmul.bf16.vlgmr.msra.gmra.mxu2 %v1952_v55  ;;  %v1472_v30 = vor.u32 %v1563_v22, %v1469_v23  ;;  %v1545_v32 = vld [vmem:[%s1857_s5 + $0x134] sm:$0xf]  ;;  %v1397_v33 = vld [vmem:[%s1857_s5 + $0x138] sm:$0xf0]  ;;  %v1336_v37 = vor.u32 %v1529_v29, %v1333_v31  ;;  %v1511_v39 = vld [vmem:[%s1857_s5 + $0x24] sm:$0xf] }
  0x82   : > { %1041 = vmatpush.bf16.msrb.mxu2 %v1432_v50  ;;  %1007 = vmatmul.bf16.vlgmr.msra.gmra.mxu3 %v1967_v62  ;;  %v1561_v34 = vld [vmem:[%s1857_s5 + $0x1b4] sm:$0xf]  ;;  %v1461_v35 = vld [vmem:[%s1857_s5 + $0x1b8] sm:$0xf0]  ;;  %v1400_v38 = vor.u32 %v1545_v32, %v1397_v33  ;;  %v1261_v40 = vld [vmem:[%s1857_s5 + $0x28] sm:$0xf0] }
  0x83   : > { %1055 = vmatpush.bf16.msrb.mxu3 %v1496_v54  ;;  %v1527_v41 = vld [vmem:[%s1857_s5 + $0xa4] sm:$0xf]  ;;  %v1464_v42 = vor.u32 %v1561_v34, %v1461_v35  ;;  %v1325_v43 = vld [vmem:[%s1857_s5 + $0xa8] sm:$0xf0]  ;;  %v1264_v48 = vor.u32 %v1511_v39, %v1261_v40  ;;  %v1509_v51 = vld [vmem:[%s1857_s5 + $0x14] sm:$0xf] }
  0x84   : > { %1014 = vmatpush.bf16.msrb.mxu0 %v1296_v63  ;;  %v1543_v44 = vld [vmem:[%s1857_s5 + $0x124] sm:$0xf]  ;;  %v1389_v45 = vld [vmem:[%s1857_s5 + $0x128] sm:$0xf0]  ;;  %v1328_v49 = vor.u32 %v1527_v41, %v1325_v43  ;;  %v1253_v52 = vld [vmem:[%s1857_s5 + $0x18] sm:$0xf0] }
  0x85   : > { %1028 = vmatpush.bf16.msrb.mxu1 %v1360_v1  ;;  %v1559_v46 = vld [vmem:[%s1857_s5 + $0x1a4] sm:$0xf]  ;;  %v1453_v47 = vld [vmem:[%s1857_s5 + $0x1a8] sm:$0xf0]  ;;  %v1392_v50 = vor.u32 %v1543_v44, %v1389_v45  ;;  %v1525_v53 = vld [vmem:[%s1857_s5 + $0x94] sm:$0xf]  ;;  %v1256_v63 = vor.u32 %v1509_v51, %v1253_v52 }
  0x86   : > { %1042 = vmatpush.bf16.msrb.mxu2 %v1424_v2  ;;  %v1456_v54 = vor.u32 %v1559_v46, %v1453_v47  ;;  %v1317_v56 = vld [vmem:[%s1857_s5 + $0x98] sm:$0xf0]  ;;  %v1541_v57 = vld [vmem:[%s1857_s5 + $0x114] sm:$0xf]  ;;  %v1507_v3 = vld [vmem:[%s1857_s5 + $0x4] sm:$0xf] }
  0x87   : > { %1056 = vmatpush.bf16.msrb.mxu3 %v1488_v6  ;;  %v1381_v58 = vld [vmem:[%s1857_s5 + $0x118] sm:$0xf0]  ;;  %v1557_v59 = vld [vmem:[%s1857_s5 + $0x194] sm:$0xf]  ;;  %v1320_v1 = vor.u32 %v1525_v53, %v1317_v56  ;;  %v1245_v4 = vld [vmem:[%s1857_s5 + $0x8] sm:$0xf0] }
  0x88   : > { %1015 = vmatpush.bf16.msrb.mxu0 %v1288_v12  ;;  %v1445_v60 = vld [vmem:[%s1857_s5 + $0x198] sm:$0xf0]  ;;  %v1384_v2 = vor.u32 %v1541_v57, %v1381_v58  ;;  %v1523_v5 = vld [vmem:[%s1857_s5 + $0x84] sm:$0xf]  ;;  %v1309_v7 = vld [vmem:[%s1857_s5 + $0x88] sm:$0xf0]  ;;  %v1248_v12 = vor.u32 %v1507_v3, %v1245_v4 }
  0x89   : > { %1029 = vmatpush.bf16.msrb.mxu1 %v1352_v13  ;;  %v1448_v6 = vor.u32 %v1557_v59, %v1445_v60  ;;  %v1539_v8 = vld [vmem:[%s1857_s5 + $0x104] sm:$0xf]  ;;  %v1373_v9 = vld [vmem:[%s1857_s5 + $0x108] sm:$0xf0]  ;;  %v1312_v13 = vor.u32 %v1523_v5, %v1309_v7  ;;  %s2076_s4 = smov (!%p537_p11, %s1224_s4), 7  ;;  %s1571_s12 = sshll.u32 (%p1707_p6), %s1642_s14, 4 }
  0x8a   : > { %1043 = vmatpush.bf16.msrb.mxu2 %v1416_v14  ;;  %v1555_v10 = vld [vmem:[%s1857_s5 + $0x184] sm:$0xf]  ;;  %v1437_v11 = vld [vmem:[%s1857_s5 + $0x188] sm:$0xf0]  ;;  %v1376_v14 = vor.u32 %v1539_v8, %v1373_v9  ;;  %s539_s7 = scalar_lea.vmem %s2066_s2, %s2076_s4  ;;  %s1085_s11 = scalar_lea.vmem (%p1707_p6), %s2067_s3, %s1571_s12 }
  0x8b   : > { %1057 = vmatpush.bf16.msrb.mxu3 %v1480_v18  ;;  %v1440_v15 = vor.u32 %v1555_v10, %v1437_v11  ;;  %v611_v16 = vld [vmem:[%s539_s7] sm:$0x3] }
  0x8c   : > { %1016 = vmatpush.bf16.msrb.mxu0 %v1280_v24  ;;  %v613_v17 = vperm.slane %v611_v16, 0 }
  0x8d   : > { %1030 = vmatpush.bf16.msrb.mxu1 %v1344_v25 }
  0x8e   : > { %1044 = vmatpush.bf16.msrb.mxu2 %v1408_v26 }
  0x8f   : > { %1058 = vmatpush.bf16.msrb.mxu3 %v1472_v30  ;;  %v614_v30 = vperm.slane %v611_v16, 1 }
  0x90   : > { %1017 = vmatpush.bf16.msrb.mxu0 %v1272_v36 }
  0x91   : > { %1031 = vmatpush.bf16.msrb.mxu1 %v1336_v37 }
  0x92   : > { %1045 = vmatpush.bf16.msrb.mxu2 %v1400_v38 }
  0x93   : > { %1059 = vmatpush.bf16.msrb.mxu3 %v1464_v42 }
  0x94   : > { %1018 = vmatpush.bf16.msrb.mxu0 %v1264_v48 }
  0x95   : > { %1032 = vmatpush.bf16.msrb.mxu1 %v1328_v49 }
  0x96   : > { %1046 = vmatpush.bf16.msrb.mxu2 %v1392_v50 }
  0x97   : > { %1060 = vmatpush.bf16.msrb.mxu3 %v1456_v54 }
  0x98   : > { %1019 = vmatpush.bf16.msrb.mxu0 %v1256_v63 }
  0x99   : > { %1033 = vmatpush.bf16.msrb.mxu1 %v1320_v1 }
  0x9a   : > { %1047 = vmatpush.bf16.msrb.mxu2 %v1384_v2 }
  0x9b   : > { %1061 = vmatpush.bf16.msrb.mxu3 %v1448_v6 }
  0x9c   : > { %1020 = vmatpush.bf16.msrb.mxu0 %v1248_v12 }
  0x9d   : > { %1034 = vmatpush.bf16.msrb.mxu1 %v1312_v13 }
  0x9e   : > { %1048 = vmatpush.bf16.msrb.mxu2 %v1376_v14 }
  0x9f   : > { %1062 = vmatpush.bf16.msrb.mxu3 %v1440_v15  ;;  %1021 = vmatmul.bf16.vlgmr.msrb.gmra.mxu0 %v1965_v61 }
  0xa0   : > { %1035 = vmatmul.bf16.vlgmr.msrb.gmra.mxu1 %v1969_v0 }
  0xa1   : > { %1049 = vmatmul.bf16.vlgmr.msrb.gmra.mxu2 %v1952_v55 }
  0xa2   : > { %1063 = vmatmul.bf16.vlgmr.msrb.gmra.mxu3 %v1967_v62 }
  0xfc   : > { %v966_v18 = vpop.f32.mrf.mxu0 }
  0xfd   : > { %v967_v19 = vadd.f32 %v966_v18, %v613_v17  ;;  %v980_v20 = vpop.f32.mrf.mxu1 }
  0xff   : > { %v981_v21 = vadd.f32 %v980_v20, %v967_v19 }
 0x104   : > { %v994_v61 = vpop.f32.mrf.mxu2  ;;  %v968_v62 = vpop.f32.mrf.mxu0 }
 0x105   : > { %v995_v0 = vadd.f32 %v994_v61, %v981_v21  ;;  %v1008_v55 = vpop.f32.mrf.mxu3  ;;  %v969_v23 = vadd.f32 %v968_v62, %v613_v17  ;;  %v982_v24 = vpop.f32.mrf.mxu1 }
 0x107   : > { %v1009_v22 = vadd.f32 %v1008_v55, %v995_v0  ;;  %v983_v25 = vadd.f32 %v982_v24, %v969_v23 }
 0x109   : > { %1069 = vst [vmem:[%s2033_s9] sm:$0xff] %v1009_v22 }
 0x10c   : > { %v996_v26 = vpop.f32.mrf.mxu2 }
 0x10d   : > { %v997_v27 = vadd.f32 %v996_v26, %v983_v25  ;;  %v1010_v28 = vpop.f32.mrf.mxu3 }
 0x10f   : > { %v1011_v29 = vadd.f32 %v1010_v28, %v997_v27 }
 0x110   : > { %v1098_v47 = vld [vmem:[%s2033_s9] sm:$0xff] (%p1707_p6) }
 0x111   : > { %1071 = vst [vmem:[%s2033_s9 + $0x10] sm:$0xff] %v1011_v29 }
 0x112   : > { %1099 = vst [vmem:[%s1085_s11] sm:$0xff] (%p1707_p6), %v1098_v47 }
 0x118   : > { %v1102_v49 = vld [vmem:[%s2033_s9 + $0x10] sm:$0xff] (%p1707_p6) }
 0x119   : > { %1103 = vst [vmem:[%s1085_s11 + $0x40] sm:$0xff] (%p1707_p6), %v1102_v49 }
 0x11c   : > { %v1022_v31 = vpop.f32.mrf.mxu0 }
 0x11d   : > { %v1023_v32 = vadd.f32 %v1022_v31, %v614_v30  ;;  %v1036_v33 = vpop.f32.mrf.mxu1 }
 0x11f   : > { %v1037_v34 = vadd.f32 %v1036_v33, %v1023_v32 }
 0x124   : > { %v1050_v35 = vpop.f32.mrf.mxu2  ;;  %v1024_v38 = vpop.f32.mrf.mxu0 }
 0x125   : > { %v1051_v36 = vadd.f32 %v1050_v35, %v1037_v34  ;;  %v1064_v37 = vpop.f32.mrf.mxu3  ;;  %v1025_v40 = vadd.f32 %v1024_v38, %v614_v30  ;;  %v1038_v41 = vpop.f32.mrf.mxu1 }
 0x127   : > { %v1065_v39 = vadd.f32 %v1064_v37, %v1051_v36  ;;  %v1039_v42 = vadd.f32 %v1038_v41, %v1025_v40 }
 0x129   : > { %1070 = vst [vmem:[%s2033_s9 + $0x8] sm:$0xff] %v1065_v39 }
 0x12c   : > { %v1052_v43 = vpop.f32.mrf.mxu2 }
 0x12d   : > { %v1053_v44 = vadd.f32 %v1052_v43, %v1039_v42  ;;  %v1066_v45 = vpop.f32.mrf.mxu3  ;;  %1079 = sbr.rel (!%p1707_p6) target bundleno = 314 (0x13a), region = 74 }
 0x12f   : > { %v1067_v46 = vadd.f32 %v1066_v45, %v1053_v44 }
 0x130   : > { %v1100_v48 = vld [vmem:[%s2033_s9 + $0x8] sm:$0xff] (%p1707_p6) }
 0x131   : > { %1072 = vst [vmem:[%s2033_s9 + $0x18] sm:$0xff] %v1067_v46 }
 0x132   : > { %1101 = vst [vmem:[%s1085_s11 + $0x8] sm:$0xff] %v1100_v48 }
 0x138   : > { %v1104_v50 = vld [vmem:[%s2033_s9 + $0x18] sm:$0xff] }
 0x139   : > { %1105 = vst [vmem:[%s1085_s11 + $0x48] sm:$0xff] %v1104_v50 }
 0x13a PF: > { %s13_s16 = sadd.s32 1, %s1650_s16   ;;  %s2069_s12 = smov %s1638_s13 }
 0x13b   : > { %p10_p12 = scmp.ge.s32.totalorder %s13_s16, 6   ;;  %s2070_s13 = smov %s1712_s22 }
 0x13c   : > { %s2071_s14 = smov %s1646_s15  ;;  %s2072_s15 = smov %s2074_s17 }
 0x13d   :  { %12 = sbr.rel (!%p10_p12) target bundleno = 3 (0x3), region = 134 }

</bundles_post_ra>
